<compile_context>
chip_gen: v5e
topology: v5e:2x2
jax: 0.10.0
libtpu: 0.0.40
codegen_flags: <defaults>
</compile_context>

<pallas_src>
import functools

import jax
import jax.numpy as jnp
import numpy as np
from jax.experimental import pallas as pl
from jax.experimental.pallas import tpu as pltpu


def _gelu_exact(x):
    # PyTorch nn.GELU() default: exact erf-based GELU.
    return 0.5 * x * (1.0 + jax.lax.erf(x * 0.7071067811865476))


def block_kernel(x_ref,
                 ln1_w_ref, ln1_b_ref,
                 qkv_w_ref, proj_w_ref, proj_b_ref,
                 ln2_w_ref, ln2_b_ref,
                 fc1_w_ref, fc1_b_ref,
                 dw_w_ref, dw_b_ref,
                 fc2_w_ref, fc2_b_ref,
                 o_ref,
                 dwpad_ref,
                 *, num_heads, eps):
    Bblk, H, W, C = x_ref.shape
    N = H * W
    R = Bblk * N
    hd = C // num_heads
    hidden = fc1_w_ref.shape[1]
    G = num_heads * Bblk
    f32 = jnp.float32
    bf16 = jnp.bfloat16

    # (Bblk, H, W, C) -> (R, C): tile-preserving leading-dim merge (free).
    x = x_ref[...].reshape(R, C).astype(f32)

    # ---- LayerNorm 1 (f32) ----
    mu = jnp.mean(x, axis=-1, keepdims=True)
    var = jnp.mean((x - mu) ** 2, axis=-1, keepdims=True)
    xn = (x - mu) * jax.lax.rsqrt(var + eps) * ln1_w_ref[...] + ln1_b_ref[...]
    xn_b = xn.astype(bf16)

    # ---- Fused q/k/v projection: one lane-dense (R,C)@(C,3C) matmul ----
    # qkv_bias=False; attention scale already folded into the q weight columns host-side.
    qkv = jnp.dot(xn_b, qkv_w_ref[...], preferred_element_type=f32).astype(bf16)  # (R, 3C)

    def gather_heads(base):
        # (R, 3C) -> (G, N, hd): 16-lane head slices, stacked on a new leading dim,
        # then a free leading-dim regroup (Bblk*N -> Bblk, N).
        hs = [qkv[:, base + h * hd: base + (h + 1) * hd] for h in range(num_heads)]
        return jnp.stack(hs, axis=0).reshape(G, N, hd)

    q = gather_heads(0)
    k = gather_heads(C)
    v = gather_heads(2 * C)

    # ---- Scores / softmax / weighted values (batched over head * image) ----
    s = jnp.einsum('gnd,gmd->gnm', q, k, preferred_element_type=f32)      # (G, N, N)
    s = s - jnp.max(s, axis=-1, keepdims=True)
    e = jnp.exp(s)
    inv_den = pl.reciprocal(jnp.sum(e, axis=-1, keepdims=True), approx=True)
    p = (e * inv_den).astype(bf16)
    o = jnp.einsum('gnm,gmd->gnd', p, v, preferred_element_type=f32)      # (G, N, hd)

    # ---- Output projection: heads back to the lane dim, one (R,C)@(C,C) matmul ----
    o = o.reshape(num_heads, R, hd)                                        # free leading regroup
    o_rc = jnp.concatenate([o[h] for h in range(num_heads)], axis=-1).astype(bf16)  # (R, C)
    attn = jnp.dot(o_rc, proj_w_ref[...], preferred_element_type=f32) + proj_b_ref[...]

    x = x + attn                                                           # residual 1

    # ---- LayerNorm 2 (f32) ----
    mu2 = jnp.mean(x, axis=-1, keepdims=True)
    var2 = jnp.mean((x - mu2) ** 2, axis=-1, keepdims=True)
    yn = (x - mu2) * jax.lax.rsqrt(var2 + eps) * ln2_w_ref[...] + ln2_b_ref[...]

    # ---- MLP: fc1 ----
    h1 = jnp.dot(yn.astype(bf16), fc1_w_ref[...],
                 preferred_element_type=f32) + fc1_b_ref[...]              # (R, hidden)
    h1 = h1.reshape(Bblk, H, W, hidden)                                    # free reshape

    # ---- Depthwise 3x3 conv (stride 1, pad 1, groups=hidden) ----
    # H-axis zero padding lives in a persistent VMEM scratch; each dy tap is a static
    # leading-dim slice.  W-axis taps via roll (XLU) + border mask.
    zrow = jnp.zeros((Bblk, 1, W, hidden), f32)
    dwpad_ref[:, 0:1] = zrow                  # zeroed every step: cheap, and safe under
    dwpad_ref[:, H + 1:H + 2] = zrow          # megacore grid splitting (no step-0 reliance)
    dwpad_ref[:, 1:H + 1] = h1
    pad = dwpad_ref[...]                      # (Bblk, H+2, W, hidden)

    dw_w = dw_w_ref[...]                      # (3, 3, hidden)
    wi = jax.lax.broadcasted_iota(jnp.int32, (W, hidden), 0)

    acc = None
    for dx in (-1, 0, 1):
        if dx == 0:
            rolled = pad
        else:
            r = pltpu.roll(pad, (-dx) % W, axis=2)                         # sublane rotate (XLU)
            valid = jnp.logical_and(wi + dx >= 0, wi + dx < W)
            rolled = jnp.where(valid, r, 0.0)
        for dy in (-1, 0, 1):
            term = rolled[:, 1 + dy:1 + dy + H] * dw_w[dy + 1, dx + 1]
            acc = term if acc is None else acc + term
    acc = acc + dw_b_ref[...]

    # ---- GELU (exact erf) + fc2 ----
    g = _gelu_exact(acc).reshape(R, hidden)
    out = jnp.dot(g.astype(bf16), fc2_w_ref[...],
                  preferred_element_type=f32) + fc2_b_ref[...]             # (R, C)

    x = x + out                                                            # residual 2
    # TODO(synk): emit bf16 here if the consumer re-casts anyway (halves writeback bytes).
    o_ref[...] = x.reshape(Bblk, H, W, C).astype(o_ref.dtype)


def pvt_block(x, params, *, num_heads, eps=1e-5, block_b=None):
    B, H, W, C = x.shape
    assert C % num_heads == 0
    hd = C // num_heads
    hidden = params["fc1_w"].shape[1]
    N = H * W

    if block_b is None:
        # Keep the grid length at 2 when possible so both v7x TensorCores stay loaded
        # ("parallel" axis); on single-TC v5e/v6e the extra grid step costs ~0.35 us.
        block_b = B // 2 if B % 2 == 0 else B
    assert B % block_b == 0

    bf16 = jnp.bfloat16

    # Host-side weight prep: fold the attention scale into the q columns of the fused qkv
    # weight, cast all matmul weights to bf16.
    qkv_w = params["qkv_w"]                                   # (C, 3C)
    scale = hd ** -0.5
    qkv_w_fused = jnp.concatenate([qkv_w[:, :C] * scale, qkv_w[:, C:]], axis=1).astype(bf16)
    proj_w = params["proj_w"].astype(bf16)                    # (C, C)

    weights = [
        params["ln1_w"], params["ln1_b"],
        qkv_w_fused, proj_w, params["proj_b"],
        params["ln2_w"], params["ln2_b"],
        params["fc1_w"].astype(bf16), params["fc1_b"],
        params["dw_w"], params["dw_b"],
        params["fc2_w"].astype(bf16), params["fc2_b"],
    ]

    def full_spec(shape):
        nd = len(shape)
        return pl.BlockSpec(shape, lambda i: (0,) * nd)

    grid = (B // block_b,)
    in_specs = ([pl.BlockSpec((block_b, H, W, C), lambda i: (i, 0, 0, 0))]
                + [full_spec(tuple(w.shape)) for w in weights])
    out_spec = pl.BlockSpec((block_b, H, W, C), lambda i: (i, 0, 0, 0))

    # Advisory cost estimate for the XLA scheduler.
    Rtot = B * N
    flops = (2 * Rtot * C * 3 * C                 # fused qkv projection
             + 2 * B * N * N * C * 2              # scores + p@v
             + 2 * Rtot * C * C                   # output projection
             + 2 * Rtot * C * hidden * 2          # fc1 + fc2
             + 2 * 9 * Rtot * hidden)             # depthwise conv
    transcendentals = B * num_heads * N * N + Rtot * hidden + B * num_heads * N
    weight_bytes = sum(int(w.size) * w.dtype.itemsize for w in weights)
    bytes_accessed = 2 * int(x.size) * 4 + weight_bytes

    # VMEM limit sized from the block footprint (io double-buffers + weights + padded
    # DWConv scratch + f32 intermediates), with generous headroom; clamped well below
    # every chip's physical VMEM (64 MiB on v7x).
    io_bytes = 2 * 2 * block_b * N * C * 4
    scratch_bytes = block_b * (H + 2) * W * hidden * 4
    interm_bytes = block_b * N * (6 * hidden + 3 * num_heads * N + 8 * C) * 4
    vmem_limit = min(max(2 * (io_bytes + weight_bytes + scratch_bytes + interm_bytes),
                         8 * 1024 * 1024),
                     32 * 1024 * 1024)

    kernel = functools.partial(block_kernel, num_heads=num_heads, eps=eps)
    return pl.pallas_call(
        kernel,
        out_shape=jax.ShapeDtypeStruct((B, H, W, C), jnp.float32),
        grid_spec=pltpu.PrefetchScalarGridSpec(
            num_scalar_prefetch=0,
            grid=grid,
            in_specs=in_specs,
            out_specs=out_spec,
            scratch_shapes=[pltpu.VMEM((block_b, H + 2, W, hidden), jnp.float32)],
        ),
        compiler_params=pltpu.CompilerParams(
            dimension_semantics=("parallel",),
            vmem_limit_bytes=int(vmem_limit),
        ),
        cost_estimate=pl.CostEstimate(flops=int(flops),
                                      transcendentals=int(transcendentals),
                                      bytes_accessed=int(bytes_accessed)),
    )(x, *weights)


# ---------------- pure-JAX reference (f32, same math, used for verification) ----------------
def block_ref(x, p, num_heads, eps=1e-5):
    B, H, W, C = x.shape
    N = H * W
    hd = C // num_heads
    xf = x.reshape(B, N, C)

    def ln(v, w, b):
        mu = jnp.mean(v, -1, keepdims=True)
        var = jnp.mean((v - mu) ** 2, -1, keepdims=True)
        return (v - mu) * jax.lax.rsqrt(var + eps) * w + b

    xn = ln(xf, p["ln1_w"], p["ln1_b"])
    qkv = xn @ p["qkv_w"]                               # qkv_bias=False
    q, k, v = jnp.split(qkv, 3, axis=-1)

    def heads(t):
        return t.reshape(B, N, num_heads, hd).transpose(0, 2, 1, 3)

    qh, kh, vh = heads(q), heads(k), heads(v)
    s = jnp.einsum("bhnd,bhmd->bhnm", qh, kh) * (hd ** -0.5)
    s = s - jnp.max(s, -1, keepdims=True)
    e = jnp.exp(s)
    pa = e / jnp.sum(e, -1, keepdims=True)
    ao = jnp.einsum("bhnm,bhmd->bhnd", pa, vh).transpose(0, 2, 1, 3).reshape(B, N, C)
    ao = ao @ p["proj_w"] + p["proj_b"]
    xf = xf + ao

    yn = ln(xf, p["ln2_w"], p["ln2_b"])
    h1 = (yn @ p["fc1_w"] + p["fc1_b"]).reshape(B, H, W, -1)
    pad = jnp.pad(h1, ((0, 0), (1, 1), (1, 1), (0, 0)))
    acc = jnp.zeros_like(h1)
    for dy in range(3):
        for dx in range(3):
            acc = acc + pad[:, dy:dy + H, dx:dx + W, :] * p["dw_w"][dy, dx]
    acc = acc + p["dw_b"]
    g = _gelu_exact(acc)
    out = g.reshape(B, N, -1) @ p["fc2_w"] + p["fc2_b"]
    xf = xf + out
    return xf.reshape(B, H, W, C)


if __name__ == "__main__":
    B, H, W, C = 4, 8, 8, 64
    NUM_HEADS = 4
    MLP_RATIO = 4.0
    HIDDEN = int(C * MLP_RATIO)

    key = jax.random.PRNGKey(0)
    ks = jax.random.split(key, 8)

    def tnorm(k, shape, std=0.02):
        return (std * jax.random.truncated_normal(k, -2.0, 2.0, shape)).astype(jnp.float32)

    params = {
        # LayerNorms: weight=1, bias=0 (per _init_weights)
        "ln1_w": jnp.ones((1, C), jnp.float32),
        "ln1_b": jnp.zeros((1, C), jnp.float32),
        "ln2_w": jnp.ones((1, C), jnp.float32),
        "ln2_b": jnp.zeros((1, C), jnp.float32),
        # Attention (qkv_bias=False -> no qkv bias)
        "qkv_w": tnorm(ks[0], (C, 3 * C)),
        "proj_w": tnorm(ks[1], (C, C)),
        "proj_b": jnp.zeros((1, C), jnp.float32),
        # Mlp
        "fc1_w": tnorm(ks[2], (C, HIDDEN)),
        "fc1_b": jnp.zeros((1, HIDDEN), jnp.float32),
        # depthwise conv: normal(0, sqrt(2 / (3*3*hidden/hidden))) = sqrt(2/9)
        "dw_w": (np.sqrt(2.0 / 9.0)
                 * jax.random.normal(ks[3], (3, 3, HIDDEN))).astype(jnp.float32),
        "dw_b": jnp.zeros((1, HIDDEN), jnp.float32),
        "fc2_w": tnorm(ks[4], (HIDDEN, C)),
        "fc2_b": jnp.zeros((1, C), jnp.float32),
    }

    x = jax.random.normal(ks[5], (B, H, W, C), jnp.float32)

    y = pvt_block(x, params, num_heads=NUM_HEADS)
    y = jax.block_until_ready(y)

    y_ref = jax.block_until_ready(block_ref(x, params, NUM_HEADS))
    # bf16 MXU operands + approx reciprocal -> loosened tolerance vs f32 reference.
    np.testing.assert_allclose(np.asarray(y), np.asarray(y_ref), rtol=1e-2, atol=1e-2)

    print("KERNEL_OK")
</pallas_src>

<mosaic_0001>
module attributes {stable_mosaic.version = 11 : i64} {
  func.func @block_kernel(%arg0: i32, %arg1: memref<2x8x8x64xf32, #tpu.memory_space<vmem>>, %arg2: memref<1x64xf32, #tpu.memory_space<vmem>>, %arg3: memref<1x64xf32, #tpu.memory_space<vmem>>, %arg4: memref<64x192xbf16, #tpu.memory_space<vmem>>, %arg5: memref<64x64xbf16, #tpu.memory_space<vmem>>, %arg6: memref<1x64xf32, #tpu.memory_space<vmem>>, %arg7: memref<1x64xf32, #tpu.memory_space<vmem>>, %arg8: memref<1x64xf32, #tpu.memory_space<vmem>>, %arg9: memref<64x256xbf16, #tpu.memory_space<vmem>>, %arg10: memref<1x256xf32, #tpu.memory_space<vmem>>, %arg11: memref<3x3x256xf32, #tpu.memory_space<vmem>>, %arg12: memref<1x256xf32, #tpu.memory_space<vmem>>, %arg13: memref<256x64xbf16, #tpu.memory_space<vmem>>, %arg14: memref<1x64xf32, #tpu.memory_space<vmem>>, %arg15: memref<2x8x8x64xf32, #tpu.memory_space<vmem>>, %arg16: memref<2x10x8x256xf32, #tpu.memory_space<vmem>>) attributes {dimension_semantics = [#tpu.dimension_semantics<parallel>], iteration_bounds = array<i64: 2>, scalar_prefetch = 0 : i64, scratch_operands = 1 : i64, tpu.core_type = #tpu.core_type<tc>, window_params = [{transform_indices = @transform_0, window_bounds = array<i64: 2, 8, 8, 64>}, {pipeline_mode = #tpu.pipeline_mode<synchronous>, transform_indices = @transform_1, window_bounds = array<i64: 1, 64>}, {pipeline_mode = #tpu.pipeline_mode<synchronous>, transform_indices = @transform_2, window_bounds = array<i64: 1, 64>}, {pipeline_mode = #tpu.pipeline_mode<synchronous>, transform_indices = @transform_3, window_bounds = array<i64: 64, 192>}, {pipeline_mode = #tpu.pipeline_mode<synchronous>, transform_indices = @transform_4, window_bounds = array<i64: 64, 64>}, {pipeline_mode = #tpu.pipeline_mode<synchronous>, transform_indices = @transform_5, window_bounds = array<i64: 1, 64>}, {pipeline_mode = #tpu.pipeline_mode<synchronous>, transform_indices = @transform_6, window_bounds = array<i64: 1, 64>}, {pipeline_mode = #tpu.pipeline_mode<synchronous>, transform_indices = @transform_7, window_bounds = array<i64: 1, 64>}, {pipeline_mode = #tpu.pipeline_mode<synchronous>, transform_indices = @transform_8, window_bounds = array<i64: 64, 256>}, {pipeline_mode = #tpu.pipeline_mode<synchronous>, transform_indices = @transform_9, window_bounds = array<i64: 1, 256>}, {pipeline_mode = #tpu.pipeline_mode<synchronous>, transform_indices = @transform_10, window_bounds = array<i64: 3, 3, 256>}, {pipeline_mode = #tpu.pipeline_mode<synchronous>, transform_indices = @transform_11, window_bounds = array<i64: 1, 256>}, {pipeline_mode = #tpu.pipeline_mode<synchronous>, transform_indices = @transform_12, window_bounds = array<i64: 256, 64>}, {pipeline_mode = #tpu.pipeline_mode<synchronous>, transform_indices = @transform_13, window_bounds = array<i64: 1, 64>}, {transform_indices = @transform_14, window_bounds = array<i64: 2, 8, 8, 64>}]} {
    %c0 = arith.constant 0 : index
    %c0_0 = arith.constant 0 : index
    %c0_1 = arith.constant 0 : index
    %c0_2 = arith.constant 0 : index
    %0 = vector.load %arg1[%c0, %c0_0, %c0_1, %c0_2] : memref<2x8x8x64xf32, #tpu.memory_space<vmem>>, vector<2x8x8x64xf32>
    %1 = vector.shape_cast %0 : vector<2x8x8x64xf32> to vector<128x64xf32>
    %cst = arith.constant dense<0.000000e+00> : vector<128xf32>
    %2 = vector.multi_reduction <add>, %1, %cst [1] : vector<128x64xf32> to vector<128xf32>
    %3 = vector.shape_cast %2 : vector<128xf32> to vector<128x1xf32>
    %cst_3 = arith.constant 6.400000e+01 : f32
    %4 = vector.broadcast %cst_3 : f32 to vector<128x1xf32>
    %5 = arith.divf %3, %4 : vector<128x1xf32>
    %6 = vector.broadcast %5 : vector<128x1xf32> to vector<128x64xf32>
    %7 = arith.subf %1, %6 : vector<128x64xf32>
    %8 = arith.mulf %7, %7 : vector<128x64xf32>
    %cst_4 = arith.constant dense<0.000000e+00> : vector<128xf32>
    %9 = vector.multi_reduction <add>, %8, %cst_4 [1] : vector<128x64xf32> to vector<128xf32>
    %10 = vector.shape_cast %9 : vector<128xf32> to vector<128x1xf32>
    %cst_5 = arith.constant 6.400000e+01 : f32
    %11 = vector.broadcast %cst_5 : f32 to vector<128x1xf32>
    %12 = arith.divf %10, %11 : vector<128x1xf32>
    %13 = vector.broadcast %5 : vector<128x1xf32> to vector<128x64xf32>
    %14 = arith.subf %1, %13 : vector<128x64xf32>
    %cst_6 = arith.constant 9.99999974E-6 : f32
    %15 = vector.broadcast %cst_6 : f32 to vector<128x1xf32>
    %16 = arith.addf %12, %15 : vector<128x1xf32>
    %17 = math.rsqrt %16 : vector<128x1xf32>
    %18 = vector.broadcast %17 : vector<128x1xf32> to vector<128x64xf32>
    %19 = arith.mulf %14, %18 : vector<128x64xf32>
    %c0_7 = arith.constant 0 : index
    %c0_8 = arith.constant 0 : index
    %20 = vector.load %arg2[%c0_7, %c0_8] : memref<1x64xf32, #tpu.memory_space<vmem>>, vector<1x64xf32>
    %21 = vector.broadcast %20 : vector<1x64xf32> to vector<128x64xf32>
    %22 = arith.mulf %19, %21 : vector<128x64xf32>
    %c0_9 = arith.constant 0 : index
    %c0_10 = arith.constant 0 : index
    %23 = vector.load %arg3[%c0_9, %c0_10] : memref<1x64xf32, #tpu.memory_space<vmem>>, vector<1x64xf32>
    %24 = vector.broadcast %23 : vector<1x64xf32> to vector<128x64xf32>
    %25 = arith.addf %22, %24 : vector<128x64xf32>
    %26 = arith.truncf %25 : vector<128x64xf32> to vector<128x64xbf16>
    %c0_11 = arith.constant 0 : index
    %c0_12 = arith.constant 0 : index
    %27 = vector.load %arg4[%c0_11, %c0_12] : memref<64x192xbf16, #tpu.memory_space<vmem>>, vector<64x192xbf16>
    %cst_13 = arith.constant dense<0.000000e+00> : vector<128x192xf32>
    %28 = tpu.matmul %26, %27, %cst_13 {dimension_numbers = #tpu.dot_dimension_numbers<[1], [0], [0], [1], [0, 0, 1, 1], [], []>} : vector<128x64xbf16>, vector<64x192xbf16>, vector<128x192xf32> -> vector<128x192xf32>
    %29 = arith.truncf %28 : vector<128x192xf32> to vector<128x192xbf16>
    %30 = vector.extract_strided_slice %29 {offsets = [0, 0], sizes = [128, 16], strides = [1, 1]} : vector<128x192xbf16> to vector<128x16xbf16>
    %31 = vector.extract_strided_slice %29 {offsets = [0, 16], sizes = [128, 16], strides = [1, 1]} : vector<128x192xbf16> to vector<128x16xbf16>
    %32 = vector.extract_strided_slice %29 {offsets = [0, 32], sizes = [128, 16], strides = [1, 1]} : vector<128x192xbf16> to vector<128x16xbf16>
    %33 = vector.extract_strided_slice %29 {offsets = [0, 48], sizes = [128, 16], strides = [1, 1]} : vector<128x192xbf16> to vector<128x16xbf16>
    %34 = vector.shape_cast %30 : vector<128x16xbf16> to vector<1x128x16xbf16>
    %35 = vector.shape_cast %31 : vector<128x16xbf16> to vector<1x128x16xbf16>
    %36 = vector.shape_cast %32 : vector<128x16xbf16> to vector<1x128x16xbf16>
    %37 = vector.shape_cast %33 : vector<128x16xbf16> to vector<1x128x16xbf16>
    %38 = tpu.concatenate %34, %35, %36, %37 in 0 : vector<1x128x16xbf16>, vector<1x128x16xbf16>, vector<1x128x16xbf16>, vector<1x128x16xbf16> -> vector<4x128x16xbf16>
    %39 = vector.shape_cast %38 : vector<4x128x16xbf16> to vector<8x64x16xbf16>
    %40 = vector.extract_strided_slice %29 {offsets = [0, 64], sizes = [128, 16], strides = [1, 1]} : vector<128x192xbf16> to vector<128x16xbf16>
    %41 = vector.extract_strided_slice %29 {offsets = [0, 80], sizes = [128, 16], strides = [1, 1]} : vector<128x192xbf16> to vector<128x16xbf16>
    %42 = vector.extract_strided_slice %29 {offsets = [0, 96], sizes = [128, 16], strides = [1, 1]} : vector<128x192xbf16> to vector<128x16xbf16>
    %43 = vector.extract_strided_slice %29 {offsets = [0, 112], sizes = [128, 16], strides = [1, 1]} : vector<128x192xbf16> to vector<128x16xbf16>
    %44 = vector.shape_cast %40 : vector<128x16xbf16> to vector<1x128x16xbf16>
    %45 = vector.shape_cast %41 : vector<128x16xbf16> to vector<1x128x16xbf16>
    %46 = vector.shape_cast %42 : vector<128x16xbf16> to vector<1x128x16xbf16>
    %47 = vector.shape_cast %43 : vector<128x16xbf16> to vector<1x128x16xbf16>
    %48 = tpu.concatenate %44, %45, %46, %47 in 0 : vector<1x128x16xbf16>, vector<1x128x16xbf16>, vector<1x128x16xbf16>, vector<1x128x16xbf16> -> vector<4x128x16xbf16>
    %49 = vector.shape_cast %48 : vector<4x128x16xbf16> to vector<8x64x16xbf16>
    %50 = vector.extract_strided_slice %29 {offsets = [0, 128], sizes = [128, 16], strides = [1, 1]} : vector<128x192xbf16> to vector<128x16xbf16>
    %51 = vector.extract_strided_slice %29 {offsets = [0, 144], sizes = [128, 16], strides = [1, 1]} : vector<128x192xbf16> to vector<128x16xbf16>
    %52 = vector.extract_strided_slice %29 {offsets = [0, 160], sizes = [128, 16], strides = [1, 1]} : vector<128x192xbf16> to vector<128x16xbf16>
    %53 = vector.extract_strided_slice %29 {offsets = [0, 176], sizes = [128, 16], strides = [1, 1]} : vector<128x192xbf16> to vector<128x16xbf16>
    %54 = vector.shape_cast %50 : vector<128x16xbf16> to vector<1x128x16xbf16>
    %55 = vector.shape_cast %51 : vector<128x16xbf16> to vector<1x128x16xbf16>
    %56 = vector.shape_cast %52 : vector<128x16xbf16> to vector<1x128x16xbf16>
    %57 = vector.shape_cast %53 : vector<128x16xbf16> to vector<1x128x16xbf16>
    %58 = tpu.concatenate %54, %55, %56, %57 in 0 : vector<1x128x16xbf16>, vector<1x128x16xbf16>, vector<1x128x16xbf16>, vector<1x128x16xbf16> -> vector<4x128x16xbf16>
    %59 = vector.shape_cast %58 : vector<4x128x16xbf16> to vector<8x64x16xbf16>
    "tpu.trace_start"() <{level = 10 : i32, message = "gnd,gmd->gnm"}> : () -> ()
    %cst_14 = arith.constant dense<0.000000e+00> : vector<8x64x64xf32>
    %60 = tpu.matmul %39, %49, %cst_14 {dimension_numbers = #tpu.dot_dimension_numbers<[2], [2], [1], [1], [0, 0, 0, 1, 1, 1], [0], [0]>} : vector<8x64x16xbf16>, vector<8x64x16xbf16>, vector<8x64x64xf32> -> vector<8x64x64xf32>
    "tpu.trace_stop"() : () -> ()
    %cst_15 = arith.constant dense<0xFF800000> : vector<8x64xf32>
    %61 = vector.multi_reduction <maximumf>, %60, %cst_15 [2] : vector<8x64x64xf32> to vector<8x64xf32>
    %62 = vector.shape_cast %61 : vector<8x64xf32> to vector<8x64x1xf32>
    %63 = vector.broadcast %62 : vector<8x64x1xf32> to vector<8x64x64xf32>
    %64 = arith.subf %60, %63 : vector<8x64x64xf32>
    %65 = math.exp %64 : vector<8x64x64xf32>
    %cst_16 = arith.constant dense<0.000000e+00> : vector<8x64xf32>
    %66 = vector.multi_reduction <add>, %65, %cst_16 [2] : vector<8x64x64xf32> to vector<8x64xf32>
    %67 = vector.shape_cast %66 : vector<8x64xf32> to vector<8x64x1xf32>
    %68 = tpu.reciprocal %67 {approx = true} : vector<8x64x1xf32> -> vector<8x64x1xf32>
    %69 = vector.broadcast %68 : vector<8x64x1xf32> to vector<8x64x64xf32>
    %70 = arith.mulf %65, %69 : vector<8x64x64xf32>
    %71 = arith.truncf %70 : vector<8x64x64xf32> to vector<8x64x64xbf16>
    "tpu.trace_start"() <{level = 10 : i32, message = "gnm,gmd->gnd"}> : () -> ()
    %cst_17 = arith.constant dense<0.000000e+00> : vector<8x64x16xf32>
    %72 = tpu.matmul %71, %59, %cst_17 {dimension_numbers = #tpu.dot_dimension_numbers<[2], [1], [1], [2], [0, 0, 0, 1, 1, 2], [0], [0]>} : vector<8x64x64xbf16>, vector<8x64x16xbf16>, vector<8x64x16xf32> -> vector<8x64x16xf32>
    "tpu.trace_stop"() : () -> ()
    %73 = vector.shape_cast %72 : vector<8x64x16xf32> to vector<4x128x16xf32>
    %74 = vector.extract_strided_slice %73 {offsets = [0, 0, 0], sizes = [1, 128, 16], strides = [1, 1, 1]} : vector<4x128x16xf32> to vector<1x128x16xf32>
    %75 = vector.shape_cast %74 : vector<1x128x16xf32> to vector<128x16xf32>
    %76 = vector.extract_strided_slice %73 {offsets = [1, 0, 0], sizes = [1, 128, 16], strides = [1, 1, 1]} : vector<4x128x16xf32> to vector<1x128x16xf32>
    %77 = vector.shape_cast %76 : vector<1x128x16xf32> to vector<128x16xf32>
    %78 = vector.extract_strided_slice %73 {offsets = [2, 0, 0], sizes = [1, 128, 16], strides = [1, 1, 1]} : vector<4x128x16xf32> to vector<1x128x16xf32>
    %79 = vector.shape_cast %78 : vector<1x128x16xf32> to vector<128x16xf32>
    %80 = vector.extract_strided_slice %73 {offsets = [3, 0, 0], sizes = [1, 128, 16], strides = [1, 1, 1]} : vector<4x128x16xf32> to vector<1x128x16xf32>
    %81 = vector.shape_cast %80 : vector<1x128x16xf32> to vector<128x16xf32>
    %82 = tpu.concatenate %75, %77, %79, %81 in 1 : vector<128x16xf32>, vector<128x16xf32>, vector<128x16xf32>, vector<128x16xf32> -> vector<128x64xf32>
    %83 = arith.truncf %82 : vector<128x64xf32> to vector<128x64xbf16>
    %c0_18 = arith.constant 0 : index
    %c0_19 = arith.constant 0 : index
    %84 = vector.load %arg5[%c0_18, %c0_19] : memref<64x64xbf16, #tpu.memory_space<vmem>>, vector<64x64xbf16>
    %cst_20 = arith.constant dense<0.000000e+00> : vector<128x64xf32>
    %85 = tpu.matmul %83, %84, %cst_20 {dimension_numbers = #tpu.dot_dimension_numbers<[1], [0], [0], [1], [0, 0, 1, 1], [], []>} : vector<128x64xbf16>, vector<64x64xbf16>, vector<128x64xf32> -> vector<128x64xf32>
    %c0_21 = arith.constant 0 : index
    %c0_22 = arith.constant 0 : index
    %86 = vector.load %arg6[%c0_21, %c0_22] : memref<1x64xf32, #tpu.memory_space<vmem>>, vector<1x64xf32>
    %87 = vector.broadcast %86 : vector<1x64xf32> to vector<128x64xf32>
    %88 = arith.addf %85, %87 : vector<128x64xf32>
    %89 = arith.addf %1, %88 : vector<128x64xf32>
    %cst_23 = arith.constant dense<0.000000e+00> : vector<128xf32>
    %90 = vector.multi_reduction <add>, %89, %cst_23 [1] : vector<128x64xf32> to vector<128xf32>
    %91 = vector.shape_cast %90 : vector<128xf32> to vector<128x1xf32>
    %cst_24 = arith.constant 6.400000e+01 : f32
    %92 = vector.broadcast %cst_24 : f32 to vector<128x1xf32>
    %93 = arith.divf %91, %92 : vector<128x1xf32>
    %94 = vector.broadcast %93 : vector<128x1xf32> to vector<128x64xf32>
    %95 = arith.subf %89, %94 : vector<128x64xf32>
    %96 = arith.mulf %95, %95 : vector<128x64xf32>
    %cst_25 = arith.constant dense<0.000000e+00> : vector<128xf32>
    %97 = vector.multi_reduction <add>, %96, %cst_25 [1] : vector<128x64xf32> to vector<128xf32>
    %98 = vector.shape_cast %97 : vector<128xf32> to vector<128x1xf32>
    %cst_26 = arith.constant 6.400000e+01 : f32
    %99 = vector.broadcast %cst_26 : f32 to vector<128x1xf32>
    %100 = arith.divf %98, %99 : vector<128x1xf32>
    %101 = vector.broadcast %93 : vector<128x1xf32> to vector<128x64xf32>
    %102 = arith.subf %89, %101 : vector<128x64xf32>
    %cst_27 = arith.constant 9.99999974E-6 : f32
    %103 = vector.broadcast %cst_27 : f32 to vector<128x1xf32>
    %104 = arith.addf %100, %103 : vector<128x1xf32>
    %105 = math.rsqrt %104 : vector<128x1xf32>
    %106 = vector.broadcast %105 : vector<128x1xf32> to vector<128x64xf32>
    %107 = arith.mulf %102, %106 : vector<128x64xf32>
    %c0_28 = arith.constant 0 : index
    %c0_29 = arith.constant 0 : index
    %108 = vector.load %arg7[%c0_28, %c0_29] : memref<1x64xf32, #tpu.memory_space<vmem>>, vector<1x64xf32>
    %109 = vector.broadcast %108 : vector<1x64xf32> to vector<128x64xf32>
    %110 = arith.mulf %107, %109 : vector<128x64xf32>
    %c0_30 = arith.constant 0 : index
    %c0_31 = arith.constant 0 : index
    %111 = vector.load %arg8[%c0_30, %c0_31] : memref<1x64xf32, #tpu.memory_space<vmem>>, vector<1x64xf32>
    %112 = vector.broadcast %111 : vector<1x64xf32> to vector<128x64xf32>
    %113 = arith.addf %110, %112 : vector<128x64xf32>
    %114 = arith.truncf %113 : vector<128x64xf32> to vector<128x64xbf16>
    %c0_32 = arith.constant 0 : index
    %c0_33 = arith.constant 0 : index
    %115 = vector.load %arg9[%c0_32, %c0_33] : memref<64x256xbf16, #tpu.memory_space<vmem>>, vector<64x256xbf16>
    %cst_34 = arith.constant dense<0.000000e+00> : vector<128x256xf32>
    %116 = tpu.matmul %114, %115, %cst_34 {dimension_numbers = #tpu.dot_dimension_numbers<[1], [0], [0], [1], [0, 0, 1, 1], [], []>} : vector<128x64xbf16>, vector<64x256xbf16>, vector<128x256xf32> -> vector<128x256xf32>
    %c0_35 = arith.constant 0 : index
    %c0_36 = arith.constant 0 : index
    %117 = vector.load %arg10[%c0_35, %c0_36] : memref<1x256xf32, #tpu.memory_space<vmem>>, vector<1x256xf32>
    %118 = vector.broadcast %117 : vector<1x256xf32> to vector<128x256xf32>
    %119 = arith.addf %116, %118 : vector<128x256xf32>
    %120 = vector.shape_cast %119 : vector<128x256xf32> to vector<2x8x8x256xf32>
    %cst_37 = arith.constant 0.000000e+00 : f32
    %121 = vector.broadcast %cst_37 : f32 to vector<2x1x8x256xf32>
    %c0_38 = arith.constant 0 : index
    %c0_39 = arith.constant 0 : index
    %c0_40 = arith.constant 0 : index
    %c0_41 = arith.constant 0 : index
    %122 = vector.load %arg16[%c0_38, %c0_39, %c0_40, %c0_41] : memref<2x10x8x256xf32, #tpu.memory_space<vmem>>, vector<2x1x8x256xf32>
    tpu.vector_store %arg16[%c0_38, %c0_39, %c0_40, %c0_41], %121 {strides = array<i32>} : memref<2x10x8x256xf32, #tpu.memory_space<vmem>>, vector<2x1x8x256xf32>,
    %c0_42 = arith.constant 0 : index
    %c9 = arith.constant 9 : index
    %c0_43 = arith.constant 0 : index
    %c0_44 = arith.constant 0 : index
    %123 = vector.load %arg16[%c0_42, %c9, %c0_43, %c0_44] : memref<2x10x8x256xf32, #tpu.memory_space<vmem>>, vector<2x1x8x256xf32>
    tpu.vector_store %arg16[%c0_42, %c9, %c0_43, %c0_44], %121 {strides = array<i32>} : memref<2x10x8x256xf32, #tpu.memory_space<vmem>>, vector<2x1x8x256xf32>,
    %c0_45 = arith.constant 0 : index
    %c1 = arith.constant 1 : index
    %c0_46 = arith.constant 0 : index
    %c0_47 = arith.constant 0 : index
    %124 = vector.load %arg16[%c0_45, %c1, %c0_46, %c0_47] : memref<2x10x8x256xf32, #tpu.memory_space<vmem>>, vector<2x8x8x256xf32>
    tpu.vector_store %arg16[%c0_45, %c1, %c0_46, %c0_47], %120 {strides = array<i32>} : memref<2x10x8x256xf32, #tpu.memory_space<vmem>>, vector<2x8x8x256xf32>,
    %c0_48 = arith.constant 0 : index
    %c0_49 = arith.constant 0 : index
    %c0_50 = arith.constant 0 : index
    %c0_51 = arith.constant 0 : index
    %125 = vector.load %arg16[%c0_48, %c0_49, %c0_50, %c0_51] : memref<2x10x8x256xf32, #tpu.memory_space<vmem>>, vector<2x10x8x256xf32>
    %c0_52 = arith.constant 0 : index
    %c0_53 = arith.constant 0 : index
    %c0_54 = arith.constant 0 : index
    %126 = vector.load %arg11[%c0_52, %c0_53, %c0_54] : memref<3x3x256xf32, #tpu.memory_space<vmem>>, vector<3x3x256xf32>
    %127 = tpu.iota {dimensions = array<i32: 0>} : vector<8x256xi32>
    %c1_i32 = arith.constant 1 : i32
    %128 = tpu.dynamic_rotate %125 by %c1_i32 dim 2 : vector<2x10x8x256xf32>, i32 -> vector<2x10x8x256xf32>
    %c-1_i32 = arith.constant -1 : i32
    %129 = vector.broadcast %c-1_i32 : i32 to vector<8x256xi32>
    %130 = arith.addi %127, %129 : vector<8x256xi32>
    %c0_i32 = arith.constant 0 : i32
    %131 = vector.broadcast %c0_i32 : i32 to vector<8x256xi32>
    %132 = arith.cmpi sge, %130, %131 : vector<8x256xi32>
    %c-1_i32_55 = arith.constant -1 : i32
    %133 = vector.broadcast %c-1_i32_55 : i32 to vector<8x256xi32>
    %134 = arith.addi %127, %133 : vector<8x256xi32>
    %c8_i32 = arith.constant 8 : i32
    %135 = vector.broadcast %c8_i32 : i32 to vector<8x256xi32>
    %136 = arith.cmpi slt, %134, %135 : vector<8x256xi32>
    %137 = arith.andi %132, %136 : vector<8x256xi1>
    %cst_56 = arith.constant 0.000000e+00 : f32
    %138 = vector.shape_cast %137 : vector<8x256xi1> to vector<1x1x8x256xi1>
    %139 = vector.broadcast %138 : vector<1x1x8x256xi1> to vector<2x10x8x256xi1>
    %140 = vector.broadcast %cst_56 : f32 to vector<2x10x8x256xf32>
    %141 = arith.select %139, %128, %140 : vector<2x10x8x256xi1>, vector<2x10x8x256xf32>
    %142 = vector.extract_strided_slice %141 {offsets = [0, 0, 0, 0], sizes = [2, 8, 8, 256], strides = [1, 1, 1, 1]} : vector<2x10x8x256xf32> to vector<2x8x8x256xf32>
    %143 = vector.extract_strided_slice %126 {offsets = [0, 0, 0], sizes = [1, 1, 256], strides = [1, 1, 1]} : vector<3x3x256xf32> to vector<1x1x256xf32>
    %144 = vector.shape_cast %143 : vector<1x1x256xf32> to vector<256xf32>
    %145 = vector.shape_cast %144 : vector<256xf32> to vector<1x1x1x256xf32>
    %146 = vector.broadcast %145 : vector<1x1x1x256xf32> to vector<2x8x8x256xf32>
    %147 = arith.mulf %142, %146 : vector<2x8x8x256xf32>
    %148 = vector.extract_strided_slice %141 {offsets = [0, 1, 0, 0], sizes = [2, 8, 8, 256], strides = [1, 1, 1, 1]} : vector<2x10x8x256xf32> to vector<2x8x8x256xf32>
    %149 = vector.extract_strided_slice %126 {offsets = [1, 0, 0], sizes = [1, 1, 256], strides = [1, 1, 1]} : vector<3x3x256xf32> to vector<1x1x256xf32>
    %150 = vector.shape_cast %149 : vector<1x1x256xf32> to vector<256xf32>
    %151 = vector.shape_cast %150 : vector<256xf32> to vector<1x1x1x256xf32>
    %152 = vector.broadcast %151 : vector<1x1x1x256xf32> to vector<2x8x8x256xf32>
    %153 = arith.mulf %148, %152 : vector<2x8x8x256xf32>
    %154 = arith.addf %147, %153 : vector<2x8x8x256xf32>
    %155 = vector.extract_strided_slice %141 {offsets = [0, 2, 0, 0], sizes = [2, 8, 8, 256], strides = [1, 1, 1, 1]} : vector<2x10x8x256xf32> to vector<2x8x8x256xf32>
    %156 = vector.extract_strided_slice %126 {offsets = [2, 0, 0], sizes = [1, 1, 256], strides = [1, 1, 1]} : vector<3x3x256xf32> to vector<1x1x256xf32>
    %157 = vector.shape_cast %156 : vector<1x1x256xf32> to vector<256xf32>
    %158 = vector.shape_cast %157 : vector<256xf32> to vector<1x1x1x256xf32>
    %159 = vector.broadcast %158 : vector<1x1x1x256xf32> to vector<2x8x8x256xf32>
    %160 = arith.mulf %155, %159 : vector<2x8x8x256xf32>
    %161 = arith.addf %154, %160 : vector<2x8x8x256xf32>
    %162 = vector.extract_strided_slice %125 {offsets = [0, 0, 0, 0], sizes = [2, 8, 8, 256], strides = [1, 1, 1, 1]} : vector<2x10x8x256xf32> to vector<2x8x8x256xf32>
    %163 = vector.extract_strided_slice %126 {offsets = [0, 1, 0], sizes = [1, 1, 256], strides = [1, 1, 1]} : vector<3x3x256xf32> to vector<1x1x256xf32>
    %164 = vector.shape_cast %163 : vector<1x1x256xf32> to vector<256xf32>
    %165 = vector.shape_cast %164 : vector<256xf32> to vector<1x1x1x256xf32>
    %166 = vector.broadcast %165 : vector<1x1x1x256xf32> to vector<2x8x8x256xf32>
    %167 = arith.mulf %162, %166 : vector<2x8x8x256xf32>
    %168 = arith.addf %161, %167 : vector<2x8x8x256xf32>
    %169 = vector.extract_strided_slice %125 {offsets = [0, 1, 0, 0], sizes = [2, 8, 8, 256], strides = [1, 1, 1, 1]} : vector<2x10x8x256xf32> to vector<2x8x8x256xf32>
    %170 = vector.extract_strided_slice %126 {offsets = [1, 1, 0], sizes = [1, 1, 256], strides = [1, 1, 1]} : vector<3x3x256xf32> to vector<1x1x256xf32>
    %171 = vector.shape_cast %170 : vector<1x1x256xf32> to vector<256xf32>
    %172 = vector.shape_cast %171 : vector<256xf32> to vector<1x1x1x256xf32>
    %173 = vector.broadcast %172 : vector<1x1x1x256xf32> to vector<2x8x8x256xf32>
    %174 = arith.mulf %169, %173 : vector<2x8x8x256xf32>
    %175 = arith.addf %168, %174 : vector<2x8x8x256xf32>
    %176 = vector.extract_strided_slice %125 {offsets = [0, 2, 0, 0], sizes = [2, 8, 8, 256], strides = [1, 1, 1, 1]} : vector<2x10x8x256xf32> to vector<2x8x8x256xf32>
    %177 = vector.extract_strided_slice %126 {offsets = [2, 1, 0], sizes = [1, 1, 256], strides = [1, 1, 1]} : vector<3x3x256xf32> to vector<1x1x256xf32>
    %178 = vector.shape_cast %177 : vector<1x1x256xf32> to vector<256xf32>
    %179 = vector.shape_cast %178 : vector<256xf32> to vector<1x1x1x256xf32>
    %180 = vector.broadcast %179 : vector<1x1x1x256xf32> to vector<2x8x8x256xf32>
    %181 = arith.mulf %176, %180 : vector<2x8x8x256xf32>
    %182 = arith.addf %175, %181 : vector<2x8x8x256xf32>
    %c7_i32 = arith.constant 7 : i32
    %183 = tpu.dynamic_rotate %125 by %c7_i32 dim 2 : vector<2x10x8x256xf32>, i32 -> vector<2x10x8x256xf32>
    %c1_i32_57 = arith.constant 1 : i32
    %184 = vector.broadcast %c1_i32_57 : i32 to vector<8x256xi32>
    %185 = arith.addi %127, %184 : vector<8x256xi32>
    %c0_i32_58 = arith.constant 0 : i32
    %186 = vector.broadcast %c0_i32_58 : i32 to vector<8x256xi32>
    %187 = arith.cmpi sge, %185, %186 : vector<8x256xi32>
    %c1_i32_59 = arith.constant 1 : i32
    %188 = vector.broadcast %c1_i32_59 : i32 to vector<8x256xi32>
    %189 = arith.addi %127, %188 : vector<8x256xi32>
    %c8_i32_60 = arith.constant 8 : i32
    %190 = vector.broadcast %c8_i32_60 : i32 to vector<8x256xi32>
    %191 = arith.cmpi slt, %189, %190 : vector<8x256xi32>
    %192 = arith.andi %187, %191 : vector<8x256xi1>
    %cst_61 = arith.constant 0.000000e+00 : f32
    %193 = vector.shape_cast %192 : vector<8x256xi1> to vector<1x1x8x256xi1>
    %194 = vector.broadcast %193 : vector<1x1x8x256xi1> to vector<2x10x8x256xi1>
    %195 = vector.broadcast %cst_61 : f32 to vector<2x10x8x256xf32>
    %196 = arith.select %194, %183, %195 : vector<2x10x8x256xi1>, vector<2x10x8x256xf32>
    %197 = vector.extract_strided_slice %196 {offsets = [0, 0, 0, 0], sizes = [2, 8, 8, 256], strides = [1, 1, 1, 1]} : vector<2x10x8x256xf32> to vector<2x8x8x256xf32>
    %198 = vector.extract_strided_slice %126 {offsets = [0, 2, 0], sizes = [1, 1, 256], strides = [1, 1, 1]} : vector<3x3x256xf32> to vector<1x1x256xf32>
    %199 = vector.shape_cast %198 : vector<1x1x256xf32> to vector<256xf32>
    %200 = vector.shape_cast %199 : vector<256xf32> to vector<1x1x1x256xf32>
    %201 = vector.broadcast %200 : vector<1x1x1x256xf32> to vector<2x8x8x256xf32>
    %202 = arith.mulf %197, %201 : vector<2x8x8x256xf32>
    %203 = arith.addf %182, %202 : vector<2x8x8x256xf32>
    %204 = vector.extract_strided_slice %196 {offsets = [0, 1, 0, 0], sizes = [2, 8, 8, 256], strides = [1, 1, 1, 1]} : vector<2x10x8x256xf32> to vector<2x8x8x256xf32>
    %205 = vector.extract_strided_slice %126 {offsets = [1, 2, 0], sizes = [1, 1, 256], strides = [1, 1, 1]} : vector<3x3x256xf32> to vector<1x1x256xf32>
    %206 = vector.shape_cast %205 : vector<1x1x256xf32> to vector<256xf32>
    %207 = vector.shape_cast %206 : vector<256xf32> to vector<1x1x1x256xf32>
    %208 = vector.broadcast %207 : vector<1x1x1x256xf32> to vector<2x8x8x256xf32>
    %209 = arith.mulf %204, %208 : vector<2x8x8x256xf32>
    %210 = arith.addf %203, %209 : vector<2x8x8x256xf32>
    %211 = vector.extract_strided_slice %196 {offsets = [0, 2, 0, 0], sizes = [2, 8, 8, 256], strides = [1, 1, 1, 1]} : vector<2x10x8x256xf32> to vector<2x8x8x256xf32>
    %212 = vector.extract_strided_slice %126 {offsets = [2, 2, 0], sizes = [1, 1, 256], strides = [1, 1, 1]} : vector<3x3x256xf32> to vector<1x1x256xf32>
    %213 = vector.shape_cast %212 : vector<1x1x256xf32> to vector<256xf32>
    %214 = vector.shape_cast %213 : vector<256xf32> to vector<1x1x1x256xf32>
    %215 = vector.broadcast %214 : vector<1x1x1x256xf32> to vector<2x8x8x256xf32>
    %216 = arith.mulf %211, %215 : vector<2x8x8x256xf32>
    %217 = arith.addf %210, %216 : vector<2x8x8x256xf32>
    %c0_62 = arith.constant 0 : index
    %c0_63 = arith.constant 0 : index
    %218 = vector.load %arg12[%c0_62, %c0_63] : memref<1x256xf32, #tpu.memory_space<vmem>>, vector<1x256xf32>
    %219 = vector.shape_cast %218 : vector<1x256xf32> to vector<1x1x1x256xf32>
    %220 = vector.broadcast %219 : vector<1x1x1x256xf32> to vector<2x8x8x256xf32>
    %221 = arith.addf %217, %220 : vector<2x8x8x256xf32>
    %cst_64 = arith.constant 5.000000e-01 : f32
    %222 = vector.broadcast %cst_64 : f32 to vector<2x8x8x256xf32>
    %223 = arith.mulf %222, %221 : vector<2x8x8x256xf32>
    %cst_65 = arith.constant 0.707106769 : f32
    %224 = vector.broadcast %cst_65 : f32 to vector<2x8x8x256xf32>
    %225 = arith.mulf %221, %224 : vector<2x8x8x256xf32>
    %226 = math.erf %225 : vector<2x8x8x256xf32>
    %cst_66 = arith.constant 1.000000e+00 : f32
    %227 = vector.broadcast %cst_66 : f32 to vector<2x8x8x256xf32>
    %228 = arith.addf %227, %226 : vector<2x8x8x256xf32>
    %229 = arith.mulf %223, %228 : vector<2x8x8x256xf32>
    %230 = vector.shape_cast %229 : vector<2x8x8x256xf32> to vector<128x256xf32>
    %231 = arith.truncf %230 : vector<128x256xf32> to vector<128x256xbf16>
    %c0_67 = arith.constant 0 : index
    %c0_68 = arith.constant 0 : index
    %232 = vector.load %arg13[%c0_67, %c0_68] : memref<256x64xbf16, #tpu.memory_space<vmem>>, vector<256x64xbf16>
    %cst_69 = arith.constant dense<0.000000e+00> : vector<128x64xf32>
    %233 = tpu.matmul %231, %232, %cst_69 {dimension_numbers = #tpu.dot_dimension_numbers<[1], [0], [0], [1], [0, 0, 1, 1], [], []>} : vector<128x256xbf16>, vector<256x64xbf16>, vector<128x64xf32> -> vector<128x64xf32>
    %c0_70 = arith.constant 0 : index
    %c0_71 = arith.constant 0 : index
    %234 = vector.load %arg14[%c0_70, %c0_71] : memref<1x64xf32, #tpu.memory_space<vmem>>, vector<1x64xf32>
    %235 = vector.broadcast %234 : vector<1x64xf32> to vector<128x64xf32>
    %236 = arith.addf %233, %235 : vector<128x64xf32>
    %237 = arith.addf %89, %236 : vector<128x64xf32>
    %238 = vector.shape_cast %237 : vector<128x64xf32> to vector<2x8x8x64xf32>
    %c0_72 = arith.constant 0 : index
    %c0_73 = arith.constant 0 : index
    %c0_74 = arith.constant 0 : index
    %c0_75 = arith.constant 0 : index
    %239 = vector.load %arg15[%c0_72, %c0_73, %c0_74, %c0_75] : memref<2x8x8x64xf32, #tpu.memory_space<vmem>>, vector<2x8x8x64xf32>
    tpu.vector_store %arg15[%c0_72, %c0_73, %c0_74, %c0_75], %238 {strides = array<i32>} : memref<2x8x8x64xf32, #tpu.memory_space<vmem>>, vector<2x8x8x64xf32>,
    return
  }
  func.func @transform_0(%arg0: i32) -> (i32, i32, i32, i32) {
    %c0_i32 = arith.constant 0 : i32
    %c0_i32_0 = arith.constant 0 : i32
    %c0_i32_1 = arith.constant 0 : i32
    %c0_i32_2 = arith.constant 0 : i32
    return %arg0, %c0_i32, %c0_i32_0, %c0_i32_1 : i32, i32, i32, i32
  }
  func.func @transform_1(%arg0: i32) -> (i32, i32) {
    %c0_i32 = arith.constant 0 : i32
    %c0_i32_0 = arith.constant 0 : i32
    %c0_i32_1 = arith.constant 0 : i32
    return %c0_i32, %c0_i32_0 : i32, i32
  }
  func.func @transform_2(%arg0: i32) -> (i32, i32) {
    %c0_i32 = arith.constant 0 : i32
    %c0_i32_0 = arith.constant 0 : i32
    %c0_i32_1 = arith.constant 0 : i32
    return %c0_i32, %c0_i32_0 : i32, i32
  }
  func.func @transform_3(%arg0: i32) -> (i32, i32) {
    %c0_i32 = arith.constant 0 : i32
    %c0_i32_0 = arith.constant 0 : i32
    %c0_i32_1 = arith.constant 0 : i32
    return %c0_i32, %c0_i32_0 : i32, i32
  }
  func.func @transform_4(%arg0: i32) -> (i32, i32) {
    %c0_i32 = arith.constant 0 : i32
    %c0_i32_0 = arith.constant 0 : i32
    %c0_i32_1 = arith.constant 0 : i32
    return %c0_i32, %c0_i32_0 : i32, i32
  }
  func.func @transform_5(%arg0: i32) -> (i32, i32) {
    %c0_i32 = arith.constant 0 : i32
    %c0_i32_0 = arith.constant 0 : i32
    %c0_i32_1 = arith.constant 0 : i32
    return %c0_i32, %c0_i32_0 : i32, i32
  }
  func.func @transform_6(%arg0: i32) -> (i32, i32) {
    %c0_i32 = arith.constant 0 : i32
    %c0_i32_0 = arith.constant 0 : i32
    %c0_i32_1 = arith.constant 0 : i32
    return %c0_i32, %c0_i32_0 : i32, i32
  }
  func.func @transform_7(%arg0: i32) -> (i32, i32) {
    %c0_i32 = arith.constant 0 : i32
    %c0_i32_0 = arith.constant 0 : i32
    %c0_i32_1 = arith.constant 0 : i32
    return %c0_i32, %c0_i32_0 : i32, i32
  }
  func.func @transform_8(%arg0: i32) -> (i32, i32) {
    %c0_i32 = arith.constant 0 : i32
    %c0_i32_0 = arith.constant 0 : i32
    %c0_i32_1 = arith.constant 0 : i32
    return %c0_i32, %c0_i32_0 : i32, i32
  }
  func.func @transform_9(%arg0: i32) -> (i32, i32) {
    %c0_i32 = arith.constant 0 : i32
    %c0_i32_0 = arith.constant 0 : i32
    %c0_i32_1 = arith.constant 0 : i32
    return %c0_i32, %c0_i32_0 : i32, i32
  }
  func.func @transform_10(%arg0: i32) -> (i32, i32, i32) {
    %c0_i32 = arith.constant 0 : i32
    %c0_i32_0 = arith.constant 0 : i32
    %c0_i32_1 = arith.constant 0 : i32
    %c0_i32_2 = arith.constant 0 : i32
    return %c0_i32, %c0_i32_0, %c0_i32_1 : i32, i32, i32
  }
  func.func @transform_11(%arg0: i32) -> (i32, i32) {
    %c0_i32 = arith.constant 0 : i32
    %c0_i32_0 = arith.constant 0 : i32
    %c0_i32_1 = arith.constant 0 : i32
    return %c0_i32, %c0_i32_0 : i32, i32
  }
  func.func @transform_12(%arg0: i32) -> (i32, i32) {
    %c0_i32 = arith.constant 0 : i32
    %c0_i32_0 = arith.constant 0 : i32
    %c0_i32_1 = arith.constant 0 : i32
    return %c0_i32, %c0_i32_0 : i32, i32
  }
  func.func @transform_13(%arg0: i32) -> (i32, i32) {
    %c0_i32 = arith.constant 0 : i32
    %c0_i32_0 = arith.constant 0 : i32
    %c0_i32_1 = arith.constant 0 : i32
    return %c0_i32, %c0_i32_0 : i32, i32
  }
  func.func @transform_14(%arg0: i32) -> (i32, i32, i32, i32) {
    %c0_i32 = arith.constant 0 : i32
    %c0_i32_0 = arith.constant 0 : i32
    %c0_i32_1 = arith.constant 0 : i32
    %c0_i32_2 = arith.constant 0 : i32
    return %arg0, %c0_i32, %c0_i32_0, %c0_i32_1 : i32, i32, i32, i32
  }
}

</mosaic_0001>

<bundles_post_ra>
// kernel: tpu_custom_call.1
= control target key start
LH: loop header
LB: loop body
LE: loop exit
PB: predicated region body
PF: predicated region fallthrough
CT: control target
= control target key end

     0   :  { %s13123_s0 = inlined_call_operand.hbm [shape: f32[4,8,8,64], index: 0, kind: input, shape index: {}]   ;;  %s13124_s1 = inlined_call_operand.vmem [shape: f32[1,64], index: 1, kind: input, shape index: {}]   ;;  %s13125_s2 = inlined_call_operand.vmem [shape: f32[1,64], index: 2, kind: input, shape index: {}]   ;;  %s13126_s3 = inlined_call_operand.vmem [shape: bf16[64,192], index: 3, kind: input, shape index: {}]   ;;  %s13127_s4 = inlined_call_operand.vmem [shape: bf16[64,64], index: 4, kind: input, shape index: {}]   ;;  %s13128_s5 = inlined_call_operand.vmem [shape: f32[1,64], index: 5, kind: input, shape index: {}]   ;;  %s13129_s6 = inlined_call_operand.vmem [shape: f32[1,64], index: 6, kind: input, shape index: {}]   ;;  %s13130_s7 = inlined_call_operand.vmem [shape: f32[1,64], index: 7, kind: input, shape index: {}]   ;;  %s13131_s8 = inlined_call_operand.vmem [shape: bf16[64,256], index: 8, kind: input, shape index: {}]   ;;  %s13132_s9 = inlined_call_operand.vmem [shape: f32[1,256], index: 9, kind: input, shape index: {}]   ;;  %s13133_s10 = inlined_call_operand.vmem [shape: f32[3,3,256], index: 10, kind: input, shape index: {}]   ;;  %s13134_s11 = inlined_call_operand.vmem [shape: f32[1,256], index: 11, kind: input, shape index: {}]   ;;  %s13135_s12 = inlined_call_operand.vmem [shape: bf16[256,64], index: 12, kind: input, shape index: {}]   ;;  %s13136_s13 = inlined_call_operand.vmem [shape: f32[1,64], index: 13, kind: input, shape index: {}]   ;;  %s13137_s14 = inlined_call_operand.hbm [shape: f32[4,8,8,64], index: 14, kind: output, shape index: {}]  }
   0x1   :  { %13337 = sst [smem:[#allocation100_spill]] %s13123_s0 }
   0x2   :  { %13338 = sst [smem:[#allocation101_spill]] %s13124_s1 }
   0x3   :  { %13339 = sst [smem:[#allocation102_spill]] %s13137_s14 }
   0x4   :  { %19 = vsyncpa [#allocation4], 0 }
   0x5   :  { %21 = vsyncpa [#allocation4 + $0x1], 0 }
   0x6   :  { %22 = vsyncpa [#allocation5], 0 }
   0x7   :  { %24 = vsyncpa [#allocation5 + $0x1], 0  ;;  %s7993_s29 = smov 0   ;;  %s7995_s30 = smov 0  }
   0x8   :  { %s7997_s15 = smov 0   ;;  %s7999_s16 = smov 0  }
   0x9 LB: > { %13340 = sst [smem:[#allocation9_spill]] %s7891_s29  ;;  %s8014_s17 = sadd.s32 4294967295, %s7903_s16   ;;  %s7903_s16 = sphi %s7999_s16, %s13759_s16   ;;  %s7899_s15 = sphi %s7997_s15, %s13764_s15   ;;  %s7895_s30 = sphi %s7995_s30, %s13763_s30   ;;  %s7891_s29 = sphi %s7993_s29, %s13762_s29  }
   0xa   : > { %13341 = sst [smem:[#allocation10_spill]] %s7899_s15  ;;  %s6872_s18 = sadd.s32 4294967294, %s7903_s16  }
   0xb   : > { %13342 = sst [smem:[#allocation11_spill]] %s8014_s17  ;;  %s8018_s19 = sadd.s32 1, %s7903_s16  }
   0xc   : > { %13343 = sst [smem:[#allocation12_spill]] %s8018_s19  ;;  %s37_s20 = sadd.s32 1, %s7899_s15 }
   0xd   : > { %s34_s21 = ssub.s32 %s7903_s16, %s8018_s19  ;;  %p44_p0 = scmp.ne.s32.totalorder %s7899_s15, %s7895_s30 }
   0xe   : > { %p35_p1 = scmp.eq.s32.totalorder %s34_s21, 0  ;;  %p45_p2 = scmp.eq.s32.totalorder %s7903_s16, 0 }
   0xf   : > { %p50_p3 = scmp.ne.s32.totalorder %s7895_s30, %s7891_s29  ;;  %p51_p4 = scmp.eq.s32.totalorder %s8014_s17, 0 }
  0x10   : > { %s8030_s22 = scalar_select %p35_p1, %s7899_s15, %s37_s20  }
  0x11   : > { %p8032_p5 = por %p45_p2, %p44_p0  ;;  %p8036_p6 = por %p51_p4, %p50_p3 }
  0x12   : > { %13344 = sst [smem:[#allocation13_spill]] %s8030_s22  ;;  %p347_p7 = scmp.eq.s32.totalorder %s8014_s17, 1 }
  0x13   : > { %p353_p8 = scmp.eq.s32.totalorder %s6872_s18, 1  ;;  %p7228_p10 = scmp.lt.s32.totalorder %s7903_s16, 2 }
  0x14   : > { %p8043_p11 = por %p347_p7, %p44_p0  ;;  %s412_s27 = sand.u32 1, %s7899_s15  }
  0x15   : > { %p8047_p12 = por %p353_p8, %p50_p3  ;;  %s7169_s28 = sshll.u32 %s7903_s16, 7 }
  0x16   : > { %s13347_s25 = scalar_select %p8043_p11, 1, 0 }
  0x17   : > { %s13349_s26 = scalar_select %p8047_p12, 1, 0 }
  0x18   : > { %13348 = sst [smem:[#allocation14_spill]] %s13347_s25  ;;  %s6875_s20 = sshll.u32 %s412_s27, 7 }
  0x19   : > { %13350 = sst [smem:[#allocation15_spill]] %s13349_s26  ;;  %s416_s18 = scalar_lea.vmem [#allocation3], %s6875_s20 }
  0x1a   : > { %s13351_s0 = sld [smem:[#allocation100_spill]]  ;;  %s425_s14 = sshll.u32 %s416_s18, 4  ;;  %s426_s14 = int_to_ptr.vmem [resolvable:$true] %s425_s14 }
  0x1b   : > { %p8058_p13 = pnand %p7228_p10, %p8032_p5  ;;  %p6879_p0 = scmp.ge.s32.totalorder %s7903_s16, 1 }
  0x1c   : > { %p433_p1 = scmp.lt.s32.totalorder %s7903_s16, 3  ;;  %s413_s15 = scalar_lea.sflag [#allocation4], %s412_s27 }
  0x1d   : > { %p7811_p3 = pneg %p8058_p13 }
  0x20   : > { %s422_s19 = scalar_lea.hbm %s13351_s0, %s7169_s28  ;;  %s7814_s23 = scalar_lea.hbm %s13351_s0, 256 }
  0x21   : > { %s423_s29 = sshll.u32 %s422_s19, 4  ;;  %s424_s29 = int_to_ptr.hbm [resolvable:$true] %s423_s29 }
  0x22   : > { %s7807_s26 = sshra.s32 %s424_s29, 4  ;;  %s7808_s26 = int_to_ptr.hbm [resolvable:$true] %s7807_s26 }
  0x23   : > { %s7809_s25 = scalar_lea.hbm %s7808_s26, 128  ;;  %p7815_p5 = scmp.lt.s32.totalorder %s7808_s26, %s13351_s0 }
  0x24   : > { %p7810_p2 = scmp.ne.s32.totalorder %s7808_s26, %s7809_s25  ;;  %p7816_p8 = scmp.lt.s32.totalorder %s7814_s23, %s7809_s25 }
  0x26   : > { %p7812_p4 = pnand %p7811_p3, %p7810_p2  ;;  %p7817_p10 = por %p7816_p8, %p7815_p5 }
  0x28   : > { %p7813_p7 = pneg %p7812_p4 }
  0x2a   : > { %p7818_p9 = pnand %p7817_p10, %p7813_p7 }
  0x2c   : > { %7821 = shalt.err (!%p7818_p9)
}
  0x2d   : > { %s7905_s27 = smov 128   ;;  %s7906_s21 = smov 8  }
  0x2e   : > { %7223 = dma.hbm_to_vmem [thread:$0]  (!%p8058_p13), %s424_s29, 2048, %s426_s14, %s413_s15, %s7905_s27, %s7905_s27, %s7906_s21  }
  0x2f   : > { %p434_p2 = pnand %p6879_p0, %p433_p1 }
  0x31   : > { %437 = sbr.rel (%p434_p2) target bundleno = 2993 (0xbb1), region = 76 }
  0x36   : > { %s8079_s18 = sand.u32 1, %s7895_s30  }
  0x37   : > { %s6880_s25 = sshll.u32 %s8079_s18, 7  ;;  %s440_s26 = scalar_lea.sflag [#allocation4], %s8079_s18 }
  0x38   : > { %s8085_s19 = scalar_lea.vmem [#allocation3], %s6880_s25 }
  0x39   : > { %7882 = dma.done.wait (%p8036_p6), %s440_s26, 2048  }
  0x3a   : > { %7884 = vsyncadd (%p8036_p6), %s440_s26, 4294965248  ;;  %vm508_vm0 = vcmask 523264   ;;  %v494_v0 = vld [vmem:[%s8085_s19 + $0x10] sm:$0xff]  ;;  %v492_v1 = vld [vmem:[%s8085_s19] sm:$0xff]  ;;  %v7907_v14 = vmov 64.0   ;;  %s13358_s1 = sld [smem:[#allocation101_spill]] }
  0x3b   : > { %v515_v2 = vsel %vm508_vm0, %v494_v0, 0.0  ;;  %v509_v3 = vsel %vm508_vm0, %v492_v1, 0.0  ;;  %v496_v4 = vld [vmem:[%s8085_s19 + $0x20] sm:$0xff]  ;;  %v495_v6 = vld [vmem:[%s8085_s19 + $0x18] sm:$0xff]  ;;  %v493_v7 = vld [vmem:[%s8085_s19 + $0x8] sm:$0xff]  ;;  %7401 = vrcp.f32 %v7907_v14  ;;  %s7908_s14 = smov 80  }
  0x3c   : > { %516 = vadd.xlane.f32.xlu1 %v515_v2  ;;  %510 = vadd.xlane.f32.xlu0 %v509_v3  ;;  %v521_v5 = vsel %vm508_vm0, %v496_v4, 0.0  ;;  %v497_v8 = vld [vmem:[%s8085_s19 + $0x28] sm:$0xff]  ;;  %v518_v9 = vsel %vm508_vm0, %v495_v6, 0.0  ;;  %v512_v10 = vsel %vm508_vm0, %v493_v7, 0.0  ;;  %v498_v12 = vld [vmem:[%s8085_s19 + $0x30] sm:$0xff]  ;;  %v8118_v34 = vld [vmem:[%s8085_s19 + $0x38] sm:$0xff] }
  0x3d   : > { %522 = vadd.xlane.f32.xlu2 %v521_v5  ;;  %v524_v11 = vsel %vm508_vm0, %v497_v8, 0.0  ;;  %v527_v13 = vsel %vm508_vm0, %v498_v12, 0.0  ;;  %v530_v40 = vsel %vm508_vm0, %v8118_v34, 0.0  ;;  %v8140_v47 = vld [vmem:[%s8085_s19 + $0x40] sm:$0xff]  ;;  %v8154_v56 = vld [vmem:[%s8085_s19 + $0x58] sm:$0xff]  ;;  %v8157_v57 = vld [vmem:[%s8085_s19 + $0x48] sm:$0xff] }
  0x3e   : > { %v533_v51 = vsel %vm508_vm0, %v8140_v47, 0.0  ;;  %v542_v59 = vsel %vm508_vm0, %v8154_v56, 0.0  ;;  %v536_v61 = vsel %vm508_vm0, %v8157_v57, 0.0  ;;  %v8169_v63 = vld [vmem:[%s8085_s19 + $0x60] sm:$0xff]  ;;  %s7909_s29 = smov 112   ;;  %s7910_s15 = smov 64  }
  0x3f   : > { %v6900_v14 = vld [vmem:[%s13126_s3 + $0x20] sm:$0xf]  ;;  %s7911_s17 = smov 96   ;;  %s7912_s24 = smov 16  }
  0x40   : > { %s7913_s22 = smov 32   ;;  %s7914_s23 = smov 48  }
  0x41   : > { %v7402_v15 = vpop.eup %7401  ;;  %s13753_s20 = sld [smem:[#allocation102_spill]] }
  0x42   : > { %v558_v16 = vmul.f32 64.0, %v7402_v15  ;;  %vm562_vm1 = vweird.f32 %v7402_v15 }
  0x44   : > { %519 = vadd.xlane.f32.xlu1 %v518_v9  ;;  %513 = vadd.xlane.f32.xlu0 %v512_v10  ;;  %v559_v17 = vsub.f32 1.0, %v558_v16  ;;  %v7177_v9 = vld [vmem:[%s13126_s3 + $0x34] sm:$0xf0]  ;;  %v7176_v10 = vld [vmem:[%s13126_s3 + $0x34] sm:$0xf] }
  0x45   : > { %525 = vadd.xlane.f32.xlu2 %v524_v11  ;;  %v7174_v16 = vld [vmem:[%s13126_s3 + $0x24] sm:$0xf] }
  0x46   : > { %v560_v18 = vmul.f32 %v7402_v15, %v559_v17 }
  0x48   : > { %v561_v19 = vadd.f32 %v7402_v15, %v560_v18  ;;  %v6902_v18 = vld [vmem:[%s13126_s3 + $0x28] sm:$0xf0] }
  0x4a   : > { %v8105_v20 = vsel %vm562_vm1, %v7402_v15, %v561_v19  ;;  %v7175_v15 = vld [vmem:[%s13126_s3 + $0x24] sm:$0xf0]  ;;  %v6905_v19 = vor.u32 %v7174_v16, %v6902_v18 }
  0x4b   : > { %13353 = vst [vmem:[#allocation16_spill] sm:$0xff] %v8105_v20  ;;  %v6901_v17 = vor.u32 %v7175_v15, %v6900_v14 }
  0x4d   : > { %528 = vadd.xlane.f32.xlu2 %v527_v13 }
  0xaf   : > { %v517_v21 = vpop.xlane.xlu1 %516  ;;  %v511_v22 = vpop.xlane.xlu0 %510 }
  0xb0   : > { %v564_v23 = vmul.f32 %v8105_v20, %v511_v22  ;;  %v523_v24 = vpop.xlane.xlu2 %522  ;;  %v566_v33 = vmul.f32 %v8105_v20, %v517_v21  ;;  %v6892_v21 = vld [vmem:[%s13126_s3 + $0x10] sm:$0xf]  ;;  %v7173_v22 = vld [vmem:[%s13126_s3 + $0x14] sm:$0xf0] }
  0xb1   : > { %v568_v32 = vmul.f32 %v8105_v20, %v523_v24 }
  0xb2   : > { %v8108_v25 = vsub.f32 %v492_v1, %v564_v23  ;;  %v8132_v42 = vsub.f32 %v494_v0, %v566_v33  ;;  %v8172_v0 = vld [vmem:[%s8085_s19 + $0x50] sm:$0xff]  ;;  %v545_v1 = vsel %vm508_vm0, %v8169_v63, 0.0 }
  0xb3   : > { %v8124_v38 = vsub.f32 %v496_v4, %v568_v32  ;;  %v539_v3 = vsel %vm508_vm0, %v8172_v0, 0.0  ;;  %v8180_v4 = vld [vmem:[%s8085_s19 + $0x68] sm:$0xff]  ;;  %v7172_v23 = vld [vmem:[%s13126_s3 + $0x14] sm:$0xf] }
  0xb4   : > { %v596_v26 = vmul.f32 %v8108_v25, %v8108_v25  ;;  %v598_v48 = vmul.f32 %v8132_v42, %v8132_v42  ;;  %v548_v5 = vsel %vm508_vm0, %v8180_v4, 0.0  ;;  %v7171_v32 = vld [vmem:[%s13126_s3 + $0x4] sm:$0xf0] }
  0xb5   : > { %v600_v46 = vmul.f32 %v8124_v38, %v8124_v38 }
  0xb6   : > { %v612_v27 = vsel %vm508_vm0, %v596_v26, 0.0  ;;  %v618_v52 = vsel %vm508_vm0, %v598_v48, 0.0  ;;  %v6893_v26 = vor.u32 %v7173_v22, %v6892_v21 }
  0xb7   : > { %v520_v28 = vpop.xlane.xlu1 %519  ;;  %613 = vadd.xlane.f32.xlu0 %v612_v27  ;;  %v514_v29 = vpop.xlane.xlu0 %513  ;;  %v624_v50 = vsel %vm508_vm0, %v600_v46, 0.0  ;;  %v6894_v27 = vld [vmem:[%s13126_s3 + $0x18] sm:$0xf0] }
  0xb8   : > { %v567_v30 = vmul.f32 %v8105_v20, %v520_v28  ;;  %v565_v31 = vmul.f32 %v8105_v20, %v514_v29  ;;  %v526_v37 = vpop.xlane.xlu2 %525  ;;  %v6897_v29 = vor.u32 %v7172_v23, %v6894_v27 }
  0xb9   : > { %v569_v45 = vmul.f32 %v8105_v20, %v526_v37  ;;  %v7170_v37 = vld [vmem:[%s13126_s3 + $0x4] sm:$0xf] }
  0xba   : > { %v8120_v35 = vsub.f32 %v495_v6, %v567_v30  ;;  %v8122_v36 = vsub.f32 %v493_v7, %v565_v31  ;;  %v8185_v6 = vld [vmem:[%s8085_s19 + $0x70] sm:$0xff]  ;;  %v6884_v31 = vld [vmem:[%s13126_s3] sm:$0xf] }
  0xbb   : > { %v8144_v49 = vsub.f32 %v497_v8, %v569_v45  ;;  %v551_v7 = vsel %vm508_vm0, %v8185_v6, 0.0  ;;  %v6908_v8 = vld [vmem:[%s13126_s3 + $0x30] sm:$0xf]  ;;  %v6885_v33 = vor.u32 %v7171_v32, %v6884_v31 }
  0xbc   : > { %v599_v39 = vmul.f32 %v8120_v35, %v8120_v35  ;;  %v597_v41 = vmul.f32 %v8122_v36, %v8122_v36  ;;  %v6909_v11 = vor.u32 %v7177_v9, %v6908_v8 }
  0xbd   : > { %v601_v55 = vmul.f32 %v8144_v49, %v8144_v49 }
  0xbe   : > { %v621_v43 = vsel %vm508_vm0, %v599_v39, 0.0  ;;  %v615_v44 = vsel %vm508_vm0, %v597_v41, 0.0  ;;  %992 = vmatpush.bf16.msra.mxu0 %v6909_v11  ;;  %v6886_v39 = vld [vmem:[%s13126_s3 + $0x8] sm:$0xf0] }
  0xbf   : > { %622 = vadd.xlane.f32.xlu2 %v621_v43  ;;  %531 = vadd.xlane.f32.xlu0 %v530_v40  ;;  %v627_v60 = vsel %vm508_vm0, %v601_v55, 0.0  ;;  %v6889_v40 = vor.u32 %v7170_v37, %v6886_v39 }
  0xc0   : > { %616 = vadd.xlane.f32.xlu1 %v615_v44  ;;  %v529_v53 = vpop.xlane.xlu2 %528 }
  0xc1   : > { %v570_v54 = vmul.f32 %v8105_v20, %v529_v53 }
  0xc2   : > { %993 = vmatpush.bf16.msra.mxu0 %v6901_v17 }
  0xc3   : > { %v8159_v58 = vsub.f32 %v498_v12, %v570_v54  ;;  %v6910_v12 = vld [vmem:[%s13126_s3 + $0x38] sm:$0xf0] }
  0xc4   : > { %v6913_v13 = vor.u32 %v7176_v10, %v6910_v12 }
  0xc5   : > { %v602_v62 = vmul.f32 %v8159_v58, %v8159_v58 }
  0xc6   : > { %1041 = vmatpush.bf16.msra.mxu1 %v6913_v13  ;;  %994 = vmatpush.bf16.msra.mxu0 %v6893_v26 }
  0xc7   : > { %625 = vadd.xlane.f32.xlu2 %v624_v50  ;;  %534 = vadd.xlane.f32.xlu0 %v533_v51  ;;  %v630_v2 = vsel %vm508_vm0, %v602_v62, 0.0 }
  0xc8   : > { %619 = vadd.xlane.f32.xlu1 %v618_v52 }
  0xca   : > { %1042 = vmatpush.bf16.msra.mxu1 %v6905_v19  ;;  %995 = vmatpush.bf16.msra.mxu0 %v6885_v33 }
  0xce   : > { %1043 = vmatpush.bf16.msra.mxu1 %v6897_v29 }
  0xcf   : > { %543 = vadd.xlane.f32.xlu2 %v542_v59  ;;  %628 = vadd.xlane.f32.xlu0 %v627_v60 }
  0xd0   : > { %537 = vadd.xlane.f32.xlu1 %v536_v61 }
  0xd2   : > { %1044 = vmatpush.bf16.msra.mxu1 %v6889_v40  ;;  %v8296_v40 = vld [vmem:[%s8085_s19 + $0x78] sm:$0xff] }
  0xd7   : > { %546 = vadd.xlane.f32.xlu2 %v545_v1  ;;  %631 = vadd.xlane.f32.xlu0 %v630_v2 }
  0xd8   : > { %540 = vadd.xlane.f32.xlu1 %v539_v3 }
  0xdf   : > { %549 = vadd.xlane.f32.xlu0 %v548_v5 }
  0xe7   : > { %552 = vadd.xlane.f32.xlu0 %v551_v7 }
 0x12a   : > { %v614_v24 = vpop.xlane.xlu0 %613 }
 0x12b   : > { %v660_v28 = vmul.f32 %v614_v24, %v8105_v20 }
 0x12d   : > { %v676_v30 = vadd.f32 1e-05, %v660_v28 }
 0x12f   : > { %7403 = vrsqrt.f32 %v676_v30  ;;  %vm698_vm3 = vweird.f32 %v676_v30 }
 0x132   : > { %v623_v41 = vpop.xlane.xlu2 %622  ;;  %v532_v43 = vpop.xlane.xlu0 %531 }
 0x133   : > { %v663_v44 = vmul.f32 %v623_v41, %v8105_v20  ;;  %v617_v45 = vpop.xlane.xlu1 %616  ;;  %v571_v46 = vmul.f32 %v8105_v20, %v532_v43 }
 0x134   : > { %v661_v48 = vmul.f32 %v617_v45, %v8105_v20 }
 0x135   : > { %v7404_v50 = vpop.eup %7403  ;;  %v8241_v51 = vadd.f32 1e-05, %v663_v44  ;;  %v8244_v52 = vsub.f32 %v8118_v34, %v571_v46  ;;  %v8305_v44 = vld [vmem:[%s13358_s1] ss:$0 sm:$0xff] }
 0x136   : > { %v693_v53 = vmul.f32 %v7404_v50, %v676_v30  ;;  %v677_v54 = vadd.f32 1e-05, %v661_v48  ;;  %vm699_vm2 = vweird.f32 %v7404_v50 }
 0x137   : > { %7405 = vrsqrt.f32 %v8241_v51  ;;  %v603_v55 = vmul.f32 %v8244_v52, %v8244_v52  ;;  %vm8267_vm6 = vmor %vm698_vm3, %vm699_vm2  ;;  %vm728_vm10 = vweird.f32 %v8241_v51 }
 0x138   : > { %v694_v59 = vmul.f32 %v7404_v50, %v693_v53  ;;  %7407 = vrsqrt.f32 %v677_v54  ;;  %vm708_vm4 = vweird.f32 %v677_v54 }
 0x139   : > { %v633_v60 = vsel %vm508_vm0, %v603_v55, 0.0 }
 0x13a   : > { %v695_v61 = vmul.f32 0.5, %v694_v59  ;;  %v626_v62 = vpop.xlane.xlu2 %625  ;;  %634 = vadd.xlane.f32.xlu1 %v633_v60  ;;  %v535_v1 = vpop.xlane.xlu0 %534 }
 0x13b   : > { %v620_v2 = vpop.xlane.xlu1 %619  ;;  %v572_v3 = vmul.f32 %v8105_v20, %v535_v1  ;;  %v664_v10 = vmul.f32 %v626_v62, %v8105_v20 }
 0x13c   : > { %v696_v34 = vsub.f32 1.5, %v695_v61  ;;  %v662_v5 = vmul.f32 %v620_v2, %v8105_v20 }
 0x13d   : > { %v8252_v7 = vpop.eup %7405  ;;  %v8255_v8 = vsub.f32 %v8140_v47, %v572_v3  ;;  %v8265_v47 = vadd.f32 1e-05, %v664_v10  ;;  %v8327_v3 = vld [vmem:[%s13125_s2] ss:$0 sm:$0xff] }
 0x13e   : > { %v7408_v9 = vpop.eup %7407  ;;  %v8258_v11 = vadd.f32 1e-05, %v662_v5  ;;  %v697_v13 = vmul.f32 %v7404_v50, %v696_v34  ;;  %v723_v14 = vmul.f32 %v8252_v7, %v8241_v51  ;;  %vm729_vm11 = vweird.f32 %v8252_v7 }
 0x13f   : > { %v703_v12 = vmul.f32 %v7408_v9, %v677_v54  ;;  %v604_v16 = vmul.f32 %v8255_v8, %v8255_v8  ;;  %vm709_vm5 = vweird.f32 %v7408_v9  ;;  %vm8362_vm13 = vmor %vm728_vm10, %vm729_vm11  ;;  %vm738_vm1 = vweird.f32 %v8265_v47 }
 0x140   : > { %7409 = vrsqrt.f32 %v8258_v11  ;;  %v701_v27 = vsel %vm8267_vm6, %v7404_v50, %v697_v13  ;;  %v724_v28 = vmul.f32 %v8252_v7, %v723_v14  ;;  %vm8287_vm7 = vmor %vm708_vm4, %vm709_vm5  ;;  %vm718_vm8 = vweird.f32 %v8258_v11 }
 0x141   : > { %v704_v15 = vmul.f32 %v7408_v9, %v703_v12  ;;  %v636_v24 = vsel %vm508_vm0, %v604_v16, 0.0  ;;  %7411 = vrsqrt.f32 %v8265_v47  ;;  %v852_v43 = vmul.f32 %v701_v27, %v8108_v25 }
 0x142   : > { %v544_v17 = vpop.xlane.xlu2 %543  ;;  %v629_v18 = vpop.xlane.xlu0 %628  ;;  %637 = vadd.xlane.f32.xlu1 %v636_v24  ;;  %v725_v45 = vmul.f32 0.5, %v724_v28  ;;  %v554_v25 = vsel %vm508_vm0, %v8296_v40, 0.0 }
 0x143   : > { %v705_v21 = vmul.f32 0.5, %v704_v15  ;;  %v575_v22 = vmul.f32 %v8105_v20, %v544_v17  ;;  %v538_v23 = vpop.xlane.xlu1 %537  ;;  %v665_v26 = vmul.f32 %v629_v18, %v8105_v20  ;;  %v872_v2 = vmul.f32 %v8305_v44, %v852_v43 }
 0x144   : > { %v573_v29 = vmul.f32 %v8105_v20, %v538_v23  ;;  %v726_v5 = vsub.f32 1.5, %v725_v45 }
 0x145   : > { %v706_v30 = vsub.f32 1.5, %v705_v21  ;;  %v8279_v31 = vsub.f32 %v8154_v56, %v575_v22  ;;  %v8281_v32 = vadd.f32 1e-05, %v665_v26 }
 0x146   : > { %v8283_v33 = vpop.eup %7409  ;;  %v8293_v39 = vsub.f32 %v8157_v57, %v573_v29  ;;  %v727_v18 = vmul.f32 %v8252_v7, %v726_v5 }
 0x147   : > { %v707_v41 = vmul.f32 %v7408_v9, %v706_v30  ;;  %v713_v56 = vmul.f32 %v8283_v33, %v8258_v11  ;;  %7413 = vrsqrt.f32 %v8281_v32  ;;  %v607_v57 = vmul.f32 %v8279_v31, %v8279_v31  ;;  %v8329_v34 = vpop.eup %7411 }
 0x148   : > { %v605_v50 = vmul.f32 %v8293_v39, %v8293_v39  ;;  %vm719_vm9 = vweird.f32 %v8283_v33  ;;  %v733_v19 = vmul.f32 %v8329_v34, %v8265_v47  ;;  %v731_v30 = vsel %vm8362_vm13, %v8252_v7, %v727_v18 }
 0x149   : > { %v711_v46 = vsel %vm8287_vm7, %v7408_v9, %v707_v41  ;;  %v714_v48 = vmul.f32 %v8283_v33, %v713_v56  ;;  %v645_v54 = vsel %vm508_vm0, %v607_v57, 0.0  ;;  %vm8349_vm12 = vmor %vm718_vm8, %vm719_vm9  ;;  %v855_v45 = vmul.f32 %v731_v30, %v8120_v35 }
 0x14a   : > { %v547_v53 = vpop.xlane.xlu2 %546  ;;  %v8318_v55 = vpop.xlane.xlu0 %631  ;;  %v853_v59 = vmul.f32 %v711_v46, %v8122_v36  ;;  %646 = vadd.xlane.f32.xlu0 %v645_v54  ;;  %v639_v62 = vsel %vm508_vm0, %v605_v50, 0.0  ;;  %555 = vadd.xlane.f32.xlu1 %v554_v25  ;;  %v734_v37 = vmul.f32 %v8329_v34, %v733_v19  ;;  %vm748_vm14 = vweird.f32 %v8281_v32 }
 0x14b   : > { %v715_v60 = vmul.f32 0.5, %v714_v48  ;;  %v576_v61 = vmul.f32 %v8105_v20, %v547_v53  ;;  %v541_v1 = vpop.xlane.xlu1 %540  ;;  %640 = vadd.xlane.f32.xlu2 %v639_v62  ;;  %vm739_vm2 = vweird.f32 %v8329_v34 }
 0x14c   : > { %v574_v36 = vmul.f32 %v8105_v20, %v541_v1  ;;  %v873_v9 = vmul.f32 %v8305_v44, %v853_v59  ;;  %v735_v57 = vmul.f32 0.5, %v734_v37  ;;  %vm740_vm4 = vmor %vm738_vm1, %vm739_vm2 }
 0x14d   : > { %v8334_v10 = vpop.eup %7413  ;;  %v716_v12 = vsub.f32 1.5, %v715_v60  ;;  %v8337_v13 = vsub.f32 %v8169_v63, %v576_v61  ;;  %v892_v63 = vadd.f32 %v8327_v3, %v872_v2 }
 0x14e   : > { %v743_v14 = vmul.f32 %v8334_v10, %v8281_v32  ;;  %v8344_v15 = vsub.f32 %v8172_v0, %v574_v36  ;;  %v893_v51 = vadd.f32 %v8327_v3, %v873_v9  ;;  %v736_v53 = vsub.f32 1.5, %v735_v57 }
 0x14f   : > { %v717_v16 = vmul.f32 %v8283_v33, %v716_v12  ;;  %v608_v21 = vmul.f32 %v8337_v13, %v8337_v13  ;;  %vm749_vm15 = vweird.f32 %v8334_v10 }
 0x150   : > { %v606_v0 = vmul.f32 %v8344_v15, %v8344_v15  ;;  %v908_v22 = vpack.c.bf16 %v893_v51, %v892_v63  ;;  %v744_v24 = vmul.f32 %v8334_v10, %v743_v14  ;;  %vm750_vm3 = vmor %vm748_vm14, %vm749_vm15  ;;  %v737_v60 = vmul.f32 %v8329_v34, %v736_v53 }
 0x151   : > { %v721_v23 = vsel %vm8349_vm12, %v8283_v33, %v717_v16  ;;  %v648_v27 = vsel %vm508_vm0, %v608_v21, 0.0 }
 0x152   : > { %v642_v26 = vsel %vm508_vm0, %v606_v0, 0.0  ;;  %v550_v28 = vpop.xlane.xlu0 %549  ;;  %6914 = vmatmul.msk.bf16.vlgmr.msra.gmra.mxu0 %vm508_vm0, %v908_v22  ;;  %6922 = vmatmul.msk.bf16.vlgmr.msra.gmra.mxu1 %vm508_vm0, %v908_v22  ;;  %v854_v41 = vmul.f32 %v721_v23, %v8132_v42  ;;  %v745_v56 = vmul.f32 0.5, %v744_v24  ;;  %v741_v47 = vsel %vm740_vm4, %v8329_v34, %v737_v60 }
 0x153   : > { %v577_v29 = vmul.f32 %v8105_v20, %v550_v28  ;;  %643 = vadd.xlane.f32.xlu2 %v642_v26  ;;  %649 = vadd.xlane.f32.xlu1 %v648_v27  ;;  %v856_v2 = vmul.f32 %v741_v47, %v8124_v38  ;;  %v666_v34 = vmul.f32 %v8318_v55, %v8105_v20 }
 0x154   : > { %v874_v7 = vmul.f32 %v8305_v44, %v854_v41  ;;  %v746_v48 = vsub.f32 1.5, %v745_v56 }
 0x155   : > { %v8380_v33 = vsub.f32 %v8180_v4, %v577_v29  ;;  %v875_v4 = vmul.f32 %v8305_v44, %v855_v45  ;;  %v876_v36 = vmul.f32 %v8305_v44, %v856_v2  ;;  %v682_v14 = vadd.f32 1e-05, %v666_v34 }
 0x156   : > { %v894_v35 = vadd.f32 %v8327_v3, %v874_v7  ;;  %v747_v54 = vmul.f32 %v8334_v10, %v746_v48 }
 0x157   : > { %v609_v43 = vmul.f32 %v8380_v33, %v8380_v33  ;;  %v895_v59 = vadd.f32 %v8327_v3, %v875_v4  ;;  %v896_v12 = vadd.f32 %v8327_v3, %v876_v36  ;;  %7415 = vrsqrt.f32 %v682_v14 }
 0x158   : > { %v751_v62 = vsel %vm750_vm3, %v8334_v10, %v747_v54  ;;  %vm758_vm5 = vweird.f32 %v682_v14 }
 0x159   : > { %v651_v46 = vsel %vm508_vm0, %v609_v43, 0.0  ;;  %v909_v61 = vpack.c.bf16 %v895_v59, %v894_v35  ;;  %v857_v1 = vmul.f32 %v751_v62, %v8144_v49 }
 0x15a   : > { %v553_v50 = vpop.xlane.xlu0 %552 }
 0x15b   : > { %v578_v25 = vmul.f32 %v8105_v20, %v553_v50  ;;  %652 = vadd.xlane.f32.xlu2 %v651_v46  ;;  %v877_v5 = vmul.f32 %v8305_v44, %v857_v1 }
 0x15d   : > { %v8393_v42 = vsub.f32 %v8185_v6, %v578_v25  ;;  %v897_v9 = vadd.f32 %v8327_v3, %v877_v5  ;;  %v7416_v49 = vpop.eup %7415 }
 0x15e   : > { %v753_v38 = vmul.f32 %v7416_v49, %v682_v14  ;;  %vm759_vm6 = vweird.f32 %v7416_v49 }
 0x15f   : > { %v610_v32 = vmul.f32 %v8393_v42, %v8393_v42  ;;  %v910_v10 = vpack.c.bf16 %v897_v9, %v896_v12  ;;  %vm8420_vm7 = vmor %vm758_vm5, %vm759_vm6 }
 0x160   : > { %v754_v17 = vmul.f32 %v7416_v49, %v753_v38 }
 0x161   : > { %v654_v6 = vsel %vm508_vm0, %v610_v32, 0.0 }
 0x162   : > { %655 = vadd.xlane.f32.xlu0 %v654_v6  ;;  %6915 = vmatmul.msk.bf16.gmra.mxu0 %vm508_vm0, %v909_v61  ;;  %v755_v18 = vmul.f32 0.5, %v754_v17 }
 0x163   : > { %6923 = vmatmul.msk.bf16.gmra.mxu1 %vm508_vm0, %v909_v61 }
 0x164   : > { %v756_v19 = vsub.f32 1.5, %v755_v18 }
 0x166   : > { %v757_v55 = vmul.f32 %v7416_v49, %v756_v19 }
 0x168   : > { %v761_v28 = vsel %vm8420_vm7, %v7416_v49, %v757_v55 }
 0x169   : > { %v858_v7 = vmul.f32 %v761_v28, %v8159_v58 }
 0x16b   : > { %v878_v32 = vmul.f32 %v8305_v44, %v858_v7 }
 0x16d   : > { %v898_v2 = vadd.f32 %v8327_v3, %v878_v32 }
 0x172   : > { %6916 = vmatmul.msk.bf16.gmra.mxu0 %vm508_vm0, %v910_v10 }
 0x173   : > { %6924 = vmatmul.msk.bf16.gmra.mxu1 %vm508_vm0, %v910_v10 }
 0x1ad   : > { %v635_v16 = vpop.xlane.xlu1 %634 }
 0x1ae   : > { %v667_v63 = vmul.f32 %v635_v16, %v8105_v20 }
 0x1b0   : > { %v683_v51 = vadd.f32 1e-05, %v667_v63 }
 0x1b2   : > { %7417 = vrsqrt.f32 %v683_v51  ;;  %vm768_vm9 = vweird.f32 %v683_v51 }
 0x1b5   : > { %v638_v0 = vpop.xlane.xlu1 %637 }
 0x1b6   : > { %v668_v11 = vmul.f32 %v638_v0, %v8105_v20 }
 0x1b8   : > { %v7418_v21 = vpop.eup %7417  ;;  %v684_v23 = vadd.f32 1e-05, %v668_v11 }
 0x1b9   : > { %v763_v22 = vmul.f32 %v7418_v21, %v683_v51  ;;  %vm769_vm8 = vweird.f32 %v7418_v21 }
 0x1ba   : > { %7419 = vrsqrt.f32 %v684_v23  ;;  %vm770_vm10 = vmor %vm768_vm9, %vm769_vm8  ;;  %vm778_vm12 = vweird.f32 %v684_v23 }
 0x1bb   : > { %v764_v26 = vmul.f32 %v7418_v21, %v763_v22 }
 0x1bd   : > { %v765_v27 = vmul.f32 0.5, %v764_v26  ;;  %v647_v29 = vpop.xlane.xlu0 %646  ;;  %v556_v41 = vpop.xlane.xlu1 %555 }
 0x1be   : > { %v641_v37 = vpop.xlane.xlu2 %640  ;;  %v671_v56 = vmul.f32 %v647_v29, %v8105_v20  ;;  %v579_v45 = vmul.f32 %v8105_v20, %v556_v41 }
 0x1bf   : > { %v766_v30 = vsub.f32 1.5, %v765_v27  ;;  %v669_v43 = vmul.f32 %v641_v37, %v8105_v20 }
 0x1c0   : > { %v8429_v46 = vadd.f32 1e-05, %v671_v56  ;;  %v7420_v48 = vpop.eup %7419  ;;  %v8433_v25 = vsub.f32 %v8296_v40, %v579_v45 }
 0x1c1   : > { %v767_v57 = vmul.f32 %v7418_v21, %v766_v30  ;;  %v685_v50 = vadd.f32 1e-05, %v669_v43  ;;  %v773_v53 = vmul.f32 %v7420_v48, %v684_v23  ;;  %vm779_vm11 = vweird.f32 %v7420_v48 }
 0x1c2   : > { %7421 = vrsqrt.f32 %v8429_v46  ;;  %v611_v35 = vmul.f32 %v8433_v25, %v8433_v25  ;;  %vm8452_vm13 = vmor %vm778_vm12, %vm779_vm11  ;;  %vm808_vm4 = vweird.f32 %v8429_v46 }
 0x1c3   : > { %v771_v4 = vsel %vm770_vm10, %v7418_v21, %v767_v57  ;;  %7423 = vrsqrt.f32 %v685_v50  ;;  %v774_v54 = vmul.f32 %v7420_v48, %v773_v53  ;;  %vm788_vm14 = vweird.f32 %v685_v50 }
 0x1c4   : > { %v859_v59 = vmul.f32 %v771_v4, %v8244_v52  ;;  %v657_v58 = vsel %vm508_vm0, %v611_v35, 0.0 }
 0x1c5   : > { %v775_v60 = vmul.f32 0.5, %v774_v54  ;;  %658 = vadd.xlane.f32.xlu1 %v657_v58 }
 0x1c6   : > { %v644_v61 = vpop.xlane.xlu2 %643  ;;  %v650_v40 = vpop.xlane.xlu1 %649  ;;  %v879_v6 = vmul.f32 %v8305_v44, %v859_v59 }
 0x1c7   : > { %v670_v62 = vmul.f32 %v644_v61, %v8105_v20  ;;  %v776_v1 = vsub.f32 1.5, %v775_v60  ;;  %v672_v12 = vmul.f32 %v650_v40, %v8105_v20 }
 0x1c8   : > { %v8443_v47 = vpop.eup %7421  ;;  %v899_v5 = vadd.f32 %v8327_v3, %v879_v6 }
 0x1c9   : > { %v7424_v52 = vpop.eup %7423  ;;  %v803_v36 = vmul.f32 %v8443_v47, %v8429_v46  ;;  %v686_v9 = vadd.f32 1e-05, %v670_v62  ;;  %v777_v10 = vmul.f32 %v7420_v48, %v776_v1  ;;  %v8457_v17 = vadd.f32 1e-05, %v672_v12 }
 0x1ca   : > { %v783_v34 = vmul.f32 %v7424_v52, %v685_v50  ;;  %v911_v14 = vpack.c.bf16 %v899_v5, %v898_v2  ;;  %vm789_vm15 = vweird.f32 %v7424_v52  ;;  %vm809_vm5 = vweird.f32 %v8443_v47 }
 0x1cb   : > { %7425 = vrsqrt.f32 %v686_v9  ;;  %v804_v16 = vmul.f32 %v8443_v47, %v803_v36  ;;  %v781_v63 = vsel %vm8452_vm13, %v7420_v48, %v777_v10  ;;  %vm790_vm1 = vmor %vm788_vm14, %vm789_vm15  ;;  %vm798_vm2 = vweird.f32 %v686_v9 }
 0x1cc   : > { %v784_v49 = vmul.f32 %v7424_v52, %v783_v34  ;;  %6917 = vmatmul.msk.bf16.gmra.mxu0 %vm508_vm0, %v911_v14  ;;  %6925 = vmatmul.msk.bf16.gmra.mxu1 %vm508_vm0, %v911_v14  ;;  %7427 = vrsqrt.f32 %v8457_v17  ;;  %v860_v26 = vmul.f32 %v781_v63, %v8255_v8  ;;  %vm8498_vm7 = vmor %vm808_vm4, %vm809_vm5  ;;  %vm818_vm10 = vweird.f32 %v8457_v17 }
 0x1cd   : > { %v805_v23 = vmul.f32 0.5, %v804_v16  ;;  %vm1298_vm5 = vcmask 130048  }
 0x1ce   : > { %v785_v51 = vmul.f32 0.5, %v784_v49  ;;  %v653_v18 = vpop.xlane.xlu2 %652  ;;  %v880_v56 = vmul.f32 %v8305_v44, %v860_v26 }
 0x1cf   : > { %v673_v19 = vmul.f32 %v653_v18, %v8105_v20  ;;  %v997_v0 = vpop.f32.mrf.mxu0  ;;  %v1046_v21 = vpop.f32.mrf.mxu1  ;;  %v806_v37 = vsub.f32 1.5, %v805_v23 }
 0x1d0   : > { %v786_v11 = vsub.f32 1.5, %v785_v51  ;;  %v8462_v22 = vpack.c.bf16 %v1046_v21, %v997_v0  ;;  %v900_v35 = vadd.f32 %v8327_v3, %v880_v56 }
 0x1d1   : > { %v7426_v55 = vpop.eup %7425  ;;  %v8465_v24 = vadd.f32 1e-05, %v673_v19 }
 0x1d2   : > { %v787_v27 = vmul.f32 %v7424_v52, %v786_v11  ;;  %v793_v28 = vmul.f32 %v7426_v55, %v686_v9  ;;  %1182 = vrot.lane.b32.xlu0 %v8462_v22, %s7908_s14  ;;  %vm799_vm3 = vweird.f32 %v7426_v55  ;;  %v8473_v45 = vpop.eup %7427  ;;  %v1214_v59 = vrot.slane %v8462_v22, 4 }
 0x1d3   : > { %7429 = vrsqrt.f32 %v8465_v24  ;;  %vm8481_vm6 = vmor %vm798_vm2, %vm799_vm3  ;;  %v813_v58 = vmul.f32 %v8473_v45, %v8457_v17  ;;  %v1278_v9 = vunpack.c.l.b16 %v8462_v22  ;;  %vm828_vm8 = vweird.f32 %v8465_v24 }
 0x1d4   : > { %v791_v29 = vsel %vm790_vm1, %v7424_v52, %v787_v27  ;;  %v794_v30 = vmul.f32 %v7426_v55, %v793_v28  ;;  %v2651_v5 = vunpack.c.l.b16 %v1214_v59  ;;  %vm819_vm11 = vweird.f32 %v8473_v45 }
 0x1d5   : > { %v861_v41 = vmul.f32 %v791_v29, %v8293_v39  ;;  %v807_v39 = vmul.f32 %v8443_v47, %v806_v37  ;;  %v814_v36 = vmul.f32 %v8473_v45, %v813_v58  ;;  %vm820_vm13 = vmor %vm818_vm10, %vm819_vm11 }
 0x1d6   : > { %v795_v43 = vmul.f32 0.5, %v794_v30 }
 0x1d7   : > { %v999_v8 = vpop.f32.mrf.mxu0  ;;  %v1048_v57 = vpop.f32.mrf.mxu1  ;;  %v881_v7 = vmul.f32 %v8305_v44, %v861_v41  ;;  %v811_v46 = vsel %vm8498_vm7, %v8443_v47, %v807_v39  ;;  %v815_v63 = vmul.f32 0.5, %v814_v36  ;;  %vm3472_vm7 = vcmask 392192  }
 0x1d8   : > { %v796_v48 = vsub.f32 1.5, %v795_v43  ;;  %v1087_v50 = vpack.c.bf16 %v1048_v57, %v999_v8  ;;  %v863_v16 = vmul.f32 %v811_v46, %v8279_v31 }
 0x1d9   : > { %v8478_v4 = vpop.eup %7429  ;;  %v901_v54 = vadd.f32 %v8327_v3, %v881_v7  ;;  %v816_v19 = vsub.f32 1.5, %v815_v63 }
 0x1da   : > { %v797_v32 = vmul.f32 %v7426_v55, %v796_v48  ;;  %v823_v60 = vmul.f32 %v8478_v4, %v8465_v24  ;;  %1184 = vrot.lane.b32.xlu2 %v1087_v50, %s7908_s14  ;;  %1120 = vrot.lane.b32.xlu0 %v1087_v50, %s7909_s29  ;;  %v1215_v6 = vrot.slane %v1087_v50, 4  ;;  %v1279_v2 = vunpack.c.l.b16 %v1087_v50 }
 0x1db   : > { %v912_v40 = vpack.c.bf16 %v901_v54, %v900_v35  ;;  %vm829_vm9 = vweird.f32 %v8478_v4  ;;  %v817_v27 = vmul.f32 %v8473_v45, %v816_v19 }
 0x1dc   : > { %v801_v62 = vsel %vm8481_vm6, %v7426_v55, %v797_v32  ;;  %v824_v1 = vmul.f32 %v8478_v4, %v823_v60  ;;  %v2652_v52 = vunpack.c.l.b16 %v1215_v6  ;;  %v8517_v38 = vpack.c.b16 %v1279_v2, %v1278_v9  ;;  %vm8533_vm12 = vmor %vm828_vm8, %vm829_vm9  ;;  %v656_v2 = vpop.xlane.xlu0 %655 }
 0x1dd   : > { %6918 = vmatmul.msk.bf16.gmra.mxu0 %vm508_vm0, %v912_v40  ;;  %6926 = vmatmul.msk.bf16.gmra.mxu1 %vm508_vm0, %v912_v40  ;;  %v862_v34 = vmul.f32 %v801_v62, %v8344_v15  ;;  %v883_v15 = vmul.f32 %v8305_v44, %v863_v16  ;;  %v821_v41 = vsel %vm820_vm13, %v8473_v45, %v817_v27  ;;  %vm3455_vm6 = vcmask 261120  }
 0x1de   : > { %1118 = vrot.lane.b32.xlu1 %v8462_v22, %s7909_s29  ;;  %v8515_v14 = vpack.c.b16 %v2652_v52, %v2651_v5  ;;  %v825_v49 = vmul.f32 0.5, %v824_v1  ;;  %v864_v57 = vmul.f32 %v821_v41, %v8337_v13  ;;  %v674_v5 = vmul.f32 %v656_v2, %v8105_v20 }
 0x1df   : > { %v1002_v12 = vpop.f32.mrf.mxu0  ;;  %v882_v47 = vmul.f32 %v8305_v44, %v862_v34  ;;  %v903_v24 = vadd.f32 %v8327_v3, %v883_v15 }
 0x1e0   : > { %v1051_v10 = vpop.f32.mrf.mxu1  ;;  %v826_v51 = vsub.f32 1.5, %v825_v49  ;;  %v690_v52 = vadd.f32 1e-05, %v674_v5 }
 0x1e1   : > { %v1088_v18 = vpack.c.bf16 %v1051_v10, %v1002_v12  ;;  %v902_v21 = vadd.f32 %v8327_v3, %v882_v47 }
 0x1e2   : > { %1290 = vrot.lane.b32.xlu2 %v8517_v38, %s7910_s15  ;;  %1152 = vrot.lane.b32.xlu0 %v1087_v50, %s7911_s17  ;;  %v827_v11 = vmul.f32 %v8478_v4, %v826_v51  ;;  %v884_v50 = vmul.f32 %v8305_v44, %v864_v57  ;;  %7431 = vrsqrt.f32 %v690_v52  ;;  %vm838_vm14 = vweird.f32 %v690_v52 }
 0x1e3   : > { %v1216_v23 = vrot.slane %v1088_v18, 4  ;;  %v913_v28 = vpack.c.bf16 %v903_v24, %v902_v21  ;;  %v1280_v61 = vunpack.c.l.b16 %v1088_v18 }
 0x1e4   : > { %v831_v29 = vsel %vm8533_vm12, %v8478_v4, %v827_v11  ;;  %v904_v54 = vadd.f32 %v8327_v3, %v884_v50 }
 0x1e5   : > { %v2653_v30 = vunpack.c.l.b16 %v1216_v23  ;;  %v865_v8 = vmul.f32 %v831_v29, %v8380_v33 }
 0x1e6   : > { %1150 = vrot.lane.b32.xlu1 %v8462_v22, %s7911_s17 }
 0x1e7   : > { %v1004_v31 = vpop.f32.mrf.mxu0  ;;  %v885_v7 = vmul.f32 %v8305_v44, %v865_v8 }
 0x1e8   : > { %v1053_v0 = vpop.f32.mrf.mxu1  ;;  %v7432_v46 = vpop.eup %7431 }
 0x1e9   : > { %v1089_v55 = vpack.c.bf16 %v1053_v0, %v1004_v31  ;;  %v905_v39 = vadd.f32 %v8327_v3, %v885_v7  ;;  %v833_v36 = vmul.f32 %v7432_v46, %v690_v52  ;;  %vm839_vm15 = vweird.f32 %v7432_v46 }
 0x1ea   : > { %1186 = vrot.lane.b32.xlu2 %v1088_v18, %s7908_s14  ;;  %vm840_vm1 = vmor %vm838_vm14, %vm839_vm15 }
 0x1eb   : > { %1124 = vrot.lane.b32.xlu0 %v1089_v55, %s7909_s29  ;;  %v1217_v22 = vrot.slane %v1089_v55, 4  ;;  %v914_v33 = vpack.c.bf16 %v905_v39, %v904_v54  ;;  %v1281_v60 = vunpack.c.l.b16 %v1089_v55  ;;  %v834_v9 = vmul.f32 %v7432_v46, %v833_v36 }
 0x1ed   : > { %v2654_v37 = vunpack.c.l.b16 %v1217_v22  ;;  %6919 = vmatmul.msk.bf16.gmra.mxu0 %vm508_vm0, %v913_v28  ;;  %6927 = vmatmul.msk.bf16.gmra.mxu1 %vm508_vm0, %v913_v28  ;;  %v8568_v40 = vpack.c.b16 %v1281_v60, %v1280_v61  ;;  %v835_v49 = vmul.f32 0.5, %v834_v9 }
 0x1ee   : > { %1122 = vrot.lane.b32.xlu1 %v1088_v18, %s7909_s29 }
 0x1ef   : > { %v8549_v56 = vpack.c.b16 %v2654_v37, %v2653_v30  ;;  %v1007_v43 = vpop.f32.mrf.mxu0  ;;  %v836_v16 = vsub.f32 1.5, %v835_v49 }
 0x1f0   : > { %v1056_v17 = vpop.f32.mrf.mxu1 }
 0x1f1   : > { %v1090_v48 = vpack.c.bf16 %v1056_v17, %v1007_v43  ;;  %v837_v47 = vmul.f32 %v7432_v46, %v836_v16 }
 0x1f3   : > { %1156 = vrot.lane.b32.xlu0 %v1089_v55, %s7911_s17  ;;  %v1218_v35 = vrot.slane %v1090_v48, 4  ;;  %v1282_v62 = vunpack.c.l.b16 %v1090_v48  ;;  %v841_v15 = vsel %vm840_vm1, %v7432_v46, %v837_v47 }
 0x1f5   : > { %v2655_v59 = vunpack.c.l.b16 %v1218_v35 }
 0x1f6   : > { %1154 = vrot.lane.b32.xlu1 %v1088_v18, %s7911_s17 }
 0x1f7   : > { %v1009_v45 = vpop.f32.mrf.mxu0 }
 0x1f8   : > { %v1058_v4 = vpop.f32.mrf.mxu1 }
 0x1f9   : > { %v1091_v53 = vpack.c.bf16 %v1058_v4, %v1009_v45 }
 0x1fb   : > { %1160 = vrot.lane.b32.xlu2 %v1091_v53, %s7911_s17  ;;  %1158 = vrot.lane.b32.xlu0 %v1090_v48, %s7911_s17  ;;  %v1219_v13 = vrot.slane %v1091_v53, 4  ;;  %v1283_v6 = vunpack.c.l.b16 %v1091_v53 }
 0x1fd   : > { %v2656_v32 = vunpack.c.l.b16 %v1219_v13  ;;  %6920 = vmatmul.msk.bf16.gmra.mxu0 %vm508_vm0, %v914_v33  ;;  %6928 = vmatmul.msk.bf16.gmra.mxu1 %vm508_vm0, %v914_v33  ;;  %v8574_v1 = vpack.c.b16 %v1283_v6, %v1282_v62 }
 0x1fe   : > { %1188 = vrot.lane.b32.xlu1 %v1089_v55, %s7908_s14  ;;  %v866_v55 = vmul.f32 %v841_v15, %v8393_v42 }
 0x1ff   : > { %v8564_v58 = vpack.c.b16 %v2656_v32, %v2655_v59 }
 0x200   : > { %v886_v27 = vmul.f32 %v8305_v44, %v866_v55 }
 0x202   : > { %v906_v37 = vadd.f32 %v8327_v3, %v886_v27 }
 0x203   : > { %1128 = vrot.lane.b32.xlu0 %v1091_v53, %s7909_s29 }
 0x206   : > { %1292 = vrot.lane.b32.xlu1 %v8568_v40, %s7910_s15 }
 0x20b   : > { %1192 = vrot.lane.b32.xlu0 %v1091_v53, %s7908_s14 }
 0x20e   : > { %1126 = vrot.lane.b32.xlu1 %v1090_v48, %s7909_s29 }
 0x213   : > { %1294 = vrot.lane.b32.xlu0 %v8574_v1, %s7910_s15 }
 0x216   : > { %1190 = vrot.lane.b32.xlu1 %v1090_v48, %s7908_s14 }
 0x234   : > { %v8647_v16 = vpop.permute.xlu2 %1184 }
 0x235   : > { %13379 = vst [vmem:[#allocation23_spill] sm:$0xff] %v8647_v16 }
 0x238   : > { %v659_v12 = vpop.xlane.xlu1 %658 }
 0x239   : > { %v675_v10 = vmul.f32 %v659_v12, %v8105_v20 }
 0x23b   : > { %v691_v34 = vadd.f32 1e-05, %v675_v10 }
 0x23d   : > { %7433 = vrsqrt.f32 %v691_v34  ;;  %vm848_vm3 = vweird.f32 %v691_v34 }
 0x243   : > { %v7434_v63 = vpop.eup %7433 }
 0x244   : > { %v843_v51 = vmul.f32 %v7434_v63, %v691_v34  ;;  %vm849_vm2 = vweird.f32 %v7434_v63  ;;  %v8621_v60 = vpop.permute.xlu0 %1182 }
 0x245   : > { %vm850_vm4 = vmor %vm848_vm3, %vm849_vm2  ;;  %13376 = vst [vmem:[#allocation20_spill] sm:$0xff] %v8621_v60 }
 0x246   : > { %v844_v18 = vmul.f32 %v7434_v63, %v843_v51 }
 0x248   : > { %v845_v19 = vmul.f32 0.5, %v844_v18 }
 0x249   : > { %v1012_v31 = vpop.f32.mrf.mxu0  ;;  %v1061_v0 = vpop.f32.mrf.mxu1 }
 0x24a   : > { %v1092_v21 = vpack.c.bf16 %v1061_v0, %v1012_v31  ;;  %v846_v11 = vsub.f32 1.5, %v845_v19 }
 0x24c   : > { %1194 = vrot.lane.b32.xlu1 %v1092_v21, %s7908_s14  ;;  %1130 = vrot.lane.b32.xlu2 %v1092_v21, %s7909_s29  ;;  %v847_v23 = vmul.f32 %v7434_v63, %v846_v11  ;;  %v1220_v42 = vrot.slane %v1092_v21, 4  ;;  %v1284_v57 = vunpack.c.l.b16 %v1092_v21  ;;  %v8633_v46 = vpop.permute.xlu0 %1120 }
 0x24e   : > { %v851_v26 = vsel %vm850_vm4, %v7434_v63, %v847_v23 }
 0x24f   : > { %v867_v24 = vmul.f32 %v851_v26, %v8433_v25 }
 0x250   : > { %v8625_v61 = vpop.permute.xlu1 %1118 }
 0x251   : > { %v1014_v22 = vpop.f32.mrf.mxu0  ;;  %v1063_v28 = vpop.f32.mrf.mxu1  ;;  %v887_v29 = vmul.f32 %v8305_v44, %v867_v24  ;;  %v2657_v44 = vunpack.c.l.b16 %v1220_v42 }
 0x252   : > { %v1093_v30 = vpack.c.bf16 %v1063_v28, %v1014_v22 }
 0x253   : > { %v907_v41 = vadd.f32 %v8327_v3, %v887_v29 }
 0x254   : > { %1162 = vrot.lane.b32.xlu2 %v1092_v21, %s7911_s17  ;;  %1164 = vrot.lane.b32.xlu1 %v1093_v30, %s7911_s17  ;;  %v1221_v25 = vrot.slane %v1093_v30, 4  ;;  %v1285_v17 = vunpack.c.l.b16 %v1093_v30  ;;  %v8645_v49 = vpop.permute.xlu0 %1152  ;;  %v1291_v21 = vpop.permute.xlu2 %1290 }
 0x255   : > { %1132 = vrot.lane.b32.xlu0 %v1093_v30, %s7909_s29  ;;  %v915_v43 = vpack.c.bf16 %v907_v41, %v906_v37 }
 0x256   : > { %v2658_v8 = vunpack.c.l.b16 %v1221_v25  ;;  %v8596_v3 = vpack.c.b16 %v1285_v17, %v1284_v57 }
 0x257   : > { %6921 = vmatmul.msk.bf16.gmra.mxu0 %vm508_vm0, %v915_v43  ;;  %6929 = vmatmul.msk.bf16.gmra.mxu1 %vm508_vm0, %v915_v43 }
 0x258   : > { %v8594_v50 = vpack.c.b16 %v2658_v8, %v2657_v44  ;;  %v8637_v9 = vpop.permute.xlu1 %1150 }
 0x25a   : > { %v1017_v7 = vpop.f32.mrf.mxu0  ;;  %v1066_v48 = vpop.f32.mrf.mxu1  ;;  %2683 = vmatpush.bf16.msrb.mxu0 %v8594_v50 }
 0x25b   : > { %v8598_v45 = vpack.c.bf16 %v1066_v48, %v1017_v7 }
 0x25c   : > { %1296 = vrot.lane.b32.xlu2 %v8596_v3, %s7910_s15  ;;  %v8671_v23 = vpop.permute.xlu2 %1186 }
 0x25d   : > { %13373 = vst [vmem:[#allocation17_spill] sm:$0xff] %v8598_v45  ;;  %1134 = vrot.lane.b32.xlu1 %v8598_v45, %s7909_s29  ;;  %1196 = vrot.lane.b32.xlu0 %v1093_v30, %s7908_s14  ;;  %v1352_v35 = vunpack.c.l.b16 %v8598_v45  ;;  %v8663_v0 = vpop.permute.xlu0 %1124 }
 0x25e   : > { %2684 = vmatpush.bf16.msrb.mxu0 %v8564_v58  ;;  %13381 = vst [vmem:[#allocation25_spill] sm:$0xff] %v8671_v23 }
 0x260   : > { %v8651_v18 = vpop.permute.xlu1 %1122 }
 0x262   : > { %v1019_v4 = vpop.f32.mrf.mxu0  ;;  %v1068_v39 = vpop.f32.mrf.mxu1  ;;  %2685 = vmatpush.bf16.msrb.mxu0 %v8549_v56 }
 0x263   : > { %v8607_v53 = vpack.c.bf16 %v1068_v39, %v1019_v4 }
 0x264   : > { %v8675_v24 = vpop.permute.xlu2 %1160 }
 0x265   : > { %13374 = vst [vmem:[#allocation18_spill] sm:$0xff] %v8607_v53  ;;  %1136 = vrot.lane.b32.xlu0 %v8607_v53, %s7909_s29  ;;  %v1353_v54 = vunpack.c.l.b16 %v8607_v53  ;;  %v8669_v55 = vpop.permute.xlu0 %1156 }
 0x266   : > { %2686 = vmatpush.bf16.msrb.mxu0 %v8515_v14 }
 0x267   : > { %v8614_v13 = vpack.c.b16 %v1353_v54, %v1352_v35  ;;  %v1251_v35 = vrot.slane %v8675_v24, 4 }
 0x268   : > { %v8667_v11 = vpop.permute.xlu1 %1154 }
 0x269   : > { %1364 = vrot.lane.b32.xlu2 %v8614_v13, %s7910_s15 }
 0x26a   : > { %v1022_v33 = vpop.f32.mrf.mxu0  ;;  %v1071_v59 = vpop.f32.mrf.mxu1 }
 0x26b   : > { %v8619_v32 = vpack.c.bf16 %v1071_v59, %v1022_v33  ;;  %v1248_v59 = vrot.slane %v8667_v11, 4 }
 0x26d   : > { %13375 = vst [vmem:[#allocation19_spill] sm:$0xff] %v8619_v32  ;;  %1138 = vrot.lane.b32.xlu1 %v8619_v32, %s7909_s29  ;;  %v1354_v5 = vunpack.c.l.b16 %v8619_v32  ;;  %v8677_v27 = vpop.permute.xlu0 %1158 }
 0x26e   : > { %v1250_v4 = vrot.slane %v8677_v27, 4 }
 0x270   : > { %v8673_v26 = vpop.permute.xlu1 %1188 }
 0x271   : > { %13382 = vst [vmem:[#allocation26_spill] sm:$0xff] %v8673_v26 }
 0x272   : > { %v1024_v6 = vpop.f32.mrf.mxu0  ;;  %v1073_v62 = vpop.f32.mrf.mxu1 }
 0x273   : > { %v8627_v2 = vpack.c.bf16 %v1073_v62, %v1024_v6  ;;  %v2963_v6 = vunpack.c.l.b16 %v1250_v4 }
 0x275   : > { %13377 = vst [vmem:[#allocation21_spill] sm:$0xff] %v8627_v2  ;;  %1140 = vrot.lane.b32.xlu0 %v8627_v2, %s7909_s29  ;;  %v1355_v52 = vunpack.c.l.b16 %v8627_v2  ;;  %v8681_v29 = vpop.permute.xlu0 %1128 }
 0x277   : > { %v8635_v36 = vpack.c.b16 %v1355_v52, %v1354_v5  ;;  %v2964_v5 = vunpack.c.l.b16 %v1251_v35  ;;  %v1249_v52 = vrot.slane %v8669_v55, 4 }
 0x278   : > { %v1293_v22 = vpop.permute.xlu1 %1292 }
 0x279   : > { %1366 = vrot.lane.b32.xlu2 %v8635_v36, %s7910_s15  ;;  %v1315_v48 = vsel %vm1298_vm5, %v1293_v22, 0 }
 0x27a   : > { %v1027_v12 = vpop.f32.mrf.mxu0  ;;  %v1076_v10 = vpop.f32.mrf.mxu1 }
 0x27b   : > { %v8641_v34 = vpack.c.bf16 %v1076_v10, %v1027_v12  ;;  %v1312_v12 = vsel %vm1298_vm5, %v1291_v21, 0  ;;  %v1246_v10 = vrot.slane %v8637_v9, 4 }
 0x27d   : > { %13378 = vst [vmem:[#allocation22_spill] sm:$0xff] %v8641_v34  ;;  %1142 = vrot.lane.b32.xlu1 %v8641_v34, %s7909_s29  ;;  %v1356_v15 = vunpack.c.l.b16 %v8641_v34  ;;  %v8687_v41 = vpop.permute.xlu0 %1192  ;;  %v2959_v22 = vunpack.c.l.b16 %v1246_v10 }
 0x27e   : > { %13383 = vst [vmem:[#allocation27_spill] sm:$0xff] %v8687_v41 }
 0x280   : > { %v8683_v30 = vpop.permute.xlu1 %1126 }
 0x282   : > { %v1029_v63 = vpop.f32.mrf.mxu0  ;;  %v1078_v47 = vpop.f32.mrf.mxu1 }
 0x283   : > { %v8649_v51 = vpack.c.bf16 %v1078_v47, %v1029_v63  ;;  %v2961_v63 = vunpack.c.l.b16 %v1248_v59  ;;  %v2969_v47 = vpack.c.b16 %v2964_v5, %v2963_v6 }
 0x285   : > { %13380 = vst [vmem:[#allocation24_spill] sm:$0xff] %v8649_v51  ;;  %1206 = vrot.lane.b32.xlu1 %v8641_v34, %s7908_s14  ;;  %1144 = vrot.lane.b32.xlu0 %v8649_v51, %s7909_s29  ;;  %v1357_v19 = vunpack.c.l.b16 %v8649_v51  ;;  %v1295_v17 = vpop.permute.xlu0 %1294 }
 0x286   : > { %v1318_v8 = vsel %vm1298_vm5, %v1295_v17, 0 }
 0x287   : > { %v8659_v31 = vpack.c.b16 %v1357_v19, %v1356_v15  ;;  %v1247_v15 = vrot.slane %v8645_v49, 4  ;;  %v2962_v19 = vunpack.c.l.b16 %v1249_v52 }
 0x288   : > { %v8689_v42 = vpop.permute.xlu1 %1190 }
 0x289   : > { %1368 = vrot.lane.b32.xlu2 %v8659_v31, %s7910_s15  ;;  %13384 = vst [vmem:[#allocation28_spill] sm:$0xff] %v8689_v42 }
 0x28d   : > { %1208 = vrot.lane.b32.xlu0 %v8649_v51, %s7908_s14 }
 0x2a6   : > { %v8679_v28 = vpop.permute.xlu2 %1130 }
 0x2ae   : > { %v8685_v37 = vpop.permute.xlu2 %1162 }
 0x2af   : > { %v1252_v57 = vrot.slane %v8685_v37, 4 }
 0x2b1   : > { %v2965_v54 = vunpack.c.l.b16 %v1252_v57 }
 0x2b6   : > { %v1297_v43 = vpop.permute.xlu2 %1296 }
 0x2b7   : > { %v1321_v25 = vsel %vm1298_vm5, %v1297_v43, 0  ;;  %v2968_v43 = vpack.c.b16 %v2962_v19, %v2961_v63  ;;  %v1720_v19 = vunpack.c.l.b16 %v8673_v26 }
 0x2b8   : > { %1327 = vmatpush.bf16.xpose.msra.mxu2 %v1321_v25 }
 0x2be   : > { %v8692_v44 = vpop.permute.xlu1 %1194 }
 0x2bf   : > { %13385 = vst [vmem:[#allocation29_spill] sm:$0xff] %v8692_v44 }
 0x2c0   : > { %1328 = vmatpush.bf16.xpose.msra.mxu2 %v1318_v8  ;;  %v2960_v8 = vunpack.c.l.b16 %v1247_v15  ;;  %v1425_v15 = vunpack.c.l.b16 %v8625_v61 }
 0x2c2   : > { %v2967_v21 = vpack.c.b16 %v2960_v8, %v2959_v22  ;;  %v1571_v22 = vunpack.c.l.b16 %v8637_v9 }
 0x2c6   : > { %v8696_v7 = vpop.permute.xlu1 %1164 }
 0x2c7   : > { %v1253_v39 = vrot.slane %v8696_v7, 4 }
 0x2c8   : > { %1329 = vmatpush.bf16.xpose.msra.mxu2 %v1315_v48  ;;  %v8711_v48 = vpop.permute.xlu0 %1132 }
 0x2c9   : > { %v2966_v33 = vunpack.c.l.b16 %v1253_v39 }
 0x2cb   : > { %v2970_v62 = vpack.c.b16 %v2966_v33, %v2965_v54 }
 0x2cd   : > { %2991 = vmatpush.bf16.msra.mxu0 %v2970_v62  ;;  %v1717_v62 = vunpack.c.l.b16 %v8621_v60 }
 0x2cf   : > { %v8755_v9 = vpop.permute.xlu1 %1134 }
 0x2d0   : > { %1330 = vmatpush.bf16.xpose.msra.mxu2 %v1312_v12  ;;  %v1718_v12 = vunpack.c.l.b16 %v8647_v16  ;;  %v8724_v10 = vpop.permute.xlu0 %1196 }
 0x2d1   : > { %2992 = vmatpush.bf16.msra.mxu0 %v2969_v47  ;;  %13388 = vst [vmem:[#allocation32_spill] sm:$0xff] %v8724_v10 }
 0x2d2   : > { %v8728_v47 = vpack.c.b16 %v1718_v12, %v1717_v62  ;;  %v1724_v12 = vunpack.c.l.b16 %v8724_v10 }
 0x2d4   : > { %v1032_v25 = vpop.f32.mrf.mxu0  ;;  %v1081_v17 = vpop.f32.mrf.mxu1 }
 0x2d5   : > { %v1100_v57 = vpack.c.bf16 %v1081_v17, %v1032_v25  ;;  %2993 = vmatpush.bf16.msra.mxu0 %v2968_v43  ;;  %v1719_v43 = vunpack.c.l.b16 %v8671_v23  ;;  %v1426_v25 = vunpack.c.l.b16 %v8633_v46 }
 0x2d7   : > { %6930 = vmatmul.msk.bf16.vlgmr.msra.gmra.mxu2 %vm1298_vm5, %v8517_v38  ;;  %1210 = vrot.lane.b32.xlu2 %v1100_v57, %s7908_s14  ;;  %v1228_v54 = vrot.slane %v1100_v57, 4  ;;  %v1358_v5 = vunpack.c.l.b16 %v1100_v57  ;;  %v8743_v17 = vpack.c.b16 %v1720_v19, %v1719_v43  ;;  %v8745_v8 = vpack.c.b16 %v1426_v25, %v1425_v15 }
 0x2d8   : > { %1146 = vrot.lane.b32.xlu1 %v1100_v57, %s7909_s29  ;;  %v1575_v15 = vunpack.c.l.b16 %v8677_v27  ;;  %v1574_v19 = vunpack.c.l.b16 %v8669_v55  ;;  %v1429_v55 = vunpack.c.l.b16 %v8683_v30  ;;  %v1430_v27 = vunpack.c.l.b16 %v8681_v29 }
 0x2d9   : > { %2994 = vmatpush.bf16.msra.mxu0 %v2967_v21  ;;  %v8716_v59 = vunpack.c.l.b16 %v1228_v54 }
 0x2db   : > { %13386 = vst [vmem:[#allocation30_spill] sm:$0xff] %v8716_v59 }
 0x2dc   : > { %v1034_v4 = vpop.f32.mrf.mxu0  ;;  %v1083_v39 = vpop.f32.mrf.mxu1 }
 0x2dd   : > { %v1101_v35 = vpack.c.bf16 %v1083_v39, %v1034_v4  ;;  %v1721_v4 = vunpack.c.l.b16 %v8689_v42  ;;  %v1428_v39 = vunpack.c.l.b16 %v8663_v0 }
 0x2df   : > { %1178 = vrot.lane.b32.xlu2 %v1100_v57, %s7911_s17  ;;  %v1229_v33 = vrot.slane %v1101_v35, 4  ;;  %1148 = vrot.lane.b32.xlu0 %v1101_v35, %s7909_s29  ;;  %v1359_v38 = vunpack.c.l.b16 %v1101_v35  ;;  %v8747_v57 = vpop.permute.xlu0 %1136  ;;  %v8775_v62 = vpop.permute.xlu1 %1138  ;;  %s12293_s29 = scalar_lea.vmem [#allocation6], %s6880_s25  ;;  %s6783_s25 = scalar_lea.sflag [#allocation5], %s8079_s18 }
 0x2e0   : > { %1212 = vrot.lane.b32.xlu1 %v1101_v35, %s7908_s14  ;;  %s6796_s26 = sshll.u32 %s12293_s29, 4  ;;  %s6797_s26 = int_to_ptr.vmem [resolvable:$true] %s6796_s26 }
 0x2e1   : > { %v8718_v6 = vunpack.c.l.b16 %v1229_v33  ;;  %v8726_v63 = vpack.c.b16 %v1359_v38, %v1358_v5  ;;  %v1573_v5 = vunpack.c.l.b16 %v8667_v11 }
 0x2e3   : > { %13387 = vst [vmem:[#allocation31_spill] sm:$0xff] %v8718_v6  ;;  %v8785_v43 = vpack.c.b16 %v1574_v19, %v1573_v5  ;;  %v1432_v5 = vunpack.c.l.b16 %v8711_v48  ;;  %v1578_v19 = vunpack.c.l.b16 %v8696_v7 }
 0x2e7   : > { %6931 = vmatmul.msk.bf16.gmra.mxu2 %vm1298_vm5, %v8568_v40  ;;  %1370 = vrot.lane.b32.xlu2 %v8726_v63, %s7910_s15  ;;  %v1572_v40 = vunpack.c.l.b16 %v8645_v49  ;;  %v1427_v49 = vunpack.c.l.b16 %v8651_v18  ;;  %v8765_v33 = vpop.permute.xlu0 %1140 }
 0x2e8   : > { %1180 = vrot.lane.b32.xlu1 %v1101_v35, %s7911_s17  ;;  %1729 = vrot.lane.b32.xlu0 %v8728_v47, %s7910_s15  ;;  %v1722_v35 = vunpack.c.l.b16 %v8687_v41  ;;  %v1501_v7 = vunpack.c.l.b16 %v8765_v33 }
 0x2e9   : > { %v8749_v21 = vpack.c.b16 %v1572_v40, %v1571_v22  ;;  %v8763_v54 = vpack.c.b16 %v1428_v39, %v1427_v49  ;;  %v1576_v22 = vunpack.c.l.b16 %v8675_v24  ;;  %v8805_v39 = vpack.c.b16 %v1430_v27, %v1429_v55 }
 0x2ea   : > { %v8767_v38 = vpack.c.b16 %v1722_v35, %v1721_v4  ;;  %v1498_v27 = vunpack.c.l.b16 %v8755_v9 }
 0x2eb   : > { %v8791_v49 = vpack.c.b16 %v1576_v22, %v1575_v15 }
 0x2ef   : > { %1437 = vrot.lane.b32.xlu2 %v8745_v8, %s7910_s15  ;;  %v8797_v11 = vpop.permute.xlu1 %1142 }
 0x2f0   : > { %1731 = vrot.lane.b32.xlu1 %v8743_v17, %s7910_s15  ;;  %1583 = vrot.lane.b32.xlu0 %v8749_v21, %s7910_s15  ;;  %v1502_v4 = vunpack.c.l.b16 %v8797_v11 }
 0x2f7   : > { %6932 = vmatmul.msk.bf16.gmra.mxu2 %vm1298_vm5, %v8574_v1  ;;  %1439 = vrot.lane.b32.xlu2 %v8763_v54, %s7910_s15  ;;  %v1723_v1 = vunpack.c.l.b16 %v8692_v44  ;;  %v8789_v40 = vpop.permute.xlu0 %1144 }
 0x2f8   : > { %1204 = vrot.lane.b32.xlu1 %v8627_v2, %s7908_s14  ;;  %1733 = vrot.lane.b32.xlu0 %v8767_v38, %s7910_s15  ;;  %v1503_v24 = vunpack.c.l.b16 %v8789_v40 }
 0x2f9   : > { %v8787_v25 = vpack.c.b16 %v1724_v12, %v1723_v1  ;;  %v1431_v12 = vunpack.c.l.b16 %v8679_v28  ;;  %v1577_v1 = vunpack.c.l.b16 %v8685_v37  ;;  %v1500_v37 = vunpack.c.l.b16 %v8775_v62 }
 0x2fa   : > { %v8807_v35 = vpack.c.b16 %v1503_v24, %v1502_v4  ;;  %v1499_v24 = vunpack.c.l.b16 %v8747_v57 }
 0x2fb   : > { %v8817_v15 = vpack.c.b16 %v1432_v5, %v1431_v12  ;;  %v8829_v22 = vpack.c.b16 %v1578_v19, %v1577_v1  ;;  %v8841_v12 = vpack.c.b16 %v1501_v7, %v1500_v37 }
 0x2fc   : > { %v8835_v4 = vpack.c.b16 %v1499_v24, %v1498_v27  ;;  %v8853_v24 = vpop.permute.xlu1 %1206 }
 0x2ff   : > { %1585 = vrot.lane.b32.xlu2 %v8785_v43, %s7910_s15  ;;  %v8860_v20 = vpop.permute.xlu0 %1208 }
 0x300   : > { %1735 = vrot.lane.b32.xlu1 %v8787_v25, %s7910_s15  ;;  %1587 = vrot.lane.b32.xlu0 %v8791_v49, %s7910_s15 }
 0x307   : > { %6933 = vmatmul.msk.bf16.gmra.mxu2 %vm1298_vm5, %v8596_v3  ;;  %1441 = vrot.lane.b32.xlu2 %v8805_v39, %s7910_s15  ;;  %v1365_v3 = vpop.permute.xlu2 %1364 }
 0x308   : > { %1514 = vrot.lane.b32.xlu1 %v8807_v35, %s7910_s15 }
 0x30f   : > { %1443 = vrot.lane.b32.xlu2 %v8817_v15, %s7910_s15  ;;  %v1367_v55 = vpop.permute.xlu2 %1366 }
 0x310   : > { %1198 = vrot.lane.b32.xlu1 %v8598_v45, %s7908_s14  ;;  %v1388_v41 = vsel %vm1298_vm5, %v1367_v55, 0 }
 0x317   : > { %1202 = vrot.lane.b32.xlu2 %v8619_v32, %s7908_s14  ;;  %v1369_v5 = vpop.permute.xlu2 %1368 }
 0x318   : > { %1172 = vrot.lane.b32.xlu1 %v8627_v2, %s7911_s17  ;;  %v1391_v16 = vsel %vm1298_vm5, %v1369_v5, 0 }
 0x31f   : > { %1589 = vrot.lane.b32.xlu2 %v8829_v22, %s7910_s15 }
 0x327   : > { %1510 = vrot.lane.b32.xlu2 %v8835_v4, %s7910_s15 }
 0x32f   : > { %1512 = vrot.lane.b32.xlu2 %v8841_v12, %s7910_s15 }
 0x331   : > { %v8845_v19 = vpop.permute.xlu2 %1210 }
 0x337   : > { %1176 = vrot.lane.b32.xlu2 %v8649_v51, %s7911_s17 }
 0x339   : > { %v8849_v1 = vpop.permute.xlu2 %1178 }
 0x33f   : > { %1170 = vrot.lane.b32.xlu2 %v8619_v32, %s7911_s17 }
 0x341   : > { %v1371_v27 = vpop.permute.xlu2 %1370 }
 0x342   : > { %v1394_v52 = vsel %vm1298_vm5, %v1371_v27, 0 }
 0x343   : > { %1400 = vmatpush.bf16.xpose.msra.mxu3 %v1394_v52 }
 0x347   : > { %1168 = vrot.lane.b32.xlu2 %v8607_v53, %s7911_s17 }
 0x349   : > { %v1438_v37 = vpop.permute.xlu2 %1437 }
 0x34a   : > { %v8858_v7 = vpop.permute.xlu1 %1146 }
 0x34b   : > { %1401 = vmatpush.bf16.xpose.msra.mxu3 %v1391_v16  ;;  %v1504_v52 = vunpack.c.l.b16 %v8858_v7  ;;  %v1385_v16 = vsel %vm1298_vm5, %v1365_v3, 0 }
 0x351   : > { %v1440_v23 = vpop.permute.xlu2 %1439  ;;  %v8865_v26 = vpop.permute.xlu0 %1148 }
 0x352   : > { %v8863_v60 = vpop.permute.xlu1 %1212  ;;  %v1505_v27 = vunpack.c.l.b16 %v8865_v26 }
 0x353   : > { %1402 = vmatpush.bf16.xpose.msra.mxu3 %v1388_v41 }
 0x354   : > { %v8870_v44 = vpack.c.b16 %v1505_v27, %v1504_v52 }
 0x356   : > { %1516 = vrot.lane.b32.xlu0 %v8870_v44, %s7910_s15 }
 0x359   : > { %v1586_v42 = vpop.permute.xlu2 %1585 }
 0x35a   : > { %v8875_v5 = vpop.permute.xlu1 %1180  ;;  %v1730_v55 = vpop.permute.xlu0 %1729 }
 0x35b   : > { %1403 = vmatpush.bf16.xpose.msra.mxu3 %v1385_v16  ;;  %v1795_v16 = vunpack.c.l.b16 %v8860_v20 }
 0x35e   : > { %1174 = vrot.lane.b32.xlu0 %v8641_v34, %s7911_s17 }
 0x361   : > { %v1442_v10 = vpop.permute.xlu2 %1441 }
 0x362   : > { %6934 = vmatmul.msk.bf16.vlgmr.msra.gmra.mxu3 %vm1298_vm5, %v8614_v13  ;;  %v1732_v41 = vpop.permute.xlu1 %1731  ;;  %v1584_v32 = vpop.permute.xlu0 %1583 }
 0x366   : > { %1200 = vrot.lane.b32.xlu0 %v8607_v53, %s7908_s14 }
 0x369   : > { %v1444_v52 = vpop.permute.xlu2 %1443 }
 0x36a   : > { %v1467_v27 = vsel %vm1298_vm5, %v1444_v52, 0  ;;  %v8884_v3 = vpop.permute.xlu1 %1204  ;;  %v1464_v52 = vsel %vm1298_vm5, %v1442_v10, 0  ;;  %v1734_v2 = vpop.permute.xlu0 %1733 }
 0x36b   : > { %1473 = vmatpush.bf16.xpose.msrb.mxu2 %v1467_v27  ;;  %v1793_v13 = vunpack.c.l.b16 %v8884_v3  ;;  %v1794_v27 = vunpack.c.l.b16 %v8853_v24 }
 0x36e   : > { %1166 = vrot.lane.b32.xlu0 %v8598_v45, %s7911_s17  ;;  %v8899_v45 = vpack.c.b16 %v1795_v16, %v1794_v27  ;;  %v1458_v16 = vsel %vm1298_vm5, %v1438_v37, 0  ;;  %v1756_v37 = vsel %vm1298_vm5, %v1734_v2, 0 }
 0x371   : > { %v8889_v59 = vpop.permute.xlu2 %1202 }
 0x372   : > { %v1792_v6 = vunpack.c.l.b16 %v8889_v59  ;;  %6935 = vmatmul.msk.bf16.gmra.mxu3 %vm1298_vm5, %v8635_v36  ;;  %v1736_v34 = vpop.permute.xlu1 %1735  ;;  %v1461_v36 = vsel %vm1298_vm5, %v1440_v23, 0 }
 0x373   : > { %1474 = vmatpush.bf16.xpose.msrb.mxu2 %v1464_v52  ;;  %v1759_v27 = vsel %vm1298_vm5, %v1736_v34, 0 }
 0x374   : > { %v8897_v53 = vpack.c.b16 %v1793_v13, %v1792_v6  ;;  %v1588_v6 = vpop.permute.xlu0 %1587 }
 0x375   : > { %v8916_v52 = vsel %vm1298_vm5, %v1588_v6, 0  ;;  %v8938_v6 = vsel %vm1298_vm5, %v1584_v32, 0  ;;  %v1750_v32 = vsel %vm1298_vm5, %v1730_v55, 0  ;;  %v1236_v55 = vrot.slane %v8679_v28, 4 }
 0x376   : > { %1804 = vrot.lane.b32.xlu1 %v8897_v53, %s7910_s15  ;;  %1806 = vrot.lane.b32.xlu0 %v8899_v45, %s7910_s15  ;;  %v1233_v28 = vrot.slane %v8663_v0, 4 }
 0x379   : > { %v1590_v51 = vpop.permute.xlu2 %1589 }
 0x37a   : > { %v8907_v10 = vsel %vm1298_vm5, %v1590_v51, 0  ;;  %v8919_v23 = vpop.permute.xlu1 %1514 }
 0x37b   : > { %1475 = vmatpush.bf16.xpose.msrb.mxu2 %v1461_v36  ;;  %1619 = vmatpush.bf16.xpose.msrb.mxu1 %v8907_v10 }
 0x381   : > { %v8910_v13 = vpop.permute.xlu2 %1510 }
 0x382   : > { %6936 = vmatmul.msk.bf16.gmra.mxu3 %vm1298_vm5, %v8659_v31  ;;  %v8927_v31 = vsel %vm1298_vm5, %v1586_v42, 0  ;;  %v8931_v34 = vpop.permute.xlu1 %1198  ;;  %v1753_v42 = vsel %vm1298_vm5, %v1732_v41, 0  ;;  %v8956_v41 = vpop.f32.mrf.mxu2 }
 0x383   : > { %1476 = vmatpush.bf16.xpose.msrb.mxu2 %v1458_v16  ;;  %1620 = vmatpush.bf16.xpose.msrb.mxu1 %v8916_v52 }
 0x389   : > { %v8922_v51 = vpop.permute.xlu2 %1512 }
 0x38a   : > { %6938 = vmatmul.msk.bf16.vlgmr.msrb.gmra.mxu2 %vm1298_vm5, %v8745_v8  ;;  %v8942_v8 = vpop.permute.xlu1 %1172 }
 0x38b   : > { %1765 = vmatpush.bf16.xpose.msra.mxu2 %v1759_v27  ;;  %1621 = vmatpush.bf16.xpose.msrb.mxu1 %v8927_v31  ;;  %v1647_v2 = vunpack.c.l.b16 %v8942_v8 }
 0x391   : > { %v8933_v36 = vpop.permute.xlu2 %1176 }
 0x392   : > { %6937 = vmatmul.msk.bf16.gmra.mxu3 %vm1298_vm5, %v8726_v63 }
 0x393   : > { %1766 = vmatpush.bf16.xpose.msra.mxu2 %v1756_v37  ;;  %1622 = vmatpush.bf16.xpose.msrb.mxu1 %v8938_v6  ;;  %v1797_v37 = vunpack.c.l.b16 %v8863_v60 }
 0x399   : > { %v8944_v16 = vpop.permute.xlu2 %1170 }
 0x39a   : > { %v1646_v27 = vunpack.c.l.b16 %v8944_v16  ;;  %6939 = vmatmul.msk.bf16.gmra.mxu2 %vm1298_vm5, %v8763_v54  ;;  %6946 = vmatmul.msk.bf16.vlgmr.msrb.gmra.mxu1 %vm1298_vm5, %v8749_v21  ;;  %v1796_v54 = vunpack.c.l.b16 %v8845_v19  ;;  %v8968_v21 = vpop.f32.mrf.mxu2 }
 0x39b   : > { %1767 = vmatpush.bf16.xpose.msra.mxu2 %v1753_v42 }
 0x39c   : > { %v8953_v63 = vpack.c.b16 %v1647_v2, %v1646_v27  ;;  %v8963_v42 = vpack.c.b16 %v1797_v37, %v1796_v54  ;;  %v1234_v2 = vrot.slane %v8683_v30, 4  ;;  %v1230_v30 = vrot.slane %v8625_v61, 4 }
 0x39e   : > { %1658 = vrot.lane.b32.xlu1 %v8953_v63, %s7910_s15  ;;  %13389 = vst [vmem:[#allocation33_spill] sm:$0xff] %v8963_v42  ;;  %v2809_v37 = vunpack.c.l.b16 %v1234_v2  ;;  %v1866_v2 = vsel %vm508_vm0, %v8968_v21, -inf }
 0x3a3   : > { %1768 = vmatpush.bf16.xpose.msra.mxu2 %v1750_v32  ;;  %v2811_v32 = vunpack.c.l.b16 %v1236_v55  ;;  %v1231_v55 = vrot.slane %v8633_v46, 4 }
 0x3a5   : > { %v2806_v46 = vunpack.c.l.b16 %v1231_v55 }
 0x3a6   : > { %1808 = vrot.lane.b32.xlu1 %v8963_v42, %s7910_s15 }
 0x3aa   : > { %6940 = vmatmul.msk.bf16.gmra.mxu2 %vm1298_vm5, %v8805_v39  ;;  %6947 = vmatmul.msk.bf16.gmra.mxu1 %vm1298_vm5, %v8785_v43  ;;  %v1235_v39 = vrot.slane %v8681_v29, 4  ;;  %v1232_v43 = vrot.slane %v8651_v18, 4  ;;  %v2808_v18 = vunpack.c.l.b16 %v1233_v28  ;;  %v1790_v28 = vunpack.c.l.b16 %v8931_v34 }
 0x3ab   : > { %7212 = vmatpush.bf16.msrb.mxu2 %v8594_v50 }
 0x3af   : > { %7213 = vmatpush.bf16.msrb.mxu2 %v8564_v58  ;;  %v8975_v58 = vpop.f32.mrf.mxu2 }
 0x3b3   : > { %7214 = vmatpush.bf16.msrb.mxu2 %v8549_v56  ;;  %v1237_v56 = vrot.slane %v8711_v48, 4  ;;  %v2810_v48 = vunpack.c.l.b16 %v1235_v39  ;;  %v1649_v39 = vunpack.c.l.b16 %v8933_v36 }
 0x3b5   : > { %v2815_v29 = vpack.c.b16 %v2810_v48, %v2809_v37 }
 0x3b7   : > { %7215 = vmatpush.bf16.msrb.mxu2 %v8515_v14  ;;  %v8979_v50 = vpop.f32.mrf.mxu2  ;;  %v2812_v14 = vunpack.c.l.b16 %v1237_v56  ;;  %v2807_v56 = vunpack.c.l.b16 %v1232_v43 }
 0x3b9   : > { %v2816_v54 = vpack.c.b16 %v2812_v14, %v2811_v32  ;;  %v2814_v0 = vpack.c.b16 %v2808_v18, %v2807_v56  ;;  %v1537_v32 = vsel %vm1298_vm5, %v8919_v23, 0  ;;  %v1651_v18 = vunpack.c.l.b16 %v8875_v5 }
 0x3ba   : > { %6941 = vmatmul.msk.bf16.gmra.mxu2 %vm1298_vm5, %v8817_v15 }
 0x3bf   : > { %v8984_v27 = vpop.f32.mrf.mxu2 }
 0x3c8   : > { %v1517_v42 = vpop.permute.xlu0 %1516 }
 0x3c9   : > { %v1540_v15 = vsel %vm1298_vm5, %v1517_v42, 0  ;;  %v8996_v42 = vpop.f32.mrf.mxu2 }
 0x3ca   : > { %6954 = vmatmul.msk.bf16.vlgmr.msra.gmra.mxu2 %vm1298_vm5, %v8728_v47  ;;  %1546 = vmatpush.bf16.xpose.msrb.mxu3 %v1540_v15  ;;  %v2805_v47 = vunpack.c.l.b16 %v1230_v30  ;;  %v1534_v30 = vsel %vm1298_vm5, %v8922_v51, 0  ;;  %v1878_v55 = vsel %vm508_vm0, %v8996_v42, -inf  ;;  %v1650_v51 = vunpack.c.l.b16 %v8849_v1 }
 0x3cb   : > { %2837 = vmatpush.bf16.msra.mxu2 %v2816_v54  ;;  %v1872_v54 = vsel %vm508_vm0, %v8979_v50, -inf }
 0x3cc   : > { %v2813_v37 = vpack.c.b16 %v2806_v46, %v2805_v47 }
 0x3cf   : > { %2838 = vmatpush.bf16.msra.mxu2 %v2815_v29  ;;  %v9024_v29 = vpop.permute.xlu2 %1168 }
 0x3d0   : > { %1867 = vmax.xlane.f32.xlu1 %v1866_v2  ;;  %v8998_v14 = vpop.permute.xlu0 %1174 }
 0x3d1   : > { %v1648_v61 = vunpack.c.l.b16 %v8998_v14  ;;  %v9013_v48 = vpop.f32.mrf.mxu2 }
 0x3d2   : > { %1547 = vmatpush.bf16.xpose.msrb.mxu3 %v1537_v32 }
 0x3d3   : > { %2839 = vmatpush.bf16.msra.mxu2 %v2814_v0  ;;  %v9004_v43 = vpack.c.b16 %v1649_v39, %v1648_v61  ;;  %v1531_v0 = vsel %vm1298_vm5, %v8910_v13, 0  ;;  %v9039_v61 = vpack.c.b16 %v1651_v18, %v1650_v51 }
 0x3d5   : > { %1660 = vrot.lane.b32.xlu0 %v9004_v43, %s7910_s15 }
 0x3d7   : > { %2840 = vmatpush.bf16.msra.mxu2 %v2813_v37 }
 0x3d8   : > { %1873 = vmax.xlane.f32.xlu1 %v1872_v54  ;;  %v9010_v15 = vpop.permute.xlu0 %1200 }
 0x3d9   : > { %v1791_v23 = vunpack.c.l.b16 %v9010_v15  ;;  %v9036_v39 = vpop.f32.mrf.mxu2 }
 0x3da   : > { %6955 = vmatmul.msk.bf16.gmra.mxu2 %vm1298_vm5, %v8743_v17  ;;  %1548 = vmatpush.bf16.xpose.msrb.mxu3 %v1534_v30  ;;  %v1645_v17 = vunpack.c.l.b16 %v9024_v29  ;;  %v1884_v13 = vsel %vm508_vm0, %v9036_v39, -inf }
 0x3db   : > { %v9020_v56 = vpack.c.b16 %v1791_v23, %v1790_v28 }
 0x3dd   : > { %1802 = vrot.lane.b32.xlu2 %v9020_v56, %s7910_s15 }
 0x3e0   : > { %1879 = vmax.xlane.f32.xlu1 %v1878_v55  ;;  %v9029_v2 = vpop.permute.xlu0 %1166 }
 0x3e1   : > { %v1644_v47 = vunpack.c.l.b16 %v9029_v2 }
 0x3e2   : > { %1549 = vmatpush.bf16.xpose.msrb.mxu3 %v1531_v0 }
 0x3e3   : > { %v9041_v32 = vpack.c.b16 %v1645_v17, %v1644_v47  ;;  %v1875_v17 = vsel %vm508_vm0, %v8984_v27, -inf }
 0x3e5   : > { %v9043_v46 = vpop.f32.mrf.mxu3  ;;  %1662 = vrot.lane.b32.xlu2 %v9039_v61, %s7910_s15  ;;  %1656 = vrot.lane.b32.xlu0 %v9041_v32, %s7910_s15 }
 0x3e8   : > { %1885 = vmax.xlane.f32.xlu1 %v1884_v13  ;;  %v1805_v54 = vpop.permute.xlu1 %1804  ;;  %v1807_v47 = vpop.permute.xlu0 %1806 }
 0x3e9   : > { %6942 = vmatmul.msk.bf16.vlgmr.msrb.gmra.mxu3 %vm1298_vm5, %v8835_v4 }
 0x3ea   : > { %7208 = vmatpush.bf16.xpose.msra.mxu3 %v8907_v10  ;;  %6956 = vmatmul.msk.bf16.gmra.mxu2 %vm1298_vm5, %v8767_v38 }
 0x3ed   : > { %v9056_v10 = vpop.f32.mrf.mxu3 }
 0x3f2   : > { %7209 = vmatpush.bf16.xpose.msra.mxu3 %v8916_v52  ;;  %v1863_v52 = vsel %vm508_vm0, %v8956_v41, -inf }
 0x3f5   : > { %v9059_v37 = vpop.f32.mrf.mxu3 }
 0x3f9   : > { %6943 = vmatmul.msk.bf16.gmra.mxu3 %vm1298_vm5, %v8841_v12  ;;  %v1887_v12 = vsel %vm508_vm0, %v9043_v46, -inf }
 0x3fa   : > { %7210 = vmatpush.bf16.xpose.msra.mxu3 %v8927_v31  ;;  %6957 = vmatmul.msk.bf16.gmra.mxu2 %vm1298_vm5, %v8787_v25 }
 0x3fd   : > { %v9066_v4 = vpop.f32.mrf.mxu3 }
 0x402   : > { %7211 = vmatpush.bf16.xpose.msra.mxu3 %v8938_v6  ;;  %v1869_v6 = vsel %vm508_vm0, %v8975_v58, -inf }
 0x405   : > { %v9068_v38 = vpop.f32.mrf.mxu3 }
 0x406   : > { %v1899_v13 = vsel %vm508_vm0, %v9068_v38, -inf }
 0x409   : > { %6944 = vmatmul.msk.bf16.gmra.mxu3 %vm1298_vm5, %v8807_v35  ;;  %v1893_v35 = vsel %vm508_vm0, %v9059_v37, -inf }
 0x40d   : > { %v9078_v25 = vpop.f32.mrf.mxu3  ;;  %v9086_v23 = vpop.f32.mrf.mxu2 }
 0x40e   : > { %1864 = vmax.xlane.f32.xlu2 %v1863_v52 }
 0x40f   : > { %1888 = vmax.xlane.f32.xlu0 %v1887_v12 }
 0x410   : > { %v9076_v31 = vpop.permute.xlu1 %1658 }
 0x415   : > { %v9093_v51 = vpop.f32.mrf.mxu3  ;;  %v9103_v12 = vpop.f32.mrf.mxu2 }
 0x416   : > { %1870 = vmax.xlane.f32.xlu2 %v1869_v6  ;;  %13390 = vst [vmem:[#allocation34_spill] sm:$0xff] %v9093_v51  ;;  %v1905_v52 = vsel %vm508_vm0, %v9093_v51, -inf  ;;  %v1881_v6 = vsel %vm508_vm0, %v9013_v48, -inf  ;;  %v1241_v51 = vrot.slane %v8765_v33, 4 }
 0x417   : > { %v9082_v28 = vpop.f32.mrf.mxu1  ;;  %1894 = vmax.xlane.f32.xlu0 %v1893_v35 }
 0x418   : > { %v1809_v30 = vpop.permute.xlu1 %1808  ;;  %v1959_v55 = vsel %vm508_vm0, %v9082_v28, -inf }
 0x419   : > { %v1832_v18 = vsel %vm1298_vm5, %v1809_v30, 0  ;;  %1960 = vmax.xlane.f32.xlu1 %v1959_v55  ;;  %6945 = vmatmul.msk.bf16.gmra.mxu3 %vm1298_vm5, %v8870_v44  ;;  %v1829_v44 = vsel %vm1298_vm5, %v1807_v47, 0  ;;  %v1911_v30 = vsel %vm508_vm0, %v9086_v23, -inf  ;;  %v1890_v47 = vsel %vm508_vm0, %v9056_v10, -inf }
 0x41a   : > { %1838 = vmatpush.bf16.xpose.msrb.mxu3 %v1832_v18  ;;  %v1826_v18 = vsel %vm1298_vm5, %v1805_v54, 0 }
 0x41d   : > { %v9127_v54 = vpop.f32.mrf.mxu3 }
 0x41e   : > { %1876 = vmax.xlane.f32.xlu2 %v1875_v17  ;;  %v9117_v17 = vpop.f32.mrf.mxu2 }
 0x41f   : > { %v9097_v0 = vpop.f32.mrf.mxu1  ;;  %1900 = vmax.xlane.f32.xlu0 %v1899_v13  ;;  %13392 = vst [vmem:[#allocation36_spill] sm:$0xff] %v9117_v17 }
 0x420   : > { %v1962_v13 = vsel %vm508_vm0, %v9097_v0, -inf }
 0x421   : > { %1906 = vmax.xlane.f32.xlu1 %v1905_v52  ;;  %v1917_v52 = vsel %vm508_vm0, %v9117_v17, -inf }
 0x422   : > { %1839 = vmatpush.bf16.xpose.msrb.mxu3 %v1829_v44  ;;  %v1245_v44 = vrot.slane %v8865_v26, 4 }
 0x426   : > { %1882 = vmax.xlane.f32.xlu2 %v1881_v6  ;;  %v1243_v6 = vrot.slane %v8789_v40, 4 }
 0x427   : > { %v9108_v35 = vpop.f32.mrf.mxu1  ;;  %1912 = vmax.xlane.f32.xlu0 %v1911_v30  ;;  %v2889_v30 = vunpack.c.l.b16 %v1245_v44 }
 0x428   : > { %13391 = vst [vmem:[#allocation35_spill] sm:$0xff] %v9108_v35  ;;  %v1965_v55 = vsel %vm508_vm0, %v9108_v35, -inf  ;;  %v2887_v40 = vunpack.c.l.b16 %v1243_v6 }
 0x429   : > { %1966 = vmax.xlane.f32.xlu1 %v1965_v55  ;;  %6948 = vmatmul.msk.bf16.vlgmr.msra.gmra.mxu3 %vm1298_vm5, %v8791_v49  ;;  %v1244_v49 = vrot.slane %v8858_v7, 4  ;;  %v9130_v55 = vpop.f32.mrf.mxu2 }
 0x42a   : > { %1840 = vmatpush.bf16.xpose.msrb.mxu3 %v1826_v18  ;;  %v1896_v18 = vsel %vm508_vm0, %v9066_v4, -inf }
 0x42e   : > { %1891 = vmax.xlane.f32.xlu2 %v1890_v47  ;;  %v1908_v47 = vsel %vm508_vm0, %v9127_v54, -inf }
 0x42f   : > { %1963 = vmax.xlane.f32.xlu0 %v1962_v13  ;;  %v1242_v13 = vrot.slane %v8797_v11, 4  ;;  %v9142_v35 = vpop.f32.mrf.mxu1  ;;  %v1239_v11 = vrot.slane %v8747_v57, 4 }
 0x430   : > { %v1968_v33 = vsel %vm508_vm0, %v9142_v35, -inf }
 0x431   : > { %1918 = vmax.xlane.f32.xlu1 %v1917_v52  ;;  %v2888_v52 = vunpack.c.l.b16 %v1244_v49  ;;  %v2886_v17 = vunpack.c.l.b16 %v1242_v13  ;;  %v2885_v49 = vunpack.c.l.b16 %v1241_v51  ;;  %v1277_v13 = vrot.slane %v8863_v60, 4 }
 0x432   : > { %v2883_v51 = vunpack.c.l.b16 %v1239_v11 }
 0x433   : > { %v2893_v44 = vpack.c.b16 %v2889_v30, %v2888_v52  ;;  %v9150_v30 = vpop.f32.mrf.mxu2 }
 0x436   : > { %1897 = vmax.xlane.f32.xlu2 %v1896_v18  ;;  %v1240_v18 = vrot.slane %v8775_v62, 4 }
 0x437   : > { %v1803_v26 = vpop.permute.xlu2 %1802  ;;  %1909 = vmax.xlane.f32.xlu0 %v1908_v47  ;;  %v1902_v47 = vsel %vm508_vm0, %v9078_v25, -inf }
 0x438   : > { %v1823_v7 = vsel %vm1298_vm5, %v1803_v26, 0  ;;  %v2892_v26 = vpack.c.b16 %v2887_v40, %v2886_v17  ;;  %v2884_v6 = vunpack.c.l.b16 %v1240_v18  ;;  %v1276_v17 = vrot.slane %v8845_v19, 4 }
 0x439   : > { %6949 = vmatmul.msk.bf16.gmra.mxu3 %vm1298_vm5, %v8829_v22  ;;  %v1238_v22 = vrot.slane %v8755_v9, 4  ;;  %v3197_v18 = vunpack.c.l.b16 %v1277_v13  ;;  %v1920_v19 = vsel %vm508_vm0, %v9130_v55, -inf  ;;  %v1273_v13 = vrot.slane %v8884_v3, 4 }
 0x43a   : > { %1841 = vmatpush.bf16.xpose.msrb.mxu3 %v1823_v7  ;;  %v2891_v52 = vpack.c.b16 %v2885_v49, %v2884_v6  ;;  %v3196_v11 = vunpack.c.l.b16 %v1276_v17  ;;  %v1271_v17 = vrot.slane %v9010_v15, 4  ;;  %v1680_v15 = vsel %vm1298_vm5, %v9076_v31, 0 }
 0x43b   : > { %v2882_v40 = vunpack.c.l.b16 %v1238_v22 }
 0x43c   : > { %v3201_v22 = vpack.c.b16 %v3197_v18, %v3196_v11  ;;  %v13393_v11 = vld [vmem:[#allocation24_spill] sm:$0xff] }
 0x43d   : > { %v2890_v60 = vpack.c.b16 %v2883_v51, %v2882_v40 }
 0x43e   : > { %1903 = vmax.xlane.f32.xlu2 %v1902_v47 }
 0x43f   : > { %v1663_v62 = vpop.permute.xlu2 %1662  ;;  %1969 = vmax.xlane.f32.xlu0 %v1968_v33  ;;  %v1274_v33 = vrot.slane %v8853_v24, 4 }
 0x440   : > { %v1686_v57 = vsel %vm1298_vm5, %v1663_v62, 0  ;;  %v9164_v62 = vpop.f32.mrf.mxu2 }
 0x441   : > { %1692 = vmatpush.bf16.xpose.msra.mxu1 %v1686_v57  ;;  %v3194_v24 = vunpack.c.l.b16 %v1274_v33 }
 0x442   : > { %2914 = vmatpush.bf16.msra.mxu3 %v2893_v44  ;;  %v1275_v44 = vrot.slane %v8860_v20, 4  ;;  %v1272_v20 = vrot.slane %v8889_v59, 4 }
 0x443   : > { %v1868_v7 = vpop.xlane.xlu1 %1867 }
 0x444   : > { %v2056_v9 = vsub.f32 %v8968_v21, %v1868_v7  ;;  %v3195_v21 = vunpack.c.l.b16 %v1275_v44  ;;  %v1270_v44 = vrot.slane %v8931_v34, 4 }
 0x446   : > { %2915 = vmatpush.bf16.msra.mxu3 %v2892_v26  ;;  %v2121_v47 = vmul.f32 1.442695, %v2056_v9  ;;  %v1914_v26 = vsel %vm508_vm0, %v9103_v12, -inf  ;;  %v3200_v7 = vpack.c.b16 %v3195_v21, %v3194_v24  ;;  %v3193_v9 = vunpack.c.l.b16 %v1273_v13 }
 0x447   : > { %1915 = vmax.xlane.f32.xlu2 %v1914_v26  ;;  %1921 = vmax.xlane.f32.xlu0 %v1920_v19  ;;  %v1661_v49 = vpop.permute.xlu0 %1660  ;;  %v1227_v19 = vrot.slane %v13393_v11, 4  ;;  %v1260_v11 = vrot.slane %v8849_v1, 4  ;;  %v1256_v1 = vrot.slane %v8944_v16, 4 }
 0x448   : > { %7435 = vpow2.f32 %v2121_v47  ;;  %v1683_v6 = vsel %vm1298_vm5, %v1661_v49, 0  ;;  %v3190_v47 = vunpack.c.l.b16 %v1270_v44  ;;  %v9180_v34 = vpop.f32.mrf.mxu2 }
 0x449   : > { %1693 = vmatpush.bf16.xpose.msra.mxu1 %v1683_v6  ;;  %6958 = vmatmul.msk.bf16.vlgmr.msrb.gmra.mxu3 %vm1298_vm5, %v9020_v56  ;;  %v1923_v56 = vsel %vm508_vm0, %v9150_v30, -inf  ;;  %v2733_v13 = vunpack.c.l.b16 %v1227_v19 }
 0x44a   : > { %2916 = vmatpush.bf16.msra.mxu3 %v2891_v52  ;;  %v3192_v52 = vunpack.c.l.b16 %v1272_v20  ;;  %v13394_v20 = vld [vmem:[#allocation22_spill] sm:$0xff] }
 0x44b   : > { %v1874_v57 = vpop.xlane.xlu1 %1873  ;;  %v1226_v6 = vrot.slane %v13394_v20, 4 }
 0x44c   : > { %v2058_v51 = vsub.f32 %v8979_v50, %v1874_v57  ;;  %v3191_v50 = vunpack.c.l.b16 %v1271_v17  ;;  %v3199_v18 = vpack.c.b16 %v3193_v9, %v3192_v52  ;;  %v13395_v57 = vld [vmem:[#allocation21_spill] sm:$0xff]  ;;  %v13396_v52 = vld [vmem:[#allocation31_spill] sm:$0xff]  ;;  %v13397_v17 = vld [vmem:[#allocation30_spill] sm:$0xff] }
 0x44d   : > { %v13399_v9 = vld [vmem:[#allocation19_spill] sm:$0xff] }
 0x44e   : > { %2917 = vmatpush.bf16.msra.mxu3 %v2890_v60  ;;  %v9171_v59 = vpop.eup %7435  ;;  %v2125_v40 = vmul.f32 1.442695, %v2058_v51  ;;  %v3198_v33 = vpack.c.b16 %v3191_v50, %v3190_v47  ;;  %v1225_v51 = vrot.slane %v13395_v57, 4  ;;  %v1224_v44 = vrot.slane %v13399_v9, 4  ;;  %v13400_v50 = vld [vmem:[#allocation18_spill] sm:$0xff] }
 0x44f   : > { %v2250_v3 = vsel %vm508_vm0, %v9171_v59, 0.0  ;;  %1924 = vmax.xlane.f32.xlu0 %v1923_v56  ;;  %v1261_v47 = vrot.slane %v8875_v5, 4  ;;  %v1255_v9 = vrot.slane %v9024_v29, 4 }
 0x450   : > { %7437 = vpow2.f32 %v2125_v40  ;;  %2251 = vadd.xlane.f32.xlu1 %v2250_v3  ;;  %v2732_v40 = vunpack.c.l.b16 %v1226_v6  ;;  %v2731_v3 = vunpack.c.l.b16 %v1225_v51  ;;  %v3042_v6 = vunpack.c.l.b16 %v1260_v11 }
 0x451   : > { %1694 = vmatpush.bf16.xpose.msra.mxu1 %v1680_v15  ;;  %v1223_v15 = vrot.slane %v13400_v50, 4 }
 0x452   : > { %3222 = vmatpush.bf16.msrb.mxu3 %v3201_v22  ;;  %v1929_v22 = vsel %vm508_vm0, %v9180_v34, -inf  ;;  %v2738_v56 = vpack.c.b16 %v2733_v13, %v2732_v40  ;;  %v1254_v40 = vrot.slane %v9029_v2, 4 }
 0x453   : > { %v1880_v26 = vpop.xlane.xlu1 %1879 }
 0x454   : > { %v2060_v60 = vsub.f32 %v8996_v42, %v1880_v26 }
 0x456   : > { %3223 = vmatpush.bf16.msrb.mxu3 %v3200_v7  ;;  %v9184_v49 = vpop.eup %7437  ;;  %v2129_v21 = vmul.f32 1.442695, %v2060_v60  ;;  %v13398_v7 = vpack.c.b16 %v13396_v52, %v13397_v17  ;;  %v13401_v60 = vld [vmem:[#allocation17_spill] sm:$0xff]  ;;  %v9213_v52 = vpop.f32.mrf.mxu2 }
 0x457   : > { %v2256_v31 = vsel %vm508_vm0, %v9184_v49, 0.0  ;;  %1930 = vmax.xlane.f32.xlu0 %v1929_v22  ;;  %v1657_v24 = vpop.permute.xlu0 %1656  ;;  %v3043_v22 = vunpack.c.l.b16 %v1261_v47 }
 0x458   : > { %7439 = vpow2.f32 %v2129_v21  ;;  %2257 = vadd.xlane.f32.xlu1 %v2256_v31  ;;  %v1677_v42 = vsel %vm1298_vm5, %v1657_v24, 0  ;;  %v2729_v21 = vunpack.c.l.b16 %v1223_v15  ;;  %v1258_v31 = vrot.slane %v8998_v14, 4  ;;  %v13402_v15 = vld [vmem:[#allocation33_spill] sm:$0xff] }
 0x459   : > { %1695 = vmatpush.bf16.xpose.msra.mxu1 %v1677_v42  ;;  %6959 = vmatmul.msk.bf16.gmra.mxu3 %vm1298_vm5, %v8897_v53  ;;  %v2730_v53 = vunpack.c.l.b16 %v1224_v44  ;;  %v1259_v24 = vrot.slane %v8933_v36, 4  ;;  %v3047_v57 = vpack.c.b16 %v3043_v22, %v3042_v6  ;;  %v3036_v44 = vunpack.c.l.b16 %v1254_v40 }
 0x45a   : > { %3224 = vmatpush.bf16.msrb.mxu3 %v3199_v18  ;;  %v3040_v51 = vunpack.c.l.b16 %v1258_v31 }
 0x45b   : > { %v2737_v19 = vpack.c.b16 %v2731_v3, %v2730_v53  ;;  %v1886_v20 = vpop.xlane.xlu1 %1885  ;;  %v3041_v17 = vunpack.c.l.b16 %v1259_v24  ;;  %v3037_v3 = vunpack.c.l.b16 %v1255_v9 }
 0x45c   : > { %v2062_v42 = vsub.f32 %v9036_v39, %v1886_v20 }
 0x45d   : > { %v3046_v36 = vpack.c.b16 %v3041_v17, %v3040_v51 }
 0x45e   : > { %3225 = vmatpush.bf16.msrb.mxu3 %v3198_v33  ;;  %v9200_v18 = vpop.eup %7439  ;;  %v1222_v33 = vrot.slane %v13401_v60, 4  ;;  %v2133_v14 = vmul.f32 1.442695, %v2062_v42  ;;  %v9224_v2 = vpop.f32.mrf.mxu2 }
 0x45f   : > { %v2262_v26 = vsel %vm508_vm0, %v9200_v18, 0.0 }
 0x460   : > { %2263 = vadd.xlane.f32.xlu1 %v2262_v26  ;;  %6950 = vmatmul.msk.bf16.vlgmr.msra.gmra.mxu1 %vm1298_vm5, %v9041_v32  ;;  %v2728_v5 = vunpack.c.l.b16 %v1222_v33  ;;  %v1257_v32 = vrot.slane %v8942_v8, 4  ;;  %7441 = vpow2.f32 %v2133_v14 }
 0x461   : > { %2760 = vmatpush.bf16.msrb.mxu1 %v13398_v7  ;;  %v3038_v7 = vunpack.c.l.b16 %v1256_v1 }
 0x462   : > { %v2736_v13 = vpack.c.b16 %v2729_v21, %v2728_v5  ;;  %v3039_v39 = vunpack.c.l.b16 %v1257_v32 }
 0x465   : > { %2761 = vmatpush.bf16.msrb.mxu1 %v2738_v56  ;;  %v3045_v56 = vpack.c.b16 %v3039_v39, %v3038_v7 }
 0x466   : > { %v9228_v50 = vpop.eup %7441  ;;  %v9234_v47 = vpop.f32.mrf.mxu2 }
 0x467   : > { %v2268_v29 = vsel %vm508_vm0, %v9228_v50, 0.0  ;;  %v2010_v26 = vsel %vm508_vm0, %v9234_v47, -inf }
 0x469   : > { %2762 = vmatpush.bf16.msrb.mxu1 %v2737_v19  ;;  %6960 = vmatmul.msk.bf16.gmra.mxu3 %vm1298_vm5, %v8899_v45  ;;  %v3044_v45 = vpack.c.b16 %v3037_v3, %v3036_v44 }
 0x46c   : > { %v9220_v16 = vpop.f32.mrf.mxu3 }
 0x46d   : > { %2763 = vmatpush.bf16.msrb.mxu1 %v2736_v13  ;;  %v1935_v8 = vsel %vm508_vm0, %v9220_v16, -inf }
 0x46e   : > { %1936 = vmax.xlane.f32.xlu0 %v1935_v8  ;;  %v9244_v22 = vpop.f32.mrf.mxu2 }
 0x470   : > { %6951 = vmatmul.msk.bf16.gmra.mxu1 %vm1298_vm5, %v8953_v63 }
 0x471   : > { %3068 = vmatpush.bf16.msra.mxu1 %v3047_v57 }
 0x474   : > { %v9240_v63 = vpop.f32.mrf.mxu3 }
 0x475   : > { %3069 = vmatpush.bf16.msra.mxu1 %v3046_v36 }
 0x476   : > { %2269 = vadd.xlane.f32.xlu0 %v2268_v29  ;;  %v9261_v13 = vpop.f32.mrf.mxu2 }
 0x477   : > { %v2016_v9 = vsel %vm508_vm0, %v9261_v13, -inf }
 0x479   : > { %3070 = vmatpush.bf16.msra.mxu1 %v3045_v56  ;;  %6961 = vmatmul.msk.bf16.gmra.mxu3 %vm1298_vm5, %v13402_v15 }
 0x47c   : > { %v9247_v5 = vpop.f32.mrf.mxu3 }
 0x47d   : > { %3071 = vmatpush.bf16.msra.mxu1 %v3044_v45  ;;  %v1941_v17 = vsel %vm508_vm0, %v9247_v5, -inf }
 0x47e   : > { %2011 = vmax.xlane.f32.xlu0 %v2010_v26  ;;  %v9275_v39 = vpop.f32.mrf.mxu2 }
 0x480   : > { %6952 = vmatmul.msk.bf16.gmra.mxu1 %vm1298_vm5, %v9004_v43 }
 0x481   : > { %v1865_v53 = vpop.xlane.xlu2 %1864 }
 0x482   : > { %v2055_v60 = vsub.f32 %v8956_v41, %v1865_v53  ;;  %v1889_v33 = vpop.xlane.xlu0 %1888 }
 0x483   : > { %v2063_v11 = vsub.f32 %v9043_v46, %v1889_v33 }
 0x484   : > { %v2119_v19 = vmul.f32 1.442695, %v2055_v60  ;;  %v9266_v51 = vpop.f32.mrf.mxu3 }
 0x485   : > { %v2135_v21 = vmul.f32 1.442695, %v2063_v11 }
 0x486   : > { %7443 = vpow2.f32 %v2119_v19  ;;  %v9293_v26 = vpop.f32.mrf.mxu2  ;;  %v1932_v19 = vsel %vm508_vm0, %v9213_v52, -inf }
 0x487   : > { %7445 = vpow2.f32 %v2135_v21  ;;  %v2007_v21 = vsel %vm508_vm0, %v9224_v2, -inf }
 0x489   : > { %v1871_v31 = vpop.xlane.xlu2 %1870 }
 0x48a   : > { %v2057_v20 = vsub.f32 %v8975_v58, %v1871_v31  ;;  %v9255_v46 = vpop.xlane.xlu0 %1894  ;;  %v2022_v31 = vsel %vm508_vm0, %v9293_v26, -inf }
 0x48c   : > { %v9249_v43 = vpop.eup %7443  ;;  %v2123_v6 = vmul.f32 1.442695, %v2057_v20  ;;  %v9281_v44 = vpop.f32.mrf.mxu3 }
 0x48d   : > { %v9251_v24 = vpop.eup %7445  ;;  %v2247_v41 = vsel %vm508_vm0, %v9249_v43, 0.0  ;;  %v1947_v15 = vsel %vm508_vm0, %v9281_v44, -inf }
 0x48e   : > { %7447 = vpow2.f32 %v2123_v6  ;;  %2248 = vadd.xlane.f32.xlu2 %v2247_v41  ;;  %v2271_v42 = vsel %vm508_vm0, %v9251_v24, 0.0  ;;  %v9306_v6 = vpop.f32.mrf.mxu2 }
 0x48f   : > { %2272 = vadd.xlane.f32.xlu0 %v2271_v42 }
 0x490   : > { %6953 = vmatmul.msk.bf16.gmra.mxu1 %vm1298_vm5, %v9039_v61 }
 0x491   : > { %v1877_v58 = vpop.xlane.xlu2 %1876 }
 0x492   : > { %v2059_v1 = vsub.f32 %v8984_v27, %v1877_v58  ;;  %v9272_v7 = vpop.xlane.xlu0 %1900  ;;  %v1926_v27 = vsel %vm508_vm0, %v9164_v62, -inf  ;;  %v2013_v58 = vsel %vm508_vm0, %v9244_v22, -inf }
 0x494   : > { %v9263_v57 = vpop.eup %7447  ;;  %v2127_v14 = vmul.f32 1.442695, %v2059_v1  ;;  %v9295_v53 = vpop.f32.mrf.mxu3 }
 0x495   : > { %v2253_v32 = vsel %vm508_vm0, %v9263_v57, 0.0 }
 0x496   : > { %2254 = vadd.xlane.f32.xlu2 %v2253_v32  ;;  %7449 = vpow2.f32 %v2127_v14 }
 0x497   : > { %1942 = vmax.xlane.f32.xlu0 %v1941_v17  ;;  %v1961_v17 = vpop.xlane.xlu1 %1960 }
 0x499   : > { %v1883_v61 = vpop.xlane.xlu2 %1882 }
 0x49a   : > { %v2061_v40 = vsub.f32 %v9013_v48, %v1883_v61  ;;  %v1913_v3 = vpop.xlane.xlu0 %1912 }
 0x49c   : > { %v2131_v36 = vmul.f32 1.442695, %v2061_v40  ;;  %v9283_v56 = vpop.eup %7449  ;;  %v9310_v42 = vpop.f32.mrf.mxu3 }
 0x49d   : > { %v2259_v45 = vsel %vm508_vm0, %v9283_v56, 0.0  ;;  %v1953_v32 = vsel %vm508_vm0, %v9310_v42, -inf }
 0x49e   : > { %7451 = vpow2.f32 %v2131_v36  ;;  %1927 = vmax.xlane.f32.xlu2 %v1926_v27  ;;  %v9323_v36 = vpop.f32.mrf.mxu2  ;;  %v2087_v27 = vsub.f32 %v9082_v28, %v1961_v17  ;;  %v1950_v17 = vsel %vm508_vm0, %v9295_v53, -inf }
 0x49f   : > { %2017 = vmax.xlane.f32.xlu0 %v2016_v9 }
 0x4a1   : > { %v1892_v8 = vpop.xlane.xlu2 %1891 }
 0x4a2   : > { %v2064_v33 = vsub.f32 %v9056_v10, %v1892_v8  ;;  %v1964_v11 = vpop.xlane.xlu0 %1963  ;;  %v1938_v10 = vsel %vm508_vm0, %v9240_v63, -inf }
 0x4a3   : > { %v2088_v8 = vsub.f32 %v9097_v0, %v1964_v11  ;;  %v2071_v0 = vsub.f32 %v9086_v23, %v1913_v3  ;;  %v2025_v11 = vsel %vm508_vm0, %v9306_v6, -inf }
 0x4a4   : > { %v9285_v48 = vpop.eup %7451  ;;  %v2137_v20 = vmul.f32 1.442695, %v2064_v33 }
 0x4a5   : > { %v2265_v29 = vsel %vm508_vm0, %v9285_v48, 0.0 }
 0x4a6   : > { %2260 = vadd.xlane.f32.xlu2 %v2259_v45  ;;  %2266 = vadd.xlane.f32.xlu1 %v2265_v29  ;;  %7453 = vpow2.f32 %v2137_v20  ;;  %v2019_v45 = vsel %vm508_vm0, %v9275_v39, -inf }
 0x4a7   : > { %1948 = vmax.xlane.f32.xlu0 %v1947_v15  ;;  %v2028_v15 = vsel %vm508_vm0, %v9323_v36, -inf }
 0x4a9   : > { %v9297_v60 = vpop.xlane.xlu2 %1897 }
 0x4aa   : > { %v9316_v1 = vpop.xlane.xlu0 %1909 }
 0x4ac   : > { %v9320_v61 = vpop.eup %7453 }
 0x4ad   : > { %v2274_v29 = vsel %vm508_vm0, %v9320_v61, 0.0 }
 0x4ae   : > { %1933 = vmax.xlane.f32.xlu2 %v1932_v19  ;;  %2008 = vmax.xlane.f32.xlu1 %v2007_v21  ;;  %v2185_v19 = vmul.f32 1.442695, %v2088_v8  ;;  %v2065_v21 = vsub.f32 %v9059_v37, %v9255_v46  ;;  %v2067_v37 = vsub.f32 %v9068_v38, %v9272_v7  ;;  %v2066_v7 = vsub.f32 %v9066_v4, %v9297_v60 }
 0x4af   : > { %2023 = vmax.xlane.f32.xlu0 %v2022_v31  ;;  %v1944_v31 = vsel %vm508_vm0, %v9266_v51, -inf }
 0x4b1   : > { %v9308_v41 = vpop.xlane.xlu2 %1903 }
 0x4b2   : > { %v1970_v33 = vpop.xlane.xlu0 %1969 }
 0x4b6   : > { %1939 = vmax.xlane.f32.xlu2 %v1938_v10  ;;  %2014 = vmax.xlane.f32.xlu1 %v2013_v58  ;;  %v2151_v10 = vmul.f32 1.442695, %v2071_v0  ;;  %v2139_v58 = vmul.f32 1.442695, %v2065_v21  ;;  %v2090_v21 = vsub.f32 %v9142_v35, %v1970_v33  ;;  %v2068_v35 = vsub.f32 %v9078_v25, %v9308_v41  ;;  %v13405_v41 = vld [vmem:[#allocation35_spill] sm:$0xff] }
 0x4b7   : > { %1954 = vmax.xlane.f32.xlu0 %v1953_v32 }
 0x4ba   : > { %v1916_v14 = vpop.xlane.xlu2 %1915  ;;  %v9346_v23 = vpop.xlane.xlu0 %1921 }
 0x4bb   : > { %v2072_v40 = vsub.f32 %v9103_v12, %v1916_v14  ;;  %v2183_v12 = vmul.f32 1.442695, %v2087_v27  ;;  %v2143_v27 = vmul.f32 1.442695, %v2067_v37  ;;  %v2189_v37 = vmul.f32 1.442695, %v2090_v21 }
 0x4bd   : > { %v2153_v9 = vmul.f32 1.442695, %v2072_v40  ;;  %v9358_v40 = vpop.f32.mrf.mxu3 }
 0x4be   : > { %2020 = vmax.xlane.f32.xlu1 %v2019_v45  ;;  %2275 = vadd.xlane.f32.xlu2 %v2274_v29  ;;  %v1956_v45 = vsel %vm508_vm0, %v9358_v40, -inf }
 0x4bf   : > { %7455 = vpow2.f32 %v2153_v9  ;;  %2029 = vmax.xlane.f32.xlu0 %v2028_v15  ;;  %v9372_v15 = vpop.xlane.xlu1 %1906 }
 0x4c0   : > { %7457 = vpow2.f32 %v2183_v12 }
 0x4c1   : > { %7459 = vpow2.f32 %v2185_v19  ;;  %v2141_v19 = vmul.f32 1.442695, %v2066_v7 }
 0x4c2   : > { %7461 = vpow2.f32 %v2151_v10  ;;  %v9364_v38 = vpop.xlane.xlu0 %1924 }
 0x4c3   : > { %7463 = vpow2.f32 %v2139_v58 }
 0x4c4   : > { %7465 = vpow2.f32 %v2143_v27 }
 0x4c5   : > { %v9333_v28 = vpop.eup %7455  ;;  %v9376_v0 = vpop.f32.mrf.mxu3  ;;  %7467 = vpow2.f32 %v2141_v19 }
 0x4c6   : > { %v2298_v20 = vsel %vm508_vm0, %v9333_v28, 0.0  ;;  %2026 = vmax.xlane.f32.xlu1 %v2025_v11  ;;  %1945 = vmax.xlane.f32.xlu2 %v1944_v31  ;;  %v9344_v32 = vpop.eup %7457  ;;  %v1971_v60 = vsel %vm508_vm0, %v9376_v0, -inf  ;;  %7469 = vpow2.f32 %v2189_v37 }
 0x4c7   : > { %2299 = vadd.xlane.f32.xlu0 %v2298_v20  ;;  %v9348_v3 = vpop.eup %7459  ;;  %v2343_v46 = vsel %vm508_vm0, %v9344_v32, 0.0  ;;  %v1967_v58 = vpop.xlane.xlu1 %1966 }
 0x4c8   : > { %v2346_v14 = vsel %vm508_vm0, %v9348_v3, 0.0  ;;  %v9360_v9 = vpop.eup %7461  ;;  %v2089_v19 = vsub.f32 %v13405_v41, %v1967_v58  ;;  %v2074_v58 = vsub.f32 %v9130_v55, %v9346_v23  ;;  %v2075_v55 = vsub.f32 %v9150_v30, %v9364_v38 }
 0x4c9   : > { %v9362_v8 = vpop.eup %7463  ;;  %v2295_v29 = vsel %vm508_vm0, %v9360_v9, 0.0 }
 0x4ca   : > { %v2277_v12 = vsel %vm508_vm0, %v9362_v8, 0.0  ;;  %v9378_v11 = vpop.eup %7465  ;;  %v9385_v31 = vpop.xlane.xlu0 %1930 }
 0x4cb   : > { %v2283_v10 = vsel %vm508_vm0, %v9378_v11, 0.0 }
 0x4ce   : > { %2344 = vadd.xlane.f32.xlu1 %v2343_v46  ;;  %1951 = vmax.xlane.f32.xlu2 %v1950_v17  ;;  %v9391_v46 = vpop.eup %7467  ;;  %v9393_v17 = vpop.f32.mrf.mxu3 }
 0x4cf   : > { %2347 = vadd.xlane.f32.xlu0 %v2346_v14  ;;  %v2280_v27 = vsel %vm508_vm0, %v9391_v46, 0.0  ;;  %v9407_v25 = vpop.eup %7469 }
 0x4d0   : > { %v2352_v37 = vsel %vm508_vm0, %v9407_v25, 0.0 }
 0x4d6   : > { %1957 = vmax.xlane.f32.xlu2 %v1956_v45  ;;  %2296 = vadd.xlane.f32.xlu1 %v2295_v29  ;;  %v1974_v45 = vsel %vm508_vm0, %v9393_v17, -inf  ;;  %v2145_v29 = vmul.f32 1.442695, %v2068_v35 }
 0x4d7   : > { %2278 = vadd.xlane.f32.xlu0 %v2277_v12  ;;  %v1919_v12 = vpop.xlane.xlu1 %1918 }
 0x4d8   : > { %7471 = vpow2.f32 %v2145_v29 }
 0x4dd   : > { %v9380_v4 = vpop.f32.mrf.mxu1 }
 0x4de   : > { %13403 = vst [vmem:[#allocation24_spill] sm:$0xff] %v9380_v4  ;;  %1972 = vmax.xlane.f32.xlu1 %v1971_v60  ;;  %v1983_v20 = vsel %vm508_vm0, %v9380_v4, -inf  ;;  %v13406_v60 = vld [vmem:[#allocation36_spill] sm:$0xff] }
 0x4df   : > { %1984 = vmax.xlane.f32.xlu2 %v1983_v20  ;;  %2284 = vadd.xlane.f32.xlu0 %v2283_v10  ;;  %v2073_v21 = vsub.f32 %v13406_v60, %v1919_v12  ;;  %v2252_v60 = vpop.xlane.xlu1 %2251 }
 0x4e1   : > { %v9399_v14 = vpop.xlane.xlu0 %1936  ;;  %v2155_v35 = vmul.f32 1.442695, %v2073_v21 }
 0x4e5   : > { %v9397_v33 = vpop.f32.mrf.mxu1 }
 0x4e6   : > { %13404 = vst [vmem:[#allocation22_spill] sm:$0xff] %v9397_v33  ;;  %v1986_v7 = vsel %vm508_vm0, %v9397_v33, -inf }
 0x4e7   : > { %2281 = vadd.xlane.f32.xlu2 %v2280_v27  ;;  %1987 = vmax.xlane.f32.xlu1 %v1986_v7  ;;  %v2187_v27 = vmul.f32 1.442695, %v2089_v19  ;;  %v2157_v19 = vmul.f32 1.442695, %v2074_v58  ;;  %v2159_v58 = vmul.f32 1.442695, %v2075_v55 }
 0x4e8   : > { %1975 = vmax.xlane.f32.xlu0 %v1974_v45  ;;  %v9419_v45 = vpop.eup %7471 }
 0x4e9   : > { %v9417_v7 = vpop.xlane.xlu0 %2269  ;;  %7473 = vpow2.f32 %v2187_v27  ;;  %v2286_v12 = vsel %vm508_vm0, %v9419_v45, 0.0 }
 0x4ea   : > { %7475 = vpow2.f32 %v2155_v35 }
 0x4eb   : > { %7477 = vrcp.f32 %v2252_v60 }
 0x4ec   : > { %7479 = vpow2.f32 %v2157_v19 }
 0x4ed   : > { %v9411_v20 = vpop.f32.mrf.mxu1 }
 0x4ee   : > { %13407 = vst [vmem:[#allocation21_spill] sm:$0xff] %v9411_v20  ;;  %v1989_v10 = vsel %vm508_vm0, %v9411_v20, -inf }
 0x4ef   : > { %1990 = vmax.xlane.f32.xlu2 %v1989_v10  ;;  %v9429_v21 = vpop.eup %7473  ;;  %v9431_v10 = vpop.f32.mrf.mxu3 }
 0x4f0   : > { %2353 = vadd.xlane.f32.xlu0 %v2352_v37  ;;  %13409 = vst [vmem:[#allocation30_spill] sm:$0xff] %v9431_v10  ;;  %v9435_v27 = vpop.eup %7475  ;;  %v2349_v35 = vsel %vm508_vm0, %v9429_v21, 0.0  ;;  %v1977_v38 = vsel %vm508_vm0, %v9431_v10, -inf }
 0x4f1   : > { %v9433_v37 = vpop.xlane.xlu0 %2011  ;;  %13410 = vst [vmem:[#allocation19_spill] sm:$0xff] %v9435_v27  ;;  %v2301_v23 = vsel %vm508_vm0, %v9435_v27, 0.0 }
 0x4f5   : > { %v9423_v29 = vpop.f32.mrf.mxu1 }
 0x4f6   : > { %13408 = vst [vmem:[#allocation31_spill] sm:$0xff] %v9423_v29  ;;  %v1992_v41 = vsel %vm508_vm0, %v9423_v29, -inf }
 0x4f7   : > { %2287 = vadd.xlane.f32.xlu2 %v2286_v12  ;;  %1993 = vmax.xlane.f32.xlu1 %v1992_v41  ;;  %v7478_v41 = vpop.eup %7477  ;;  %v9447_v19 = vpop.f32.mrf.mxu3 }
 0x4f8   : > { %v9445_v4 = vpop.eup %7479  ;;  %v2504_v30 = vmul.f32 %v7478_v41, %v9171_v59  ;;  %v2077_v41 = vsub.f32 %v9180_v34, %v9385_v31 }
 0x4f9   : > { %13411 = vst [vmem:[#allocation18_spill] sm:$0xff] %v9445_v4  ;;  %v2304_v60 = vsel %vm508_vm0, %v9445_v4, 0.0 }
 0x4ff   : > { %2302 = vadd.xlane.f32.xlu2 %v2301_v23  ;;  %2350 = vadd.xlane.f32.xlu1 %v2349_v35  ;;  %v2258_v23 = vpop.xlane.xlu1 %2257  ;;  %v2568_v35 = vpack.c.bf16 %v2504_v30, %v2504_v30  ;;  %v9461_v10 = vpop.f32.mrf.mxu3  ;;  %v1980_v30 = vsel %vm508_vm0, %v9447_v19, -inf }
 0x500   : > { %13413 = vst [vmem:[#allocation33_spill] sm:$0xff] %v9461_v10 }
 0x501   : > { %v2249_v12 = vpop.xlane.xlu2 %2248  ;;  %v2640_v4 = vunpack.c.l.b16 %v2568_v35 }
 0x502   : > { %7481 = vrcp.f32 %v2249_v12  ;;  %v9443_v29 = vpop.xlane.xlu0 %2272 }
 0x503   : > { %7483 = vpow2.f32 %v2159_v58 }
 0x507   : > { %1978 = vmax.xlane.f32.xlu2 %v1977_v38  ;;  %2305 = vadd.xlane.f32.xlu1 %v2304_v60  ;;  %v2163_v60 = vmul.f32 1.442695, %v2077_v41  ;;  %v9476_v41 = vpop.f32.mrf.mxu3 }
 0x508   : > { %v7482_v55 = vpop.eup %7481 }
 0x509   : > { %v2503_v12 = vmul.f32 %v7482_v55, %v9249_v43  ;;  %v2255_v20 = vpop.xlane.xlu2 %2254  ;;  %v9457_v58 = vpop.eup %7483 }
 0x50a   : > { %7485 = vrcp.f32 %v2255_v20  ;;  %v9455_v33 = vpop.xlane.xlu0 %1942  ;;  %13412 = vst [vmem:[#allocation17_spill] sm:$0xff] %v9457_v58  ;;  %v2307_v43 = vsel %vm508_vm0, %v9457_v58, 0.0  ;;  %v2264_v55 = vpop.xlane.xlu1 %2263 }
 0x50b   : > { %v2567_v59 = vpack.c.bf16 %v2503_v12, %v2503_v12  ;;  %7487 = vrcp.f32 %v2258_v23 }
 0x50c   : > { %7489 = vrcp.f32 %v9417_v7 }
 0x50d   : > { %v2639_v27 = vunpack.c.l.b16 %v2567_v59  ;;  %7491 = vpow2.f32 %v2163_v60  ;;  %v2079_v60 = vsub.f32 %v9220_v16, %v9399_v14 }
 0x50f   : > { %1981 = vmax.xlane.f32.xlu1 %v1980_v30  ;;  %2308 = vadd.xlane.f32.xlu2 %v2307_v43  ;;  %v2647_v20 = vpack.c.b16 %v2640_v4, %v2639_v27  ;;  %v2031_v4 = vsel %vm508_vm0, %v9461_v10, -inf  ;;  %v2167_v58 = vmul.f32 1.442695, %v2079_v60 }
 0x510   : > { %v7486_v38 = vpop.eup %7485 }
 0x511   : > { %6962 = vmatmul.msk.bf16.vlgmr.msrb.gmra.mxu0 %vm508_vm0, %v2647_v20  ;;  %v1928_v23 = vpop.xlane.xlu2 %1927  ;;  %v7488_v34 = vpop.eup %7487  ;;  %v2505_v12 = vmul.f32 %v7486_v38, %v9263_v57 }
 0x512   : > { %v2076_v31 = vsub.f32 %v9164_v62, %v1928_v23  ;;  %v9469_v35 = vpop.xlane.xlu0 %2017  ;;  %v2506_v30 = vmul.f32 %v7488_v34, %v9184_v49  ;;  %v7490_v23 = vpop.eup %7489 }
 0x513   : > { %v2569_v27 = vpack.c.bf16 %v2505_v12, %v2505_v12  ;;  %v9480_v7 = vpop.eup %7491  ;;  %v2510_v34 = vmul.f32 %v7490_v23, %v9228_v50 }
 0x514   : > { %v2161_v59 = vmul.f32 1.442695, %v2076_v31  ;;  %v2570_v20 = vpack.c.bf16 %v2506_v30, %v2506_v30  ;;  %13414 = vst [vmem:[#allocation35_spill] sm:$0xff] %v9480_v7  ;;  %v2313_v12 = vsel %vm508_vm0, %v9480_v7, 0.0  ;;  %v13416_v30 = vld [vmem:[#allocation32_spill] sm:$0xff] }
 0x515   : > { %v2641_v49 = vunpack.c.l.b16 %v2569_v27  ;;  %v2574_v10 = vpack.c.bf16 %v2510_v34, %v2510_v34 }
 0x516   : > { %7493 = vpow2.f32 %v2161_v59  ;;  %v2642_v31 = vunpack.c.l.b16 %v2570_v20  ;;  %v13417_v20 = vld [vmem:[#allocation28_spill] sm:$0xff] }
 0x517   : > { %2032 = vmax.xlane.f32.xlu2 %v2031_v4  ;;  %7495 = vrcp.f32 %v2264_v55  ;;  %v1269_v4 = vrot.slane %v13416_v30, 4  ;;  %v1266_v23 = vrot.slane %v13417_v20, 4 }
 0x518   : > { %v2648_v27 = vpack.c.b16 %v2642_v31, %v2641_v49  ;;  %v9500_v31 = vpop.f32.mrf.mxu3 }
 0x519   : > { %v2267_v62 = vpop.xlane.xlu1 %2266  ;;  %v2261_v43 = vpop.xlane.xlu2 %2260  ;;  %v3120_v49 = vunpack.c.l.b16 %v1269_v4  ;;  %v2104_v4 = vsub.f32 %v9234_v47, %v9433_v37 }
 0x51a   : > { %7497 = vrcp.f32 %v2267_v62  ;;  %v9478_v57 = vpop.xlane.xlu0 %1948 }
 0x51b   : > { %7499 = vrcp.f32 %v2261_v43 }
 0x51c   : > { %v9482_v38 = vpop.eup %7493  ;;  %7501 = vpow2.f32 %v2167_v58  ;;  %v3117_v58 = vunpack.c.l.b16 %v1266_v23 }
 0x51d   : > { %13415 = vst [vmem:[#allocation36_spill] sm:$0xff] %v9482_v38  ;;  %v2310_v55 = vsel %vm508_vm0, %v9482_v38, 0.0  ;;  %v7496_v59 = vpop.eup %7495 }
 0x51e   : > { %2311 = vadd.xlane.f32.xlu1 %v2310_v55  ;;  %v13418_v55 = vld [vmem:[#allocation29_spill] sm:$0xff] }
 0x51f   : > { %2314 = vadd.xlane.f32.xlu2 %v2313_v12  ;;  %v1268_v38 = vrot.slane %v13418_v55, 4 }
 0x520   : > { %v7498_v62 = vpop.eup %7497 }
 0x521   : > { %v7500_v43 = vpop.eup %7499  ;;  %v2509_v16 = vmul.f32 %v7498_v62, %v9285_v48  ;;  %v2009_v50 = vpop.xlane.xlu1 %2008  ;;  %6963 = vmatmul.msk.bf16.gmra.mxu0 %vm508_vm0, %v2648_v27  ;;  %v2034_v48 = vsel %vm508_vm0, %v9476_v41, -inf  ;;  %v2081_v27 = vsub.f32 %v9247_v5, %v9455_v33  ;;  %v3119_v55 = vunpack.c.l.b16 %v1268_v38  ;;  %v13420_v33 = vld [vmem:[#allocation26_spill] sm:$0xff] }
 0x522   : > { %v1934_v14 = vpop.xlane.xlu2 %1933  ;;  %v2103_v7 = vsub.f32 %v9224_v2, %v2009_v50  ;;  %v9498_v12 = vpop.xlane.xlu0 %2023  ;;  %v2507_v34 = vmul.f32 %v7500_v43, %v9283_v56  ;;  %v2508_v2 = vmul.f32 %v7496_v59, %v9200_v18  ;;  %v2037_v56 = vsel %vm508_vm0, %v9500_v31, -inf }
 0x523   : > { %v2078_v30 = vsub.f32 %v9213_v52, %v1934_v14  ;;  %v2573_v60 = vpack.c.bf16 %v2509_v16, %v2509_v16  ;;  %v2646_v52 = vunpack.c.l.b16 %v2574_v10  ;;  %v13419_v14 = vld [vmem:[#allocation27_spill] sm:$0xff]  ;;  %v1265_v18 = vrot.slane %v13420_v33, 4 }
 0x524   : > { %v2215_v62 = vmul.f32 1.442695, %v2103_v7  ;;  %v1267_v16 = vrot.slane %v13419_v14, 4  ;;  %v2571_v5 = vpack.c.bf16 %v2507_v34, %v2507_v34  ;;  %v3124_v10 = vpack.c.b16 %v3120_v49, %v3119_v55  ;;  %v13422_v34 = vld [vmem:[#allocation20_spill] sm:$0xff] }
 0x525   : > { %v2165_v20 = vmul.f32 1.442695, %v2078_v30  ;;  %v2645_v50 = vunpack.c.l.b16 %v2573_v60  ;;  %v2171_v7 = vmul.f32 1.442695, %v2081_v27  ;;  %v2217_v59 = vmul.f32 1.442695, %v2104_v4 }
 0x526   : > { %7503 = vpow2.f32 %v2215_v62  ;;  %2035 = vmax.xlane.f32.xlu1 %v2034_v48  ;;  %v2572_v38 = vpack.c.bf16 %v2508_v2, %v2508_v2  ;;  %v13421_v30 = vld [vmem:[#allocation25_spill] sm:$0xff]  ;;  %v3118_v48 = vunpack.c.l.b16 %v1267_v16  ;;  %v2643_v23 = vunpack.c.l.b16 %v2571_v5  ;;  %v9534_v5 = vpop.f32.mrf.mxu3 }
 0x527   : > { %v2650_v43 = vpack.c.b16 %v2646_v52, %v2645_v50  ;;  %7505 = vpow2.f32 %v2165_v20  ;;  %2038 = vmax.xlane.f32.xlu2 %v2037_v56  ;;  %v1264_v60 = vrot.slane %v13421_v30, 4  ;;  %v9520_v20 = vpop.eup %7501  ;;  %v1262_v52 = vrot.slane %v13422_v34, 4  ;;  %v13423_v56 = vld [vmem:[#allocation23_spill] sm:$0xff] }
 0x528   : > { %7507 = vrcp.f32 %v9443_v29  ;;  %v3116_v27 = vunpack.c.l.b16 %v1265_v18  ;;  %v2106_v2 = vsub.f32 %v9261_v13, %v9469_v35  ;;  %v3123_v4 = vpack.c.b16 %v3118_v48, %v3117_v58 }
 0x529   : > { %v9514_v47 = vpop.xlane.xlu1 %2014  ;;  %6965 = vmatmul.msk.bf16.vlgmr.msrb.gmra.mxu2 %vm508_vm0, %v2650_v43  ;;  %7509 = vpow2.f32 %v2171_v7  ;;  %v2644_v55 = vunpack.c.l.b16 %v2572_v38  ;;  %v1263_v29 = vrot.slane %v13423_v56, 4  ;;  %v3115_v43 = vunpack.c.l.b16 %v1264_v60 }
 0x52a   : > { %v1940_v37 = vpop.xlane.xlu2 %1939  ;;  %3145 = vmatpush.bf16.msrb.mxu2 %v3124_v10  ;;  %v9518_v62 = vpop.xlane.xlu0 %1954  ;;  %7511 = vpow2.f32 %v2217_v59  ;;  %v2319_v35 = vsel %vm508_vm0, %v9520_v20, 0.0  ;;  %v3113_v33 = vunpack.c.l.b16 %v1262_v52  ;;  %v2221_v18 = vmul.f32 1.442695, %v2106_v2 }
 0x52b   : > { %v2080_v14 = vsub.f32 %v9240_v63, %v1940_v37  ;;  %v2649_v63 = vpack.c.b16 %v2644_v55, %v2643_v23  ;;  %v3122_v58 = vpack.c.b16 %v3116_v27, %v3115_v43  ;;  %v3114_v30 = vunpack.c.l.b16 %v1263_v29 }
 0x52c   : > { %v9524_v49 = vpop.eup %7503  ;;  %v2083_v52 = vsub.f32 %v9281_v44, %v9478_v57  ;;  %v2040_v2 = vsel %vm508_vm0, %v9534_v5, -inf  ;;  %v2108_v57 = vsub.f32 %v9293_v26, %v9498_v12  ;;  %v2105_v26 = vsub.f32 %v9244_v22, %v9514_v47 }
 0x52d   : > { %v9528_v50 = vpop.eup %7505  ;;  %v2391_v16 = vsel %vm508_vm0, %v9524_v49, 0.0  ;;  %v2169_v7 = vmul.f32 1.442695, %v2080_v14  ;;  %v3121_v23 = vpack.c.b16 %v3114_v30, %v3113_v33 }
 0x52e   : > { %3146 = vmatpush.bf16.msrb.mxu2 %v3123_v4  ;;  %2392 = vadd.xlane.f32.xlu0 %v2391_v16  ;;  %v2316_v13 = vsel %vm508_vm0, %v9528_v50, 0.0  ;;  %v7508_v10 = vpop.eup %7507  ;;  %v9558_v14 = vpop.f32.mrf.mxu3  ;;  %v2175_v44 = vmul.f32 1.442695, %v2083_v52  ;;  %v2219_v30 = vmul.f32 1.442695, %v2105_v26 }
 0x52f   : > { %2317 = vadd.xlane.f32.xlu1 %v2316_v13  ;;  %2320 = vadd.xlane.f32.xlu2 %v2319_v35  ;;  %v9543_v38 = vpop.eup %7509  ;;  %v2511_v34 = vmul.f32 %v7508_v10, %v9251_v24  ;;  %v2225_v10 = vmul.f32 1.442695, %v2108_v57 }
 0x530   : > { %v9547_v48 = vpop.eup %7511  ;;  %v2325_v27 = vsel %vm508_vm0, %v9543_v38, 0.0 }
 0x531   : > { %v9540_v59 = vpop.xlane.xlu1 %2020  ;;  %6964 = vmatmul.msk.bf16.gmra.mxu0 %vm508_vm0, %v2649_v63  ;;  %v2394_v4 = vsel %vm508_vm0, %v9547_v48, 0.0  ;;  %v2575_v16 = vpack.c.bf16 %v2511_v34, %v2511_v34 }
 0x532   : > { %v2276_v37 = vpop.xlane.xlu2 %2275  ;;  %3147 = vmatpush.bf16.msrb.mxu2 %v3122_v58  ;;  %v9545_v60 = vpop.xlane.xlu0 %2029 }
 0x533   : > { %7513 = vrcp.f32 %v2276_v37 }
 0x534   : > { %7515 = vpow2.f32 %v2221_v18  ;;  %v2716_v18 = vunpack.c.l.b16 %v2575_v16 }
 0x535   : > { %7517 = vpow2.f32 %v2169_v7 }
 0x536   : > { %3148 = vmatpush.bf16.msrb.mxu2 %v3121_v23  ;;  %2326 = vadd.xlane.f32.xlu0 %v2325_v27  ;;  %7519 = vpow2.f32 %v2175_v44  ;;  %v9581_v23 = vpop.f32.mrf.mxu3  ;;  %v2085_v27 = vsub.f32 %v9310_v42, %v9518_v62 }
 0x537   : > { %2041 = vmax.xlane.f32.xlu1 %v2040_v2  ;;  %2395 = vadd.xlane.f32.xlu2 %v2394_v4  ;;  %v2046_v16 = vsel %vm508_vm0, %v9581_v23, -inf }
 0x538   : > { %v2179_v42 = vmul.f32 1.442695, %v2085_v27 }
 0x539   : > { %v7514_v24 = vpop.eup %7513  ;;  %v9563_v56 = vpop.xlane.xlu1 %2026 }
 0x53a   : > { %v2512_v55 = vmul.f32 %v7514_v24, %v9320_v61  ;;  %v1946_v29 = vpop.xlane.xlu2 %1945  ;;  %v9565_v43 = vpop.eup %7515 }
 0x53b   : > { %v2082_v13 = vsub.f32 %v9266_v51, %v1946_v29  ;;  %v2300_v35 = vpop.xlane.xlu0 %2299  ;;  %v9568_v63 = vpop.eup %7517  ;;  %v2400_v61 = vsel %vm508_vm0, %v9565_v43, 0.0  ;;  %v2043_v51 = vsel %vm508_vm0, %v9558_v14, -inf }
 0x53c   : > { %v2576_v33 = vpack.c.bf16 %v2512_v55, %v2512_v55  ;;  %v2322_v7 = vsel %vm508_vm0, %v9568_v63, 0.0  ;;  %v9579_v22 = vpop.eup %7519  ;;  %v9596_v55 = vpop.f32.mrf.mxu1 }
 0x53d   : > { %v2173_v58 = vmul.f32 1.442695, %v2082_v13  ;;  %v2331_v24 = vsel %vm508_vm0, %v9579_v22, 0.0 }
 0x53e   : > { %v2717_v12 = vunpack.c.l.b16 %v2576_v33  ;;  %2401 = vadd.xlane.f32.xlu0 %v2400_v61  ;;  %v2110_v61 = vsub.f32 %v9323_v36, %v9545_v60  ;;  %v1995_v36 = vsel %vm508_vm0, %v9596_v55, -inf }
 0x53f   : > { %7521 = vpow2.f32 %v2173_v58  ;;  %2323 = vadd.xlane.f32.xlu1 %v2322_v7  ;;  %2044 = vmax.xlane.f32.xlu2 %v2043_v51  ;;  %v2107_v58 = vsub.f32 %v9275_v39, %v9540_v59 }
 0x540   : > { %v2724_v37 = vpack.c.b16 %v2717_v12, %v2716_v18  ;;  %7523 = vpow2.f32 %v2225_v10  ;;  %v2229_v60 = vmul.f32 1.442695, %v2110_v61 }
 0x541   : > { %v2345_v34 = vpop.xlane.xlu1 %2344 }
 0x542   : > { %v1952_v52 = vpop.xlane.xlu2 %1951  ;;  %6966 = vmatmul.msk.bf16.vlgmr.msrb.gmra.mxu1 %vm508_vm0, %v2724_v37  ;;  %7525 = vrcp.f32 %v2345_v34 }
 0x543   : > { %v2348_v47 = vpop.xlane.xlu0 %2347  ;;  %v2084_v4 = vsub.f32 %v9295_v53, %v1952_v52 }
 0x544   : > { %7527 = vrcp.f32 %v2348_v47 }
 0x545   : > { %7529 = vrcp.f32 %v2300_v35  ;;  %v9585_v2 = vpop.eup %7521  ;;  %v2177_v13 = vmul.f32 1.442695, %v2084_v4 }
 0x546   : > { %7531 = vpow2.f32 %v2219_v30  ;;  %2332 = vadd.xlane.f32.xlu0 %v2331_v24  ;;  %v2328_v44 = vsel %vm508_vm0, %v9585_v2, 0.0  ;;  %v9594_v57 = vpop.eup %7523 }
 0x547   : > { %2047 = vmax.xlane.f32.xlu1 %v2046_v16  ;;  %2329 = vadd.xlane.f32.xlu2 %v2328_v44 }
 0x548   : > { %v7526_v62 = vpop.eup %7525 }
 0x549   : > { %v2535_v53 = vmul.f32 %v7526_v62, %v9344_v32  ;;  %v2297_v33 = vpop.xlane.xlu1 %2296  ;;  %v2406_v32 = vsel %vm508_vm0, %v9594_v57, 0.0 }
 0x54a   : > { %v7528_v29 = vpop.eup %7527  ;;  %v1958_v35 = vpop.xlane.xlu2 %1957  ;;  %7533 = vrcp.f32 %v2297_v33 }
 0x54b   : > { %v7530_v18 = vpop.eup %7529  ;;  %v2536_v10 = vmul.f32 %v7528_v29, %v9348_v3  ;;  %v2279_v26 = vpop.xlane.xlu0 %2278  ;;  %7535 = vpow2.f32 %v2179_v42  ;;  %v2599_v7 = vpack.c.bf16 %v2535_v53, %v2535_v53  ;;  %v2086_v39 = vsub.f32 %v9358_v40, %v1958_v35 }
 0x54c   : > { %v9602_v12 = vpop.eup %7531  ;;  %v2520_v37 = vmul.f32 %v7530_v18, %v9333_v28  ;;  %7537 = vpow2.f32 %v2177_v13  ;;  %v2223_v3 = vmul.f32 1.442695, %v2107_v58  ;;  %v9622_v42 = vpop.f32.mrf.mxu1  ;;  %v2070_v29 = vsub.f32 %v9127_v54, %v9316_v1 }
 0x54d   : > { %v2600_v51 = vpack.c.bf16 %v2536_v10, %v2536_v10  ;;  %v2947_v30 = vunpack.c.l.b16 %v2599_v7  ;;  %v2397_v34 = vsel %vm508_vm0, %v9602_v12, 0.0  ;;  %v2181_v4 = vmul.f32 1.442695, %v2086_v39 }
 0x54e   : > { %2407 = vadd.xlane.f32.xlu0 %v2406_v32  ;;  %v2584_v28 = vpack.c.bf16 %v2520_v37, %v2520_v37  ;;  %7539 = vpow2.f32 %v2223_v3  ;;  %v1998_v33 = vsel %vm508_vm0, %v9622_v42, -inf  ;;  %v2149_v1 = vmul.f32 1.442695, %v2070_v29 }
 0x54f   : > { %v2948_v59 = vunpack.c.l.b16 %v2600_v51  ;;  %2398 = vadd.xlane.f32.xlu1 %v2397_v34  ;;  %1996 = vmax.xlane.f32.xlu2 %v1995_v36  ;;  %7541 = vpow2.f32 %v2229_v60  ;;  %v13424_v51 = vld [vmem:[#allocation34_spill] sm:$0xff] }
 0x550   : > { %v7534_v52 = vpop.eup %7533  ;;  %7543 = vrcp.f32 %v2279_v26  ;;  %v2794_v13 = vunpack.c.l.b16 %v2584_v28  ;;  %v2069_v32 = vsub.f32 %v13424_v51, %v9372_v15 }
 0x551   : > { %v2955_v47 = vpack.c.b16 %v2948_v59, %v2947_v30  ;;  %v9614_v27 = vpop.eup %7535  ;;  %v2519_v40 = vmul.f32 %v7534_v52, %v9360_v9  ;;  %v2109_v9 = vsub.f32 %v9306_v6, %v9563_v56  ;;  %7545 = vpow2.f32 %v2181_v4  ;;  %v1973_v10 = vpop.xlane.xlu1 %1972 }
 0x552   : > { %v9617_v24 = vpop.xlane.xlu2 %1984  ;;  %v9620_v44 = vpop.eup %7537  ;;  %v2337_v53 = vsel %vm508_vm0, %v9614_v27, 0.0  ;;  %v2091_v39 = vsub.f32 %v9376_v0, %v1973_v10  ;;  %v2147_v60 = vmul.f32 1.442695, %v2069_v32 }
 0x553   : > { %6978 = vmatmul.msk.bf16.vlgmr.msra.gmra.mxu0 %vm508_vm0, %v2955_v47  ;;  %v2285_v16 = vpop.xlane.xlu0 %2284  ;;  %v2583_v62 = vpack.c.bf16 %v2519_v40, %v2519_v40  ;;  %v2334_v18 = vsel %vm508_vm0, %v9620_v44, 0.0  ;;  %v2227_v6 = vmul.f32 1.442695, %v2109_v9 }
 0x554   : > { %v9634_v54 = vpop.eup %7539  ;;  %v2191_v52 = vmul.f32 1.442695, %v2091_v39 }
 0x555   : > { %v2793_v35 = vunpack.c.l.b16 %v2583_v62  ;;  %v9636_v26 = vpop.eup %7541  ;;  %v2403_v36 = vsel %vm508_vm0, %v9634_v54, 0.0 }
 0x556   : > { %2338 = vadd.xlane.f32.xlu0 %v2337_v53  ;;  %v7544_v56 = vpop.eup %7543  ;;  %v2412_v3 = vsel %vm508_vm0, %v9636_v26, 0.0 }
 0x557   : > { %v2801_v58 = vpack.c.b16 %v2794_v13, %v2793_v35  ;;  %1999 = vmax.xlane.f32.xlu1 %v1998_v33  ;;  %2335 = vadd.xlane.f32.xlu2 %v2334_v18  ;;  %v9639_v7 = vpop.eup %7545  ;;  %v2513_v59 = vmul.f32 %v7544_v56, %v9362_v8  ;;  %v9671_v18 = vpop.f32.mrf.mxu3 }
 0x558   : > { %v2340_v15 = vsel %vm508_vm0, %v9639_v7, 0.0  ;;  %v2049_v32 = vsel %vm508_vm0, %v9671_v18, -inf }
 0x559   : > { %6970 = vmatmul.msk.bf16.vlgmr.msra.gmra.mxu2 %vm508_vm0, %v2801_v58  ;;  %v2577_v47 = vpack.c.bf16 %v2513_v59, %v2513_v59 }
 0x55a   : > { %v2282_v61 = vpop.xlane.xlu2 %2281  ;;  %v9655_v8 = vpop.xlane.xlu1 %1987 }
 0x55b   : > { %7547 = vrcp.f32 %v2282_v61  ;;  %v1976_v37 = vpop.xlane.xlu0 %1975  ;;  %v2718_v53 = vunpack.c.l.b16 %v2577_v47 }
 0x55c   : > { %7549 = vpow2.f32 %v2149_v1  ;;  %v2092_v30 = vsub.f32 %v9393_v17, %v1976_v37 }
 0x55d   : > { %7551 = vpow2.f32 %v2227_v6 }
 0x55e   : > { %v2193_v34 = vmul.f32 1.442695, %v2092_v30  ;;  %2413 = vadd.xlane.f32.xlu0 %v2412_v3 }
 0x55f   : > { %2404 = vadd.xlane.f32.xlu1 %v2403_v36  ;;  %2341 = vadd.xlane.f32.xlu2 %v2340_v15 }
 0x560   : > { %7553 = vpow2.f32 %v2193_v34 }
 0x561   : > { %v7548_v17 = vpop.eup %7547  ;;  %7555 = vpow2.f32 %v2147_v60 }
 0x562   : > { %v9652_v0 = vpop.eup %7549  ;;  %v2514_v28 = vmul.f32 %v7548_v17, %v9391_v46  ;;  %v9657_v4 = vpop.xlane.xlu2 %1990  ;;  %7557 = vrcp.f32 %v2285_v16 }
 0x563   : > { %v9659_v40 = vpop.eup %7551  ;;  %7559 = vpow2.f32 %v2191_v52  ;;  %v2292_v46 = vsel %vm508_vm0, %v9652_v0, 0.0  ;;  %v2354_v56 = vpop.xlane.xlu0 %2353 }
 0x564   : > { %v2578_v62 = vpack.c.bf16 %v2514_v28, %v2514_v28  ;;  %v2409_v13 = vsel %vm508_vm0, %v9659_v40, 0.0 }
 0x566   : > { %v9661_v29 = vpop.eup %7553  ;;  %v2719_v9 = vunpack.c.l.b16 %v2578_v62 }
 0x567   : > { %2410 = vadd.xlane.f32.xlu1 %v2409_v13  ;;  %2293 = vadd.xlane.f32.xlu2 %v2292_v46  ;;  %v2358_v35 = vsel %vm508_vm0, %v9661_v29, 0.0  ;;  %v9669_v16 = vpop.eup %7555 }
 0x568   : > { %2359 = vadd.xlane.f32.xlu0 %v2358_v35  ;;  %v2725_v33 = vpack.c.b16 %v2719_v9, %v2718_v53  ;;  %v7558_v58 = vpop.eup %7557  ;;  %v2289_v37 = vsel %vm508_vm0, %v9669_v16, 0.0  ;;  %v13425_v35 = vld [vmem:[#allocation30_spill] sm:$0xff] }
 0x569   : > { %v9676_v6 = vpop.eup %7559  ;;  %v2515_v61 = vmul.f32 %v7558_v58, %v9378_v11  ;;  %v9686_v11 = vpop.f32.mrf.mxu3 }
 0x56a   : > { %v2288_v1 = vpop.xlane.xlu2 %2287  ;;  %v9673_v10 = vpop.xlane.xlu1 %1993  ;;  %6967 = vmatmul.msk.bf16.gmra.mxu1 %vm508_vm0, %v2725_v33  ;;  %v2355_v51 = vsel %vm508_vm0, %v9676_v6, 0.0  ;;  %v2052_v52 = vsel %vm508_vm0, %v9686_v11, -inf }
 0x56b   : > { %7561 = vrcp.f32 %v2288_v1  ;;  %v2579_v39 = vpack.c.bf16 %v2515_v61, %v2515_v61 }
 0x56c   : > { %7563 = vrcp.f32 %v2354_v56  ;;  %v13426_v56 = vld [vmem:[#allocation19_spill] sm:$0xff] }
 0x56d   : > { %v2720_v60 = vunpack.c.l.b16 %v2579_v39  ;;  %v13427_v39 = vld [vmem:[#allocation18_spill] sm:$0xff] }
 0x56f   : > { %2356 = vadd.xlane.f32.xlu1 %v2355_v51  ;;  %2050 = vmax.xlane.f32.xlu2 %v2049_v32 }
 0x570   : > { %2290 = vadd.xlane.f32.xlu0 %v2289_v37 }
 0x571   : > { %v7562_v30 = vpop.eup %7561 }
 0x572   : > { %v2516_v3 = vmul.f32 %v7562_v30, %v9419_v45  ;;  %v2303_v59 = vpop.xlane.xlu2 %2302  ;;  %v2351_v34 = vpop.xlane.xlu1 %2350 }
 0x573   : > { %v7564_v36 = vpop.eup %7563  ;;  %7565 = vrcp.f32 %v2351_v34 }
 0x574   : > { %v2580_v15 = vpack.c.bf16 %v2516_v3, %v2516_v3  ;;  %7567 = vrcp.f32 %v2303_v59  ;;  %v2538_v47 = vmul.f32 %v7564_v36, %v9407_v25 }
 0x576   : > { %v2721_v17 = vunpack.c.l.b16 %v2580_v15  ;;  %v2602_v13 = vpack.c.bf16 %v2538_v47, %v2538_v47 }
 0x577   : > { %2053 = vmax.xlane.f32.xlu1 %v2052_v52 }
 0x578   : > { %v2726_v28 = vpack.c.b16 %v2721_v17, %v2720_v60  ;;  %v2950_v51 = vunpack.c.l.b16 %v2602_v13  ;;  %v13428_v60 = vld [vmem:[#allocation22_spill] sm:$0xff]  ;;  %v13429_v13 = vld [vmem:[#allocation33_spill] sm:$0xff] }
 0x579   : > { %v7566_v62 = vpop.eup %7565  ;;  %v2096_v17 = vsub.f32 %v13428_v60, %v9655_v8  ;;  %v13430_v8 = vld [vmem:[#allocation21_spill] sm:$0xff] }
 0x57a   : > { %v1979_v53 = vpop.xlane.xlu2 %1978  ;;  %v2306_v45 = vpop.xlane.xlu1 %2305  ;;  %6968 = vmatmul.msk.bf16.gmra.mxu1 %vm508_vm0, %v2726_v28  ;;  %v2537_v46 = vmul.f32 %v7566_v62, %v9429_v21 }
 0x57b   : > { %v7568_v9 = vpop.eup %7567  ;;  %v2093_v33 = vsub.f32 %v13425_v35, %v1979_v53  ;;  %7569 = vrcp.f32 %v2306_v45  ;;  %v2201_v45 = vmul.f32 1.442695, %v2096_v17 }
 0x57c   : > { %v2601_v58 = vpack.c.bf16 %v2537_v46, %v2537_v46  ;;  %v2521_v61 = vmul.f32 %v7568_v9, %v13426_v56 }
 0x57d   : > { %v2195_v1 = vmul.f32 1.442695, %v2093_v33  ;;  %v2097_v33 = vsub.f32 %v13430_v8, %v9657_v4  ;;  %v13431_v4 = vld [vmem:[#allocation17_spill] sm:$0xff] }
 0x57e   : > { %v2949_v25 = vunpack.c.l.b16 %v2601_v58  ;;  %v2585_v30 = vpack.c.bf16 %v2521_v61, %v2521_v61 }
 0x57f   : > { %7571 = vpow2.f32 %v2195_v1  ;;  %v2203_v61 = vmul.f32 1.442695, %v2097_v33 }
 0x580   : > { %v2956_v37 = vpack.c.b16 %v2950_v51, %v2949_v25  ;;  %v2795_v47 = vunpack.c.l.b16 %v2585_v30 }
 0x581   : > { %v7570_v32 = vpop.eup %7569 }
 0x582   : > { %v2522_v3 = vmul.f32 %v7570_v32, %v13427_v39  ;;  %v1982_v59 = vpop.xlane.xlu1 %1981  ;;  %v2309_v34 = vpop.xlane.xlu2 %2308  ;;  %6979 = vmatmul.msk.bf16.gmra.mxu0 %vm508_vm0, %v2956_v37 }
 0x583   : > { %v2094_v36 = vsub.f32 %v9447_v19, %v1982_v59  ;;  %v9705_v19 = vpop.f32.mrf.mxu1 }
 0x584   : > { %v2586_v21 = vpack.c.bf16 %v2522_v3, %v2522_v3  ;;  %v2001_v1 = vsel %vm508_vm0, %v9705_v19, -inf }
 0x585   : > { %v9698_v15 = vpop.eup %7571  ;;  %v2197_v52 = vmul.f32 1.442695, %v2094_v36 }
 0x586   : > { %v2796_v28 = vunpack.c.l.b16 %v2586_v21  ;;  %v2361_v62 = vsel %vm508_vm0, %v9698_v15, 0.0  ;;  %v13432_v21 = vld [vmem:[#allocation36_spill] sm:$0xff] }
 0x587   : > { %7573 = vpow2.f32 %v2197_v52  ;;  %2362 = vadd.xlane.f32.xlu1 %v2361_v62 }
 0x588   : > { %v2802_v53 = vpack.c.b16 %v2796_v28, %v2795_v47  ;;  %7575 = vrcp.f32 %v2309_v34 }
 0x589   : > { %7577 = vpow2.f32 %v2201_v45 }
 0x58a   : > { %v2033_v9 = vpop.xlane.xlu2 %2032  ;;  %6971 = vmatmul.msk.bf16.gmra.mxu2 %vm508_vm0, %v2802_v53 }
 0x58b   : > { %v2111_v46 = vsub.f32 %v13429_v13, %v2033_v9  ;;  %v9729_v62 = vpop.f32.mrf.mxu1  ;;  %v13433_v9 = vld [vmem:[#allocation24_spill] sm:$0xff] }
 0x58c   : > { %v2095_v13 = vsub.f32 %v13433_v9, %v9617_v24 }
 0x58d   : > { %v9708_v35 = vpop.eup %7573  ;;  %v2231_v58 = vmul.f32 1.442695, %v2111_v46  ;;  %v13434_v46 = vld [vmem:[#allocation31_spill] sm:$0xff] }
 0x58e   : > { %v2364_v56 = vsel %vm508_vm0, %v9708_v35, 0.0  ;;  %v7576_v25 = vpop.eup %7575  ;;  %v2098_v8 = vsub.f32 %v13434_v46, %v9673_v10  ;;  %v2199_v24 = vmul.f32 1.442695, %v2095_v13 }
 0x58f   : > { %7579 = vpow2.f32 %v2231_v58  ;;  %2002 = vmax.xlane.f32.xlu1 %v2001_v1  ;;  %2365 = vadd.xlane.f32.xlu0 %v2364_v56  ;;  %v9716_v37 = vpop.eup %7577  ;;  %v2523_v39 = vmul.f32 %v7576_v25, %v13431_v4 }
 0x590   : > { %v2370_v3 = vsel %vm508_vm0, %v9716_v37, 0.0 }
 0x591   : > { %v2312_v51 = vpop.xlane.xlu1 %2311  ;;  %v2587_v36 = vpack.c.bf16 %v2523_v39, %v2523_v39 }
 0x592   : > { %7581 = vrcp.f32 %v2312_v51  ;;  %v2315_v32 = vpop.xlane.xlu2 %2314  ;;  %v2205_v51 = vmul.f32 1.442695, %v2098_v8 }
 0x593   : > { %7583 = vpow2.f32 %v2203_v61  ;;  %v2797_v58 = vunpack.c.l.b16 %v2587_v36  ;;  %v2004_v61 = vsel %vm508_vm0, %v9729_v62, -inf }
 0x594   : > { %7585 = vrcp.f32 %v2315_v32 }
 0x595   : > { %v9718_v30 = vpop.eup %7579 }
 0x596   : > { %v2415_v59 = vsel %vm508_vm0, %v9718_v30, 0.0 }
 0x597   : > { %2371 = vadd.xlane.f32.xlu1 %v2370_v3  ;;  %2416 = vadd.xlane.f32.xlu0 %v2415_v59 }
 0x598   : > { %v7582_v34 = vpop.eup %7581 }
 0x599   : > { %v2524_v60 = vmul.f32 %v7582_v34, %v13432_v21  ;;  %v2036_v17 = vpop.xlane.xlu1 %2035  ;;  %v9727_v28 = vpop.eup %7583  ;;  %v13435_v34 = vld [vmem:[#allocation35_spill] sm:$0xff] }
 0x59a   : > { %v2112_v52 = vsub.f32 %v9476_v41, %v2036_v17  ;;  %v2039_v47 = vpop.xlane.xlu2 %2038  ;;  %v2373_v41 = vsel %vm508_vm0, %v9727_v28, 0.0  ;;  %v7586_v32 = vpop.eup %7585 }
 0x59b   : > { %v2588_v53 = vpack.c.bf16 %v2524_v60, %v2524_v60  ;;  %v2113_v45 = vsub.f32 %v9500_v31, %v2039_v47  ;;  %v2525_v36 = vmul.f32 %v7586_v32, %v13435_v34 }
 0x59c   : > { %v2233_v33 = vmul.f32 1.442695, %v2112_v52 }
 0x59d   : > { %v2798_v1 = vunpack.c.l.b16 %v2588_v53  ;;  %v2235_v56 = vmul.f32 1.442695, %v2113_v45  ;;  %v2589_v47 = vpack.c.bf16 %v2525_v36, %v2525_v36 }
 0x59e   : > { %7587 = vpow2.f32 %v2233_v33 }
 0x59f   : > { %7589 = vpow2.f32 %v2235_v56  ;;  %2374 = vadd.xlane.f32.xlu1 %v2373_v41  ;;  %2005 = vmax.xlane.f32.xlu0 %v2004_v61  ;;  %v2803_v31 = vpack.c.b16 %v2798_v1, %v2797_v58  ;;  %v2799_v1 = vunpack.c.l.b16 %v2589_v47 }
 0x5a1   : > { %6972 = vmatmul.msk.bf16.gmra.mxu2 %vm508_vm0, %v2803_v31  ;;  %v2393_v10 = vpop.xlane.xlu0 %2392 }
 0x5a2   : > { %v2318_v25 = vpop.xlane.xlu1 %2317  ;;  %v2321_v4 = vpop.xlane.xlu2 %2320 }
 0x5a3   : > { %7591 = vrcp.f32 %v2318_v25 }
 0x5a4   : > { %v9741_v39 = vpop.eup %7587  ;;  %7593 = vpow2.f32 %v2199_v24 }
 0x5a5   : > { %v9743_v3 = vpop.eup %7589  ;;  %7595 = vpow2.f32 %v2205_v51  ;;  %v2418_v59 = vsel %vm508_vm0, %v9741_v39, 0.0 }
 0x5a6   : > { %2419 = vadd.xlane.f32.xlu2 %v2418_v59  ;;  %v2421_v21 = vsel %vm508_vm0, %v9743_v3, 0.0 }
 0x5a7   : > { %2422 = vadd.xlane.f32.xlu0 %v2421_v21 }
 0x5a9   : > { %v7592_v60 = vpop.eup %7591  ;;  %v2327_v17 = vpop.xlane.xlu0 %2326 }
 0x5aa   : > { %v9750_v52 = vpop.eup %7593  ;;  %v2526_v53 = vmul.f32 %v7592_v60, %v9528_v50  ;;  %v2042_v45 = vpop.xlane.xlu1 %2041 }
 0x5ab   : > { %v2396_v9 = vpop.xlane.xlu2 %2395  ;;  %v9753_v13 = vpop.eup %7595  ;;  %v2114_v46 = vsub.f32 %v9534_v5, %v2042_v45  ;;  %v2367_v58 = vsel %vm508_vm0, %v9750_v52, 0.0 }
 0x5ac   : > { %7597 = vrcp.f32 %v2396_v9  ;;  %v2590_v8 = vpack.c.bf16 %v2526_v53, %v2526_v53  ;;  %v2376_v50 = vsel %vm508_vm0, %v9753_v13, 0.0 }
 0x5ad   : > { %7599 = vrcp.f32 %v2393_v10  ;;  %v2237_v33 = vmul.f32 1.442695, %v2114_v46 }
 0x5ae   : > { %7601 = vrcp.f32 %v2321_v4  ;;  %v2800_v56 = vunpack.c.l.b16 %v2590_v8  ;;  %2368 = vadd.xlane.f32.xlu2 %v2367_v58 }
 0x5af   : > { %7603 = vpow2.f32 %v2237_v33  ;;  %2377 = vadd.xlane.f32.xlu0 %v2376_v50 }
 0x5b0   : > { %v2804_v41 = vpack.c.b16 %v2800_v56, %v2799_v1 }
 0x5b1   : > { %v2402_v31 = vpop.xlane.xlu0 %2401 }
 0x5b2   : > { %v7598_v61 = vpop.eup %7597  ;;  %v2324_v24 = vpop.xlane.xlu1 %2323  ;;  %6973 = vmatmul.msk.bf16.gmra.mxu2 %vm508_vm0, %v2804_v41 }
 0x5b3   : > { %v7600_v5 = vpop.eup %7599  ;;  %v2045_v51 = vpop.xlane.xlu2 %2044  ;;  %7605 = vrcp.f32 %v2324_v24  ;;  %v2552_v4 = vmul.f32 %v7598_v61, %v9547_v48 }
 0x5b4   : > { %v7602_v10 = vpop.eup %7601  ;;  %v2115_v25 = vsub.f32 %v9558_v14, %v2045_v51  ;;  %v2551_v34 = vmul.f32 %v7600_v5, %v9524_v49 }
 0x5b5   : > { %v9763_v32 = vpop.eup %7603  ;;  %v2527_v36 = vmul.f32 %v7602_v10, %v9520_v20  ;;  %v2616_v60 = vpack.c.bf16 %v2552_v4, %v2552_v4 }
 0x5b6   : > { %v2239_v59 = vmul.f32 1.442695, %v2115_v25  ;;  %v2424_v21 = vsel %vm508_vm0, %v9763_v32, 0.0  ;;  %v2615_v45 = vpack.c.bf16 %v2551_v34, %v2551_v34 }
 0x5b7   : > { %2425 = vadd.xlane.f32.xlu2 %v2424_v21  ;;  %v2591_v9 = vpack.c.bf16 %v2527_v36, %v2527_v36  ;;  %v3102_v49 = vunpack.c.l.b16 %v2616_v60 }
 0x5b8   : > { %7607 = vpow2.f32 %v2239_v59  ;;  %v3101_v1 = vunpack.c.l.b16 %v2615_v45 }
 0x5b9   : > { %v7606_v47 = vpop.eup %7605  ;;  %v2333_v53 = vpop.xlane.xlu0 %2332  ;;  %v2870_v56 = vunpack.c.l.b16 %v2591_v9 }
 0x5ba   : > { %v2528_v14 = vmul.f32 %v7606_v47, %v9568_v63  ;;  %v2048_v48 = vpop.xlane.xlu1 %2047  ;;  %v3109_v63 = vpack.c.b16 %v3102_v49, %v3101_v1 }
 0x5bb   : > { %v2330_v46 = vpop.xlane.xlu2 %2329  ;;  %v2116_v8 = vsub.f32 %v9581_v23, %v2048_v48 }
 0x5bc   : > { %7609 = vrcp.f32 %v2330_v46  ;;  %v2592_v20 = vpack.c.bf16 %v2528_v14, %v2528_v14 }
 0x5bd   : > { %7611 = vrcp.f32 %v2327_v17  ;;  %v2241_v58 = vmul.f32 1.442695, %v2116_v8 }
 0x5be   : > { %v9771_v33 = vpop.eup %7607  ;;  %7613 = vrcp.f32 %v2402_v31  ;;  %v2871_v50 = vunpack.c.l.b16 %v2592_v20 }
 0x5bf   : > { %v2427_v41 = vsel %vm508_vm0, %v9771_v33, 0.0  ;;  %7615 = vpow2.f32 %v2241_v58 }
 0x5c0   : > { %2428 = vadd.xlane.f32.xlu2 %v2427_v41  ;;  %v2878_v61 = vpack.c.b16 %v2871_v50, %v2870_v56 }
 0x5c1   : > { %v2408_v23 = vpop.xlane.xlu0 %2407 }
 0x5c2   : > { %v7610_v5 = vpop.eup %7609  ;;  %v2399_v17 = vpop.xlane.xlu1 %2398  ;;  %6974 = vmatmul.msk.bf16.vlgmr.msra.gmra.mxu3 %vm508_vm0, %v2878_v61  ;;  %6986 = vmatmul.msk.bf16.vlgmr.msrb.gmra.mxu2 %vm508_vm0, %v3109_v63 }
 0x5c3   : > { %v7612_v24 = vpop.eup %7611  ;;  %v1997_v31 = vpop.xlane.xlu2 %1996  ;;  %7617 = vrcp.f32 %v2399_v17  ;;  %v2530_v25 = vmul.f32 %v7610_v5, %v9585_v2 }
 0x5c4   : > { %v7614_v51 = vpop.eup %7613  ;;  %v2099_v10 = vsub.f32 %v9596_v55, %v1997_v31  ;;  %v2529_v34 = vmul.f32 %v7612_v24, %v9543_v38 }
 0x5c5   : > { %v9779_v4 = vpop.eup %7615  ;;  %v2554_v36 = vmul.f32 %v7614_v51, %v9565_v43  ;;  %v2594_v60 = vpack.c.bf16 %v2530_v25, %v2530_v25 }
 0x5c6   : > { %v2207_v59 = vmul.f32 1.442695, %v2099_v10  ;;  %v2430_v21 = vsel %vm508_vm0, %v9779_v4, 0.0  ;;  %v2593_v9 = vpack.c.bf16 %v2529_v34, %v2529_v34 }
 0x5c7   : > { %2431 = vadd.xlane.f32.xlu1 %v2430_v21  ;;  %v2618_v14 = vpack.c.bf16 %v2554_v36, %v2554_v36  ;;  %v2873_v38 = vunpack.c.l.b16 %v2594_v60 }
 0x5c8   : > { %7619 = vpow2.f32 %v2207_v59  ;;  %v2872_v20 = vunpack.c.l.b16 %v2593_v9 }
 0x5c9   : > { %v7618_v47 = vpop.eup %7617  ;;  %v2339_v45 = vpop.xlane.xlu0 %2338  ;;  %v3104_v58 = vunpack.c.l.b16 %v2618_v14 }
 0x5ca   : > { %v2553_v55 = vmul.f32 %v7618_v47, %v9602_v12  ;;  %v2000_v2 = vpop.xlane.xlu1 %1999  ;;  %v2879_v12 = vpack.c.b16 %v2873_v38, %v2872_v20 }
 0x5cb   : > { %v2336_v48 = vpop.xlane.xlu2 %2335  ;;  %v2100_v46 = vsub.f32 %v9622_v42, %v2000_v2 }
 0x5cc   : > { %7621 = vrcp.f32 %v2336_v48  ;;  %v2617_v43 = vpack.c.bf16 %v2553_v55, %v2553_v55 }
 0x5cd   : > { %7623 = vrcp.f32 %v2333_v53  ;;  %v2209_v49 = vmul.f32 1.442695, %v2100_v46 }
 0x5ce   : > { %v9787_v8 = vpop.eup %7619  ;;  %7625 = vrcp.f32 %v2408_v23  ;;  %v3103_v1 = vunpack.c.l.b16 %v2617_v43  ;;  %v9793_v23 = vpop.f32.mrf.mxu0 }
 0x5cf   : > { %v2379_v56 = vsel %vm508_vm0, %v9787_v8, 0.0  ;;  %7627 = vpow2.f32 %v2209_v49 }
 0x5d0   : > { %2380 = vadd.xlane.f32.xlu0 %v2379_v56  ;;  %v3110_v50 = vpack.c.b16 %v3104_v58, %v3103_v1 }
 0x5d1   : > { %v2414_v42 = vpop.xlane.xlu0 %2413 }
 0x5d2   : > { %v7622_v41 = vpop.eup %7621  ;;  %v2405_v53 = vpop.xlane.xlu1 %2404  ;;  %6975 = vmatmul.msk.bf16.gmra.mxu3 %vm508_vm0, %v2879_v12  ;;  %6987 = vmatmul.msk.bf16.gmra.mxu2 %vm508_vm0, %v3110_v50 }
 0x5d3   : > { %v7624_v63 = vpop.eup %7623  ;;  %v2342_v61 = vpop.xlane.xlu2 %2341  ;;  %7629 = vrcp.f32 %v2405_v53  ;;  %v2532_v24 = vmul.f32 %v7622_v41, %v9620_v44 }
 0x5d4   : > { %v7626_v5 = vpop.eup %7625  ;;  %v2531_v31 = vmul.f32 %v7624_v63, %v9579_v22  ;;  %7631 = vrcp.f32 %v2339_v45 }
 0x5d5   : > { %v9796_v17 = vpop.eup %7627  ;;  %v2556_v51 = vmul.f32 %v7626_v5, %v9594_v57  ;;  %v2596_v25 = vpack.c.bf16 %v2532_v24, %v2532_v24  ;;  %7633 = vrcp.f32 %v2414_v42 }
 0x5d6   : > { %v2382_v10 = vsel %vm508_vm0, %v9796_v17, 0.0  ;;  %v2595_v34 = vpack.c.bf16 %v2531_v31, %v2531_v31  ;;  %7635 = vrcp.f32 %v2342_v61  ;;  %v9803_v57 = vpop.f32.mrf.mxu0 }
 0x5d7   : > { %2383 = vadd.xlane.f32.xlu2 %v2382_v10  ;;  %v2620_v36 = vpack.c.bf16 %v2556_v51, %v2556_v51  ;;  %v2875_v9 = vunpack.c.l.b16 %v2596_v25  ;;  %v9816_v51 = vpop.f32.mrf.mxu2 }
 0x5d8   : > { %v2874_v14 = vunpack.c.l.b16 %v2595_v34 }
 0x5d9   : > { %v7630_v59 = vpop.eup %7629  ;;  %v3106_v55 = vunpack.c.l.b16 %v2620_v36 }
 0x5da   : > { %v2555_v21 = vmul.f32 %v7630_v59, %v9634_v54  ;;  %v2411_v60 = vpop.xlane.xlu1 %2410  ;;  %v7632_v45 = vpop.eup %7631  ;;  %v2880_v46 = vpack.c.b16 %v2875_v9, %v2874_v14 }
 0x5db   : > { %v2294_v44 = vpop.xlane.xlu2 %2293  ;;  %v2360_v47 = vpop.xlane.xlu0 %2359  ;;  %7637 = vrcp.f32 %v2411_v60  ;;  %v2533_v63 = vmul.f32 %v7632_v45, %v9614_v27 }
 0x5dc   : > { %v2619_v22 = vpack.c.bf16 %v2555_v21, %v2555_v21  ;;  %7639 = vrcp.f32 %v2360_v47  ;;  %v7634_v48 = vpop.eup %7633 }
 0x5dd   : > { %7641 = vrcp.f32 %v2294_v44  ;;  %v7636_v54 = vpop.eup %7635  ;;  %v2558_v61 = vmul.f32 %v7634_v48, %v9636_v26  ;;  %v2597_v25 = vpack.c.bf16 %v2533_v63, %v2533_v63 }
 0x5de   : > { %v3105_v2 = vunpack.c.l.b16 %v2619_v22  ;;  %v2534_v50 = vmul.f32 %v7636_v54, %v9639_v7  ;;  %v9814_v24 = vpop.f32.mrf.mxu0 }
 0x5df   : > { %v2622_v34 = vpack.c.bf16 %v2558_v61, %v2558_v61  ;;  %v2876_v22 = vunpack.c.l.b16 %v2597_v25 }
 0x5e0   : > { %v3111_v38 = vpack.c.b16 %v3106_v55, %v3105_v2 }
 0x5e1   : > { %v7638_v43 = vpop.eup %7637  ;;  %v3108_v2 = vunpack.c.l.b16 %v2622_v34 }
 0x5e2   : > { %v2357_v49 = vpop.xlane.xlu1 %2356  ;;  %6976 = vmatmul.msk.bf16.gmra.mxu3 %vm508_vm0, %v2880_v46  ;;  %6988 = vmatmul.msk.bf16.gmra.mxu2 %vm508_vm0, %v3111_v38  ;;  %v7640_v58 = vpop.eup %7639  ;;  %v2557_v41 = vmul.f32 %v7638_v43, %v9659_v40 }
 0x5e3   : > { %v2051_v20 = vpop.xlane.xlu2 %2050  ;;  %7643 = vrcp.f32 %v2357_v49  ;;  %v2291_v56 = vpop.xlane.xlu0 %2290  ;;  %v2540_v53 = vmul.f32 %v7640_v58, %v9661_v29 }
 0x5e4   : > { %v2117_v1 = vsub.f32 %v9671_v18, %v2051_v20  ;;  %v7642_v12 = vpop.eup %7641  ;;  %7645 = vrcp.f32 %v2291_v56  ;;  %v2598_v18 = vpack.c.bf16 %v2534_v50, %v2534_v50  ;;  %v2621_v7 = vpack.c.bf16 %v2557_v41, %v2557_v41  ;;  %v9829_v43 = vpop.f32.mrf.mxu2 }
 0x5e5   : > { %v2518_v5 = vmul.f32 %v7642_v12, %v9652_v0  ;;  %v2604_v40 = vpack.c.bf16 %v2540_v53, %v2540_v53 }
 0x5e6   : > { %v2243_v42 = vmul.f32 1.442695, %v2117_v1  ;;  %v2877_v36 = vunpack.c.l.b16 %v2598_v18  ;;  %v3107_v44 = vunpack.c.l.b16 %v2621_v7  ;;  %v9825_v54 = vpop.f32.mrf.mxu0 }
 0x5e7   : > { %v2582_v29 = vpack.c.bf16 %v2518_v5, %v2518_v5  ;;  %v2952_v14 = vunpack.c.l.b16 %v2604_v40 }
 0x5e8   : > { %7647 = vpow2.f32 %v2243_v42  ;;  %v3112_v46 = vpack.c.b16 %v3108_v2, %v3107_v44 }
 0x5e9   : > { %v7644_v31 = vpop.eup %7643  ;;  %v2723_v45 = vunpack.c.l.b16 %v2582_v29 }
 0x5ea   : > { %v7646_v10 = vpop.eup %7645  ;;  %v2539_v59 = vmul.f32 %v7644_v31, %v9676_v6  ;;  %v2054_v27 = vpop.xlane.xlu1 %2053 }
 0x5eb   : > { %v2517_v26 = vmul.f32 %v7646_v10, %v9669_v16  ;;  %v2118_v0 = vsub.f32 %v9686_v11, %v2054_v27  ;;  %v2881_v16 = vpack.c.b16 %v2877_v36, %v2876_v22 }
 0x5ec   : > { %v2603_v21 = vpack.c.bf16 %v2539_v59, %v2539_v59  ;;  %v2842_v1 = vpop.f32.mrf.mxu2 }
 0x5ed   : > { %v2581_v47 = vpack.c.bf16 %v2517_v26, %v2517_v26  ;;  %v2245_v9 = vmul.f32 1.442695, %v2118_v0 }
 0x5ee   : > { %v9821_v60 = vpop.eup %7647  ;;  %v2951_v55 = vunpack.c.l.b16 %v2603_v21  ;;  %v9837_v56 = vpop.f32.mrf.mxu0 }
 0x5ef   : > { %v2433_v6 = vsel %vm508_vm0, %v9821_v60, 0.0  ;;  %v2722_v48 = vunpack.c.l.b16 %v2581_v47  ;;  %7649 = vpow2.f32 %v2245_v9 }
 0x5f0   : > { %2434 = vadd.xlane.f32.xlu1 %v2433_v6  ;;  %v2957_v11 = vpack.c.b16 %v2952_v14, %v2951_v55 }
 0x5f1   : > { %v2727_v38 = vpack.c.b16 %v2723_v45, %v2722_v48 }
 0x5f2   : > { %6977 = vmatmul.msk.bf16.gmra.mxu3 %vm508_vm0, %v2881_v16  ;;  %6980 = vmatmul.msk.bf16.gmra.mxu0 %vm508_vm0, %v2957_v11 }
 0x5f3   : > { %6989 = vmatmul.msk.bf16.gmra.mxu2 %vm508_vm0, %v3112_v46  ;;  %6969 = vmatmul.msk.bf16.gmra.mxu1 %vm508_vm0, %v2727_v38 }
 0x5f4   : > { %v2844_v63 = vpop.f32.mrf.mxu2 }
 0x5f5   : > { %v9833_v49 = vpop.eup %7649  ;;  %v7275_v31 = vpack.i.bf16 %v2844_v63, %v2842_v1 }
 0x5f6   : > { %v2436_v20 = vsel %vm508_vm0, %v9833_v49, 0.0  ;;  %v9840_v61 = vpop.f32.mrf.mxu0 }
 0x5f7   : > { %2437 = vadd.xlane.f32.xlu0 %v2436_v20 }
 0x5fa   : > { %v2363_v58 = vpop.xlane.xlu1 %2362 }
 0x5fb   : > { %7651 = vrcp.f32 %v2363_v58 }
 0x5fe   : > { %v2996_v27 = vpop.f32.mrf.mxu0 }
 0x601   : > { %v7652_v41 = vpop.eup %7651 }
 0x602   : > { %v2003_v12 = vpop.xlane.xlu1 %2002  ;;  %v2366_v50 = vpop.xlane.xlu0 %2365  ;;  %v2541_v5 = vmul.f32 %v7652_v41, %v9698_v15 }
 0x603   : > { %v2101_v42 = vsub.f32 %v9705_v19, %v2003_v12  ;;  %7653 = vrcp.f32 %v2366_v50 }
 0x604   : > { %v2605_v7 = vpack.c.bf16 %v2541_v5, %v2541_v5 }
 0x605   : > { %v2211_v53 = vmul.f32 1.442695, %v2101_v42 }
 0x606   : > { %v2953_v34 = vunpack.c.l.b16 %v2605_v7  ;;  %v2998_v47 = vpop.f32.mrf.mxu0 }
 0x607   : > { %7655 = vpow2.f32 %v2211_v53  ;;  %v7280_v58 = vpack.i.bf16 %v2998_v47, %v2996_v27 }
 0x609   : > { %v7654_v18 = vpop.eup %7653 }
 0x60a   : > { %v2542_v10 = vmul.f32 %v7654_v18, %v9708_v35  ;;  %v2417_v25 = vpop.xlane.xlu0 %2416  ;;  %v2372_v9 = vpop.xlane.xlu1 %2371 }
 0x60b   : > { %7276 = vrot.lane.b32.xlu0 %v7275_v31, %s7912_s24  ;;  %7657 = vrcp.f32 %v2417_v25 }
 0x60c   : > { %v2606_v40 = vpack.c.bf16 %v2542_v10, %v2542_v10 }
 0x60d   : > { %v9845_v59 = vpop.eup %7655  ;;  %v2847_v19 = vpop.f32.mrf.mxu2 }
 0x60e   : > { %v2954_v29 = vunpack.c.l.b16 %v2606_v40  ;;  %v2385_v15 = vsel %vm508_vm0, %v9845_v59, 0.0  ;;  %v3001_v48 = vpop.f32.mrf.mxu0 }
 0x60f   : > { %2386 = vadd.xlane.f32.xlu2 %v2385_v15 }
 0x610   : > { %v2958_v26 = vpack.c.b16 %v2954_v29, %v2953_v34 }
 0x611   : > { %v7658_v14 = vpop.eup %7657 }
 0x612   : > { %6981 = vmatmul.msk.bf16.gmra.mxu0 %vm508_vm0, %v2958_v26  ;;  %v2006_v0 = vpop.xlane.xlu0 %2005  ;;  %v2559_v6 = vmul.f32 %v7658_v14, %v9718_v30 }
 0x613   : > { %v2102_v35 = vsub.f32 %v9729_v62, %v2006_v0 }
 0x614   : > { %v2623_v16 = vpack.c.bf16 %v2559_v6, %v2559_v6 }
 0x615   : > { %v2213_v36 = vmul.f32 1.442695, %v2102_v35  ;;  %v2849_v21 = vpop.f32.mrf.mxu2 }
 0x616   : > { %v7290_v44 = vpack.i.bf16 %v2849_v21, %v2847_v19  ;;  %v3178_v30 = vunpack.c.l.b16 %v2623_v16  ;;  %v3003_v18 = vpop.f32.mrf.mxu0 }
 0x617   : > { %7659 = vpow2.f32 %v2213_v36  ;;  %v7295_v25 = vpack.i.bf16 %v3003_v18, %v3001_v48 }
 0x618   : > { %7291 = vrot.lane.b32.xlu0 %v7290_v44, %s7912_s24 }
 0x619   : > { %v2420_v22 = vpop.xlane.xlu2 %2419 }
 0x61a   : > { %7661 = vrcp.f32 %v2420_v22  ;;  %v2423_v2 = vpop.xlane.xlu0 %2422 }
 0x61b   : > { %7663 = vrcp.f32 %v2372_v9 }
 0x61d   : > { %v9852_v55 = vpop.eup %7659 }
 0x61e   : > { %v2388_v62 = vsel %vm508_vm0, %v9852_v55, 0.0 }
 0x61f   : > { %2389 = vadd.xlane.f32.xlu1 %v2388_v62 }
 0x620   : > { %v7662_v45 = vpop.eup %7661 }
 0x621   : > { %v2560_v11 = vmul.f32 %v7662_v45, %v9741_v39  ;;  %v2369_v46 = vpop.xlane.xlu2 %2368  ;;  %v7664_v38 = vpop.eup %7663 }
 0x622   : > { %7665 = vrcp.f32 %v2369_v46  ;;  %v2544_v12 = vmul.f32 %v7664_v38, %v9716_v37  ;;  %v2378_v42 = vpop.xlane.xlu0 %2377  ;;  %v2375_v39 = vpop.xlane.xlu1 %2374 }
 0x623   : > { %v2624_v20 = vpack.c.bf16 %v2560_v11, %v2560_v11  ;;  %7667 = vrcp.f32 %v2423_v2 }
 0x624   : > { %v9858_v1 = vpop.f32.mrf.mxu2  ;;  %v2608_v53 = vpack.c.bf16 %v2544_v12, %v2544_v12  ;;  %7669 = vrcp.f32 %v2378_v42 }
 0x625   : > { %v3179_v50 = vunpack.c.l.b16 %v2624_v20 }
 0x626   : > { %v3025_v40 = vunpack.c.l.b16 %v2608_v53 }
 0x627   : > { %v3186_v41 = vpack.c.b16 %v3179_v50, %v3178_v30  ;;  %7281 = vrot.lane.b32.xlu2 %v7280_v58, %s7913_s22 }
 0x628   : > { %v7666_v63 = vpop.eup %7665 }
 0x629   : > { %v2543_v5 = vmul.f32 %v7666_v63, %v9750_v52  ;;  %6990 = vmatmul.msk.bf16.vlgmr.msrb.gmra.mxu3 %vm508_vm0, %v3186_v41  ;;  %v7668_v7 = vpop.eup %7667 }
 0x62a   : > { %v2426_v31 = vpop.xlane.xlu2 %2425  ;;  %v2561_v27 = vmul.f32 %v7668_v7, %v9743_v3  ;;  %v7670_v52 = vpop.eup %7669 }
 0x62b   : > { %v2607_v37 = vpack.c.bf16 %v2543_v5, %v2543_v5  ;;  %7671 = vrcp.f32 %v2426_v31  ;;  %v2546_v36 = vmul.f32 %v7670_v52, %v9753_v13 }
 0x62c   : > { %7673 = vrcp.f32 %v2375_v39  ;;  %v9864_v10 = vpop.f32.mrf.mxu2  ;;  %v2625_v26 = vpack.c.bf16 %v2561_v27, %v2561_v27 }
 0x62d   : > { %v3024_v19 = vunpack.c.l.b16 %v2607_v37  ;;  %v2610_v22 = vpack.c.bf16 %v2546_v36, %v2546_v36 }
 0x62e   : > { %v3180_v3 = vunpack.c.l.b16 %v2625_v26  ;;  %v9886_v26 = vpop.f32.mrf.mxu1 }
 0x62f   : > { %v3032_v34 = vpack.c.b16 %v3025_v40, %v3024_v19  ;;  %7296 = vrot.lane.b32.xlu2 %v7295_v25, %s7913_s22  ;;  %v3027_v45 = vunpack.c.l.b16 %v2610_v22  ;;  %v7305_v40 = vpack.i.bf16 %v9864_v10, %v9858_v1 }
 0x631   : > { %v7672_v29 = vpop.eup %7671  ;;  %6982 = vmatmul.msk.bf16.vlgmr.msra.gmra.mxu1 %vm508_vm0, %v3032_v34 }
 0x632   : > { %v7674_v15 = vpop.eup %7673  ;;  %v2562_v0 = vmul.f32 %v7672_v29, %v9763_v32 }
 0x633   : > { %v2429_v35 = vpop.xlane.xlu2 %2428  ;;  %v2545_v44 = vmul.f32 %v7674_v15, %v9727_v28 }
 0x634   : > { %v2626_v21 = vpack.c.bf16 %v2562_v0, %v2562_v0  ;;  %7675 = vrcp.f32 %v2429_v35 }
 0x635   : > { %v2857_v47 = vpop.f32.mrf.mxu2  ;;  %v2609_v6 = vpack.c.bf16 %v2545_v44, %v2545_v44 }
 0x636   : > { %v3181_v9 = vunpack.c.l.b16 %v2626_v21 }
 0x637   : > { %v3026_v32 = vunpack.c.l.b16 %v2609_v6 }
 0x638   : > { %v3187_v14 = vpack.c.b16 %v3181_v9, %v3180_v3 }
 0x639   : > { %v3033_v16 = vpack.c.b16 %v3027_v45, %v3026_v32 }
 0x63a   : > { %v2432_v2 = vpop.xlane.xlu1 %2431  ;;  %6991 = vmatmul.msk.bf16.gmra.mxu3 %vm508_vm0, %v3187_v14  ;;  %v7676_v62 = vpop.eup %7675 }
 0x63b   : > { %7677 = vrcp.f32 %v2432_v2  ;;  %v2563_v13 = vmul.f32 %v7676_v62, %v9771_v33 }
 0x63d   : > { %v2859_v48 = vpop.f32.mrf.mxu2  ;;  %v2627_v28 = vpack.c.bf16 %v2563_v13, %v2563_v13 }
 0x63e   : > { %v7320_v29 = vpack.i.bf16 %v2859_v48, %v2857_v47  ;;  %v9889_v47 = vpop.f32.mrf.mxu1 }
 0x63f   : > { %v3182_v30 = vunpack.c.l.b16 %v2627_v28 }
 0x641   : > { %v7678_v11 = vpop.eup %7677  ;;  %6983 = vmatmul.msk.bf16.gmra.mxu1 %vm508_vm0, %v3033_v16 }
 0x642   : > { %v2564_v46 = vmul.f32 %v7678_v11, %v9779_v4 }
 0x643   : > { %v2381_v38 = vpop.xlane.xlu0 %2380 }
 0x644   : > { %v2628_v20 = vpack.c.bf16 %v2564_v46, %v2564_v46  ;;  %7679 = vrcp.f32 %v2381_v38 }
 0x645   : > { %v2919_v58 = vpop.f32.mrf.mxu3  ;;  %v3150_v12 = vpop.f32.mrf.mxu2 }
 0x646   : > { %v3183_v50 = vunpack.c.l.b16 %v2628_v20  ;;  %v9895_v48 = vpop.f32.mrf.mxu1 }
 0x648   : > { %v3188_v41 = vpack.c.b16 %v3183_v50, %v3182_v30  ;;  %v7181_v50 = vld [vmem:[%s13127_s4 + $0x18] sm:$0xff] }
 0x649   : > { %3561 = vmatpush.bf16.msrb.mxu0 %v7181_v50 }
 0x64a   : > { %v2384_v42 = vpop.xlane.xlu2 %2383  ;;  %6992 = vmatmul.msk.bf16.gmra.mxu3 %vm508_vm0, %v3188_v41  ;;  %v7680_v63 = vpop.eup %7679 }
 0x64b   : > { %7681 = vrcp.f32 %v2384_v42  ;;  %v2547_v39 = vmul.f32 %v7680_v63, %v9787_v8  ;;  %v7180_v63 = vld [vmem:[%s13127_s4 + $0x10] sm:$0xff] }
 0x64d   : > { %v2921_v33 = vpop.f32.mrf.mxu3  ;;  %v3152_v53 = vpop.f32.mrf.mxu2  ;;  %v2611_v18 = vpack.c.bf16 %v2547_v39, %v2547_v39  ;;  %3562 = vmatpush.bf16.msrb.mxu0 %v7180_v63 }
 0x64e   : > { %v7285_v5 = vpack.i.bf16 %v3152_v53, %v3150_v12  ;;  %v7335_v0 = vpack.i.bf16 %v2921_v33, %v2919_v58  ;;  %v9900_v30 = vpop.f32.mrf.mxu1 }
 0x64f   : > { %v3028_v19 = vunpack.c.l.b16 %v2611_v18 }
 0x650   : > { %7286 = vrot.lane.b32.xlu1 %v7285_v5, %s7914_s23 }
 0x651   : > { %v7682_v4 = vpop.eup %7681 }
 0x652   : > { %v2548_v31 = vmul.f32 %v7682_v4, %v9796_v17 }
 0x654   : > { %v2612_v7 = vpack.c.bf16 %v2548_v31, %v2548_v31 }
 0x655   : > { %v2924_v37 = vpop.f32.mrf.mxu3  ;;  %v3155_v25 = vpop.f32.mrf.mxu2 }
 0x656   : > { %v3029_v27 = vunpack.c.l.b16 %v2612_v7  ;;  %v9907_v41 = vpop.f32.mrf.mxu1 }
 0x658   : > { %7306 = vrot.lane.b32.xlu1 %v7305_v40, %s7912_s24  ;;  %v3034_v34 = vpack.c.b16 %v3029_v27, %v3028_v19 }
 0x65a   : > { %6984 = vmatmul.msk.bf16.gmra.mxu1 %vm508_vm0, %v3034_v34 }
 0x65d   : > { %v2926_v8 = vpop.f32.mrf.mxu3  ;;  %v3157_v52 = vpop.f32.mrf.mxu2 }
 0x65e   : > { %v7300_v15 = vpack.i.bf16 %v3157_v52, %v3155_v25  ;;  %v7350_v3 = vpack.i.bf16 %v2926_v8, %v2924_v37  ;;  %v9912_v5 = vpop.f32.mrf.mxu1  ;;  %v7179_v8 = vld [vmem:[%s13127_s4 + $0x8] sm:$0xff] }
 0x65f   : > { %3563 = vmatpush.bf16.msrb.mxu0 %v7179_v8 }
 0x660   : > { %7301 = vrot.lane.b32.xlu0 %v7300_v15, %s7914_s23  ;;  %7321 = vrot.lane.b32.xlu1 %v7320_v29, %s7912_s24 }
 0x663   : > { %v2435_v17 = vpop.xlane.xlu1 %2434 }
 0x664   : > { %7683 = vrcp.f32 %v2435_v17 }
 0x665   : > { %v2929_v1 = vpop.f32.mrf.mxu3  ;;  %v3160_v10 = vpop.f32.mrf.mxu2 }
 0x668   : > { %7336 = vrot.lane.b32.xlu1 %v7335_v0, %s7912_s24 }
 0x66a   : > { %v2438_v35 = vpop.xlane.xlu0 %2437  ;;  %v7684_v36 = vpop.eup %7683 }
 0x66b   : > { %7685 = vrcp.f32 %v2438_v35  ;;  %v2565_v9 = vmul.f32 %v7684_v36, %v9821_v60 }
 0x66d   : > { %v2931_v21 = vpop.f32.mrf.mxu3  ;;  %v3162_v44 = vpop.f32.mrf.mxu2  ;;  %v2629_v2 = vpack.c.bf16 %v2565_v9, %v2565_v9 }
 0x66e   : > { %v7315_v22 = vpack.i.bf16 %v3162_v44, %v3160_v10  ;;  %v7365_v11 = vpack.i.bf16 %v2931_v21, %v2929_v1 }
 0x66f   : > { %v3006_v14 = vpop.f32.mrf.mxu0  ;;  %v3184_v13 = vunpack.c.l.b16 %v2629_v2 }
 0x670   : > { %7316 = vrot.lane.b32.xlu0 %v7315_v22, %s7914_s23  ;;  %7351 = vrot.lane.b32.xlu1 %v7350_v3, %s7912_s24  ;;  %v9917_v40 = vpop.f32.mrf.mxu1 }
 0x671   : > { %v7686_v6 = vpop.eup %7685 }
 0x672   : > { %v2566_v62 = vmul.f32 %v7686_v6, %v9833_v49 }
 0x674   : > { %v2630_v45 = vpack.c.bf16 %v2566_v62, %v2566_v62 }
 0x675   : > { %v2934_v32 = vpop.f32.mrf.mxu3 }
 0x676   : > { %v3185_v16 = vunpack.c.l.b16 %v2630_v45  ;;  %v3165_v28 = vpop.f32.mrf.mxu2 }
 0x677   : > { %v3008_v46 = vpop.f32.mrf.mxu0 }
 0x678   : > { %v7310_v60 = vpack.i.bf16 %v3008_v46, %v3006_v14  ;;  %7366 = vrot.lane.b32.xlu1 %v7365_v11, %s7912_s24  ;;  %v3189_v38 = vpack.c.b16 %v3185_v16, %v3184_v13 }
 0x67a   : > { %7311 = vrot.lane.b32.xlu2 %v7310_v60, %s7913_s22  ;;  %6993 = vmatmul.msk.bf16.gmra.mxu3 %vm508_vm0, %v3189_v38 }
 0x67d   : > { %v2936_v20 = vpop.f32.mrf.mxu3  ;;  %v7277_v35 = vpop.permute.xlu0 %7276 }
 0x67e   : > { %v7380_v58 = vpack.i.bf16 %v2936_v20, %v2934_v32  ;;  %v3167_v49 = vpop.f32.mrf.mxu2  ;;  %v7279_v3 = vunpack.i.h.bf16 %v7277_v35  ;;  %v7278_v9 = vunpack.i.l.bf16 %v7277_v35 }
 0x67f   : > { %v7330_v12 = vpack.i.bf16 %v3167_v49, %v3165_v28 }
 0x680   : > { %7381 = vrot.lane.b32.xlu1 %v7380_v58, %s7912_s24  ;;  %v3440_v2 = vsel %vm1298_vm5, %v9803_v57, %v7279_v3  ;;  %v3439_v62 = vsel %vm1298_vm5, %v9793_v23, %v7278_v9 }
 0x681   : > { %7331 = vrot.lane.b32.xlu0 %v7330_v12, %s7914_s23 }
 0x682   : > { %v2387_v42 = vpop.xlane.xlu2 %2386 }
 0x683   : > { %7687 = vrcp.f32 %v2387_v42 }
 0x689   : > { %v7688_v39 = vpop.eup %7687 }
 0x68a   : > { %v2549_v4 = vmul.f32 %v7688_v39, %v9845_v59  ;;  %v7178_v59 = vld [vmem:[%s13127_s4] sm:$0xff]  ;;  %v7282_v36 = vpop.permute.xlu2 %7281  ;;  %v7292_v23 = vpop.permute.xlu0 %7291 }
 0x68b   : > { %3564 = vmatpush.bf16.msrb.mxu0 %v7178_v59  ;;  %v7284_v22 = vunpack.i.h.bf16 %v7282_v36  ;;  %v7283_v14 = vunpack.i.l.bf16 %v7282_v36  ;;  %v7294_v12 = vunpack.i.h.bf16 %v7292_v23  ;;  %v7293_v50 = vunpack.i.l.bf16 %v7292_v23 }
 0x68c   : > { %v2613_v37 = vpack.c.bf16 %v2549_v4, %v2549_v4 }
 0x68d   : > { %v3456_v13 = vsel %vm3455_vm6, %v3439_v62, %v7283_v14  ;;  %v3457_v16 = vsel %vm3455_vm6, %v3440_v2, %v7284_v22  ;;  %v3441_v39 = vsel %vm1298_vm5, %v9814_v24, %v7293_v50 }
 0x68e   : > { %v3030_v27 = vunpack.c.l.b16 %v2613_v37 }
 0x68f   : > { %v3011_v33 = vpop.f32.mrf.mxu0 }
 0x692   : > { %v2390_v53 = vpop.xlane.xlu1 %2389  ;;  %v7297_v57 = vpop.permute.xlu2 %7296 }
 0x693   : > { %7689 = vrcp.f32 %v2390_v53  ;;  %v7299_v42 = vunpack.i.h.bf16 %v7297_v57  ;;  %v7298_v63 = vunpack.i.l.bf16 %v7297_v57  ;;  %v3442_v53 = vsel %vm1298_vm5, %v9825_v54, %v7294_v12 }
 0x697   : > { %v3013_v18 = vpop.f32.mrf.mxu0 }
 0x698   : > { %v7325_v31 = vpack.i.bf16 %v3013_v18, %v3011_v33 }
 0x699   : > { %v7690_v7 = vpop.eup %7689 }
 0x69a   : > { %v2550_v25 = vmul.f32 %v7690_v7, %v9852_v55  ;;  %7326 = vrot.lane.b32.xlu2 %v7325_v31, %s7913_s22  ;;  %v9926_v55 = vpop.f32.mrf.mxu1  ;;  %v3458_v31 = vsel %vm3455_vm6, %v3441_v39, %v7298_v63  ;;  %v3459_v7 = vsel %vm3455_vm6, %v3442_v53, %v7299_v42 }
 0x69c   : > { %v2614_v19 = vpack.c.bf16 %v2550_v25, %v2550_v25 }
 0x69e   : > { %v3031_v34 = vunpack.c.l.b16 %v2614_v19 }
 0x6a0   : > { %v3035_v52 = vpack.c.b16 %v3031_v34, %v3030_v27 }
 0x6a2   : > { %6985 = vmatmul.msk.bf16.gmra.mxu1 %vm508_vm0, %v3035_v52 }
 0x6ac   : > { %v3227_v29 = vpop.f32.mrf.mxu3 }
 0x6ae   : > { %v3073_v15 = vpop.f32.mrf.mxu1 }
 0x6b4   : > { %v3229_v17 = vpop.f32.mrf.mxu3 }
 0x6b5   : > { %v7345_v1 = vpack.i.bf16 %v3229_v17, %v3227_v29 }
 0x6b6   : > { %v3075_v10 = vpop.f32.mrf.mxu1 }
 0x6b7   : > { %v7340_v0 = vpack.i.bf16 %v3075_v10, %v3073_v15  ;;  %7346 = vrot.lane.b32.xlu0 %v7345_v1, %s7914_s23 }
 0x6b9   : > { %7341 = vrot.lane.b32.xlu2 %v7340_v0, %s7913_s22 }
 0x6bd   : > { %v3232_v21 = vpop.f32.mrf.mxu3 }
 0x6be   : > { %v3078_v44 = vpop.f32.mrf.mxu1 }
 0x6c2   : > { %v7287_v6 = vpop.permute.xlu1 %7286 }
 0x6c3   : > { %v7289_v45 = vunpack.i.h.bf16 %v7287_v6  ;;  %v7288_v32 = vunpack.i.l.bf16 %v7287_v6 }
 0x6c5   : > { %v3473_v11 = vsel %vm3472_vm7, %v3456_v13, %v7288_v32  ;;  %v3474_v28 = vsel %vm3472_vm7, %v3457_v16, %v7289_v45  ;;  %v3234_v46 = vpop.f32.mrf.mxu3 }
 0x6c6   : > { %v3489_v60 = vpack.c.bf16 %v3474_v28, %v3473_v11  ;;  %v7360_v38 = vpack.i.bf16 %v3234_v46, %v3232_v21  ;;  %v3080_v20 = vpop.f32.mrf.mxu1 }
 0x6c7   : > { %v7355_v58 = vpack.i.bf16 %v3080_v20, %v3078_v44 }
 0x6c8   : > { %7361 = vrot.lane.b32.xlu0 %v7360_v38, %s7914_s23  ;;  %7010 = vmatmul.msk.bf16.vlgmr.msrb.gmra.mxu0 %vm508_vm0, %v3489_v60 }
 0x6c9   : > { %7356 = vrot.lane.b32.xlu2 %v7355_v58, %s7913_s22 }
 0x6ca   : > { %v7307_v54 = vpop.permute.xlu1 %7306 }
 0x6cb   : > { %v7309_v52 = vunpack.i.h.bf16 %v7307_v54  ;;  %v7308_v59 = vunpack.i.l.bf16 %v7307_v54 }
 0x6cd   : > { %v3237_v49 = vpop.f32.mrf.mxu3  ;;  %v3444_v0 = vsel %vm1298_vm5, %v9840_v61, %v7309_v52  ;;  %v3443_v35 = vsel %vm1298_vm5, %v9837_v56, %v7308_v59 }
 0x6d2   : > { %v7302_v33 = vpop.permute.xlu0 %7301  ;;  %v7322_v6 = vpop.permute.xlu1 %7321 }
 0x6d3   : > { %v7304_v4 = vunpack.i.h.bf16 %v7302_v33  ;;  %v7303_v18 = vunpack.i.l.bf16 %v7302_v33  ;;  %v7324_v2 = vunpack.i.h.bf16 %v7322_v6  ;;  %v7323_v62 = vunpack.i.l.bf16 %v7322_v6 }
 0x6d4   : > { %v7312_v24 = vpop.permute.xlu2 %7311 }
 0x6d5   : > { %v3475_v37 = vsel %vm3472_vm7, %v3458_v31, %v7303_v18  ;;  %v3476_v25 = vsel %vm3472_vm7, %v3459_v7, %v7304_v4  ;;  %v3239_v19 = vpop.f32.mrf.mxu3  ;;  %v7314_v15 = vunpack.i.h.bf16 %v7312_v24  ;;  %v7313_v17 = vunpack.i.l.bf16 %v7312_v24 }
 0x6d6   : > { %v3490_v27 = vpack.c.bf16 %v3476_v25, %v3475_v37  ;;  %v7375_v34 = vpack.i.bf16 %v3239_v19, %v3237_v49  ;;  %v3446_v13 = vsel %vm1298_vm5, %v9829_v43, %v7324_v2  ;;  %v3445_v16 = vsel %vm1298_vm5, %v9816_v51, %v7323_v62 }
 0x6d7   : > { %v3083_v8 = vpop.f32.mrf.mxu1  ;;  %v3460_v44 = vsel %vm3455_vm6, %v3443_v35, %v7313_v17  ;;  %v3461_v3 = vsel %vm3455_vm6, %v3444_v0, %v7314_v15 }
 0x6d8   : > { %7376 = vrot.lane.b32.xlu0 %v7375_v34, %s7914_s23  ;;  %7011 = vmatmul.msk.bf16.gmra.mxu0 %vm508_vm0, %v3490_v27 }
 0x6da   : > { %v7337_v51 = vpop.permute.xlu1 %7336 }
 0x6db   : > { %v7339_v50 = vunpack.i.h.bf16 %v7337_v51  ;;  %v7338_v42 = vunpack.i.l.bf16 %v7337_v51 }
 0x6dd   : > { %v3448_v18 = vsel %vm1298_vm5, %v9889_v47, %v7339_v50  ;;  %v3447_v31 = vsel %vm1298_vm5, %v9886_v26, %v7338_v42 }
 0x6df   : > { %v3085_v29 = vpop.f32.mrf.mxu1 }
 0x6e0   : > { %v7370_v1 = vpack.i.bf16 %v3085_v29, %v3083_v8 }
 0x6e2   : > { %7371 = vrot.lane.b32.xlu2 %v7370_v1, %s7913_s22  ;;  %v7317_v10 = vpop.permute.xlu0 %7316  ;;  %v7352_v54 = vpop.permute.xlu1 %7351 }
 0x6e3   : > { %v7319_v36 = vunpack.i.h.bf16 %v7317_v10  ;;  %v7318_v21 = vunpack.i.l.bf16 %v7317_v10  ;;  %v7354_v24 = vunpack.i.h.bf16 %v7352_v54  ;;  %v7353_v52 = vunpack.i.l.bf16 %v7352_v54 }
 0x6e5   : > { %v3478_v9 = vsel %vm3472_vm7, %v3461_v3, %v7319_v36  ;;  %v3477_v22 = vsel %vm3472_vm7, %v3460_v44, %v7318_v21  ;;  %v3450_v15 = vsel %vm1298_vm5, %v9900_v30, %v7354_v24  ;;  %v3449_v17 = vsel %vm1298_vm5, %v9895_v48, %v7353_v52  ;;  %v9993_v30 = vld [vmem:[%s13128_s5] ss:$0 sm:$0xff]  ;;  %v7793_v52 = vld [vmem:[%s8085_s19 + $0x30] sm:$0xff] }
 0x6e6   : > { %v3491_v14 = vpack.c.bf16 %v3478_v9, %v3477_v22 }
 0x6e8   : > { %7012 = vmatmul.msk.bf16.gmra.mxu0 %vm508_vm0, %v3491_v14 }
 0x6ea   : > { %v7367_v48 = vpop.permute.xlu1 %7366 }
 0x6eb   : > { %v7369_v14 = vunpack.i.h.bf16 %v7367_v48  ;;  %v7368_v6 = vunpack.i.l.bf16 %v7367_v48 }
 0x6f3   : > { %v7332_v61 = vpop.permute.xlu0 %7331 }
 0x6f4   : > { %v7327_v45 = vpop.permute.xlu2 %7326  ;;  %v7334_v11 = vunpack.i.h.bf16 %v7332_v61  ;;  %v7333_v28 = vunpack.i.l.bf16 %v7332_v61  ;;  %v7787_v61 = vld [vmem:[%s8085_s19] sm:$0xff] }
 0x6f5   : > { %v7329_v32 = vunpack.i.h.bf16 %v7327_v45  ;;  %v7328_v56 = vunpack.i.l.bf16 %v7327_v45 }
 0x6f7   : > { %v3462_v46 = vsel %vm3455_vm6, %v3445_v16, %v7328_v56  ;;  %v3463_v60 = vsel %vm3455_vm6, %v3446_v13, %v7329_v32  ;;  %v3452_v13 = vsel %vm1298_vm5, %v9912_v5, %v7369_v14  ;;  %v3451_v16 = vsel %vm1298_vm5, %v9907_v41, %v7368_v6 }
 0x6f8   : > { %v3479_v38 = vsel %vm3472_vm7, %v3462_v46, %v7333_v28  ;;  %v3480_v20 = vsel %vm3472_vm7, %v3463_v60, %v7334_v11 }
 0x6f9   : > { %v3492_v58 = vpack.c.bf16 %v3480_v20, %v3479_v38 }
 0x6fb   : > { %7013 = vmatmul.msk.bf16.gmra.mxu0 %vm508_vm0, %v3492_v58 }
 0x6fd   : > { %v3242_v23 = vpop.f32.mrf.mxu3 }
 0x705   : > { %v3244_v57 = vpop.f32.mrf.mxu3 }
 0x706   : > { %v7390_v49 = vpack.i.bf16 %v3244_v57, %v3242_v23  ;;  %v7788_v57 = vld [vmem:[%s8085_s19 + $0x8] sm:$0xff] }
 0x708   : > { %7391 = vrot.lane.b32.xlu0 %v7390_v49, %s7914_s23 }
 0x713   : > { %v7342_v12 = vpop.permute.xlu2 %7341 }
 0x714   : > { %v7344_v63 = vunpack.i.h.bf16 %v7342_v12  ;;  %v7343_v33 = vunpack.i.l.bf16 %v7342_v12  ;;  %v7789_v12 = vld [vmem:[%s8085_s19 + $0x10] sm:$0xff] }
 0x716   : > { %v3464_v25 = vsel %vm3455_vm6, %v3447_v31, %v7343_v33  ;;  %v3465_v19 = vsel %vm3455_vm6, %v3448_v18, %v7344_v63 }
 0x71f   : > { %v3088_v43 = vpop.f32.mrf.mxu1 }
 0x723   : > { %v7357_v47 = vpop.permute.xlu2 %7356 }
 0x724   : > { %v7359_v26 = vunpack.i.h.bf16 %v7357_v47  ;;  %v7358_v59 = vunpack.i.l.bf16 %v7357_v47 }
 0x726   : > { %v3467_v0 = vsel %vm3455_vm6, %v3450_v15, %v7359_v26  ;;  %v3466_v35 = vsel %vm3455_vm6, %v3449_v17, %v7358_v59 }
 0x727   : > { %v3090_v53 = vpop.f32.mrf.mxu1 }
 0x728   : > { %v7385_v39 = vpack.i.bf16 %v3090_v53, %v3088_v43  ;;  %v7790_v53 = vld [vmem:[%s8085_s19 + $0x18] sm:$0xff] }
 0x729   : > { %v7347_v4 = vpop.permute.xlu0 %7346 }
 0x72a   : > { %v7349_v7 = vunpack.i.h.bf16 %v7347_v4  ;;  %v7348_v37 = vunpack.i.l.bf16 %v7347_v4  ;;  %7386 = vrot.lane.b32.xlu2 %v7385_v39, %s7913_s22 }
 0x72c   : > { %v3482_v27 = vsel %vm3472_vm7, %v3465_v19, %v7349_v7  ;;  %v3481_v34 = vsel %vm3472_vm7, %v3464_v25, %v7348_v37  ;;  %v7791_v7 = vld [vmem:[%s8085_s19 + $0x20] sm:$0xff] }
 0x72d   : > { %v3493_v8 = vpack.c.bf16 %v3482_v27, %v3481_v34  ;;  %v7792_v34 = vld [vmem:[%s8085_s19 + $0x28] sm:$0xff] }
 0x72f   : > { %7014 = vmatmul.msk.bf16.gmra.mxu0 %vm508_vm0, %v3493_v8 }
 0x73a   : > { %v7362_v29 = vpop.permute.xlu0 %7361 }
 0x73b   : > { %v7364_v1 = vunpack.i.h.bf16 %v7362_v29  ;;  %v7363_v10 = vunpack.i.l.bf16 %v7362_v29  ;;  %v7382_v29 = vpop.permute.xlu1 %7381 }
 0x73c   : > { %v7372_v3 = vpop.permute.xlu2 %7371  ;;  %v7384_v15 = vunpack.i.h.bf16 %v7382_v29  ;;  %v7383_v17 = vunpack.i.l.bf16 %v7382_v29 }
 0x73d   : > { %v3484_v36 = vsel %vm3472_vm7, %v3467_v0, %v7364_v1  ;;  %v3483_v21 = vsel %vm3472_vm7, %v3466_v35, %v7363_v10  ;;  %v7374_v2 = vunpack.i.h.bf16 %v7372_v3  ;;  %v7373_v62 = vunpack.i.l.bf16 %v7372_v3 }
 0x73e   : > { %v3494_v44 = vpack.c.bf16 %v3484_v36, %v3483_v21  ;;  %v3454_v36 = vsel %vm1298_vm5, %v9926_v55, %v7384_v15  ;;  %v3453_v21 = vsel %vm1298_vm5, %v9917_v40, %v7383_v17  ;;  %v13443_v55 = vld [vmem:[#allocation16_spill] sm:$0xff]  ;;  %v7797_v15 = vld [vmem:[%s8085_s19 + $0x50] sm:$0xff] }
 0x73f   : > { %v3469_v46 = vsel %vm3455_vm6, %v3452_v13, %v7374_v2  ;;  %v3468_v60 = vsel %vm3455_vm6, %v3451_v16, %v7373_v62 }
 0x740   : > { %7015 = vmatmul.msk.bf16.gmra.mxu0 %vm508_vm0, %v3494_v44 }
 0x745   : > { %v3566_v9 = vpop.f32.mrf.mxu0 }
 0x746   : > { %v3567_v22 = vadd.f32 %v9993_v30, %v3566_v9 }
 0x748   : > { %v9997_v45 = vadd.f32 %v7787_v61, %v3567_v22 }
 0x74a   : > { %13436 = vst [vmem:[#allocation32_spill] sm:$0xff] %v9997_v45  ;;  %v7377_v32 = vpop.permute.xlu0 %7376  ;;  %v3622_v56 = vsel %vm508_vm0, %v9997_v45, 0.0 }
 0x74b   : > { %v7379_v11 = vunpack.i.h.bf16 %v7377_v32  ;;  %v7378_v28 = vunpack.i.l.bf16 %v7377_v32  ;;  %3623 = vadd.xlane.f32.xlu1 %v3622_v56 }
 0x74d   : > { %v3486_v38 = vsel %vm3472_vm7, %v3469_v46, %v7379_v11  ;;  %v3485_v20 = vsel %vm3472_vm7, %v3468_v60, %v7378_v28  ;;  %v3568_v58 = vpop.f32.mrf.mxu0  ;;  %v7794_v46 = vld [vmem:[%s8085_s19 + $0x38] sm:$0xff] }
 0x74e   : > { %v3495_v23 = vpack.c.bf16 %v3486_v38, %v3485_v20  ;;  %v3569_v5 = vadd.f32 %v9993_v30, %v3568_v58 }
 0x750   : > { %v10011_v49 = vadd.f32 %v7788_v57, %v3569_v5  ;;  %7016 = vmatmul.msk.bf16.gmra.mxu0 %vm508_vm0, %v3495_v23 }
 0x752   : > { %13437 = vst [vmem:[#allocation28_spill] sm:$0xff] %v10011_v49  ;;  %v3625_v41 = vsel %vm508_vm0, %v10011_v49, 0.0 }
 0x753   : > { %3626 = vadd.xlane.f32.xlu2 %v3625_v41 }
 0x755   : > { %v3571_v43 = vpop.f32.mrf.mxu0 }
 0x756   : > { %v3572_v51 = vadd.f32 %v9993_v30, %v3571_v43 }
 0x758   : > { %v10018_v50 = vadd.f32 %v7789_v12, %v3572_v51  ;;  %v7795_v51 = vld [vmem:[%s8085_s19 + $0x40] sm:$0xff] }
 0x75a   : > { %13438 = vst [vmem:[#allocation29_spill] sm:$0xff] %v10018_v50  ;;  %v3628_v42 = vsel %vm508_vm0, %v10018_v50, 0.0 }
 0x75b   : > { %3629 = vadd.xlane.f32.xlu0 %v3628_v42 }
 0x75d   : > { %v3573_v63 = vpop.f32.mrf.mxu0 }
 0x75e   : > { %v3574_v33 = vadd.f32 %v9993_v30, %v3573_v63 }
 0x760   : > { %v10024_v39 = vadd.f32 %v7790_v53, %v3574_v33 }
 0x762   : > { %13439 = vst [vmem:[#allocation27_spill] sm:$0xff] %v10024_v39  ;;  %v3631_v4 = vsel %vm508_vm0, %v10024_v39, 0.0 }
 0x763   : > { %3632 = vadd.xlane.f32.xlu1 %v3631_v4 }
 0x765   : > { %v3576_v18 = vpop.f32.mrf.mxu0 }
 0x766   : > { %v3577_v31 = vadd.f32 %v9993_v30, %v3576_v18 }
 0x768   : > { %v10030_v37 = vadd.f32 %v7791_v7, %v3577_v31 }
 0x76a   : > { %13440 = vst [vmem:[#allocation26_spill] sm:$0xff] %v10030_v37  ;;  %v3634_v25 = vsel %vm508_vm0, %v10030_v37, 0.0 }
 0x76b   : > { %3635 = vadd.xlane.f32.xlu2 %v3634_v25  ;;  %v7796_v25 = vld [vmem:[%s8085_s19 + $0x48] sm:$0xff] }
 0x76d   : > { %v3578_v19 = vpop.f32.mrf.mxu0 }
 0x76e   : > { %v3579_v27 = vadd.f32 %v9993_v30, %v3578_v19 }
 0x770   : > { %v10036_v8 = vadd.f32 %v7792_v34, %v3579_v27 }
 0x772   : > { %13441 = vst [vmem:[#allocation25_spill] sm:$0xff] %v10036_v8  ;;  %v3637_v54 = vsel %vm508_vm0, %v10036_v8, 0.0 }
 0x773   : > { %3638 = vadd.xlane.f32.xlu0 %v3637_v54 }
 0x778   : > { %v3581_v47 = vpop.f32.mrf.mxu0 }
 0x779   : > { %v3582_v24 = vadd.f32 %v9993_v30, %v3581_v47 }
 0x77a   : > { %v7392_v1 = vpop.permute.xlu0 %7391 }
 0x77b   : > { %v10042_v26 = vadd.f32 %v7793_v52, %v3582_v24  ;;  %v7394_v44 = vunpack.i.h.bf16 %v7392_v1  ;;  %v7393_v48 = vunpack.i.l.bf16 %v7392_v1 }
 0x77d   : > { %13442 = vst [vmem:[#allocation20_spill] sm:$0xff] %v10042_v26  ;;  %v3640_v59 = vsel %vm508_vm0, %v10042_v26, 0.0 }
 0x77e   : > { %3641 = vadd.xlane.f32.xlu0 %v3640_v59 }
 0x780   : > { %v3583_v2 = vpop.f32.mrf.mxu0 }
 0x781   : > { %v3584_v13 = vadd.f32 %v9993_v30, %v3583_v2 }
 0x783   : > { %v10065_v60 = vadd.f32 %v7794_v46, %v3584_v13 }
 0x784   : > { %v7387_v10 = vpop.permute.xlu2 %7386 }
 0x785   : > { %v7389_v0 = vunpack.i.h.bf16 %v7387_v10  ;;  %v7388_v35 = vunpack.i.l.bf16 %v7387_v10  ;;  %13444 = vst [vmem:[#allocation23_spill] sm:$0xff] %v10065_v60  ;;  %v3643_v5 = vsel %vm508_vm0, %v10065_v60, 0.0 }
 0x787   : > { %v3471_v3 = vsel %vm3455_vm6, %v3454_v36, %v7389_v0  ;;  %v3470_v9 = vsel %vm3455_vm6, %v3453_v21, %v7388_v35 }
 0x788   : > { %v3487_v22 = vsel %vm3472_vm7, %v3470_v9, %v7393_v48  ;;  %v3488_v14 = vsel %vm3472_vm7, %v3471_v3, %v7394_v44  ;;  %v7798_v48 = vld [vmem:[%s8085_s19 + $0x58] sm:$0xff] }
 0x789   : > { %v3496_v6 = vpack.c.bf16 %v3488_v14, %v3487_v22 }
 0x78b   : > { %7017 = vmatmul.msk.bf16.gmra.mxu0 %vm508_vm0, %v3496_v6 }
 0x7ac   : > { %v3586_v32 = vpop.f32.mrf.mxu0 }
 0x7ad   : > { %v3587_v23 = vadd.f32 %v9993_v30, %v3586_v32 }
 0x7af   : > { %v10078_v12 = vadd.f32 %v7795_v51, %v3587_v23  ;;  %v7800_v23 = vld [vmem:[%s8085_s19 + $0x68] sm:$0xff]  ;;  %v7801_v51 = vld [vmem:[%s8085_s19 + $0x70] sm:$0xff] }
 0x7b1   : > { %13445 = vst [vmem:[#allocation34_spill] sm:$0xff] %v10078_v12  ;;  %v3646_v53 = vsel %vm508_vm0, %v10078_v12, 0.0 }
 0x7b4   : > { %v3588_v58 = vpop.f32.mrf.mxu0 }
 0x7b5   : > { %v3589_v33 = vadd.f32 %v9993_v30, %v3588_v58 }
 0x7b7   : > { %v10091_v19 = vadd.f32 %v7796_v25, %v3589_v33 }
 0x7b9   : > { %13446 = vst [vmem:[#allocation30_spill] sm:$0xff] %v10091_v19  ;;  %v3649_v24 = vsel %vm508_vm0, %v10091_v19, 0.0 }
 0x7bd   : > { %v3591_v18 = vpop.f32.mrf.mxu0 }
 0x7be   : > { %v3624_v62 = vpop.xlane.xlu1 %3623  ;;  %v3592_v54 = vadd.f32 %v9993_v30, %v3591_v18  ;;  %v7188_v18 = vld [vmem:[%s13131_s8 + $0x34] sm:$0xf] }
 0x7bf   : > { %v3670_v61 = vmul.f32 %v3624_v62, %v13443_v55 }
 0x7c0   : > { %v10104_v17 = vadd.f32 %v7797_v15, %v3592_v54  ;;  %v7187_v54 = vld [vmem:[%s13131_s8 + $0x24] sm:$0xf0]  ;;  %v7185_v15 = vld [vmem:[%s13131_s8 + $0x14] sm:$0xf0] }
 0x7c1   : > { %v10057_v40 = vsub.f32 %v9997_v45, %v3670_v61  ;;  %v7799_v61 = vld [vmem:[%s8085_s19 + $0x60] sm:$0xff] }
 0x7c2   : > { %13447 = vst [vmem:[#allocation19_spill] sm:$0xff] %v10104_v17  ;;  %v3652_v36 = vsel %vm508_vm0, %v10104_v17, 0.0 }
 0x7c3   : > { %v3702_v56 = vmul.f32 %v10057_v40, %v10057_v40 }
 0x7c5   : > { %v3718_v16 = vsel %vm508_vm0, %v3702_v56, 0.0  ;;  %v3593_v29 = vpop.f32.mrf.mxu0 }
 0x7c6   : > { %3719 = vadd.xlane.f32.xlu1 %v3718_v16  ;;  %v3627_v11 = vpop.xlane.xlu2 %3626  ;;  %v3594_v0 = vadd.f32 %v9993_v30, %v3593_v29  ;;  %v7028_v29 = vld [vmem:[%s13131_s8 + $0x10] sm:$0xf] }
 0x7c7   : > { %v3671_v28 = vmul.f32 %v3627_v11, %v13443_v55 }
 0x7c8   : > { %v10117_v3 = vadd.f32 %v7798_v48, %v3594_v0 }
 0x7c9   : > { %v10068_v38 = vsub.f32 %v10011_v49, %v3671_v28 }
 0x7ca   : > { %13448 = vst [vmem:[#allocation18_spill] sm:$0xff] %v10117_v3  ;;  %v3655_v62 = vsel %vm508_vm0, %v10117_v3, 0.0 }
 0x7cb   : > { %v3703_v20 = vmul.f32 %v10068_v38, %v10068_v38 }
 0x7cd   : > { %v3721_v57 = vsel %vm508_vm0, %v3703_v20, 0.0  ;;  %v3596_v22 = vpop.f32.mrf.mxu0 }
 0x7ce   : > { %v3630_v41 = vpop.xlane.xlu0 %3629  ;;  %3644 = vadd.xlane.f32.xlu1 %v3643_v5  ;;  %3722 = vadd.xlane.f32.xlu2 %v3721_v57  ;;  %v3597_v6 = vadd.f32 %v9993_v30, %v3596_v22  ;;  %v7020_v22 = vld [vmem:[%s13131_s8] sm:$0xf] }
 0x7cf   : > { %v3672_v43 = vmul.f32 %v3630_v41, %v13443_v55 }
 0x7d0   : > { %v10129_v32 = vadd.f32 %v7799_v61, %v3597_v6 }
 0x7d1   : > { %v10081_v42 = vsub.f32 %v10018_v50, %v3672_v43 }
 0x7d2   : > { %13449 = vst [vmem:[#allocation22_spill] sm:$0xff] %v10129_v32  ;;  %v3658_v28 = vsel %vm508_vm0, %v10129_v32, 0.0 }
 0x7d3   : > { %v3704_v63 = vmul.f32 %v10081_v42, %v10081_v42 }
 0x7d5   : > { %v3724_v4 = vsel %vm508_vm0, %v3704_v63, 0.0  ;;  %v3598_v11 = vpop.f32.mrf.mxu0 }
 0x7d6   : > { %3647 = vadd.xlane.f32.xlu1 %v3646_v53  ;;  %v3633_v31 = vpop.xlane.xlu1 %3632  ;;  %3725 = vadd.xlane.f32.xlu2 %v3724_v4  ;;  %v3599_v20 = vadd.f32 %v9993_v30, %v3598_v11  ;;  %v7044_v53 = vld [vmem:[%s13131_s8 + $0x30] sm:$0xf]  ;;  %v7189_v4 = vld [vmem:[%s13131_s8 + $0x34] sm:$0xf0] }
 0x7d7   : > { %v3673_v7 = vmul.f32 %v3633_v31, %v13443_v55  ;;  %v7045_v31 = vor.u32 %v7189_v4, %v7044_v53 }
 0x7d8   : > { %v10142_v5 = vadd.f32 %v7800_v23, %v3599_v20 }
 0x7d9   : > { %v10094_v27 = vsub.f32 %v10024_v39, %v3673_v7  ;;  %v7046_v7 = vld [vmem:[%s13131_s8 + $0x38] sm:$0xf0]  ;;  %4104 = vmatpush.bf16.msrb.mxu1 %v7045_v31 }
 0x7da   : > { %13450 = vst [vmem:[#allocation33_spill] sm:$0xff] %v10142_v5  ;;  %v3661_v57 = vsel %vm508_vm0, %v10142_v5, 0.0  ;;  %v7049_v25 = vor.u32 %v7188_v18, %v7046_v7 }
 0x7db   : > { %v3705_v34 = vmul.f32 %v10094_v27, %v10094_v27 }
 0x7dc   : > { %4153 = vmatpush.bf16.msra.mxu2 %v7049_v25 }
 0x7dd   : > { %v3727_v47 = vsel %vm508_vm0, %v3705_v34, 0.0  ;;  %v7036_v34 = vld [vmem:[%s13131_s8 + $0x20] sm:$0xf] }
 0x7de   : > { %v3636_v52 = vpop.xlane.xlu2 %3635  ;;  %3728 = vadd.xlane.f32.xlu0 %v3727_v47  ;;  %3650 = vadd.xlane.f32.xlu2 %v3649_v24  ;;  %v7186_v47 = vld [vmem:[%s13131_s8 + $0x24] sm:$0xf]  ;;  %v7037_v24 = vor.u32 %v7187_v54, %v7036_v34 }
 0x7df   : > { %v3674_v59 = vmul.f32 %v3636_v52, %v13443_v55  ;;  %v7038_v52 = vld [vmem:[%s13131_s8 + $0x28] sm:$0xf0] }
 0x7e0   : > { %4105 = vmatpush.bf16.msrb.mxu1 %v7037_v24 }
 0x7e1   : > { %v10107_v1 = vsub.f32 %v10030_v37, %v3674_v59  ;;  %v7041_v59 = vor.u32 %v7186_v47, %v7038_v52 }
 0x7e3   : > { %v3706_v10 = vmul.f32 %v10107_v1, %v10107_v1  ;;  %4154 = vmatpush.bf16.msra.mxu2 %v7041_v59 }
 0x7e5   : > { %v3730_v35 = vsel %vm508_vm0, %v3706_v10, 0.0  ;;  %v7184_v10 = vld [vmem:[%s13131_s8 + $0x14] sm:$0xf] }
 0x7e6   : > { %v3639_v21 = vpop.xlane.xlu0 %3638  ;;  %3731 = vadd.xlane.f32.xlu0 %v3730_v35  ;;  %3653 = vadd.xlane.f32.xlu2 %v3652_v36  ;;  %v7029_v35 = vor.u32 %v7185_v15, %v7028_v29  ;;  %v7030_v36 = vld [vmem:[%s13131_s8 + $0x18] sm:$0xf0] }
 0x7e7   : > { %v3675_v44 = vmul.f32 %v3639_v21, %v13443_v55 }
 0x7e8   : > { %4106 = vmatpush.bf16.msrb.mxu1 %v7029_v35 }
 0x7e9   : > { %v10120_v9 = vsub.f32 %v10036_v8, %v3675_v44  ;;  %v7033_v44 = vor.u32 %v7184_v10, %v7030_v36 }
 0x7eb   : > { %v3707_v14 = vmul.f32 %v10120_v9, %v10120_v9  ;;  %4155 = vmatpush.bf16.msra.mxu2 %v7033_v44 }
 0x7ed   : > { %v3733_v2 = vsel %vm508_vm0, %v3707_v14, 0.0  ;;  %v7183_v14 = vld [vmem:[%s13131_s8 + $0x4] sm:$0xf0] }
 0x7ee   : > { %3734 = vadd.xlane.f32.xlu1 %v3733_v2  ;;  %3656 = vadd.xlane.f32.xlu0 %v3655_v62  ;;  %v7021_v6 = vor.u32 %v7183_v14, %v7020_v22  ;;  %v7182_v2 = vld [vmem:[%s13131_s8 + $0x4] sm:$0xf]  ;;  %v7022_v62 = vld [vmem:[%s13131_s8 + $0x8] sm:$0xf0] }
 0x7ef   : > { %v7025_v61 = vor.u32 %v7182_v2, %v7022_v62 }
 0x7f0   : > { %4107 = vmatpush.bf16.msrb.mxu1 %v7021_v6  ;;  %v7802_v6 = vld [vmem:[%s8085_s19 + $0x78] sm:$0xff]  ;;  %s13749_s19 = sld [smem:[#allocation11_spill]] }
 0x7f1   : > { %v3642_v56 = vpop.xlane.xlu0 %3641  ;;  %4156 = vmatpush.bf16.msra.mxu2 %v7025_v61 }
 0x7f2   : > { %v3676_v13 = vmul.f32 %v3642_v56, %v13443_v55 }
 0x7f4   : > { %v10133_v16 = vsub.f32 %v10042_v26, %v3676_v13 }
 0x7f6   : > { %3659 = vadd.xlane.f32.xlu0 %v3658_v28  ;;  %v3708_v46 = vmul.f32 %v10133_v16, %v10133_v16  ;;  %s7207_s22 = sshll.u32 %s13749_s19, 7 }
 0x7f7   : > { %s6795_s27 = scalar_lea.hbm %s13753_s20, %s7207_s22  ;;  %s7857_s22 = scalar_lea.hbm %s13753_s20, 256 }
 0x7f8   : > { %v3736_v58 = vsel %vm508_vm0, %v3708_v46, 0.0  ;;  %s6798_s14 = sshll.u32 %s6795_s27, 4  ;;  %s6799_s14 = int_to_ptr.hbm [resolvable:$true] %s6798_s14 }
 0x7f9   : > { %3737 = vadd.xlane.f32.xlu1 %v3736_v58  ;;  %s7851_s15 = sshra.s32 %s6799_s14, 4  ;;  %s7852_s15 = int_to_ptr.hbm [resolvable:$true] %s7851_s15 }
 0x7fa   : > { %s7853_s19 = scalar_lea.hbm %s7852_s15, 128  ;;  %p7858_p0 = scmp.lt.s32.totalorder %s7852_s15, %s13753_s20 }
 0x7fb   : > { %p7854_p6 = scmp.ne.s32.totalorder %s7852_s15, %s7853_s19  ;;  %p7859_p1 = scmp.lt.s32.totalorder %s7857_s22, %s7853_s19 }
 0x7fd   : > { %p7855_p9 = pnand %p7854_p6, %p8043_p11  ;;  %p7860_p3 = por %p7859_p1, %p7858_p0 }
 0x7ff   : > { %p7856_p13 = pneg %p7855_p9 }
 0x801   : > { %3662 = vadd.xlane.f32.xlu1 %v3661_v57  ;;  %p7861_p4 = pnand %p7860_p3, %p7856_p13 }
 0x808   : > { %v3601_v41 = vpop.f32.mrf.mxu0 }
 0x809   : > { %v3602_v43 = vadd.f32 %v9993_v30, %v3601_v41 }
 0x80b   : > { %v10148_v63 = vadd.f32 %v7801_v51, %v3602_v43 }
 0x80d   : > { %13451 = vst [vmem:[#allocation21_spill] sm:$0xff] %v10148_v63  ;;  %v3664_v33 = vsel %vm508_vm0, %v10148_v63, 0.0 }
 0x80e   : > { %3665 = vadd.xlane.f32.xlu1 %v3664_v33 }
 0x810   : > { %v3603_v54 = vpop.f32.mrf.mxu0 }
 0x811   : > { %v3604_v29 = vadd.f32 %v9993_v30, %v3603_v54  ;;  %v10229_v30 = vld [vmem:[%s13129_s6] ss:$0 sm:$0xff] }
 0x839   : > { %v3720_v0 = vpop.xlane.xlu1 %3719 }
 0x83a   : > { %v3766_v21 = vmul.f32 %v3720_v0, %v13443_v55 }
 0x83c   : > { %v3782_v48 = vadd.f32 1e-05, %v3766_v21 }
 0x83e   : > { %7691 = vrsqrt.f32 %v3782_v48  ;;  %vm3804_vm9 = vweird.f32 %v3782_v48 }
 0x841   : > { %v3645_v56 = vpop.xlane.xlu1 %3644  ;;  %v3723_v13 = vpop.xlane.xlu2 %3722 }
 0x842   : > { %v3677_v11 = vmul.f32 %v3645_v56, %v13443_v55  ;;  %v3767_v28 = vmul.f32 %v3723_v13, %v13443_v55 }
 0x844   : > { %v7692_v46 = vpop.eup %7691  ;;  %v10204_v20 = vsub.f32 %v10065_v60, %v3677_v11  ;;  %v3783_v58 = vadd.f32 1e-05, %v3767_v28 }
 0x845   : > { %v3799_v23 = vmul.f32 %v7692_v46, %v3782_v48  ;;  %vm3805_vm8 = vweird.f32 %v7692_v46  ;;  %v10224_v48 = vadd.f32 %v7802_v6, %v3604_v29 }
 0x846   : > { %7693 = vrsqrt.f32 %v3783_v58  ;;  %v3709_v57 = vmul.f32 %v10204_v20, %v10204_v20  ;;  %vm3806_vm10 = vmor %vm3804_vm9, %vm3805_vm8  ;;  %vm3814_vm12 = vweird.f32 %v3783_v58 }
 0x847   : > { %v3800_v41 = vmul.f32 %v7692_v46, %v3799_v23  ;;  %13452 = vst [vmem:[#allocation17_spill] sm:$0xff] %v10224_v48  ;;  %v10241_v23 = vld [vmem:[%s13130_s7] ss:$0 sm:$0xff] }
 0x848   : > { %v3739_v43 = vsel %vm508_vm0, %v3709_v57, 0.0 }
 0x849   : > { %v3801_v51 = vmul.f32 0.5, %v3800_v41  ;;  %3740 = vadd.xlane.f32.xlu2 %v3739_v43  ;;  %v3648_v33 = vpop.xlane.xlu1 %3647  ;;  %v3726_v53 = vpop.xlane.xlu2 %3725 }
 0x84a   : > { %v3678_v4 = vmul.f32 %v3648_v33, %v13443_v55  ;;  %v3768_v18 = vmul.f32 %v3726_v53, %v13443_v55 }
 0x84b   : > { %v3802_v31 = vsub.f32 1.5, %v3801_v51 }
 0x84c   : > { %v7694_v7 = vpop.eup %7693  ;;  %v10212_v25 = vsub.f32 %v10078_v12, %v3678_v4  ;;  %v10214_v34 = vadd.f32 1e-05, %v3768_v18 }
 0x84d   : > { %v3803_v47 = vmul.f32 %v7692_v46, %v3802_v31  ;;  %v3809_v24 = vmul.f32 %v7694_v7, %v3783_v58  ;;  %vm3815_vm11 = vweird.f32 %v7694_v7  ;;  %v3667_v58 = vsel %vm508_vm0, %v10224_v48, 0.0 }
 0x84e   : > { %7695 = vrsqrt.f32 %v10214_v34  ;;  %v3710_v52 = vmul.f32 %v10212_v25, %v10212_v25  ;;  %vm3816_vm13 = vmor %vm3814_vm12, %vm3815_vm11  ;;  %vm3824_vm15 = vweird.f32 %v10214_v34 }
 0x84f   : > { %v3810_v59 = vmul.f32 %v7694_v7, %v3809_v24  ;;  %v3807_v10 = vsel %vm3806_vm10, %v7692_v46, %v3803_v47 }
 0x850   : > { %v3742_v15 = vsel %vm508_vm0, %v3710_v52, 0.0  ;;  %v3958_v2 = vmul.f32 %v3807_v10, %v10057_v40 }
 0x851   : > { %v3811_v0 = vmul.f32 0.5, %v3810_v59  ;;  %v3729_v35 = vpop.xlane.xlu0 %3728  ;;  %3743 = vadd.xlane.f32.xlu2 %v3742_v15  ;;  %v3651_v36 = vpop.xlane.xlu2 %3650 }
 0x852   : > { %v3769_v21 = vmul.f32 %v3729_v35, %v13443_v55  ;;  %v3679_v44 = vmul.f32 %v3651_v36, %v13443_v55  ;;  %v3978_v40 = vmul.f32 %v10229_v30, %v3958_v2 }
 0x853   : > { %v3812_v22 = vsub.f32 1.5, %v3811_v0 }
 0x854   : > { %v7696_v14 = vpop.eup %7695  ;;  %v3785_v62 = vadd.f32 1e-05, %v3769_v21  ;;  %v10233_v61 = vsub.f32 %v10091_v19, %v3679_v44 }
 0x855   : > { %v3813_v56 = vmul.f32 %v7694_v7, %v3812_v22  ;;  %v3819_v13 = vmul.f32 %v7696_v14, %v10214_v34  ;;  %vm3825_vm14 = vweird.f32 %v7696_v14 }
 0x856   : > { %7697 = vrsqrt.f32 %v3785_v62  ;;  %v3711_v11 = vmul.f32 %v10233_v61, %v10233_v61  ;;  %vm3826_vm1 = vmor %vm3824_vm15, %vm3825_vm14  ;;  %vm3834_vm3 = vweird.f32 %v3785_v62 }
 0x857   : > { %v3817_v28 = vsel %vm3816_vm13, %v7694_v7, %v3813_v56  ;;  %v3820_v46 = vmul.f32 %v7696_v14, %v3819_v13 }
 0x858   : > { %v3959_v57 = vmul.f32 %v3817_v28, %v10068_v38  ;;  %v3745_v41 = vsel %vm508_vm0, %v3711_v11, 0.0  ;;  %v3998_v38 = vadd.f32 %v10241_v23, %v3978_v40 }
 0x859   : > { %v3821_v43 = vmul.f32 0.5, %v3820_v46  ;;  %v3732_v51 = vpop.xlane.xlu0 %3731  ;;  %3668 = vadd.xlane.f32.xlu2 %v3667_v58  ;;  %v3654_v33 = vpop.xlane.xlu2 %3653  ;;  %3746 = vadd.xlane.f32.xlu0 %v3745_v41 }
 0x85a   : > { %v3979_v53 = vmul.f32 %v10229_v30, %v3959_v57  ;;  %v3770_v4 = vmul.f32 %v3732_v51, %v13443_v55  ;;  %v3680_v18 = vmul.f32 %v3654_v33, %v13443_v55 }
 0x85b   : > { %v3822_v31 = vsub.f32 1.5, %v3821_v43 }
 0x85c   : > { %v7698_v7 = vpop.eup %7697  ;;  %v3999_v54 = vadd.f32 %v10241_v23, %v3979_v53  ;;  %v3786_v47 = vadd.f32 1e-05, %v3770_v4  ;;  %v10254_v24 = vsub.f32 %v10104_v17, %v3680_v18 }
 0x85d   : > { %v3823_v52 = vmul.f32 %v7696_v14, %v3822_v31  ;;  %v3829_v59 = vmul.f32 %v7698_v7, %v3785_v62  ;;  %vm3835_vm2 = vweird.f32 %v7698_v7 }
 0x85e   : > { %v4014_v29 = vpack.c.bf16 %v3999_v54, %v3998_v38  ;;  %7699 = vrsqrt.f32 %v3786_v47  ;;  %v3712_v15 = vmul.f32 %v10254_v24, %v10254_v24  ;;  %vm3836_vm4 = vmor %vm3834_vm3, %vm3835_vm2  ;;  %vm3844_vm6 = vweird.f32 %v3786_v47 }
 0x85f   : > { %v3830_v10 = vmul.f32 %v7698_v7, %v3829_v59  ;;  %v3827_v35 = vsel %vm3826_vm1, %v7696_v14, %v3823_v52 }
 0x860   : > { %7050 = vmatmul.msk.bf16.vlgmr.msrb.gmra.mxu1 %vm508_vm0, %v4014_v29  ;;  %7058 = vmatmul.msk.bf16.vlgmr.msra.gmra.mxu2 %vm508_vm0, %v4014_v29  ;;  %v3748_v0 = vsel %vm508_vm0, %v3712_v15, 0.0  ;;  %v3960_v56 = vmul.f32 %v3827_v35, %v10081_v42 }
 0x861   : > { %v3831_v36 = vmul.f32 0.5, %v3830_v10  ;;  %v3657_v21 = vpop.xlane.xlu0 %3656  ;;  %v3735_v44 = vpop.xlane.xlu1 %3734  ;;  %3749 = vadd.xlane.f32.xlu0 %v3748_v0 }
 0x862   : > { %v3681_v22 = vmul.f32 %v3657_v21, %v13443_v55  ;;  %v3771_v6 = vmul.f32 %v3735_v44, %v13443_v55  ;;  %v3980_v42 = vmul.f32 %v10229_v30, %v3960_v56 }
 0x863   : > { %v3832_v2 = vsub.f32 1.5, %v3831_v36 }
 0x864   : > { %v7700_v34 = vpop.eup %7699  ;;  %v10266_v13 = vsub.f32 %v10117_v3, %v3681_v22  ;;  %v3787_v11 = vadd.f32 1e-05, %v3771_v6 }
 0x865   : > { %v3833_v28 = vmul.f32 %v7698_v7, %v3832_v2  ;;  %v3839_v14 = vmul.f32 %v7700_v34, %v3786_v47  ;;  %vm3845_vm5 = vweird.f32 %v7700_v34 }
 0x866   : > { %7701 = vrsqrt.f32 %v3787_v11  ;;  %v3713_v46 = vmul.f32 %v10266_v13, %v10266_v13  ;;  %vm3846_vm7 = vmor %vm3844_vm6, %vm3845_vm5  ;;  %vm3854_vm9 = vweird.f32 %v3787_v11 }
 0x867   : > { %v3837_v40 = vsel %vm3836_vm4, %v7698_v7, %v3833_v28  ;;  %v3840_v57 = vmul.f32 %v7700_v34, %v3839_v14  ;;  %v4000_v7 = vadd.f32 %v10241_v23, %v3980_v42 }
 0x868   : > { %v3961_v58 = vmul.f32 %v3837_v40, %v10094_v27  ;;  %v3751_v41 = vsel %vm508_vm0, %v3713_v46, 0.0 }
 0x869   : > { %v3841_v43 = vmul.f32 0.5, %v3840_v57  ;;  %3752 = vadd.xlane.f32.xlu1 %v3751_v41  ;;  %v3660_v51 = vpop.xlane.xlu0 %3659 }
 0x86a   : > { %v3682_v33 = vmul.f32 %v3660_v51, %v13443_v55  ;;  %v3981_v62 = vmul.f32 %v10229_v30, %v3961_v58 }
 0x86b   : > { %v3842_v53 = vsub.f32 1.5, %v3841_v43 }
 0x86c   : > { %v7702_v4 = vpop.eup %7701  ;;  %v10276_v18 = vsub.f32 %v10129_v32, %v3682_v33  ;;  %v3738_v31 = vpop.xlane.xlu1 %3737  ;;  %v4001_v27 = vadd.f32 %v10241_v23, %v3981_v62 }
 0x86d   : > { %v3843_v38 = vmul.f32 %v7700_v34, %v3842_v53  ;;  %v3849_v54 = vmul.f32 %v7702_v4, %v3787_v11  ;;  %vm3855_vm8 = vweird.f32 %v7702_v4  ;;  %v3772_v42 = vmul.f32 %v3738_v31, %v13443_v55 }
 0x86e   : > { %13453 = vst [vmem:[#allocation36_spill] sm:$0xff] %v10276_v18  ;;  %v4015_v52 = vpack.c.bf16 %v4001_v27, %v4000_v7  ;;  %v3714_v59 = vmul.f32 %v10276_v18, %v10276_v18  ;;  %vm3856_vm10 = vmor %vm3854_vm9, %vm3855_vm8 }
 0x86f   : > { %v3850_v29 = vmul.f32 %v7702_v4, %v3849_v54  ;;  %v3847_v10 = vsel %vm3846_vm7, %v7700_v34, %v3843_v38  ;;  %v3788_v43 = vadd.f32 1e-05, %v3772_v42  ;;  %v4283_v42 = vlaneseq }
 0x870   : > { %7051 = vmatmul.msk.bf16.gmra.mxu1 %vm508_vm0, %v4015_v52  ;;  %7059 = vmatmul.msk.bf16.gmra.mxu2 %vm508_vm0, %v4015_v52  ;;  %v3754_v15 = vsel %vm508_vm0, %v3714_v59, 0.0  ;;  %v3962_v36 = vmul.f32 %v3847_v10, %v10107_v1 }
 0x871   : > { %v3851_v0 = vmul.f32 0.5, %v3850_v29  ;;  %3755 = vadd.xlane.f32.xlu2 %v3754_v15  ;;  %7703 = vrsqrt.f32 %v3788_v43  ;;  %vm3864_vm12 = vweird.f32 %v3788_v43 }
 0x872   : > { %v3982_v34 = vmul.f32 %v10229_v30, %v3962_v36 }
 0x873   : > { %v3852_v35 = vsub.f32 1.5, %v3851_v0 }
 0x874   : > { %v3663_v21 = vpop.xlane.xlu1 %3662  ;;  %v4002_v11 = vadd.f32 %v10241_v23, %v3982_v34 }
 0x875   : > { %v3853_v44 = vmul.f32 %v7702_v4, %v3852_v35  ;;  %v3683_v47 = vmul.f32 %v3663_v21, %v13443_v55 }
 0x877   : > { %v3857_v22 = vsel %vm3856_vm10, %v7702_v4, %v3853_v44  ;;  %v10288_v6 = vsub.f32 %v10142_v5, %v3683_v47  ;;  %v7704_v51 = vpop.eup %7703 }
 0x878   : > { %v3963_v2 = vmul.f32 %v3857_v22, %v10120_v9  ;;  %v3859_v33 = vmul.f32 %v7704_v51, %v3788_v43  ;;  %vm3865_vm11 = vweird.f32 %v7704_v51 }
 0x879   : > { %13454 = vst [vmem:[#allocation24_spill] sm:$0xff] %v10288_v6  ;;  %v3715_v56 = vmul.f32 %v10288_v6, %v10288_v6  ;;  %vm3866_vm13 = vmor %vm3864_vm12, %vm3865_vm11 }
 0x87a   : > { %v3983_v28 = vmul.f32 %v10229_v30, %v3963_v2  ;;  %v3860_v62 = vmul.f32 %v7704_v51, %v3859_v33 }
 0x87b   : > { %v3757_v1 = vsel %vm508_vm0, %v3715_v56, 0.0 }
 0x87c   : > { %3758 = vadd.xlane.f32.xlu0 %v3757_v1  ;;  %v4003_v14 = vadd.f32 %v10241_v23, %v3983_v28  ;;  %v3861_v27 = vmul.f32 0.5, %v3860_v62 }
 0x87e   : > { %v4016_v46 = vpack.c.bf16 %v4003_v14, %v4002_v11  ;;  %v3862_v38 = vsub.f32 1.5, %v3861_v27  ;;  %v4284_v27 = vshrl.u32 %v4283_v42, 7 }
 0x880   : > { %7052 = vmatmul.msk.bf16.gmra.mxu1 %vm508_vm0, %v4016_v46  ;;  %7060 = vmatmul.msk.bf16.gmra.mxu2 %vm508_vm0, %v4016_v46  ;;  %v3863_v15 = vmul.f32 %v7704_v51, %v3862_v38 }
 0x881   : > { %v3666_v9 = vpop.xlane.xlu1 %3665 }
 0x882   : > { %v3684_v40 = vmul.f32 %v3666_v9, %v13443_v55  ;;  %v3867_v0 = vsel %vm3866_vm13, %v7704_v51, %v3863_v15  ;;  %v10345_v15 = vld [vmem:[%s13133_s10 + $0x8] sm:$0x77] }
 0x883   : > { %v3964_v34 = vmul.f32 %v3867_v0, %v10133_v16  ;;  %v10347_v0 = vadd.s32 4294967295, %v4284_v27 }
 0x884   : > { %v10302_v57 = vsub.f32 %v10148_v63, %v3684_v40 }
 0x885   : > { %13457 = vst [vmem:[#allocation37_spill] sm:$0xff] %v10347_v0  ;;  %vm4326_vm7 = vcmp.ge.s32.totalorder %v10347_v0, 0 }
 0x886   : > { %13455 = vst [vmem:[#allocation31_spill] sm:$0xff] %v10302_v57  ;;  %v3716_v58 = vmul.f32 %v10302_v57, %v10302_v57 }
 0x888   : > { %v3760_v41 = vsel %vm508_vm0, %v3716_v58, 0.0  ;;  %v3984_v58 = vmul.f32 %v10229_v30, %v3964_v34  ;;  %v4622_v34 = vperm.slane %v10345_v15, 1 }
 0x889   : > { %3761 = vadd.xlane.f32.xlu1 %v3760_v41 }
 0x8bc   : > { %v3741_v53 = vpop.xlane.xlu2 %3740 }
 0x8bd   : > { %v3773_v4 = vmul.f32 %v3741_v53, %v13443_v55  ;;  %v4004_v53 = vadd.f32 %v10241_v23, %v3984_v58 }
 0x8bf   : > { %v3789_v7 = vadd.f32 1e-05, %v3773_v4 }
 0x8c1   : > { %7705 = vrsqrt.f32 %v3789_v7  ;;  %vm3874_vm15 = vweird.f32 %v3789_v7 }
 0x8c4   : > { %v3744_v54 = vpop.xlane.xlu2 %3743 }
 0x8c5   : > { %v3774_v52 = vmul.f32 %v3744_v54, %v13443_v55 }
 0x8c7   : > { %v7706_v59 = vpop.eup %7705  ;;  %v10310_v29 = vadd.f32 1e-05, %v3774_v52 }
 0x8c8   : > { %v3869_v31 = vmul.f32 %v7706_v59, %v3789_v7  ;;  %vm3875_vm14 = vweird.f32 %v7706_v59 }
 0x8c9   : > { %7707 = vrsqrt.f32 %v10310_v29  ;;  %vm3876_vm1 = vmor %vm3874_vm15, %vm3875_vm14  ;;  %vm3884_vm4 = vweird.f32 %v10310_v29 }
 0x8ca   : > { %v3870_v10 = vmul.f32 %v7706_v59, %v3869_v31 }
 0x8cc   : > { %v3871_v35 = vmul.f32 0.5, %v3870_v10  ;;  %v3669_v36 = vpop.xlane.xlu2 %3668  ;;  %v3747_v21 = vpop.xlane.xlu0 %3746 }
 0x8cd   : > { %v3685_v44 = vmul.f32 %v3669_v36, %v13443_v55  ;;  %v3775_v47 = vmul.f32 %v3747_v21, %v13443_v55 }
 0x8ce   : > { %v3872_v22 = vsub.f32 1.5, %v3871_v35 }
 0x8cf   : > { %v10315_v2 = vpop.eup %7707  ;;  %v10319_v56 = vsub.f32 %v10224_v48, %v3685_v44  ;;  %v3791_v28 = vadd.f32 1e-05, %v3775_v47 }
 0x8d0   : > { %v3873_v1 = vmul.f32 %v7706_v59, %v3872_v22  ;;  %v3879_v11 = vmul.f32 %v10315_v2, %v10310_v29  ;;  %vm3885_vm2 = vweird.f32 %v10315_v2  ;;  %v4030_v22 = vld [vmem:[%s13132_s9] sm:$0x3] }
 0x8d1   : > { %13456 = vst [vmem:[#allocation35_spill] sm:$0xff] %v10319_v56  ;;  %7709 = vrsqrt.f32 %v3791_v28  ;;  %v3717_v14 = vmul.f32 %v10319_v56, %v10319_v56  ;;  %vm10362_vm5 = vmor %vm3884_vm4, %vm3885_vm2  ;;  %vm3894_vm6 = vweird.f32 %v3791_v28 }
 0x8d2   : > { %v3877_v46 = vsel %vm3876_vm1, %v7706_v59, %v3873_v1  ;;  %v3880_v9 = vmul.f32 %v10315_v2, %v3879_v11  ;;  %v10338_v59 = vld [vmem:[%s13133_s10] sm:$0x77]  ;;  %v7915_v11 = vmov 0.0  }
 0x8d3   : > { %v3965_v40 = vmul.f32 %v3877_v46, %v10204_v20  ;;  %v3763_v16 = vsel %vm508_vm0, %v3717_v14, 0.0  ;;  %v4552_v44 = vperm.slane %v10338_v59, 1  ;;  %v4285_v14 = vrot.slane %v7915_v11, 7 }
 0x8d4   : > { %3764 = vadd.xlane.f32.xlu2 %v3763_v16  ;;  %v3750_v41 = vpop.xlane.xlu0 %3749  ;;  %v3881_v43 = vmul.f32 0.5, %v3880_v9  ;;  %v4372_v46 = vperm.slane %v10338_v59, 0  ;;  %v4411_v16 = vperm.slane %v10345_v15, 0  ;;  %v4762_v3 = vrot.slane %v7915_v11, 1 }
 0x8d5   : > { %v3985_v51 = vmul.f32 %v10229_v30, %v3965_v40  ;;  %v3776_v33 = vmul.f32 %v3750_v41, %v13443_v55  ;;  %v10376_v41 = vperm.slane %v4030_v22, 0  ;;  %v10378_v42 = vperm.slane %v4552_v44, 1 }
 0x8d6   : > { %v3882_v20 = vsub.f32 1.5, %v3881_v43  ;;  %v10383_v43 = vperm.slane %v4622_v34, 1 }
 0x8d7   : > { %v7710_v62 = vpop.eup %7709  ;;  %v4005_v4 = vadd.f32 %v10241_v23, %v3985_v51  ;;  %v10333_v52 = vadd.f32 1e-05, %v3776_v33  ;;  %13462 = vst [vmem:[#allocation38_spill] sm:$0xff] %v10376_v41  ;;  %v4848_v51 = vperm.slane %v10338_v59, 2  ;;  %v10390_v33 = vperm.slane %v4372_v46, 0 }
 0x8d8   : > { %v3889_v7 = vmul.f32 %v7710_v62, %v3791_v28  ;;  %v3883_v35 = vmul.f32 %v10315_v2, %v3882_v20  ;;  %vm3895_vm3 = vweird.f32 %v7710_v62  ;;  %13463 = vst [vmem:[#allocation39_spill] sm:$0xff] %v10378_v42  ;;  %v4849_v46 = vperm.slane %v10338_v59, 6 }
 0x8d9   : > { %v4017_v38 = vpack.c.bf16 %v4005_v4, %v4004_v53  ;;  %7711 = vrsqrt.f32 %v10333_v52  ;;  %vm10372_vm8 = vmor %vm3894_vm6, %vm3895_vm3  ;;  %13464 = vst [vmem:[#allocation40_spill] sm:$0xff] %v10383_v43  ;;  %v10392_v53 = vadd.s32 1, %v4284_v27  ;;  %v4918_v4 = vperm.slane %v10345_v15, 2 }
 0x8da   : > { %v3890_v54 = vmul.f32 %v7710_v62, %v3889_v7  ;;  %v3887_v29 = vsel %vm10362_vm5, %v10315_v2, %v3883_v35  ;;  %v10388_v2 = vsel %vm4326_vm7, %v4285_v14, 0.0  ;;  %13466 = vst [vmem:[#allocation42_spill] sm:$0xff] %v10390_v33  ;;  %v4373_v27 = vperm.slane %v10338_v59, 4 }
 0x8db   : > { %7053 = vmatmul.msk.bf16.gmra.mxu1 %vm508_vm0, %v4017_v38  ;;  %7061 = vmatmul.msk.bf16.gmra.mxu2 %vm508_vm0, %v4017_v38  ;;  %13465 = vst [vmem:[#allocation41_spill] sm:$0xff] %v10388_v2  ;;  %v10398_v38 = vperm.slane %v4411_v16, 0  ;;  %v10408_v34 = vperm.slane %v4848_v51, 2  ;;  %v4412_v14 = vperm.slane %v10345_v15, 4  ;;  %vm4804_vm9 = vcmp.lt.s32.totalorder %v10392_v53, 8 }
 0x8dc   : > { %v3891_v31 = vmul.f32 0.5, %v3890_v54  ;;  %v3753_v10 = vpop.xlane.xlu1 %3752  ;;  %13467 = vst [vmem:[#allocation43_spill] sm:$0xff] %v10392_v53  ;;  %v4553_v54 = vperm.slane %v10338_v59, 5  ;;  %vm3904_vm10 = vweird.f32 %v10333_v52 }
 0x8dd   : > { %v3777_v36 = vmul.f32 %v3753_v10, %v13443_v55  ;;  %v4109_v21 = vpop.f32.mrf.mxu1  ;;  %13468 = vst [vmem:[#allocation44_spill] sm:$0xff] %v10398_v38  ;;  %v10445_v63 = vperm.slane %v4412_v14, 0 }
 0x8de   : > { %v3892_v47 = vsub.f32 1.5, %v3891_v31  ;;  %v4623_v31 = vperm.slane %v10345_v15, 5  ;;  %13469 = vst [vmem:[#allocation45_spill] sm:$0xff] %v10408_v34  ;;  %v10431_v59 = vperm.slane %v4553_v54, 1  ;;  %v10447_v54 = vperm.slane %v4849_v46, 2 }
 0x8df   : > { %v10359_v1 = vadd.f32 1e-05, %v3777_v36  ;;  %v10395_v20 = vpop.eup %7711  ;;  %v10404_v36 = vadd.f32 %v4109_v21, %v10376_v41  ;;  %v10420_v21 = vperm.slane %v4918_v4, 2  ;;  %v10437_v4 = vperm.slane %v4373_v27, 0  ;;  %13476 = vst [vmem:[#allocation52_spill] sm:$0xff] %v10445_v63 }
 0x8e0   : > { %v3893_v40 = vmul.f32 %v7710_v62, %v3892_v47  ;;  %v3899_v9 = vmul.f32 %v10395_v20, %v10333_v52  ;;  %13473 = vst [vmem:[#allocation49_spill] sm:$0xff] %v10431_v59  ;;  %vm3905_vm11 = vweird.f32 %v10395_v20 }
 0x8e1   : > { %7713 = vrsqrt.f32 %v10359_v1  ;;  %13472 = vst [vmem:[#allocation48_spill] sm:$0xff] %v10420_v21  ;;  %v4287_v51 = vrot.slane %v10404_v36, 7  ;;  %vm3914_vm12 = vweird.f32 %v10359_v1  ;;  %v10534_v6 = vmul.f32 %v10378_v42, %v10404_v36  ;;  %vm10552_vm14 = vmor %vm3904_vm10, %vm3905_vm11 }
 0x8e2   : > { %v3897_v28 = vsel %vm10372_vm8, %v7710_v62, %v3893_v40  ;;  %v3966_v62 = vmul.f32 %v3887_v29, %v10212_v25  ;;  %v10410_v25 = vperm.slane %v4030_v22, 1  ;;  %v4282_v22 = vld [vmem:[%s13133_s10 + $0x10] sm:$0x77]  ;;  %v10433_v29 = vperm.slane %v4623_v31, 1  ;;  %13475 = vst [vmem:[#allocation51_spill] sm:$0xff] %v10437_v4 }
 0x8e3   : > { %v4158_v7 = vpop.f32.mrf.mxu2  ;;  %v3967_v35 = vmul.f32 %v3897_v28, %v10233_v61  ;;  %v10418_v61 = vmul.f32 %v10390_v33, %v10388_v2  ;;  %v4482_v58 = vperm.slane %v4282_v22, 0  ;;  %13477 = vst [vmem:[#allocation53_spill] sm:$0xff] %v10447_v54  ;;  %v4919_v31 = vperm.slane %v10345_v15, 6 }
 0x8e4   : > { %v3756_v10 = vpop.xlane.xlu2 %3755  ;;  %13470 = vst [vmem:[#allocation46_spill] sm:$0xff] %v10410_v25  ;;  %v3986_v28 = vmul.f32 %v10229_v30, %v3966_v62  ;;  %v10443_v48 = vadd.f32 %v4158_v7, %v10410_v25  ;;  %v3900_v5 = vmul.f32 %v10395_v20, %v3899_v9  ;;  %v4988_v7 = vperm.slane %v4282_v22, 2 }
 0x8e5   : > { %v3778_v44 = vmul.f32 %v3756_v10, %v13443_v55  ;;  %v4111_v47 = vpop.f32.mrf.mxu1  ;;  %13471 = vst [vmem:[#allocation47_spill] sm:$0xff] %v10418_v61  ;;  %v4333_v46 = vsel %vm4326_vm7, %v4287_v51, 0.0  ;;  %v4483_v19 = vperm.slane %v4282_v22, 4  ;;  %v4693_v12 = vperm.slane %v4282_v22, 5 }
 0x8e6   : > { %v10423_v40 = vadd.f32 %v4111_v47, %v10376_v41  ;;  %13474 = vst [vmem:[#allocation50_spill] sm:$0xff] %v10433_v29  ;;  %v3987_v47 = vmul.f32 %v10229_v30, %v3967_v35  ;;  %v10454_v35 = vperm.slane %v4482_v58, 0  ;;  %v4006_v14 = vadd.f32 %v10241_v23, %v3986_v28 }
 0x8e7   : > { %v10428_v16 = vpop.eup %7713  ;;  %v10439_v10 = vadd.f32 1e-05, %v3778_v44  ;;  %v4692_v44 = vperm.slane %v4282_v22, 1  ;;  %v4288_v17 = vrot.slane %v10443_v48, 7  ;;  %v4989_v11 = vperm.slane %v4282_v22, 6 }
 0x8e8   : > { %v3909_v62 = vmul.f32 %v10428_v16, %v10359_v1  ;;  %v4289_v27 = vrot.slane %v10423_v40, 7  ;;  %13478 = vst [vmem:[#allocation54_spill] sm:$0xff] %v10454_v35  ;;  %v4007_v15 = vadd.f32 %v10241_v23, %v3987_v47  ;;  %v3901_v58 = vmul.f32 0.5, %v3900_v5 }
 0x8e9   : > { %7715 = vrsqrt.f32 %v10439_v10  ;;  %v4417_v26 = vmul.f32 %v10398_v38, %v4333_v46  ;;  %v10473_v47 = vmul.f32 %v10437_v4, %v10388_v2  ;;  %v4764_v22 = vrot.slane %v10404_v36, 1 }
 0x8ea   : > { %v3910_v60 = vmul.f32 %v10428_v16, %v3909_v62  ;;  %v10468_v28 = vsel %vm4326_vm7, %v4289_v27, 0.0  ;;  %v4018_v51 = vpack.c.bf16 %v4007_v15, %v4006_v14  ;;  %v10479_v5 = vperm.slane %v4692_v44, 1 }
 0x8eb   : > { %v4160_v32 = vpop.f32.mrf.mxu2  ;;  %13479 = vst [vmem:[#allocation55_spill] sm:$0xff] %v10473_v47  ;;  %v10483_v62 = vsel %vm4804_vm9, %v4762_v3, 0.0  ;;  %v10485_v27 = vperm.slane %v4988_v7, 2  ;;  %v4334_v14 = vsel %vm4326_vm7, %v4288_v17, 0.0  ;;  %v10493_v15 = vmul.f32 0.0, %v10378_v42 }
 0x8ec   : > { %v10462_v9 = vadd.f32 %v4160_v32, %v10410_v25  ;;  %v10475_v32 = vperm.slane %v4919_v31, 2  ;;  %13481 = vst [vmem:[#allocation57_spill] sm:$0xff] %v10479_v5  ;;  %7054 = vmatmul.msk.bf16.gmra.mxu1 %vm508_vm0, %v4018_v51  ;;  %v4488_v31 = vmul.f32 %v10454_v35, %v10468_v28  ;;  %v10495_v37 = vperm.slane %v4693_v12, 1  ;;  %7062 = vmatmul.msk.bf16.gmra.mxu2 %vm508_vm0, %v4018_v51 }
 0x8ed   : > { %13482 = vst [vmem:[#allocation58_spill] sm:$0xff] %v10483_v62  ;;  %v3902_v3 = vsub.f32 1.5, %v3901_v58  ;;  %v3911_v7 = vmul.f32 0.5, %v3910_v60  ;;  %v10500_v39 = vperm.slane %v4483_v19, 0  ;;  %v10502_v50 = vperm.slane %v4989_v11, 2  ;;  %v4114_v49 = vpop.f32.mrf.mxu1 }
 0x8ee   : > { %13480 = vst [vmem:[#allocation56_spill] sm:$0xff] %v10475_v32  ;;  %v4290_v8 = vrot.slane %v10462_v9, 7  ;;  %v4449_v17 = vadd.f32 %v4417_v26, %v10418_v61  ;;  %v10508_v45 = vmul.f32 %v10408_v34, %v10483_v62  ;;  %v4810_v60 = vsel %vm4804_vm9, %v4764_v22, 0.0 }
 0x8ef   : > { %13483 = vst [vmem:[#allocation59_spill] sm:$0xff] %v10485_v27  ;;  %v10498_v44 = vpop.eup %7715  ;;  %v3759_v51 = vpop.xlane.xlu0 %3758  ;;  %v4418_v19 = vmul.f32 %v10445_v63, %v4334_v14  ;;  %v10519_v11 = vmul.f32 0.0, %v10431_v59  ;;  %v4765_v26 = vrot.slane %v10443_v48, 1  ;;  %v3903_v2 = vmul.f32 %v10395_v20, %v3902_v3 }
 0x8f0   : > { %13484 = vst [vmem:[#allocation60_spill] sm:$0xff] %v10493_v15  ;;  %v10512_v12 = vsel %vm4326_vm7, %v4290_v8, 0.0  ;;  %v3919_v58 = vmul.f32 %v10498_v44, %v10439_v10  ;;  %v4520_v61 = vadd.f32 %v4488_v31, %v4449_v17  ;;  %v10525_v8 = vadd.f32 %v4114_v49, %v10376_v41 }
 0x8f1   : > { %13485 = vst [vmem:[#allocation61_spill] sm:$0xff] %v10495_v37  ;;  %v3912_v56 = vsub.f32 1.5, %v3911_v7  ;;  %v4489_v22 = vmul.f32 %v10500_v39, %v10512_v12  ;;  %v3779_v57 = vmul.f32 %v3759_v51, %v13443_v55  ;;  %v4628_v31 = vmul.f32 %v10383_v43, %v10404_v36 }
 0x8f2   : > { %13486 = vst [vmem:[#allocation62_spill] sm:$0xff] %v10500_v39  ;;  %v10540_v49 = vmul.f32 %v10447_v54, %v10483_v62  ;;  %vm3915_vm13 = vweird.f32 %v10428_v16  ;;  %v4380_v3 = vmul.f32 %v10390_v33, %v4333_v46  ;;  %v10545_v7 = vmul.f32 %v10408_v34, %v4810_v60 }
 0x8f3   : > { %13487 = vst [vmem:[#allocation63_spill] sm:$0xff] %v10502_v50  ;;  %v4450_v17 = vadd.f32 %v4418_v19, %v10473_v47  ;;  %v4163_v51 = vpop.f32.mrf.mxu2  ;;  %v4811_v62 = vsel %vm4804_vm9, %v4765_v26, 0.0  ;;  %v3920_v55 = vmul.f32 %v10498_v44, %v3919_v58  ;;  %v4590_v46 = vadd.f32 %v10493_v15, %v4520_v61  ;;  %vm10592_vm15 = vmor %vm3914_vm12, %vm3915_vm13 }
 0x8f4   : > { %13488 = vst [vmem:[#allocation64_spill] sm:$0xff] %v10508_v45  ;;  %v3907_v19 = vsel %vm10552_vm14, %v10395_v20, %v3903_v2  ;;  %v3913_v47 = vmul.f32 %v10428_v16, %v3912_v56  ;;  %v10565_v18 = vadd.f32 1e-05, %v3779_v57  ;;  %v10572_v26 = vmul.f32 %v10431_v59, %v10443_v48 }
 0x8f5   : > { %13489 = vst [vmem:[#allocation65_spill] sm:$0xff] %v10519_v11  ;;  %v4521_v52 = vadd.f32 %v4489_v22, %v4450_v17  ;;  %v4766_v61 = vrot.slane %v10423_v40, 1  ;;  %v10576_v58 = vadd.f32 %v4163_v51, %v10410_v25  ;;  %v4381_v36 = vmul.f32 %v10437_v4, %v4334_v14  ;;  %v4116_v20 = vpop.f32.mrf.mxu1 }
 0x8f6   : > { %13490 = vst [vmem:[#allocation66_spill] sm:$0xff] %v10540_v49  ;;  %v10568_v49 = vmul.f32 %v10420_v21, %v4810_v60  ;;  %v4629_v56 = vmul.f32 %v10433_v29, %v10443_v48  ;;  %v10582_v57 = vmul.f32 %v10447_v54, %v4811_v62  ;;  %v10585_v2 = vmul.f32 %v10475_v32, %v4811_v62 }
 0x8f7   : > { %13491 = vst [vmem:[#allocation67_spill] sm:$0xff] %v10545_v7  ;;  %v4291_v7 = vrot.slane %v10525_v8, 7  ;;  %v3968_v60 = vmul.f32 %v3907_v19, %v10254_v24  ;;  %v3921_v14 = vmul.f32 0.5, %v3920_v55  ;;  %v4660_v17 = vadd.f32 %v4628_v31, %v4590_v46 }
 0x8f8   : > { %13494 = vst [vmem:[#allocation68_spill] sm:$0xff] %v10582_v57  ;;  %v3917_v62 = vsel %vm10592_vm15, %v10428_v16, %v3913_v47  ;;  %v4419_v24 = vmul.f32 %v10398_v38, %v10468_v28  ;;  %v4591_v51 = vadd.f32 %v10519_v11, %v4521_v52  ;;  %7717 = vrsqrt.f32 %v10565_v18 }
 0x8f9   : > { %v10598_v48 = vsel %vm4326_vm7, %v4291_v7, 0.0  ;;  %vm3924_vm1 = vweird.f32 %v10439_v10  ;;  %v10610_v55 = vmul.f32 %v10378_v42, %v10423_v40  ;;  %v4698_v1 = vmul.f32 %v10479_v5, %v10423_v40  ;;  %v7205_v10 = vld [vmem:[%s13135_s12 + $0x78] sm:$0xff] }
 0x8fa   : > { %v4812_v31 = vsel %vm4804_vm9, %v4766_v61, 0.0  ;;  %v4292_v16 = vrot.slane %v10576_v58, 7  ;;  %v10619_v47 = vmul.f32 %v10390_v33, %v10468_v28  ;;  %v4630_v7 = vmul.f32 %v10383_v43, %v10423_v40  ;;  %6701 = vmatpush.bf16.msra.mxu0 %v7205_v10 }
 0x8fb   : > { %13497 = vst [vmem:[#allocation69_spill] sm:$0xff] %v10610_v55  ;;  %v4767_v46 = vrot.slane %v10462_v9, 1  ;;  %v4490_v19 = vmul.f32 %v10454_v35, %v10598_v48  ;;  %v3969_v52 = vmul.f32 %v3917_v62, %v10266_v13  ;;  %v3922_v22 = vsub.f32 1.5, %v3921_v14  ;;  %v4165_v55 = vpop.f32.mrf.mxu2 }
 0x8fc   : > { %v4730_v11 = vadd.f32 %v4698_v1, %v4660_v17  ;;  %v10629_v61 = vmul.f32 %v10431_v59, %v10462_v9  ;;  %vm3925_vm2 = vweird.f32 %v10498_v44  ;;  %v4451_v28 = vadd.f32 %v4419_v24, %v4380_v3 }
 0x8fd   : > { %v10633_v15 = vmul.f32 %v10408_v34, %v4812_v31  ;;  %v4661_v40 = vadd.f32 %v4629_v56, %v4591_v51  ;;  %v10636_v57 = vmul.f32 %v10420_v21, %v4812_v31  ;;  %v4994_v35 = vmul.f32 %v10485_v27, %v4812_v31  ;;  %vm10678_vm3 = vmor %vm3924_vm1, %vm3925_vm2 }
 0x8fe   : > { %13498 = vst [vmem:[#allocation70_spill] sm:$0xff] %v10629_v61  ;;  %v4420_v13 = vmul.f32 %v10445_v63, %v10512_v12  ;;  %v10643_v14 = vsel %vm4326_vm7, %v4292_v16, 0.0  ;;  %v10645_v17 = vpop.eup %7717  ;;  %v10649_v3 = vmul.f32 %v10433_v29, %v10462_v9  ;;  %v4699_v56 = vmul.f32 %v10495_v37, %v10462_v9 }
 0x8ff   : > { %13499 = vst [vmem:[#allocation71_spill] sm:$0xff] %v10633_v15  ;;  %v4813_v62 = vsel %vm4804_vm9, %v4767_v46, 0.0  ;;  %v4522_v24 = vadd.f32 %v4490_v19, %v4451_v28  ;;  %v3923_v51 = vmul.f32 %v10498_v44, %v3922_v22  ;;  %v4886_v1 = vadd.f32 %v10508_v45, %v4730_v11  ;;  %v4119_v46 = vpop.f32.mrf.mxu1  ;;  %v7197_v28 = vld [vmem:[%s13135_s12 + $0x38] sm:$0xff]  ;;  %v13503_v45 = vld [vmem:[#allocation66_spill] sm:$0xff] }
 0x900   : > { %v3988_v31 = vmul.f32 %v10229_v30, %v3968_v60  ;;  %v3989_v16 = vmul.f32 %v10229_v30, %v3969_v52  ;;  %v10661_v21 = vmul.f32 %v10437_v4, %v10512_v12  ;;  %v4731_v15 = vadd.f32 %v4699_v56, %v4661_v40  ;;  %6652 = vmatpush.bf16.msra.mxu3 %v7197_v28 }
 0x901   : > { %v4768_v61 = vrot.slane %v10525_v8, 1  ;;  %v4491_v9 = vmul.f32 %v10500_v39, %v10643_v14  ;;  %v4452_v19 = vadd.f32 %v4420_v13, %v4381_v36  ;;  %v10667_v22 = vmul.f32 %v10447_v54, %v4813_v62 }
 0x902   : > { %v3929_v11 = vmul.f32 %v10645_v17, %v10565_v18  ;;  %v10672_v30 = vadd.f32 %v4116_v20, %v10376_v41  ;;  %v10683_v60 = vmul.f32 %v10475_v32, %v4813_v62  ;;  %v4995_v36 = vmul.f32 %v10502_v50, %v4813_v62 }
 0x903   : > { %13500 = vst [vmem:[#allocation72_spill] sm:$0xff] %v10667_v22  ;;  %v10688_v52 = vmul.f32 %v10378_v42, %v10525_v8  ;;  %v4592_v20 = vadd.f32 %v10534_v6, %v4522_v24  ;;  %v3927_v40 = vsel %vm10678_vm3, %v10498_v44, %v3923_v51  ;;  %v4956_v13 = vadd.f32 %v10568_v49, %v4886_v1  ;;  %v7196_v44 = vld [vmem:[%s13135_s12 + $0x30] sm:$0xff]  ;;  %v13504_v1 = vld [vmem:[#allocation36_spill] sm:$0xff] }
 0x904   : > { %v4008_v56 = vadd.f32 %v10241_v23, %v3988_v31  ;;  %v4009_v62 = vadd.f32 %v10241_v23, %v3989_v16  ;;  %v4887_v6 = vadd.f32 %v13503_v45, %v4731_v15  ;;  %v4421_v24 = vmul.f32 %v10398_v38, %v10598_v48  ;;  %6653 = vmatpush.bf16.msra.mxu3 %v7196_v44 }
 0x905   : > { %v10708_v32 = vsel %vm4804_vm9, %v4768_v61, 0.0  ;;  %v4523_v22 = vadd.f32 %v4491_v9, %v4452_v19  ;;  %v3930_v49 = vmul.f32 %v10645_v17, %v3929_v11  ;;  %v4293_v51 = vrot.slane %v10672_v30, 7  ;;  %v7204_v61 = vld [vmem:[%s13135_s12 + $0x70] sm:$0xff]  ;;  %v4168_v11 = vpop.f32.mrf.mxu2 }
 0x906   : > { %v4019_v23 = vpack.c.bf16 %v4009_v62, %v4008_v56  ;;  %v10716_v15 = vadd.f32 %v4119_v46, %v10376_v41  ;;  %v10722_v31 = vmul.f32 %v3927_v40, %v13504_v1  ;;  %v10726_v16 = vmul.f32 %v10383_v43, %v10525_v8  ;;  %6702 = vmatpush.bf16.msra.mxu0 %v7204_v61  ;;  %v7203_v56 = vld [vmem:[%s13135_s12 + $0x68] sm:$0xff] }
 0x907   : > { %v4662_v9 = vadd.f32 %v4630_v7, %v4592_v20  ;;  %v4700_v19 = vmul.f32 %v10479_v5, %v10525_v8  ;;  %v10730_v12 = vadd.f32 %v4994_v35, %v4956_v13  ;;  %v10734_v46 = vmul.f32 %v10390_v33, %v10598_v48 }
 0x908   : > { %v4769_v28 = vrot.slane %v10576_v58, 1  ;;  %7055 = vmatmul.msk.bf16.gmra.mxu1 %vm508_vm0, %v4019_v23  ;;  %v10739_v10 = vadd.f32 %v4165_v55, %v10410_v25  ;;  %7063 = vmatmul.msk.bf16.gmra.mxu2 %vm508_vm0, %v4019_v23  ;;  %v4453_v7 = vadd.f32 %v4421_v24, %v10619_v47  ;;  %v10745_v8 = vmul.f32 %v10408_v34, %v10708_v32  ;;  %v7195_v55 = vld [vmem:[%s13135_s12 + $0x28] sm:$0xff] }
 0x909   : > { %v10749_v35 = vmul.f32 %v10485_v27, %v10708_v32  ;;  %v4593_v48 = vadd.f32 %v10572_v26, %v4523_v22  ;;  %v4957_v20 = vadd.f32 %v10585_v2, %v4887_v6  ;;  %v3931_v40 = vmul.f32 0.5, %v3930_v49  ;;  %v4121_v6 = vpop.f32.mrf.mxu1  ;;  %6654 = vmatpush.bf16.msra.mxu3 %v7195_v55 }
 0x90a   : > { %v4339_v47 = vsel %vm4326_vm7, %v4293_v51, 0.0  ;;  %v4295_v13 = vrot.slane %v10716_v15, 7  ;;  %v4732_v62 = vadd.f32 %v4700_v19, %v4662_v9  ;;  %v10764_v26 = vmul.f32 %v10431_v59, %v10576_v58  ;;  %v7194_v9 = vld [vmem:[%s13135_s12 + $0x20] sm:$0xff]  ;;  %6703 = vmatpush.bf16.msra.mxu0 %v7203_v56 }
 0x90b   : > { %v10768_v22 = vmul.f32 %v10433_v29, %v10576_v58  ;;  %v4701_v2 = vmul.f32 %v10495_v37, %v10576_v58  ;;  %vm3934_vm4 = vweird.f32 %v10565_v18  ;;  %v10775_v24 = vmul.f32 %v10437_v4, %v10643_v14 }
 0x90c   : > { %v10779_v44 = vsel %vm4804_vm9, %v4769_v28, 0.0  ;;  %v4294_v49 = vrot.slane %v10739_v10, 7  ;;  %v10784_v51 = vsel %vm4326_vm7, %v4295_v13, 0.0  ;;  %v4422_v58 = vmul.f32 %v10445_v63, %v10643_v14 }
 0x90d   : > { %v4663_v23 = vadd.f32 %v10649_v3, %v4593_v48  ;;  %v4386_v61 = vmul.f32 %v10390_v33, %v4339_v47  ;;  %v4425_v1 = vmul.f32 %v10398_v38, %v10784_v51  ;;  %v10795_v19 = vadd.f32 %v4995_v36, %v4957_v20  ;;  %v7202_v3 = vld [vmem:[%s13135_s12 + $0x60] sm:$0xff]  ;;  %v13505_v48 = vld [vmem:[#allocation67_spill] sm:$0xff]  ;;  %v13506_v36 = vld [vmem:[#allocation54_spill] sm:$0xff]  ;;  %6655 = vmatpush.bf16.msra.mxu3 %v7194_v9 }
 0x90e   : > { %v3932_v28 = vsub.f32 1.5, %v3931_v40  ;;  %v10798_v13 = vadd.f32 %v4168_v11, %v10410_v25  ;;  %v10801_v14 = vadd.f32 %v4121_v6, %v10376_v41  ;;  %v4888_v55 = vadd.f32 %v13505_v48, %v4732_v62  ;;  %6704 = vmatpush.bf16.msra.mxu0 %v7202_v3 }
 0x90f   : > { %v10809_v45 = vmul.f32 %v10447_v54, %v10779_v44  ;;  %v4492_v20 = vmul.f32 %v13506_v36, %v4339_v47  ;;  %v4457_v40 = vadd.f32 %v4425_v1, %v4386_v61  ;;  %vm3935_vm5 = vweird.f32 %v10645_v17  ;;  %v4170_v61 = vpop.f32.mrf.mxu2  ;;  %v7193_v1 = vld [vmem:[%s13135_s12 + $0x18] sm:$0xff] }
 0x910   : > { %v10815_v11 = vmul.f32 %v10502_v50, %v10779_v44  ;;  %v4340_v56 = vsel %vm4326_vm7, %v4294_v49, 0.0  ;;  %v4296_v6 = vrot.slane %v10798_v13, 7  ;;  %v4454_v62 = vadd.f32 %v4422_v58, %v10661_v21  ;;  %vm10855_vm6 = vmor %vm3934_vm4, %vm3935_vm5 }
 0x911   : > { %v4733_v48 = vadd.f32 %v4701_v2, %v4663_v23  ;;  %v4423_v54 = vmul.f32 %v10398_v38, %v4339_v47  ;;  %v4566_v41 = vmul.f32 %v10378_v42, %v10672_v30  ;;  %v3933_v33 = vmul.f32 %v10645_v17, %v3932_v28  ;;  %v7201_v47 = vld [vmem:[%s13135_s12 + $0x58] sm:$0xff]  ;;  %6656 = vmatpush.bf16.msra.mxu3 %v7193_v1  ;;  %v13513_v1 = vld [vmem:[#allocation69_spill] sm:$0xff] }
 0x912   : > { %v4770_v49 = vrot.slane %v10672_v30, 1  ;;  %v10831_v34 = vsel %vm4326_vm7, %v4296_v6, 0.0  ;;  %v4297_v21 = vrot.slane %v10801_v14, 7  ;;  %v4958_v2 = vadd.f32 %v10636_v57, %v4888_v55  ;;  %6705 = vmatpush.bf16.msra.mxu0 %v7201_v47 }
 0x913   : > { %13507 = vst [vmem:[#allocation36_spill] sm:$0xff] %v10831_v34  ;;  %v4524_v58 = vadd.f32 %v4492_v20, %v4453_v7  ;;  %v4387_v23 = vmul.f32 %v10437_v4, %v4340_v56  ;;  %v4424_v9 = vmul.f32 %v10445_v63, %v4340_v56  ;;  %v4494_v28 = vmul.f32 %v13506_v36, %v10784_v51  ;;  %v13512_v7 = vld [vmem:[#allocation68_spill] sm:$0xff] }
 0x914   : > { %v4426_v6 = vmul.f32 %v10445_v63, %v10831_v34  ;;  %v10846_v3 = vsel %vm4326_vm7, %v4297_v21, 0.0  ;;  %v10849_v38 = vadd.f32 %v4170_v61, %v10410_v25  ;;  %v4889_v55 = vadd.f32 %v13512_v7, %v4733_v48  ;;  %v7192_v61 = vld [vmem:[%s13135_s12 + $0x10] sm:$0xff]  ;;  %v3762_v25 = vpop.xlane.xlu1 %3761 }
 0x915   : > { %13508 = vst [vmem:[#allocation67_spill] sm:$0xff] %v10846_v3  ;;  %v4455_v20 = vadd.f32 %v4423_v54, %v10734_v46  ;;  %v4634_v63 = vmul.f32 %v10383_v43, %v10672_v30  ;;  %v4493_v21 = vmul.f32 %v10500_v39, %v4340_v56  ;;  %v3937_v18 = vsel %vm10855_vm6, %v10645_v17, %v3933_v33  ;;  %v7200_v46 = vld [vmem:[%s13135_s12 + $0x50] sm:$0xff] }
 0x916   : > { %13509 = vst [vmem:[#allocation73_spill] sm:$0xff] %v10849_v38  ;;  %v4458_v4 = vadd.f32 %v4426_v6, %v4387_v23  ;;  %v4495_v48 = vmul.f32 %v10500_v39, %v10831_v34  ;;  %v4496_v54 = vmul.f32 %v13506_v36, %v10846_v3  ;;  %v5028_v56 = vadd.f32 %v10749_v35, %v4958_v2  ;;  %v13514_v36 = vld [vmem:[#allocation24_spill] sm:$0xff] }
 0x917   : > { %v4594_v7 = vadd.f32 %v13513_v1, %v4524_v58  ;;  %v4702_v33 = vmul.f32 %v10479_v5, %v10672_v30  ;;  %v10883_v17 = vsel %vm4804_vm9, %v4770_v49, 0.0  ;;  %v4456_v23 = vadd.f32 %v4424_v9, %v10775_v24  ;;  %v13515_v2 = vld [vmem:[#allocation16_spill] sm:$0xff]  ;;  %6657 = vmatpush.bf16.msra.mxu3 %v7192_v61  ;;  %v7191_v30 = vld [vmem:[%s13135_s12 + $0x8] sm:$0xff]  ;;  %6706 = vmatpush.bf16.msra.mxu0 %v7200_v46  ;;  %v13517_v1 = vld [vmem:[#allocation70_spill] sm:$0xff] }
 0x918   : > { %v4526_v6 = vadd.f32 %v4494_v28, %v4455_v20  ;;  %v4528_v57 = vadd.f32 %v4496_v54, %v4457_v40  ;;  %v4298_v47 = vrot.slane %v10849_v38, 7  ;;  %v3971_v3 = vmul.f32 %v3937_v18, %v13514_v36  ;;  %v5058_v18 = vld [vmem:[%s13134_s11] sm:$0x3] }
 0x919   : > { %v4959_v34 = vadd.f32 %v10683_v60, %v4889_v55  ;;  %v4525_v35 = vadd.f32 %v4493_v21, %v4454_v62  ;;  %v3780_v58 = vmul.f32 %v3762_v25, %v13515_v2  ;;  %v4636_v49 = vmul.f32 %v10383_v43, %v10716_v15  ;;  %v7199_v60 = vld [vmem:[%s13135_s12 + $0x48] sm:$0xff]  ;;  %v10917_v21 = vld [vmem:[%s13129_s6] ss:$0 sm:$0xff] }
 0x91a   : > { %v4527_v24 = vadd.f32 %v4495_v48, %v4456_v23  ;;  %v4598_v9 = vadd.f32 %v4566_v41, %v4528_v57  ;;  %v10897_v40 = vsel %vm4326_vm7, %v4298_v47, 0.0  ;;  %v4567_v25 = vmul.f32 %v10431_v59, %v10739_v10  ;;  %13516 = vst [vmem:[#allocation68_spill] sm:$0xff] %v10917_v21  ;;  %v7190_v46 = vld [vmem:[%s13135_s12] sm:$0xff] }
 0x91b   : > { %v4635_v36 = vmul.f32 %v10433_v29, %v10739_v10  ;;  %v4703_v62 = vmul.f32 %v10495_v37, %v10739_v10  ;;  %v4497_v41 = vmul.f32 %v10500_v39, %v10897_v40  ;;  %v4664_v28 = vadd.f32 %v10726_v16, %v4594_v7  ;;  %6658 = vmatpush.bf16.msra.mxu3 %v7191_v30 }
 0x91c   : > { %v4596_v55 = vadd.f32 %v10688_v52, %v4526_v6  ;;  %v10912_v20 = vadd.f32 %v4636_v49, %v4598_v9  ;;  %v3990_v61 = vmul.f32 %v10917_v21, %v10722_v31  ;;  %v5029_v48 = vadd.f32 %v10815_v11, %v4959_v34  ;;  %v10937_v34 = vld [vmem:[%s13130_s7] ss:$0 sm:$0xff]  ;;  %6707 = vmatpush.bf16.msra.mxu0 %v7199_v60 }
 0x91d   : > { %v4771_v16 = vrot.slane %v10739_v10, 1  ;;  %v4529_v54 = vadd.f32 %v4497_v41, %v4458_v4  ;;  %v3991_v52 = vmul.f32 %v10917_v21, %v3971_v3  ;;  %v4595_v7 = vadd.f32 %v13517_v1, %v4525_v35  ;;  %13518 = vst [vmem:[#allocation69_spill] sm:$0xff] %v10937_v34 }
 0x91e   : > { %v4597_v31 = vadd.f32 %v10764_v26, %v4527_v24  ;;  %v4637_v23 = vmul.f32 %v10433_v29, %v10798_v13  ;;  %v4010_v4 = vadd.f32 %v10937_v34, %v3990_v61  ;;  %v10941_v3 = vperm.slane %v5058_v18, 0 }
 0x91f   : > { %v4599_v10 = vadd.f32 %v4567_v25, %v4529_v54  ;;  %v4011_v11 = vadd.f32 %v10937_v34, %v3991_v52  ;;  %v10943_v6 = vperm.slane %v5058_v18, 1  ;;  %v10945_v57 = vadd.f32 1e-05, %v3780_v58  ;;  %6659 = vmatpush.bf16.msra.mxu3 %v7190_v46 }
 0x920   : > { %13519 = vst [vmem:[#allocation24_spill] sm:$0xff] %v10941_v3  ;;  %v4666_v26 = vadd.f32 %v4634_v63, %v4596_v55  ;;  %v4704_v47 = vmul.f32 %v10479_v5, %v10716_v15  ;;  %v4772_v35 = vrot.slane %v10716_v15, 1  ;;  %v5064_v24 = vadd.f32 %v10941_v3, %v10730_v12 }
 0x921   : > { %v10950_v30 = vadd.f32 %v4637_v23, %v4599_v10  ;;  %v4020_v49 = vpack.c.bf16 %v4011_v11, %v4010_v4  ;;  %v10955_v9 = vadd.f32 %v10941_v3, %v5028_v56  ;;  %v4665_v60 = vadd.f32 %v10768_v22, %v4595_v7  ;;  %v13525_v11 = vld [vmem:[#allocation48_spill] sm:$0xff] }
 0x922   : > { %v4773_v58 = vrot.slane %v10798_v13, 1  ;;  %v10961_v63 = vadd.f32 %v10943_v6, %v10795_v19  ;;  %v10964_v25 = vadd.f32 %v10943_v6, %v5029_v48  ;;  %v4734_v41 = vadd.f32 %v4702_v33, %v4664_v28 }
 0x923   : > { %13520 = vst [vmem:[#allocation16_spill] sm:$0xff] %v10950_v30  ;;  %v10968_v55 = vsel %vm4804_vm9, %v4771_v16, 0.0  ;;  %v4667_v12 = vadd.f32 %v4635_v36, %v4597_v31  ;;  %7056 = vmatmul.msk.bf16.gmra.mxu1 %vm508_vm0, %v4020_v49  ;;  %7064 = vmatmul.msk.bf16.gmra.mxu2 %vm508_vm0, %v4020_v49  ;;  %v10972_v22 = vmul.f32 0.70710677, %v5064_v24  ;;  %7719 = vrsqrt.f32 %v10945_v57  ;;  %v13524_v31 = vld [vmem:[#allocation71_spill] sm:$0xff] }
 0x924   : > { %13521 = vst [vmem:[#allocation70_spill] sm:$0xff] %v10968_v55  ;;  %v4736_v56 = vadd.f32 %v4704_v47, %v4666_v26  ;;  %v10976_v19 = vmul.f32 0.70710677, %v10955_v9  ;;  %v10979_v61 = vmul.f32 0.70710677, %v10961_v63  ;;  %v10983_v33 = vsel %vm4804_vm9, %v4772_v35, 0.0 }
 0x925   : > { %13522 = vst [vmem:[#allocation74_spill] sm:$0xff] %v10983_v33  ;;  %v4705_v36 = vmul.f32 %v10495_v37, %v10798_v13  ;;  %v5160_v28 = vmul.f32 %v10972_v22, %v10972_v22  ;;  %v10990_v18 = vmul.f32 0.70710677, %v10964_v25  ;;  %v10992_v48 = vadd.f32 %v4703_v62, %v4665_v60 }
 0x926   : > { %v10996_v16 = vsel %vm4804_vm9, %v4773_v58, 0.0  ;;  %v5240_v54 = vmul.f32 %v10976_v19, %v10976_v19  ;;  %v5200_v52 = vmul.f32 %v10979_v61, %v10979_v61  ;;  %v4890_v62 = vadd.f32 %v13524_v31, %v4734_v41 }
 0x927   : > { %13523 = vst [vmem:[#allocation75_spill] sm:$0xff] %v10996_v16  ;;  %v11002_v46 = vadd.f32 %v4705_v36, %v4667_v12  ;;  %v11004_v1 = vmin.f32 %v5160_v28, 16.0  ;;  %v5280_v7 = vmul.f32 %v10990_v18, %v10990_v18  ;;  %v4892_v10 = vadd.f32 %v10745_v8, %v4736_v56 }
 0x928   : > { %v11009_v23 = vmin.f32 %v5240_v54, 16.0  ;;  %v11011_v4 = vmin.f32 %v5200_v52, 16.0  ;;  %v4928_v26 = vmul.f32 %v13525_v11, %v10708_v32  ;;  %v11016_v47 = vmul.f32 0.5, %v5064_v24 }
 0x929   : > { %v5162_v35 = vmul.f32 2.1237322e-06, %v11004_v1  ;;  %v5173_v49 = vmul.f32 3.8918573e-05, %v11004_v1  ;;  %v11020_v60 = vmin.f32 %v5280_v7, 16.0  ;;  %v11022_v58 = vpop.eup %7719  ;;  %v4930_v8 = vmul.f32 %v13525_v11, %v10883_v17 }
 0x92a   : > { %v5242_v41 = vmul.f32 2.1237322e-06, %v11009_v23  ;;  %v5253_v12 = vmul.f32 3.8918573e-05, %v11009_v23  ;;  %v5202_v36 = vmul.f32 2.1237322e-06, %v11011_v4  ;;  %v4960_v28 = vadd.f32 %v4928_v26, %v4890_v62 }
 0x92b   : > { %v5163_v32 = vadd.f32 0.00028619796, %v5162_v35  ;;  %v5174_v24 = vadd.f32 0.001143296, %v5173_v49  ;;  %v5213_v56 = vmul.f32 3.8918573e-05, %v11011_v4  ;;  %v4962_v31 = vadd.f32 %v4930_v8, %v4892_v10 }
 0x92c   : > { %v5243_v54 = vadd.f32 0.00028619796, %v5242_v41  ;;  %v5254_v52 = vadd.f32 0.001143296, %v5253_v12  ;;  %v5203_v7 = vadd.f32 0.00028619796, %v5202_v36 }
 0x92d   : > { %v5164_v30 = vmul.f32 %v5163_v32, %v11004_v1  ;;  %v5175_v37 = vmul.f32 %v5174_v24, %v11004_v1  ;;  %v5214_v29 = vadd.f32 0.001143296, %v5213_v56  ;;  %v5282_v38 = vmul.f32 2.1237322e-06, %v11020_v60 }
 0x92e   : > { %v5244_v53 = vmul.f32 %v5243_v54, %v11009_v23  ;;  %v5255_v11 = vmul.f32 %v5254_v52, %v11009_v23  ;;  %v5204_v35 = vmul.f32 %v5203_v7, %v11011_v4  ;;  %v5293_v49 = vmul.f32 3.8918573e-05, %v11020_v60 }
 0x92f   : > { %v5165_v62 = vadd.f32 0.0036580483, %v5164_v30  ;;  %v5176_v26 = vadd.f32 0.014752088, %v5175_v37  ;;  %v5215_v41 = vmul.f32 %v5214_v29, %v11011_v4  ;;  %v5283_v10 = vadd.f32 0.00028619796, %v5282_v38 }
 0x930   : > { %v5245_v12 = vadd.f32 0.0036580483, %v5244_v53  ;;  %v5256_v36 = vadd.f32 0.014752088, %v5255_v11  ;;  %v5205_v8 = vadd.f32 0.0036580483, %v5204_v35  ;;  %v4998_v32 = vmul.f32 %v10485_v27, %v10883_v17 }
 0x931   : > { %v5166_v24 = vmul.f32 %v5165_v62, %v11004_v1  ;;  %v5177_v56 = vmul.f32 %v5176_v26, %v11004_v1  ;;  %v5216_v54 = vadd.f32 0.014752088, %v5215_v41  ;;  %v5284_v52 = vmul.f32 %v5283_v10, %v11020_v60 }
 0x932   : > { %v5246_v7 = vmul.f32 %v5245_v12, %v11009_v23  ;;  %v5257_v37 = vmul.f32 %v5256_v36, %v11009_v23  ;;  %v5206_v29 = vmul.f32 %v5205_v8, %v11011_v4  ;;  %v5294_v38 = vadd.f32 0.001143296, %v5293_v49 }
 0x933   : > { %v5167_v53 = vadd.f32 0.05243302, %v5166_v24  ;;  %v5178_v30 = vadd.f32 0.112945676, %v5177_v56  ;;  %v5217_v11 = vmul.f32 %v5216_v54, %v11011_v4  ;;  %v5285_v35 = vadd.f32 0.0036580483, %v5284_v52 }
 0x934   : > { %v5247_v43 = vadd.f32 0.05243302, %v5246_v7  ;;  %v5258_v34 = vadd.f32 0.112945676, %v5257_v37  ;;  %v5207_v62 = vadd.f32 0.05243302, %v5206_v29  ;;  %v5295_v26 = vmul.f32 %v5294_v38, %v11020_v60 }
 0x935   : > { %v5168_v41 = vmul.f32 %v5167_v53, %v11004_v1  ;;  %v5179_v10 = vmul.f32 %v5178_v30, %v11004_v1  ;;  %v5218_v12 = vadd.f32 0.112945676, %v5217_v11  ;;  %v5286_v36 = vmul.f32 %v5285_v35, %v11020_v60 }
 0x936   : > { %v5248_v8 = vmul.f32 %v5247_v43, %v11009_v23  ;;  %v5259_v49 = vmul.f32 %v5258_v34, %v11009_v23  ;;  %v5208_v24 = vmul.f32 %v5207_v62, %v11011_v4  ;;  %v5296_v56 = vadd.f32 0.014752088, %v5295_v26  ;;  %v7198_v43 = vld [vmem:[%s13135_s12 + $0x40] sm:$0xff] }
 0x937   : > { %v5169_v54 = vadd.f32 0.18741608, %v5168_v41  ;;  %v5180_v52 = vadd.f32 0.4994258, %v5179_v10  ;;  %v5219_v7 = vmul.f32 %v5218_v12, %v11011_v4  ;;  %v5287_v37 = vadd.f32 0.05243302, %v5286_v36  ;;  %6708 = vmatpush.bf16.msra.mxu0 %v7198_v43 }
 0x938   : > { %v5249_v29 = vadd.f32 0.18741608, %v5248_v8  ;;  %v5260_v38 = vadd.f32 0.4994258, %v5259_v49  ;;  %v5209_v53 = vadd.f32 0.18741608, %v5208_v24  ;;  %v5297_v30 = vmul.f32 %v5296_v56, %v11020_v60 }
 0x939   : > { %v5181_v11 = vmul.f32 %v5180_v52, %v11004_v1  ;;  %v5220_v34 = vadd.f32 0.4994258, %v5219_v7  ;;  %v5000_v35 = vmul.f32 %v10485_v27, %v10983_v33  ;;  %v5030_v62 = vadd.f32 %v4998_v32, %v4960_v28 }
 0x93a   : > { %v5170_v26 = vmul.f32 %v5169_v54, %v11004_v1  ;;  %v5250_v41 = vmul.f32 %v5249_v29, %v11009_v23  ;;  %v5261_v10 = vmul.f32 %v5260_v38, %v11009_v23  ;;  %v5298_v12 = vadd.f32 0.112945676, %v5297_v30  ;;  %v13526_v23 = vld [vmem:[#allocation72_spill] sm:$0xff] }
 0x93b   : > { %v11065_v36 = vadd.f32 1.0, %v5181_v11  ;;  %v5210_v8 = vmul.f32 %v5209_v53, %v11011_v4  ;;  %v5288_v49 = vmul.f32 %v5287_v37, %v11020_v60  ;;  %v5032_v24 = vadd.f32 %v5000_v35, %v4962_v31  ;;  %v13527_v54 = vld [vmem:[#allocation56_spill] sm:$0xff] }
 0x93c   : > { %v11070_v56 = vmul.f32 0.5, %v10955_v9  ;;  %v11072_v52 = vadd.f32 1.0, %v5261_v10  ;;  %v5221_v1 = vmul.f32 %v5220_v34, %v11011_v4  ;;  %v5299_v28 = vmul.f32 %v5298_v12, %v11020_v60 }
 0x93d   : > { %7721 = vrcp.f32 %v11065_v36  ;;  %v4891_v32 = vadd.f32 %v13526_v23, %v10992_v48  ;;  %v4929_v7 = vmul.f32 %v13527_v54, %v10779_v44  ;;  %v11083_v31 = vmul.f32 %v13527_v54, %v10968_v55 }
 0x93e   : > { %v5171_v9 = vadd.f32 1.1283791, %v5170_v26  ;;  %v5251_v37 = vadd.f32 1.1283791, %v5250_v41  ;;  %7723 = vrcp.f32 %v11072_v52  ;;  %v11088_v4 = vmul.f32 %v10502_v50, %v10968_v55 }
 0x93f   : > { %v5211_v29 = vadd.f32 1.1283791, %v5210_v8  ;;  %v5289_v38 = vadd.f32 0.18741608, %v5288_v49  ;;  %v11091_v53 = vadd.f32 %v10941_v3, %v5030_v62  ;;  %v11094_v48 = vadd.f32 %v10941_v3, %v5032_v24 }
 0x940   : > { %v5192_v44 = vand.u32 2147483647, %v11065_v36  ;;  %v5194_v30 = vand.u32 2147483648, %v11065_v36  ;;  %v11098_v11 = vadd.f32 1.0, %v5221_v1  ;;  %v5300_v43 = vadd.f32 0.4994258, %v5299_v28 }
 0x941   : > { %v5272_v34 = vand.u32 2147483647, %v11072_v52  ;;  %v11103_v35 = vadd.f32 %v10809_v45, %v11002_v46  ;;  %v11105_v26 = vadd.f32 %v4929_v7, %v4891_v32  ;;  %v11109_v62 = vmul.f32 %v10502_v50, %v10996_v16 }
 0x942   : > { %v5172_v41 = vmul.f32 %v5171_v9, %v10972_v22  ;;  %vm5188_vm8 = vweird.f32 %v11065_v36  ;;  %v5252_v10 = vmul.f32 %v5251_v37, %v10976_v19  ;;  %7725 = vrcp.f32 %v11098_v11 }
 0x943   : > { %v7722_v12 = vpop.eup %7721  ;;  %vm5268_vm10 = vweird.f32 %v11072_v52  ;;  %v5274_v45 = vand.u32 2147483648, %v11072_v52  ;;  %v5290_v46 = vmul.f32 %v5289_v38, %v11020_v60  ;;  %v5301_v8 = vmul.f32 %v5300_v43, %v11020_v60 }
 0x944   : > { %v11120_v49 = vmul.f32 0.70710677, %v11091_v53  ;;  %v7724_v24 = vpop.eup %7723  ;;  %v5184_v22 = vmul.f32 %v7722_v12, %v11065_v36  ;;  %vm11123_vm11 = vcmp.eq.f32.partialorder %v5192_v44, 8.507059e+37  ;;  %v5195_v19 = vor.u32 1.1754944e-38, %v5194_v30 }
 0x945   : > { %v11128_v28 = vmul.f32 %v5211_v29, %v10979_v61  ;;  %v5264_v23 = vmul.f32 %v7724_v24, %v11072_v52  ;;  %vm11131_vm12 = vcmp.eq.f32.partialorder %v5272_v34, 8.507059e+37  ;;  %v5232_v60 = vand.u32 2147483647, %v11098_v11 }
 0x946   : > { %v11136_v7 = vadd.f32 1.0, %v5301_v8  ;;  %v5185_v37 = vsub.f32 1.0, %v5184_v22  ;;  %v5234_v38 = vand.u32 2147483648, %v11098_v11  ;;  %v11140_v44 = vmul.f32 0.70710677, %v11094_v48 }
 0x947   : > { %v3765_v9 = vpop.xlane.xlu2 %3764  ;;  %v5320_v61 = vmul.f32 %v11120_v49, %v11120_v49  ;;  %v5265_v29 = vsub.f32 1.0, %v5264_v23  ;;  %v5275_v30 = vor.u32 1.1754944e-38, %v5274_v45  ;;  %v5291_v43 = vadd.f32 1.1283791, %v5290_v46 }
 0x948   : > { %7727 = vrcp.f32 %v11136_v7  ;;  %v7726_v34 = vpop.eup %7725  ;;  %v5186_v50 = vmul.f32 %v7722_v12, %v5185_v37  ;;  %vm5189_vm13 = vweird.f32 %v7722_v12  ;;  %vm5228_vm14 = vweird.f32 %v11098_v11 }
 0x949   : > { %v11147_v8 = vmul.f32 %v3765_v9, %v13515_v2  ;;  %v5266_v22 = vmul.f32 %v7724_v24, %v5265_v29  ;;  %vm5269_vm15 = vweird.f32 %v7724_v24  ;;  %v5224_v54 = vmul.f32 %v7726_v34, %v11098_v11  ;;  %vm5190_vm2 = vmor %vm5188_vm8, %vm5189_vm13 }
 0x94a   : > { %vm11150_vm1 = vcmp.eq.f32.partialorder %v5232_v60, 8.507059e+37  ;;  %v5187_v45 = vadd.f32 %v7722_v12, %v5186_v50  ;;  %v5235_v46 = vor.u32 1.1754944e-38, %v5234_v38  ;;  %v11154_v23 = vmin.f32 %v5320_v61, 16.0  ;;  %vm5270_vm3 = vmor %vm5268_vm10, %vm5269_vm15 }
 0x94b   : > { %v5400_v37 = vmul.f32 %v11140_v44, %v11140_v44  ;;  %v5267_v2 = vadd.f32 %v7724_v24, %v5266_v22  ;;  %v5225_v9 = vsub.f32 1.0, %v5224_v54  ;;  %v5292_v29 = vmul.f32 %v5291_v43, %v10990_v18 }
 0x94c   : > { %v5314_v55 = vand.u32 2147483648, %v11136_v7  ;;  %v5191_v60 = vsel %vm5190_vm2, %v7722_v12, %v5187_v45  ;;  %vm5229_vm4 = vweird.f32 %v7726_v34  ;;  %v5322_v50 = vmul.f32 2.1237322e-06, %v11154_v23 }
 0x94d   : > { %v5333_v38 = vmul.f32 3.8918573e-05, %v11154_v23  ;;  %v5196_v36 = vsel %vm11123_vm11, %v5195_v19, %v5191_v60  ;;  %v5271_v3 = vsel %vm5270_vm3, %v7724_v24, %v5267_v2  ;;  %v5226_v22 = vmul.f32 %v7726_v34, %v5225_v9  ;;  %vm5230_vm6 = vmor %vm5228_vm14, %vm5229_vm4 }
 0x94e   : > { %v7728_v61 = vpop.eup %7727  ;;  %v11168_v54 = vmin.f32 %v5400_v37, 16.0  ;;  %v5197_v18 = vmul.f32 %v5196_v36, %v5172_v41  ;;  %v5276_v12 = vsel %vm11131_vm12, %v5275_v30, %v5271_v3  ;;  %vm5308_vm5 = vweird.f32 %v11136_v7 }
 0x94f   : > { %v5304_v52 = vmul.f32 %v7728_v61, %v11136_v7  ;;  %v5277_v43 = vmul.f32 %v5276_v12, %v5252_v10  ;;  %v5227_v45 = vadd.f32 %v7726_v34, %v5226_v22  ;;  %v5312_v27 = vand.u32 2147483647, %v11136_v7 }
 0x950   : > { %v5315_v33 = vor.u32 1.1754944e-38, %v5314_v55  ;;  %v7066_v21 = vclamps-f32 %v5197_v18, 1.0  ;;  %v5323_v1 = vadd.f32 0.00028619796, %v5322_v50  ;;  %v5334_v41 = vadd.f32 0.001143296, %v5333_v38 }
 0x951   : > { %v5305_v24 = vsub.f32 1.0, %v5304_v52  ;;  %v7068_v19 = vclamps-f32 %v5277_v43, 1.0  ;;  %v5231_v32 = vsel %vm5230_vm6, %v7726_v34, %v5227_v45  ;;  %vm5309_vm8 = vweird.f32 %v7728_v61 }
 0x952   : > { %v5402_v3 = vmul.f32 2.1237322e-06, %v11168_v54  ;;  %v6440_v30 = vadd.f32 1.0, %v7066_v21  ;;  %v5236_v10 = vsel %vm11150_vm1, %v5235_v46, %v5231_v32  ;;  %v5324_v55 = vmul.f32 %v5323_v1, %v11154_v23  ;;  %vm5310_vm10 = vmor %vm5308_vm5, %vm5309_vm8 }
 0x953   : > { %v5306_v37 = vmul.f32 %v7728_v61, %v5305_v24  ;;  %v6442_v2 = vadd.f32 1.0, %v7068_v19  ;;  %v5237_v9 = vmul.f32 %v5236_v10, %v11128_v28  ;;  %v5335_v11 = vmul.f32 %v5334_v41, %v11154_v23 }
 0x954   : > { %v4963_v60 = vadd.f32 %v11083_v31, %v11103_v35  ;;  %v6472_v34 = vmul.f32 %v6440_v30, %v11016_v47  ;;  %v5403_v38 = vadd.f32 0.00028619796, %v5402_v3  ;;  %v5031_v21 = vadd.f32 %v11088_v4, %v11105_v26 }
 0x955   : > { %v5307_v50 = vadd.f32 %v7728_v61, %v5306_v37  ;;  %v6474_v16 = vmul.f32 %v6442_v2, %v11070_v56  ;;  %v7067_v46 = vclamps-f32 %v5237_v9, 1.0  ;;  %v5325_v28 = vadd.f32 0.0036580483, %v5324_v55 }
 0x956   : > { %v5336_v36 = vadd.f32 0.014752088, %v5335_v11  ;;  %vm5313_vm11 = vcmp.eq.f32.partialorder %v5312_v27, 8.507059e+37  ;;  %v5404_v31 = vmul.f32 %v5403_v38, %v11168_v54  ;;  %v5413_v47 = vmul.f32 3.8918573e-05, %v11168_v54 }
 0x957   : > { %v5311_v22 = vsel %vm5310_vm10, %v7728_v61, %v5307_v50  ;;  %v6504_v35 = vpack.c.bf16 %v6474_v16, %v6472_v34  ;;  %v11196_v12 = vadd.f32 1e-05, %v11147_v8  ;;  %v5033_v56 = vadd.f32 %v11109_v62, %v4963_v60 }
 0x958   : > { %v5316_v18 = vsel %vm5313_vm11, %v5315_v33, %v5311_v22  ;;  %v5337_v26 = vmul.f32 %v5336_v36, %v11154_v23  ;;  %v6441_v7 = vadd.f32 1.0, %v7067_v46  ;;  %v5326_v52 = vmul.f32 %v5325_v28, %v11154_v23 }
 0x959   : > { %v5317_v4 = vmul.f32 %v5316_v18, %v5292_v29  ;;  %6660 = vmatmul.bf16.vlgmr.msra.gmra.mxu3 %v6504_v35  ;;  %v5414_v61 = vadd.f32 0.001143296, %v5413_v47  ;;  %v11202_v27 = vadd.f32 %v10943_v6, %v5031_v21  ;;  %v5405_v24 = vadd.f32 0.0036580483, %v5404_v31  ;;  %v13534_v47 = vld [vmem:[#allocation45_spill] sm:$0xff] }
 0x95a   : > { %v5338_v45 = vadd.f32 0.112945676, %v5337_v26  ;;  %v5097_v33 = vmul.f32 0.5, %v10961_v63  ;;  %7729 = vrsqrt.f32 %v11196_v12  ;;  %v11208_v8 = vadd.f32 %v10943_v6, %v5033_v56 }
 0x95b   : > { %v7069_v43 = vclamps-f32 %v5317_v4, 1.0  ;;  %v5415_v62 = vmul.f32 %v5414_v61, %v11168_v54  ;;  %v5099_v29 = vmul.f32 0.5, %v10964_v25  ;;  %v11213_v19 = vmul.f32 0.70710677, %v11202_v27 }
 0x95c   : > { %v5339_v41 = vmul.f32 %v5338_v45, %v11154_v23  ;;  %v6473_v32 = vmul.f32 %v6441_v7, %v5097_v33  ;;  %v5327_v3 = vadd.f32 0.05243302, %v5326_v52  ;;  %v5406_v37 = vmul.f32 %v5405_v24, %v11168_v54  ;;  %v13535_v52 = vld [vmem:[#allocation42_spill] sm:$0xff] }
 0x95d   : > { %v6443_v1 = vadd.f32 1.0, %v7069_v43  ;;  %v5416_v30 = vadd.f32 0.014752088, %v5415_v62  ;;  %v11217_v55 = vmul.f32 0.70710677, %v11208_v8  ;;  %v4706_v2 = vmul.f32 %v10479_v5, %v10801_v14 }
 0x95e   : > { %v5340_v63 = vadd.f32 0.4994258, %v5339_v41  ;;  %v5360_v9 = vmul.f32 %v11213_v19, %v11213_v19  ;;  %v3939_v11 = vmul.f32 %v11022_v58, %v10945_v57  ;;  %v5328_v28 = vmul.f32 %v5327_v3, %v11154_v23 }
 0x95f   : > { %v6475_v10 = vmul.f32 %v6443_v1, %v5099_v29  ;;  %v5417_v25 = vmul.f32 %v5416_v30, %v11168_v54  ;;  %v5440_v50 = vmul.f32 %v11217_v55, %v11217_v55  ;;  %v4738_v21 = vadd.f32 %v4706_v2, %v10912_v20 }
 0x960   : > { %v5341_v34 = vmul.f32 %v5340_v63, %v11154_v23  ;;  %v11229_v38 = vpop.eup %7729  ;;  %v11232_v46 = vmin.f32 %v5360_v9, 16.0  ;;  %v5407_v22 = vadd.f32 0.05243302, %v5406_v37  ;;  %v4862_v35 = vmul.f32 %v13534_v47, %v10883_v17 }
 0x961   : > { %v6505_v60 = vpack.c.bf16 %v6475_v10, %v6473_v32  ;;  %v5418_v16 = vadd.f32 0.112945676, %v5417_v25  ;;  %v11237_v31 = vmin.f32 %v5440_v50, 16.0  ;;  %v3940_v4 = vmul.f32 %v11022_v58, %v3939_v11  ;;  %v13536_v50 = vld [vmem:[#allocation36_spill] sm:$0xff] }
 0x962   : > { %v11235_v36 = vadd.f32 1.0, %v5341_v34  ;;  %v5362_v56 = vmul.f32 2.1237322e-06, %v11232_v46  ;;  %v5373_v20 = vmul.f32 3.8918573e-05, %v11232_v46  ;;  %v11247_v26 = vmul.f32 %v10378_v42, %v10716_v15 }
 0x963   : > { %6709 = vmatmul.bf16.vlgmr.msra.gmra.mxu0 %v6505_v60  ;;  %v5419_v18 = vmul.f32 %v5418_v16, %v11168_v54  ;;  %v3949_v7 = vmul.f32 %v11229_v38, %v11196_v12  ;;  %v11254_v17 = vmul.f32 %v13535_v52, %v10784_v51  ;;  %v11256_v45 = vadd.f32 %v4862_v35, %v4738_v21  ;;  %v13537_v21 = vld [vmem:[#allocation51_spill] sm:$0xff] }
 0x964   : > { %7731 = vrcp.f32 %v11235_v36  ;;  %v5363_v43 = vadd.f32 0.00028619796, %v5362_v56  ;;  %v5329_v24 = vadd.f32 0.18741608, %v5328_v28  ;;  %v5408_v33 = vmul.f32 %v5407_v22, %v11168_v54  ;;  %v13538_v28 = vld [vmem:[#allocation67_spill] sm:$0xff] }
 0x965   : > { %v5420_v61 = vadd.f32 0.4994258, %v5419_v18  ;;  %v5374_v62 = vadd.f32 0.001143296, %v5373_v20  ;;  %v5442_v15 = vmul.f32 2.1237322e-06, %v11237_v31  ;;  %v11262_v29 = vmul.f32 %v10431_v59, %v10798_v13 }
 0x966   : > { %v5364_v41 = vmul.f32 %v5363_v43, %v11232_v46  ;;  %v5453_v51 = vmul.f32 3.8918573e-05, %v11237_v31  ;;  %v3941_v32 = vmul.f32 0.5, %v3940_v4  ;;  %v3950_v3 = vmul.f32 %v11229_v38, %v3949_v7  ;;  %v13539_v4 = vld [vmem:[#allocation44_spill] sm:$0xff] }
 0x967   : > { %v5421_v1 = vmul.f32 %v5420_v61, %v11168_v54  ;;  %v5375_v30 = vmul.f32 %v5374_v62, %v11232_v46  ;;  %v5443_v10 = vadd.f32 0.00028619796, %v5442_v15  ;;  %v11271_v63 = vmul.f32 %v10378_v42, %v10801_v14 }
 0x968   : > { %v5365_v13 = vadd.f32 0.0036580483, %v5364_v41  ;;  %v5454_v2 = vadd.f32 0.001143296, %v5453_v51  ;;  %v5330_v9 = vmul.f32 %v5329_v24, %v11154_v23  ;;  %v5409_v11 = vadd.f32 0.18741608, %v5408_v33 }
 0x969   : > { %v11273_v37 = vadd.f32 1.0, %v5421_v1  ;;  %v5376_v60 = vadd.f32 0.014752088, %v5375_v30  ;;  %v5444_v34 = vmul.f32 %v5443_v10, %v11237_v31  ;;  %v11279_v16 = vmul.f32 %v13537_v21, %v13536_v50 }
 0x96a   : > { %v7732_v25 = vpop.eup %7731  ;;  %v11283_v22 = vmul.f32 %v13535_v52, %v13538_v28  ;;  %v3942_v18 = vsub.f32 1.5, %v3941_v32  ;;  %v3951_v56 = vmul.f32 0.5, %v3950_v3  ;;  %v5366_v23 = vmul.f32 %v5365_v13, %v11232_v46 }
 0x96b   : > { %v5344_v35 = vmul.f32 %v7732_v25, %v11235_v36  ;;  %7733 = vrcp.f32 %v11273_v37  ;;  %v5377_v20 = vmul.f32 %v5376_v60, %v11232_v46  ;;  %v11291_v7 = vmul.f32 %v13539_v4, %v13538_v28 }
 0x96c   : > { %v5445_v43 = vadd.f32 0.0036580483, %v5444_v34  ;;  %v5455_v24 = vmul.f32 %v5454_v2, %v11237_v31  ;;  %v5331_v33 = vadd.f32 1.1283791, %v5330_v9  ;;  %v5354_v62 = vand.u32 2147483648, %v11235_v36 }
 0x96d   : > { %v5345_v61 = vsub.f32 1.0, %v5344_v35  ;;  %v5410_v15 = vmul.f32 %v5409_v11, %v11168_v54  ;;  %v5378_v1 = vadd.f32 0.112945676, %v5377_v20  ;;  %vm3945_vm12 = vweird.f32 %v11022_v58 }
 0x96e   : > { %vm5349_vm13 = vweird.f32 %v7732_v25  ;;  %v5352_v51 = vand.u32 2147483647, %v11235_v36  ;;  %v5456_v32 = vadd.f32 0.014752088, %v5455_v24  ;;  %v11299_v3 = vmul.f32 %v11022_v58, %v3942_v18 }
 0x96f   : > { %v5346_v41 = vmul.f32 %v7732_v25, %v5345_v61  ;;  %v3952_v30 = vsub.f32 1.5, %v3951_v56  ;;  %v5367_v10 = vadd.f32 0.05243302, %v5366_v23  ;;  %v5379_v13 = vmul.f32 %v5378_v1, %v11232_v46 }
 0x970   : > { %vm3944_vm14 = vweird.f32 %v10945_v57  ;;  %vm5348_vm15 = vweird.f32 %v11235_v36  ;;  %v5446_v54 = vmul.f32 %v5445_v43, %v11237_v31  ;;  %v5457_v11 = vmul.f32 %v5456_v32, %v11237_v31 }
 0x971   : > { %v7734_v2 = vpop.eup %7733  ;;  %v5347_v9 = vadd.f32 %v7732_v25, %v5346_v41  ;;  %v5332_v60 = vmul.f32 %v5331_v33, %v11120_v49  ;;  %vm5350_vm1 = vmor %vm5348_vm15, %vm5349_vm13  ;;  %v5355_v34 = vor.u32 1.1754944e-38, %v5354_v62  ;;  %v5380_v28 = vadd.f32 0.4994258, %v5379_v13 }
 0x972   : > { %v5424_v50 = vmul.f32 %v7734_v2, %v11273_v37  ;;  %vm5353_vm2 = vcmp.eq.f32.partialorder %v5352_v51, 8.507059e+37  ;;  %v5411_v18 = vadd.f32 1.1283791, %v5410_v15  ;;  %v5458_v56 = vadd.f32 0.112945676, %v5457_v11  ;;  %v13540_v15 = vld [vmem:[#allocation52_spill] sm:$0xff]  ;;  %vm11327_vm10 = vmor %vm3944_vm14, %vm3945_vm12 }
 0x973   : > { %v5351_v35 = vsel %vm5350_vm1, %v7732_v25, %v5347_v9  ;;  %v5368_v61 = vmul.f32 %v5367_v10, %v11232_v46  ;;  %v5381_v36 = vmul.f32 %v5380_v28, %v11232_v46  ;;  %v5432_v43 = vand.u32 2147483647, %v11273_v37 }
 0x974   : > { %v5356_v23 = vsel %vm5353_vm2, %v5355_v34, %v5351_v35  ;;  %v5425_v20 = vsub.f32 1.0, %v5424_v50  ;;  %v5434_v24 = vand.u32 2147483648, %v11273_v37  ;;  %v5447_v49 = vadd.f32 0.05243302, %v5446_v54  ;;  %v4173_v34 = vpop.f32.mrf.mxu2 }
 0x975   : > { %v5459_v33 = vmul.f32 %v5458_v56, %v11237_v31  ;;  %v5357_v62 = vmul.f32 %v5356_v23, %v5332_v60  ;;  %vm5429_vm3 = vweird.f32 %v7734_v2  ;;  %v11313_v25 = vadd.f32 1.0, %v5381_v36  ;;  %v4124_v60 = vpop.f32.mrf.mxu1 }
 0x976   : > { %v5426_v1 = vmul.f32 %v7734_v2, %v5425_v20  ;;  %v4428_v41 = vmul.f32 %v13540_v15, %v10897_v40  ;;  %v3953_v51 = vmul.f32 %v11229_v38, %v3952_v30  ;;  %vm3955_vm4 = vweird.f32 %v11229_v38 }
 0x977   : > { %v5460_v32 = vadd.f32 0.4994258, %v5459_v33  ;;  %vm5428_vm5 = vweird.f32 %v11273_v37  ;;  %v5369_v13 = vadd.f32 0.18741608, %v5368_v61  ;;  %7735 = vrcp.f32 %v11313_v25 }
 0x978   : > { %v5427_v10 = vadd.f32 %v7734_v2, %v5426_v1  ;;  %v5412_v9 = vmul.f32 %v5411_v18, %v11140_v44  ;;  %vm5430_vm6 = vmor %vm5428_vm5, %vm5429_vm3  ;;  %vm5433_vm8 = vcmp.eq.f32.partialorder %v5432_v43, 8.507059e+37  ;;  %v5435_v54 = vor.u32 1.1754944e-38, %v5434_v24  ;;  %v13543_v44 = vld [vmem:[#allocation38_spill] sm:$0xff]  ;;  %v13547_v24 = vld [vmem:[#allocation31_spill] sm:$0xff] }
 0x979   : > { %v5448_v11 = vmul.f32 %v5447_v49, %v11237_v31  ;;  %v7070_v37 = vclamps-f32 %v5357_v62, 1.0  ;;  %v5461_v28 = vmul.f32 %v5460_v32, %v11237_v31  ;;  %v11333_v35 = vadd.f32 %v4124_v60, %v13543_v44 }
 0x97a   : > { %v5431_v50 = vsel %vm5430_vm6, %v7734_v2, %v5427_v10  ;;  %v3947_v18 = vsel %vm11327_vm10, %v11022_v58, %v11299_v3  ;;  %v4459_v56 = vadd.f32 %v11291_v7, %v11254_v17  ;;  %vm3954_vm11 = vweird.f32 %v11196_v12  ;;  %v13546_v7 = vld [vmem:[#allocation46_spill] sm:$0xff] }
 0x97b   : > { %v5436_v57 = vsel %vm5433_vm8, %v5435_v54, %v5431_v50  ;;  %vm11344_vm12 = vmor %vm3954_vm11, %vm3955_vm4  ;;  %v5370_v20 = vmul.f32 %v5369_v13, %v11232_v46  ;;  %v11349_v61 = vadd.f32 1.0, %v5461_v28  ;;  %v4299_v36 = vrot.slane %v11333_v35, 7  ;;  %v13549_v13 = vld [vmem:[#allocation54_spill] sm:$0xff] }
 0x97c   : > { %v5437_v23 = vmul.f32 %v5436_v57, %v5412_v9  ;;  %v4460_v58 = vadd.f32 %v4428_v41, %v11279_v16  ;;  %v3957_v12 = vsel %vm11344_vm12, %v11229_v38, %v3953_v51  ;;  %v5449_v17 = vadd.f32 0.18741608, %v5448_v11  ;;  %v13548_v41 = vld [vmem:[#allocation35_spill] sm:$0xff]  ;;  %v4175_v2 = vpop.f32.mrf.mxu2 }
 0x97d   : > { %v11357_v3 = vadd.f32 %v4173_v34, %v13546_v7  ;;  %v7736_v43 = vpop.eup %7735  ;;  %v3972_v49 = vmul.f32 %v3947_v18, %v13547_v24  ;;  %v6444_v62 = vadd.f32 1.0, %v7070_v37  ;;  %7737 = vrcp.f32 %v11349_v61  ;;  %v4126_v34 = vpop.f32.mrf.mxu1 }
 0x97e   : > { %v7072_v33 = vclamps-f32 %v5437_v23, 1.0  ;;  %v5100_v46 = vmul.f32 0.5, %v11091_v53  ;;  %v5102_v1 = vmul.f32 0.5, %v11094_v48  ;;  %v5384_v16 = vmul.f32 %v7736_v43, %v11313_v25 }
 0x97f   : > { %v4345_v38 = vsel %vm4326_vm7, %v4299_v36, 0.0  ;;  %v3973_v51 = vmul.f32 %v3957_v12, %v13548_v41  ;;  %v5371_v10 = vadd.f32 1.1283791, %v5370_v20  ;;  %v5392_v11 = vand.u32 2147483647, %v11313_v25 }
 0x980   : > { %v6446_v32 = vadd.f32 1.0, %v7072_v33  ;;  %v4498_v9 = vmul.f32 %v13549_v13, %v4345_v38  ;;  %v5385_v54 = vsub.f32 1.0, %v5384_v16  ;;  %v5450_v60 = vmul.f32 %v5449_v17, %v11237_v31 }
 0x981   : > { %v4300_v53 = vrot.slane %v11357_v3, 7  ;;  %v6476_v48 = vmul.f32 %v6444_v62, %v5100_v46  ;;  %v5394_v37 = vand.u32 2147483648, %v11313_v25  ;;  %vm5389_vm13 = vweird.f32 %v7736_v43 }
 0x982   : > { %v6478_v30 = vmul.f32 %v6446_v32, %v5102_v1  ;;  %v4530_v50 = vadd.f32 %v4498_v9, %v4459_v56  ;;  %v5386_v28 = vmul.f32 %v7736_v43, %v5385_v54  ;;  %v4429_v18 = vmul.f32 %v13539_v4, %v4345_v38 }
 0x983   : > { %v11375_v57 = vsel %vm4326_vm7, %v4300_v53, 0.0  ;;  %v7738_v23 = vpop.eup %7737  ;;  %v5372_v31 = vmul.f32 %v5371_v10, %v11213_v19  ;;  %vm5388_vm14 = vweird.f32 %v11313_v25  ;;  %v5451_v17 = vadd.f32 1.1283791, %v5450_v60 }
 0x984   : > { %v6506_v20 = vpack.c.bf16 %v6478_v30, %v6476_v48  ;;  %v11379_v36 = vadd.f32 %v11247_v26, %v4530_v50  ;;  %v4499_v12 = vmul.f32 %v10500_v39, %v11375_v57  ;;  %v5387_v56 = vadd.f32 %v7736_v43, %v5386_v28  ;;  %vm5390_vm15 = vmor %vm5388_vm14, %vm5389_vm13  ;;  %v13551_v30 = vld [vmem:[#allocation41_spill] sm:$0xff] }
 0x985   : > { %v5464_v24 = vmul.f32 %v7738_v23, %v11349_v61  ;;  %vm5393_vm1 = vcmp.eq.f32.partialorder %v5392_v11, 8.507059e+37  ;;  %v5395_v33 = vor.u32 1.1754944e-38, %v5394_v37  ;;  %v11386_v46 = vadd.f32 %v4126_v34, %v13543_v44  ;;  %v13550_v11 = vld [vmem:[#allocation68_spill] sm:$0xff]  ;;  %v11401_v53 = vpop.f32.mrf.mxu1 }
 0x986   : > { %6665 = vmatmul.bf16.gmra.mxu3 %v6506_v20  ;;  %v4531_v62 = vadd.f32 %v4499_v12, %v4460_v58  ;;  %v5391_v19 = vsel %vm5390_vm15, %v7736_v43, %v5387_v56  ;;  %v5472_v1 = vand.u32 2147483647, %v11349_v61  ;;  %v4461_v16 = vadd.f32 %v4429_v18, %v11283_v22 }
 0x987   : > { %v5465_v26 = vsub.f32 1.0, %v5464_v24  ;;  %v5396_v41 = vsel %vm5393_vm1, %v5395_v33, %v5391_v19  ;;  %v5474_v25 = vand.u32 2147483648, %v11349_v61  ;;  %v4301_v10 = vrot.slane %v11386_v46, 7  ;;  %v13553_v24 = vld [vmem:[#allocation69_spill] sm:$0xff] }
 0x988   : > { %v11392_v32 = vadd.f32 %v11262_v29, %v4531_v62  ;;  %v4774_v9 = vrot.slane %v10801_v14, 1  ;;  %v5397_v58 = vmul.f32 %v5396_v41, %v5372_v31  ;;  %vm5469_vm2 = vweird.f32 %v7738_v23  ;;  %v11411_v31 = vpop.f32.mrf.mxu2 }
 0x989   : > { %v5466_v54 = vmul.f32 %v7738_v23, %v5465_v26  ;;  %vm5468_vm3 = vweird.f32 %v11349_v61  ;;  %v4347_v43 = vsel %vm4326_vm7, %v4301_v10, 0.0  ;;  %v4392_v22 = vmul.f32 %v13535_v52, %v4345_v38 }
 0x98a   : > { %v3992_v60 = vmul.f32 %v13550_v11, %v3972_v49  ;;  %v4431_v34 = vmul.f32 %v13539_v4, %v4347_v43  ;;  %v4500_v48 = vmul.f32 %v13549_v13, %v4347_v43  ;;  %v11407_v37 = vmul.f32 %v13549_v13, %v13551_v30  ;;  %vm5470_vm4 = vmor %vm5468_vm3, %vm5469_vm2 }
 0x98b   : > { %v5467_v29 = vadd.f32 %v7738_v23, %v5466_v54  ;;  %v5452_v61 = vmul.f32 %v5451_v17, %v11217_v55  ;;  %vm5473_vm5 = vcmp.eq.f32.partialorder %v5472_v1, 8.507059e+37  ;;  %v5475_v50 = vor.u32 1.1754944e-38, %v5474_v25  ;;  %v13554_v17 = vld [vmem:[#allocation40_spill] sm:$0xff] }
 0x98c   : > { %13552 = vst [vmem:[#allocation71_spill] sm:$0xff] %v11407_v37  ;;  %v3993_v38 = vmul.f32 %v13550_v11, %v3973_v51  ;;  %v7071_v28 = vclamps-f32 %v5397_v58, 1.0  ;;  %v4463_v18 = vadd.f32 %v4431_v34, %v4392_v22  ;;  %v4532_v20 = vadd.f32 %v4500_v48, %v4461_v16 }
 0x98d   : > { %v5471_v49 = vsel %vm5470_vm4, %v7738_v23, %v5467_v29  ;;  %v4572_v56 = vmul.f32 %v10378_v42, %v11333_v35  ;;  %v4012_v33 = vadd.f32 %v13553_v24, %v3992_v60  ;;  %v4640_v19 = vmul.f32 %v13554_v17, %v11333_v35  ;;  %v11444_v48 = vpop.f32.mrf.mxu1 }
 0x98e   : > { %v5476_v12 = vsel %vm5473_vm5, %v5475_v50, %v5471_v49  ;;  %v4013_v62 = vadd.f32 %v13553_v24, %v3993_v38  ;;  %v4534_v51 = vadd.f32 %v11407_v37, %v4463_v18  ;;  %v4602_v23 = vadd.f32 %v11271_v63, %v4532_v20  ;;  %v13558_v20 = vld [vmem:[#allocation73_spill] sm:$0xff] }
 0x98f   : > { %v5477_v55 = vmul.f32 %v5476_v12, %v5452_v61  ;;  %v4820_v1 = vsel %vm4804_vm9, %v4774_v9, 0.0  ;;  %v4710_v16 = vmul.f32 %v10479_v5, %v11386_v46  ;;  %v11426_v25 = vadd.f32 %v4175_v2, %v13546_v7 }
 0x990   : > { %v4021_v41 = vpack.c.bf16 %v4013_v62, %v4012_v33  ;;  %v6445_v58 = vadd.f32 1.0, %v7071_v28  ;;  %v11428_v54 = vadd.f32 %v4572_v56, %v4534_v51  ;;  %v4672_v43 = vadd.f32 %v4640_v19, %v4602_v23  ;;  %v11450_v18 = vpop.f32.mrf.mxu2  ;;  %v13559_v56 = vld [vmem:[#allocation50_spill] sm:$0xff]  ;;  %v13562_v51 = vld [vmem:[#allocation48_spill] sm:$0xff] }
 0x991   : > { %v7073_v10 = vclamps-f32 %v5477_v55, 1.0  ;;  %v5101_v22 = vmul.f32 0.5, %v11202_v27  ;;  %v4430_v63 = vmul.f32 %v13540_v15, %v11375_v57  ;;  %v4302_v9 = vrot.slane %v11426_v25, 7  ;;  %13557 = vst [vmem:[#allocation36_spill] sm:$0xff] %v11450_v18  ;;  %v13561_v19 = vld [vmem:[#allocation74_spill] sm:$0xff] }
 0x992   : > { %7057 = vmatmul.msk.bf16.gmra.mxu1 %vm508_vm0, %v4021_v41  ;;  %7065 = vmatmul.msk.bf16.gmra.mxu2 %vm508_vm0, %v4021_v41  ;;  %v5103_v11 = vmul.f32 0.5, %v11208_v8  ;;  %v4742_v60 = vadd.f32 %v4710_v16, %v4672_v43  ;;  %v4866_v29 = vmul.f32 %v13534_v47, %v4820_v1  ;;  %v4391_v34 = vmul.f32 %v13537_v21, %v10897_v40 }
 0x993   : > { %v6447_v2 = vadd.f32 1.0, %v7073_v10  ;;  %v11442_v27 = vsel %vm4326_vm7, %v4302_v9, 0.0  ;;  %v6477_v61 = vmul.f32 %v6445_v58, %v5101_v22  ;;  %v4571_v40 = vmul.f32 %v10431_v59, %v13558_v20  ;;  %v13564_v10 = vld [vmem:[#allocation59_spill] sm:$0xff] }
 0x994   : > { %v11446_v38 = vadd.f32 %v4866_v29, %v4742_v60  ;;  %v4462_v28 = vadd.f32 %v4430_v63, %v4391_v34  ;;  %v4501_v8 = vmul.f32 %v10500_v39, %v11442_v27  ;;  %v4641_v24 = vmul.f32 %v13559_v56, %v11357_v3  ;;  %v13565_v63 = vld [vmem:[#allocation24_spill] sm:$0xff] }
 0x995   : > { %v6479_v50 = vmul.f32 %v6447_v2, %v5103_v11  ;;  %v11458_v55 = vpop.f32.mrf.mxu1  ;;  %v4932_v23 = vmul.f32 %v13562_v51, %v13561_v19  ;;  %v5002_v58 = vmul.f32 %v13564_v10, %v4820_v1  ;;  %v4775_v2 = vrot.slane %v13558_v20, 1 }
 0x996   : > { %13556 = vst [vmem:[#allocation72_spill] sm:$0xff] %v11446_v38  ;;  %v4533_v12 = vadd.f32 %v4501_v8, %v4462_v28 }
 0x997   : > { %v6507_v49 = vpack.c.bf16 %v6479_v50, %v6477_v61  ;;  %13560 = vst [vmem:[#allocation67_spill] sm:$0xff] %v11458_v55  ;;  %v4964_v41 = vadd.f32 %v4932_v23, %v11256_v45  ;;  %v13567_v61 = vld [vmem:[#allocation70_spill] sm:$0xff]  ;;  %v13568_v50 = vld [vmem:[#allocation53_spill] sm:$0xff]  ;;  %v11479_v45 = vsel %vm4804_vm9, %v4775_v2, 0.0  ;;  %v4776_v23 = vrot.slane %v11333_v35, 1 }
 0x998   : > { %v4603_v33 = vadd.f32 %v4571_v40, %v4533_v12  ;;  %v11462_v16 = vpop.f32.mrf.mxu2  ;;  %v11475_v28 = vmul.f32 %v13568_v50, %v13567_v61  ;;  %v13569_v40 = vld [vmem:[#allocation75_spill] sm:$0xff]  ;;  %v4639_v2 = vmul.f32 %v13559_v56, %v13558_v20  ;;  %v13574_v61 = vld [vmem:[#allocation16_spill] sm:$0xff]  ;;  %v11510_v38 = vmul.f32 %v13568_v50, %v11479_v45 }
 0x999   : > { %6714 = vmatmul.bf16.gmra.mxu0 %v6507_v49  ;;  %13563 = vst [vmem:[#allocation31_spill] sm:$0xff] %v11462_v16  ;;  %v5034_v43 = vadd.f32 %v5002_v58, %v4964_v41  ;;  %v11485_v49 = vmul.f32 %v13534_v47, %v13561_v19  ;;  %v11489_v12 = vmul.f32 %v13568_v50, %v13569_v40 }
 0x99a   : > { %v11456_v62 = vadd.f32 %v4641_v24, %v4603_v33  ;;  %v13571_v24 = vld [vmem:[#allocation61_spill] sm:$0xff]  ;;  %v4638_v41 = vmul.f32 %v13554_v17, %v10801_v14  ;;  %13575 = vst [vmem:[#allocation73_spill] sm:$0xff] %v11510_v38  ;;  %v11513_v14 = vmul.f32 %v13562_v51, %v4820_v1 }
 0x99b   : > { %v5072_v9 = vadd.f32 %v13565_v63, %v5034_v43  ;;  %13570 = vst [vmem:[#allocation68_spill] sm:$0xff] %v11489_v12  ;;  %v4707_v33 = vmul.f32 %v13571_v24, %v13558_v20  ;;  %v11524_v20 = vsel %vm4804_vm9, %v4776_v23, 0.0  ;;  %v4573_v23 = vmul.f32 %v10431_v59, %v11357_v3 }
 0x99c   : > { %v4670_v16 = vadd.f32 %v4638_v41, %v11379_v36  ;;  %v11547_v36 = vadd.f32 %v11401_v53, %v13543_v44  ;;  %v4671_v41 = vadd.f32 %v4639_v2, %v11392_v32  ;;  %v4432_v53 = vmul.f32 %v13540_v15, %v11442_v27 }
 0x99d   : > { %v4136_v22 = vpop.f32.mrf.mxu1  ;;  %v11468_v60 = vmul.f32 0.70710677, %v5072_v9  ;;  %v11506_v37 = vadd.f32 %v4707_v33, %v13574_v61  ;;  %v4642_v33 = vmul.f32 %v13554_v17, %v11386_v46  ;;  %v4778_v61 = vrot.slane %v11386_v46, 1 }
 0x99e   : > { %v11471_v29 = vadd.f32 %v4136_v22, %v13543_v44  ;;  %v11543_v46 = vmul.f32 0.0, %v10479_v5  ;;  %v4393_v27 = vmul.f32 %v13537_v21, %v11375_v57  ;;  %v11589_v57 = vmul.f32 %v10500_v39, %v13551_v30 }
 0x99f   : > { %13566 = vst [vmem:[#allocation35_spill] sm:$0xff] %v11468_v60  ;;  %v5480_v8 = vmul.f32 %v11468_v60, %v11468_v60  ;;  %v11518_v60 = vmul.f32 0.5, %v5072_v9 }
 0x9a0   : > { %v4185_v11 = vpop.f32.mrf.mxu2  ;;  %v4313_v58 = vrot.slane %v11471_v29, 7  ;;  %13579 = vst [vmem:[#allocation75_spill] sm:$0xff] %v11543_v46 }
 0x9a1   : > { %v11498_v43 = vadd.f32 %v4185_v11, %v13546_v7  ;;  %v4708_v11 = vmul.f32 %v10479_v5, %v11333_v35  ;;  %13576 = vst [vmem:[#allocation74_spill] sm:$0xff] %v11518_v60  ;;  %v11520_v12 = vmin.f32 %v5480_v8, 16.0  ;;  %v4674_v60 = vadd.f32 %v4642_v33, %v11428_v54 }
 0x9a2   : > { %v11533_v35 = vsel %vm4326_vm7, %v4313_v58, 0.0  ;;  %v4709_v58 = vmul.f32 %v13571_v24, %v11357_v3  ;;  %v4824_v54 = vsel %vm4804_vm9, %v4778_v61, 0.0  ;;  %v4307_v5 = vrot.slane %v11547_v36, 7  ;;  %13585 = vst [vmem:[#allocation80_spill] sm:$0xff] %v11589_v57 }
 0x9a3   : > { %13572 = vst [vmem:[#allocation41_spill] sm:$0xff] %v11498_v43  ;;  %v4314_v9 = vrot.slane %v11498_v43, 7  ;;  %v4402_v32 = vmul.f32 %v13535_v52, %v11533_v35  ;;  %v4740_v2 = vadd.f32 %v4708_v11, %v4670_v16  ;;  %v4744_v61 = vadd.f32 %v11543_v46, %v4674_v60 }
 0x9a4   : > { %13577 = vst [vmem:[#allocation48_spill] sm:$0xff] %v11533_v35  ;;  %v11578_v38 = vadd.f32 %v4709_v58, %v4671_v41  ;;  %v4868_v16 = vmul.f32 %v13534_v47, %v11524_v20  ;;  %v4938_v11 = vmul.f32 %v13562_v51, %v4824_v54  ;;  %v4464_v60 = vadd.f32 %v4432_v53, %v4393_v27 }
 0x9a5   : > { %v4139_v34 = vpop.f32.mrf.mxu1  ;;  %v11571_v33 = vsel %vm4326_vm7, %v4314_v9, 0.0  ;;  %v11596_v58 = vmul.f32 %v13564_v10, %v4824_v54  ;;  %v4353_v27 = vsel %vm4326_vm7, %v4307_v5, 0.0  ;;  %v4711_v54 = vmul.f32 %v13571_v24, %v11426_v25 }
 0x9a6   : > { %v11501_v19 = vadd.f32 %v4139_v34, %v13543_v44  ;;  %v4777_v34 = vrot.slane %v11357_v3, 1  ;;  %13582 = vst [vmem:[#allocation77_spill] sm:$0xff] %v11571_v33  ;;  %v4900_v30 = vadd.f32 %v4868_v16, %v4744_v61  ;;  %v4535_v61 = vadd.f32 %v11589_v57, %v4464_v60  ;;  %v13590_v16 = vld [vmem:[#allocation56_spill] sm:$0xff] }
 0x9a7   : > { %13583 = vst [vmem:[#allocation78_spill] sm:$0xff] %v11578_v38 }
 0x9a8   : > { %13573 = vst [vmem:[#allocation69_spill] sm:$0xff] %v11501_v19  ;;  %v4188_v22 = vpop.f32.mrf.mxu2  ;;  %v4315_v1 = vrot.slane %v11501_v19, 7  ;;  %v11642_v57 = vadd.f32 %v4938_v11, %v4900_v30  ;;  %v4582_v11 = vmul.f32 %v10378_v42, %v11471_v29 }
 0x9a9   : > { %v11537_v8 = vadd.f32 %v4188_v22, %v13546_v7  ;;  %v11554_v22 = vsel %vm4804_vm9, %v4777_v34, 0.0  ;;  %v4779_v34 = vrot.slane %v11426_v25, 1  ;;  %13586 = vst [vmem:[#allocation81_spill] sm:$0xff] %v11596_v58 }
 0x9aa   : > { %13580 = vst [vmem:[#allocation16_spill] sm:$0xff] %v11554_v22  ;;  %v11558_v55 = vsel %vm4326_vm7, %v4315_v1, 0.0  ;;  %v11621_v5 = vmul.f32 %v13568_v50, %v11554_v22  ;;  %v4784_v22 = vrot.slane %v11547_v36, 1 }
 0x9ab   : > { %13578 = vst [vmem:[#allocation70_spill] sm:$0xff] %v11537_v8  ;;  %v4441_v3 = vmul.f32 %v13539_v4, %v11558_v55  ;;  %v4316_v1 = vrot.slane %v11537_v8, 7 }
 0x9ac   : > { %13581 = vst [vmem:[#allocation76_spill] sm:$0xff] %v11558_v55 }
 0x9ad   : > { %v4473_v35 = vadd.f32 %v4441_v3, %v4402_v32  ;;  %v4141_v18 = vpop.f32.mrf.mxu1  ;;  %v11585_v9 = vsel %vm4326_vm7, %v4316_v1, 0.0  ;;  %v4403_v32 = vmul.f32 %v13537_v21, %v11571_v33  ;;  %v4643_v3 = vmul.f32 %v13559_v56, %v11426_v25  ;;  %13596 = vst [vmem:[#allocation88_spill] sm:$0xff] %v11642_v57 }
 0x9ae   : > { %13584 = vst [vmem:[#allocation79_spill] sm:$0xff] %v11585_v9  ;;  %v4442_v41 = vmul.f32 %v13540_v15, %v11585_v9  ;;  %v4825_v1 = vsel %vm4804_vm9, %v4779_v34, 0.0  ;;  %v11603_v53 = vadd.f32 %v4141_v18, %v13543_v44  ;;  %v11613_v9 = vmul.f32 0.0, %v13571_v24 }
 0x9af   : > { %v4179_v34 = vadd.f32 %v11411_v31, %v13546_v7  ;;  %v11628_v25 = vmul.f32 %v10378_v42, %v11547_v36  ;;  %v4433_v31 = vmul.f32 %v13539_v4, %v4353_v27 }
 0x9b0   : > { %v4190_v55 = vpop.f32.mrf.mxu2  ;;  %13587 = vst [vmem:[#allocation82_spill] sm:$0xff] %v11603_v53  ;;  %v4474_v46 = vadd.f32 %v4442_v41, %v4403_v32  ;;  %v4317_v18 = vrot.slane %v11603_v53, 7  ;;  %v13592_v32 = vld [vmem:[#allocation63_spill] sm:$0xff]  ;;  %v11636_v53 = vmul.f32 %v13554_v17, %v11547_v36  ;;  %v11666_v36 = vadd.f32 %v11444_v48, %v13543_v44 }
 0x9b1   : > { %v11608_v33 = vadd.f32 %v4190_v55, %v13546_v7  ;;  %13589 = vst [vmem:[#allocation84_spill] sm:$0xff] %v11613_v9  ;;  %v11624_v55 = vmul.f32 %v13590_v16, %v4825_v1  ;;  %v11631_v41 = vmul.f32 %v13592_v32, %v4825_v1  ;;  %v4896_v1 = vadd.f32 %v11485_v49, %v4740_v2 }
 0x9b2   : > { %13591 = vst [vmem:[#allocation85_spill] sm:$0xff] %v11628_v25  ;;  %v11640_v60 = vsel %vm4326_vm7, %v4317_v18, 0.0  ;;  %v4308_v38 = vrot.slane %v4179_v34, 7  ;;  %v4605_v18 = vadd.f32 %v4573_v23, %v4535_v61  ;;  %v4785_v2 = vrot.slane %v4179_v34, 1 }
 0x9b3   : > { %13588 = vst [vmem:[#allocation83_spill] sm:$0xff] %v11608_v33  ;;  %v4512_v58 = vmul.f32 %v13549_v13, %v11640_v60  ;;  %v4318_v25 = vrot.slane %v11608_v33, 7  ;;  %v13598_v33 = vld [vmem:[#allocation47_spill] sm:$0xff]  ;;  %v4652_v23 = vmul.f32 %v13554_v17, %v11501_v19  ;;  %v5493_v48 = vmul.f32 3.8918573e-05, %v11520_v12 }
 0x9b4   : > { %13593 = vst [vmem:[#allocation63_spill] sm:$0xff] %v11631_v41  ;;  %v11649_v41 = vmul.f32 %v13535_v52, %v4353_v27  ;;  %v11662_v49 = vadd.f32 %v4433_v31, %v13598_v33  ;;  %v4583_v33 = vmul.f32 %v10431_v59, %v11498_v43  ;;  %v5482_v31 = vmul.f32 2.1237322e-06, %v11520_v12 }
 0x9b5   : > { %13594 = vst [vmem:[#allocation86_spill] sm:$0xff] %v11636_v53  ;;  %v11653_v53 = vmul.f32 %v10431_v59, %v4179_v34  ;;  %v4544_v30 = vadd.f32 %v4512_v58, %v4473_v35  ;;  %v4966_v35 = vadd.f32 %v11513_v14, %v4896_v1  ;;  %v5004_v58 = vmul.f32 %v13564_v10, %v11524_v20 }
 0x9b6   : > { %13595 = vst [vmem:[#allocation87_spill] sm:$0xff] %v11640_v60  ;;  %v11659_v60 = vsel %vm4326_vm7, %v4318_v25, 0.0  ;;  %v4895_v14 = vadd.f32 %v11475_v28, %v11506_v37  ;;  %v4933_v43 = vmul.f32 %v13590_v16, %v13569_v40  ;;  %v4354_v10 = vsel %vm4326_vm7, %v4308_v38, 0.0 }
 0x9b7   : > { %13597 = vst [vmem:[#allocation89_spill] sm:$0xff] %v11659_v60  ;;  %v4513_v27 = vmul.f32 %v10500_v39, %v11659_v60  ;;  %v4614_v61 = vadd.f32 %v4582_v11, %v4544_v30  ;;  %v4653_v60 = vmul.f32 %v13559_v56, %v11537_v8  ;;  %v5036_v19 = vadd.f32 %v5004_v58, %v4966_v35 }
 0x9b8   : > { %v5483_v11 = vadd.f32 0.00028619796, %v5482_v31  ;;  %v5494_v30 = vadd.f32 0.001143296, %v5493_v48  ;;  %v4965_v28 = vadd.f32 %v4933_v43, %v4895_v14  ;;  %v5003_v35 = vmul.f32 %v13592_v32, %v11479_v45 }
 0x9b9   : > { %v4545_v25 = vadd.f32 %v4513_v27, %v4474_v46  ;;  %v11681_v57 = vadd.f32 %v4652_v23, %v4614_v61  ;;  %v4675_v46 = vadd.f32 %v4643_v3, %v4605_v18  ;;  %v4830_v27 = vsel %vm4804_vm9, %v4784_v22, 0.0 }
 0x9ba   : > { %v11692_v23 = vadd.f32 %v13565_v63, %v5036_v19  ;;  %v5495_v37 = vmul.f32 %v5494_v30, %v11520_v12  ;;  %v4743_v40 = vadd.f32 %v4711_v54, %v11456_v62  ;;  %v11701_v3 = vmul.f32 %v13559_v56, %v4179_v34  ;;  %v13606_v30 = vld [vmem:[#allocation73_spill] sm:$0xff] }
 0x9bb   : > { %13599 = vst [vmem:[#allocation47_spill] sm:$0xff] %v11681_v57  ;;  %v4615_v1 = vadd.f32 %v4583_v33, %v4545_v25  ;;  %v4309_v22 = vrot.slane %v11666_v36, 7  ;;  %v4831_v19 = vsel %vm4804_vm9, %v4785_v2, 0.0  ;;  %v5035_v43 = vadd.f32 %v5003_v35, %v4965_v28  ;;  %v13609_v28 = vld [vmem:[#allocation55_spill] sm:$0xff] }
 0x9bc   : > { %v11705_v38 = vmul.f32 0.70710677, %v11692_v23  ;;  %v5496_v18 = vadd.f32 0.014752088, %v5495_v37  ;;  %v11711_v58 = vmul.f32 %v13534_v47, %v4830_v27  ;;  %v11714_v62 = vmul.f32 %v13562_v51, %v4830_v27 }
 0x9bd   : > { %v11694_v61 = vadd.f32 %v4653_v60, %v4615_v1  ;;  %v5484_v60 = vmul.f32 %v5483_v11, %v11520_v12  ;;  %v4434_v54 = vmul.f32 %v13540_v15, %v4354_v10  ;;  %v4745_v33 = vadd.f32 %v11613_v9, %v4675_v46 }
 0x9be   : > { %13601 = vst [vmem:[#allocation91_spill] sm:$0xff] %v11711_v58  ;;  %v5560_v34 = vmul.f32 %v11705_v38, %v11705_v38  ;;  %v11721_v25 = vmul.f32 %v13537_v21, %v4354_v10  ;;  %v5497_v2 = vmul.f32 %v5496_v18, %v11520_v12  ;;  %v11725_v31 = vadd.f32 %v10943_v6, %v5035_v43 }
 0x9bf   : > { %13600 = vst [vmem:[#allocation90_spill] sm:$0xff] %v11694_v61  ;;  %v11728_v48 = vmul.f32 %v13568_v50, %v4831_v19  ;;  %v11731_v14 = vmul.f32 %v13590_v16, %v4831_v19  ;;  %v4355_v1 = vsel %vm4326_vm7, %v4309_v22, 0.0  ;;  %v11738_v46 = vadd.f32 %v13606_v30, %v4743_v40 }
 0x9c0   : > { %13602 = vst [vmem:[#allocation92_spill] sm:$0xff] %v11714_v62  ;;  %v11735_v11 = vmin.f32 %v5560_v34, 16.0  ;;  %v11742_v10 = vmul.f32 %v10378_v42, %v11666_v36  ;;  %v5485_v27 = vadd.f32 0.0036580483, %v5484_v60  ;;  %v5498_v37 = vadd.f32 0.112945676, %v5497_v2 }
 0x9c1   : > { %13603 = vst [vmem:[#allocation93_spill] sm:$0xff] %v11725_v31  ;;  %v11745_v35 = vadd.f32 %v4434_v54, %v13609_v28  ;;  %v11750_v22 = vmul.f32 0.70710677, %v11725_v31  ;;  %v4901_v43 = vadd.f32 %v11621_v5, %v4745_v33  ;;  %v4504_v40 = vmul.f32 %v13549_v13, %v4355_v1  ;;  %v13611_v54 = vld [vmem:[#allocation36_spill] sm:$0xff]  ;;  %v13613_v62 = vld [vmem:[#allocation67_spill] sm:$0xff] }
 0x9c2   : > { %13604 = vst [vmem:[#allocation94_spill] sm:$0xff] %v11728_v48  ;;  %v5562_v19 = vmul.f32 2.1237322e-06, %v11735_v11  ;;  %v5573_v18 = vmul.f32 3.8918573e-05, %v11735_v11  ;;  %v11756_v34 = vmul.f32 %v13554_v17, %v11666_v36  ;;  %v5499_v60 = vmul.f32 %v5498_v37, %v11520_v12 }
 0x9c3   : > { %13605 = vst [vmem:[#allocation95_spill] sm:$0xff] %v11731_v14  ;;  %v4181_v2 = vadd.f32 %v13611_v54, %v13546_v7  ;;  %v5520_v9 = vmul.f32 %v11750_v22, %v11750_v22  ;;  %v11764_v61 = vmul.f32 %v13535_v52, %v4355_v1  ;;  %v4786_v5 = vrot.slane %v11666_v36, 1 }
 0x9c4   : > { %13607 = vst [vmem:[#allocation73_spill] sm:$0xff] %v11738_v46  ;;  %v5563_v30 = vadd.f32 0.00028619796, %v5562_v19  ;;  %v5574_v28 = vadd.f32 0.001143296, %v5573_v18  ;;  %v5486_v33 = vmul.f32 %v5485_v27, %v11520_v12  ;;  %v4435_v14 = vmul.f32 %v13539_v4, %v4355_v1  ;;  %v13612_v18 = vld [vmem:[#allocation57_spill] sm:$0xff] }
 0x9c5   : > { %13608 = vst [vmem:[#allocation96_spill] sm:$0xff] %v11742_v10  ;;  %v5500_v57 = vadd.f32 0.4994258, %v5499_v60  ;;  %v11771_v54 = vmin.f32 %v5520_v9, 16.0  ;;  %v4536_v19 = vadd.f32 %v4504_v40, %v11662_v49  ;;  %v4714_v58 = vmul.f32 %v13612_v18, %v11666_v36 }
 0x9c6   : > { %13610 = vst [vmem:[#allocation55_spill] sm:$0xff] %v11750_v22  ;;  %v5564_v37 = vmul.f32 %v5563_v30, %v11735_v11  ;;  %v5575_v48 = vmul.f32 %v5574_v28, %v11735_v11  ;;  %v11778_v31 = vadd.f32 %v13613_v62, %v13543_v44  ;;  %v11782_v60 = vadd.f32 %v11624_v55, %v4901_v43  ;;  %v13617_v43 = vld [vmem:[#allocation60_spill] sm:$0xff] }
 0x9c7   : > { %v5501_v27 = vmul.f32 %v5500_v57, %v11520_v12  ;;  %v4310_v1 = vrot.slane %v4181_v2, 7  ;;  %v11786_v9 = vsel %vm4804_vm9, %v4786_v5, 0.0  ;;  %v5487_v49 = vadd.f32 0.05243302, %v5486_v33  ;;  %v13616_v57 = vld [vmem:[#allocation31_spill] sm:$0xff] }
 0x9c8   : > { %13614 = vst [vmem:[#allocation36_spill] sm:$0xff] %v11782_v60  ;;  %v5565_v30 = vadd.f32 0.0036580483, %v5564_v37  ;;  %v5576_v46 = vadd.f32 0.014752088, %v5575_v48  ;;  %v11792_v62 = vadd.f32 %v4435_v14, %v11649_v41  ;;  %v11796_v28 = vadd.f32 %v13616_v57, %v13546_v7 }
 0x9c9   : > { %13615 = vst [vmem:[#allocation67_spill] sm:$0xff] %v11786_v9  ;;  %v11788_v40 = vadd.f32 1.0, %v5501_v27  ;;  %v5533_v36 = vmul.f32 3.8918573e-05, %v11771_v54  ;;  %v4606_v37 = vadd.f32 %v13617_v43, %v4536_v19  ;;  %v11802_v5 = vmul.f32 %v10431_v59, %v4181_v2 }
 0x9ca   : > { %v5566_v55 = vmul.f32 %v5565_v30, %v11735_v11  ;;  %v5577_v48 = vmul.f32 %v5576_v46, %v11735_v11  ;;  %v11805_v33 = vmul.f32 %v13559_v56, %v4181_v2  ;;  %v11810_v41 = vmul.f32 %v13534_v47, %v11786_v9 }
 0x9cb   : > { %13618 = vst [vmem:[#allocation31_spill] sm:$0xff] %v11802_v5  ;;  %7739 = vrcp.f32 %v11788_v40  ;;  %v4356_v14 = vsel %vm4326_vm7, %v4310_v1, 0.0  ;;  %v4787_v27 = vrot.slane %v4181_v2, 1  ;;  %v11815_v46 = vmul.f32 %v13571_v24, %v4181_v2 }
 0x9cc   : > { %13619 = vst [vmem:[#allocation60_spill] sm:$0xff] %v11805_v33  ;;  %v5578_v30 = vadd.f32 0.112945676, %v5577_v48  ;;  %v4311_v19 = vrot.slane %v11778_v31, 7  ;;  %v5488_v57 = vmul.f32 %v5487_v49, %v11520_v12  ;;  %v5534_v43 = vadd.f32 0.001143296, %v5533_v36 }
 0x9cd   : > { %13620 = vst [vmem:[#allocation97_spill] sm:$0xff] %v11810_v41  ;;  %v11821_v7 = vmul.f32 %v10378_v42, %v11778_v31  ;;  %v11825_v44 = vmul.f32 %v13554_v17, %v11778_v31  ;;  %v5567_v41 = vadd.f32 0.05243302, %v5566_v55  ;;  %v13623_v48 = vld [vmem:[#allocation86_spill] sm:$0xff]  ;;  %v11830_v2 = vmul.f32 %v13537_v21, %v4356_v14 }
 0x9ce   : > { %v5579_v1 = vmul.f32 %v5578_v30, %v11735_v11  ;;  %v4676_v9 = vadd.f32 %v13623_v48, %v4606_v37  ;;  %v4436_v60 = vmul.f32 %v13540_v15, %v4356_v14  ;;  %v5535_v49 = vmul.f32 %v5534_v43, %v11771_v54  ;;  %v13624_v37 = vld [vmem:[#allocation78_spill] sm:$0xff]  ;;  %v13625_v48 = vld [vmem:[#allocation68_spill] sm:$0xff] }
 0x9cf   : > { %13621 = vst [vmem:[#allocation98_spill] sm:$0xff] %v11821_v7  ;;  %v4505_v36 = vmul.f32 %v10500_v39, %v4356_v14  ;;  %v11837_v42 = vsel %vm4804_vm9, %v4787_v27, 0.0  ;;  %v4935_v55 = vmul.f32 %v13590_v16, %v11479_v45  ;;  %v5489_v7 = vadd.f32 0.18741608, %v5488_v57  ;;  %v13626_v16 = vld [vmem:[#allocation16_spill] sm:$0xff] }
 0x9d0   : > { %13622 = vst [vmem:[#allocation99_spill] sm:$0xff] %v11825_v44  ;;  %v5580_v8 = vadd.f32 0.4994258, %v5579_v1  ;;  %v4897_v22 = vadd.f32 %v13625_v48, %v13624_v37  ;;  %v5522_v5 = vmul.f32 2.1237322e-06, %v11771_v54  ;;  %v4357_v43 = vsel %vm4326_vm7, %v4311_v19, 0.0 }
 0x9d1   : > { %v7740_v30 = vpop.eup %7739  ;;  %v5536_v44 = vadd.f32 0.014752088, %v5535_v49  ;;  %v5568_v27 = vmul.f32 %v5567_v41, %v11735_v11  ;;  %v11851_v45 = vmul.f32 %v13612_v18, %v11778_v31  ;;  %v5005_v37 = vmul.f32 %v13592_v32, %v13626_v16 }
 0x9d2   : > { %v5504_v14 = vmul.f32 %v7740_v30, %v11788_v40  ;;  %v5581_v1 = vmul.f32 %v5580_v8, %v11735_v11  ;;  %v4967_v57 = vadd.f32 %v4935_v55, %v4897_v22  ;;  %v11856_v49 = vadd.f32 %v4714_v58, %v4676_v9 }
 0x9d3   : > { %v5537_v48 = vmul.f32 %v5536_v44, %v11771_v54  ;;  %v4788_v19 = vrot.slane %v11778_v31, 1  ;;  %v5490_v41 = vmul.f32 %v5489_v7, %v11520_v12  ;;  %v5523_v33 = vadd.f32 0.00028619796, %v5522_v5 }
 0x9d4   : > { %v5505_v10 = vsub.f32 1.0, %v5504_v14  ;;  %v11859_v63 = vadd.f32 1.0, %v5581_v1  ;;  %v5037_v8 = vadd.f32 %v5005_v37, %v4967_v57  ;;  %vm5509_vm6 = vweird.f32 %v7740_v30 }
 0x9d5   : > { %v5538_v17 = vadd.f32 0.112945676, %v5537_v48  ;;  %v5569_v22 = vadd.f32 0.18741608, %v5568_v27  ;;  %v11864_v55 = vadd.f32 %v4436_v60, %v11721_v25  ;;  %v4537_v44 = vadd.f32 %v4505_v36, %v11745_v35  ;;  %v13629_v48 = vld [vmem:[#allocation65_spill] sm:$0xff] }
 0x9d6   : > { %v5506_v18 = vmul.f32 %v7740_v30, %v5505_v10  ;;  %7741 = vrcp.f32 %v11859_v63  ;;  %v5514_v58 = vand.u32 2147483648, %v11788_v40  ;;  %v11869_v31 = vadd.f32 %v10943_v6, %v5037_v8 }
 0x9d7   : > { %vm5508_vm8 = vweird.f32 %v11788_v40  ;;  %v5512_v7 = vand.u32 2147483647, %v11788_v40  ;;  %v5539_v12 = vmul.f32 %v5538_v17, %v11771_v54  ;;  %v11876_v10 = vmul.f32 %v13568_v50, %v11837_v42 }
 0x9d8   : > { %v5507_v9 = vadd.f32 %v7740_v30, %v5506_v18  ;;  %v11879_v25 = vmul.f32 %v13535_v52, %v4357_v43  ;;  %v5491_v35 = vadd.f32 1.1283791, %v5490_v41  ;;  %vm11881_vm10 = vmor %vm5508_vm8, %vm5509_vm6  ;;  %v11886_v18 = vmul.f32 0.70710677, %v11869_v31 }
 0x9d9   : > { %v5570_v17 = vmul.f32 %v5569_v22, %v11735_v11  ;;  %v5524_v5 = vmul.f32 %v5523_v33, %v11771_v54  ;;  %v5540_v36 = vadd.f32 0.4994258, %v5539_v12  ;;  %v4437_v14 = vmul.f32 %v13539_v4, %v4357_v43 }
 0x9da   : > { %v5511_v40 = vsel %vm11881_vm10, %v7740_v30, %v5507_v9  ;;  %v4506_v27 = vmul.f32 %v13549_v13, %v4357_v43  ;;  %v5515_v1 = vor.u32 1.1754944e-38, %v5514_v58  ;;  %v5600_v57 = vmul.f32 %v11886_v18, %v11886_v18  ;;  %v13630_v58 = vld [vmem:[#allocation35_spill] sm:$0xff] }
 0x9db   : > { %v4607_v41 = vadd.f32 %v13629_v48, %v4537_v44  ;;  %v11899_v8 = vsel %vm4804_vm9, %v4788_v19, 0.0  ;;  %vm5513_vm11 = vcmp.eq.f32.partialorder %v5512_v7, 8.507059e+37  ;;  %v5541_v11 = vmul.f32 %v5540_v36, %v11771_v54 }
 0x9dc   : > { %v7742_v37 = vpop.eup %7741  ;;  %v4312_v33 = vrot.slane %v11796_v28, 7  ;;  %v5516_v30 = vsel %vm5513_vm11, %v5515_v1, %v5511_v40  ;;  %v11904_v43 = vmin.f32 %v5600_v57, 16.0  ;;  %v5492_v9 = vmul.f32 %v5491_v35, %v13630_v58 }
 0x9dd   : > { %v5584_v22 = vmul.f32 %v7742_v37, %v11859_v63  ;;  %v5571_v12 = vadd.f32 1.1283791, %v5570_v17  ;;  %v5525_v60 = vadd.f32 0.0036580483, %v5524_v5  ;;  %v11907_v52 = vadd.f32 1.0, %v5541_v11 }
 0x9de   : > { %v11911_v19 = vmul.f32 %v13534_v47, %v11899_v8  ;;  %v5602_v7 = vmul.f32 2.1237322e-06, %v11904_v43  ;;  %v5613_v36 = vmul.f32 3.8918573e-05, %v11904_v43  ;;  %v5517_v40 = vmul.f32 %v5516_v30, %v5492_v9 }
 0x9df   : > { %v5585_v44 = vsub.f32 1.0, %v5584_v22  ;;  %v5592_v1 = vand.u32 2147483647, %v11859_v63  ;;  %v5594_v57 = vand.u32 2147483648, %v11859_v63  ;;  %7743 = vrcp.f32 %v11907_v52 }
 0x9e0   : > { %vm5589_vm12 = vweird.f32 %v7742_v37  ;;  %v5603_v17 = vadd.f32 0.00028619796, %v5602_v7  ;;  %v5614_v5 = vadd.f32 0.001143296, %v5613_v36  ;;  %v4538_v48 = vadd.f32 %v4506_v27, %v11792_v62 }
 0x9e1   : > { %v5586_v35 = vmul.f32 %v7742_v37, %v5585_v44  ;;  %v4358_v11 = vsel %vm4326_vm7, %v4312_v33, 0.0  ;;  %v11923_v22 = vmul.f32 %v10431_v59, %v11796_v28  ;;  %v5526_v30 = vmul.f32 %v5525_v60, %v11771_v54 }
 0x9e2   : > { %vm5588_vm13 = vweird.f32 %v11859_v63  ;;  %v5604_v9 = vmul.f32 %v5603_v17, %v11904_v43  ;;  %v5615_v44 = vmul.f32 %v5614_v5, %v11904_v43  ;;  %v4469_v7 = vadd.f32 %v4437_v14, %v11764_v61  ;;  %v13631_v5 = vld [vmem:[#allocation85_spill] sm:$0xff] }
 0x9e3   : > { %v5587_v58 = vadd.f32 %v7742_v37, %v5586_v35  ;;  %v5572_v62 = vmul.f32 %v5571_v12, %v11705_v38  ;;  %vm5590_vm14 = vmor %vm5588_vm13, %vm5589_vm12  ;;  %vm5593_vm15 = vcmp.eq.f32.partialorder %v5592_v1, 8.507059e+37  ;;  %v5595_v27 = vor.u32 1.1754944e-38, %v5594_v57 }
 0x9e4   : > { %v7074_v33 = vclamps-f32 %v5517_v40, 1.0  ;;  %v5605_v59 = vadd.f32 0.0036580483, %v5604_v9  ;;  %v5616_v0 = vadd.f32 0.014752088, %v5615_v44  ;;  %v4677_v60 = vadd.f32 %v11701_v3, %v4607_v41 }
 0x9e5   : > { %v5591_v36 = vsel %vm5590_vm14, %v7742_v37, %v5587_v58  ;;  %v11931_v47 = vpop.eup %7743  ;;  %v4507_v63 = vmul.f32 %v10500_v39, %v4358_v11  ;;  %v4789_v35 = vrot.slane %v11796_v28, 1  ;;  %v4608_v61 = vadd.f32 %v13631_v5, %v4538_v48  ;;  %v13633_v5 = vld [vmem:[#allocation48_spill] sm:$0xff] }
 0x9e6   : > { %v5596_v17 = vsel %vm5593_vm15, %v5595_v27, %v5591_v36  ;;  %v11939_v38 = vmul.f32 %v13559_v56, %v11796_v28  ;;  %v5527_v12 = vadd.f32 0.05243302, %v5526_v30  ;;  %v4438_v37 = vmul.f32 %v13540_v15, %v4358_v11 }
 0x9e7   : > { %v5597_v14 = vmul.f32 %v5596_v17, %v5572_v62  ;;  %v5544_v40 = vmul.f32 %v11931_v47, %v11907_v52  ;;  %v5606_v3 = vmul.f32 %v5605_v59, %v11904_v43  ;;  %v5617_v41 = vmul.f32 %v5616_v0, %v11904_v43 }
 0x9e8   : > { %v11947_v1 = vmul.f32 %v13537_v21, %v4358_v11  ;;  %v4717_v57 = vmul.f32 %v13571_v24, %v11796_v28  ;;  %v6448_v58 = vadd.f32 1.0, %v7074_v33  ;;  %v11952_v9 = vadd.f32 %v11815_v46, %v4677_v60  ;;  %v13632_v60 = vld [vmem:[#allocation74_spill] sm:$0xff]  ;;  %v13651_v21 = vld [vmem:[#allocation99_spill] sm:$0xff] }
 0x9e9   : > { %v7076_v48 = vclamps-f32 %v5597_v14, 1.0  ;;  %v4539_v30 = vadd.f32 %v4507_v63, %v11864_v55  ;;  %v11957_v44 = vsel %vm4804_vm9, %v4789_v35, 0.0  ;;  %v5618_v59 = vadd.f32 0.112945676, %v5617_v41  ;;  %v13635_v41 = vld [vmem:[#allocation40_spill] sm:$0xff] }
 0x9ea   : > { %v4678_v0 = vadd.f32 %v11756_v34, %v4608_v61  ;;  %v5106_v11 = vmul.f32 0.5, %v11692_v23  ;;  %v5528_v27 = vmul.f32 %v5527_v12, %v11771_v54  ;;  %v4470_v28 = vadd.f32 %v4438_v37, %v11830_v2 }
 0x9eb   : > { %v6450_v62 = vadd.f32 1.0, %v7076_v48  ;;  %v5545_v33 = vsub.f32 1.0, %v5544_v40  ;;  %v5607_v36 = vadd.f32 0.05243302, %v5606_v3  ;;  %v5619_v46 = vmul.f32 %v5618_v59, %v11904_v43  ;;  %v13634_v40 = vld [vmem:[#allocation72_spill] sm:$0xff]  ;;  %v13636_v59 = vld [vmem:[#allocation57_spill] sm:$0xff] }
 0x9ec   : > { %v4790_v55 = vrot.slane %v11471_v29, 1  ;;  %v6480_v63 = vmul.f32 %v6448_v58, %v13632_v60  ;;  %v4936_v17 = vmul.f32 %v13562_v51, %v11524_v20  ;;  %v4609_v34 = vadd.f32 %v11653_v53, %v4539_v30  ;;  %v13638_v60 = vld [vmem:[#allocation60_spill] sm:$0xff] }
 0x9ed   : > { %v6482_v35 = vmul.f32 %v6450_v62, %v5106_v11  ;;  %v11971_v23 = vmul.f32 %v13568_v50, %v11957_v44  ;;  %v4508_v2 = vmul.f32 %v13549_v13, %v13633_v5  ;;  %v5620_v61 = vadd.f32 0.4994258, %v5619_v46 }
 0x9ee   : > { %v4439_v14 = vmul.f32 %v13539_v4, %v13633_v5  ;;  %v5529_v37 = vadd.f32 0.18741608, %v5528_v27  ;;  %v4968_v3 = vadd.f32 %v4936_v17, %v13634_v40  ;;  %v11980_v20 = vmul.f32 %v13635_v41, %v11471_v29  ;;  %v13637_v27 = vld [vmem:[#allocation81_spill] sm:$0xff]  ;;  %v13640_v17 = vld [vmem:[#allocation59_spill] sm:$0xff] }
 0x9ef   : > { %v6508_v12 = vpack.c.bf16 %v6482_v35, %v6480_v63  ;;  %v5546_v53 = vmul.f32 %v11931_v47, %v5545_v33  ;;  %v5608_v48 = vmul.f32 %v5607_v36, %v11904_v43  ;;  %v5621_v58 = vmul.f32 %v5620_v61, %v11904_v43  ;;  %v13639_v36 = vld [vmem:[#allocation58_spill] sm:$0xff]  ;;  %v13643_v61 = vld [vmem:[#allocation24_spill] sm:$0xff] }
 0x9f0   : > { %v11986_v30 = vadd.f32 %v11851_v45, %v4678_v0  ;;  %v4718_v11 = vmul.f32 %v13636_v59, %v11471_v29  ;;  %v11992_v62 = vsel %vm4804_vm9, %v4790_v55, 0.0  ;;  %v5038_v46 = vadd.f32 %v13637_v27, %v4968_v3  ;;  %v13642_v0 = vld [vmem:[#allocation77_spill] sm:$0xff] }
 0x9f1   : > { %6670 = vmatmul.bf16.gmra.mxu3 %v6508_v12  ;;  %v4679_v63 = vadd.f32 %v13638_v60, %v4609_v34  ;;  %v4540_v33 = vadd.f32 %v4508_v2, %v4469_v7  ;;  %v11996_v35 = vadd.f32 1.0, %v5621_v58  ;;  %v12000_v5 = vmul.f32 %v13640_v17, %v13639_v36  ;;  %v13644_v34 = vld [vmem:[#allocation41_spill] sm:$0xff] }
 0x9f2   : > { %v4471_v45 = vadd.f32 %v4439_v14, %v11879_v25  ;;  %v4509_v29 = vmul.f32 %v10500_v39, %v13642_v0  ;;  %v5530_v55 = vmul.f32 %v5529_v37, %v11771_v54  ;;  %v12007_v12 = vadd.f32 %v13643_v61, %v5038_v46  ;;  %v13645_v37 = vld [vmem:[#allocation96_spill] sm:$0xff] }
 0x9f3   : > { %13641 = vst [vmem:[#allocation86_spill] sm:$0xff] %v12000_v5  ;;  %v5547_v40 = vadd.f32 %v11931_v47, %v5546_v53  ;;  %vm5549_vm1 = vweird.f32 %v11931_v47  ;;  %v5609_v7 = vadd.f32 0.18741608, %v5608_v48  ;;  %7745 = vrcp.f32 %v11996_v35  ;;  %v13646_v48 = vld [vmem:[#allocation88_spill] sm:$0xff] }
 0x9f4   : > { %v12014_v2 = vmul.f32 %v13559_v56, %v13644_v34  ;;  %v4791_v25 = vrot.slane %v13644_v34, 1  ;;  %v5554_v14 = vand.u32 2147483648, %v11907_v52  ;;  %v12019_v54 = vmul.f32 0.70710677, %v12007_v12 }
 0x9f5   : > { %v4610_v3 = vadd.f32 %v13645_v37, %v4540_v33  ;;  %vm5548_vm2 = vweird.f32 %v11907_v52  ;;  %v5552_v53 = vand.u32 2147483647, %v11907_v52  ;;  %v5040_v58 = vadd.f32 %v12000_v5, %v13646_v48  ;;  %v13649_v37 = vld [vmem:[#allocation76_spill] sm:$0xff] }
 0x9f6   : > { %v12026_v27 = vadd.f32 %v4717_v57, %v4679_v63  ;;  %v4541_v46 = vadd.f32 %v4509_v29, %v4470_v28  ;;  %v12030_v60 = vmul.f32 %v13571_v24, %v13644_v34  ;;  %vm12032_vm3 = vmor %vm5548_vm2, %vm5549_vm1  ;;  %v5640_v33 = vmul.f32 %v12019_v54, %v12019_v54 }
 0x9f7   : > { %v4510_v52 = vmul.f32 %v13549_v13, %v13649_v37  ;;  %v5531_v41 = vadd.f32 1.1283791, %v5530_v55  ;;  %v5551_v57 = vsel %vm12032_vm3, %v11931_v47, %v5547_v40  ;;  %v5610_v28 = vmul.f32 %v5609_v7, %v11904_v43  ;;  %v13652_v55 = vld [vmem:[#allocation69_spill] sm:$0xff]  ;;  %v13653_v7 = vld [vmem:[#allocation31_spill] sm:$0xff] }
 0x9f8   : > { %v4440_v63 = vmul.f32 %v13540_v15, %v13642_v0  ;;  %v12048_v29 = vsel %vm4804_vm9, %v4791_v25, 0.0  ;;  %v5555_v34 = vor.u32 1.1754944e-38, %v5554_v14  ;;  %v12050_v48 = vmin.f32 %v5640_v33, 16.0  ;;  %v13654_v33 = vld [vmem:[#allocation55_spill] sm:$0xff] }
 0x9f9   : > { %13650 = vst [vmem:[#allocation78_spill] sm:$0xff] %v12048_v29  ;;  %v7746_v5 = vpop.eup %7745  ;;  %v4680_v50 = vadd.f32 %v13651_v21, %v4610_v3  ;;  %v12055_v13 = vmul.f32 %v13636_v59, %v13652_v55  ;;  %vm5553_vm4 = vcmp.eq.f32.partialorder %v5552_v53, 8.507059e+37  ;;  %v12058_v47 = vadd.f32 %v13643_v61, %v5040_v58 }
 0x9fa   : > { %v5556_v56 = vsel %vm5553_vm4, %v5555_v34, %v5551_v57  ;;  %v5624_v43 = vmul.f32 %v7746_v5, %v11996_v35  ;;  %v5642_v0 = vmul.f32 2.1237322e-06, %v12050_v48  ;;  %v5653_v40 = vmul.f32 3.8918573e-05, %v12050_v48 }
 0x9fb   : > { %v4611_v25 = vadd.f32 %v13653_v7, %v4541_v46  ;;  %v4542_v14 = vadd.f32 %v4510_v52, %v4471_v45  ;;  %v5532_v21 = vmul.f32 %v5531_v41, %v13654_v33  ;;  %v5611_v3 = vadd.f32 1.1283791, %v5610_v28  ;;  %v13655_v52 = vld [vmem:[#allocation98_spill] sm:$0xff] }
 0x9fc   : > { %v4472_v15 = vadd.f32 %v4440_v63, %v11947_v1  ;;  %v5625_v37 = vsub.f32 1.0, %v5624_v43  ;;  %v5643_v53 = vadd.f32 0.00028619796, %v5642_v0  ;;  %v5654_v4 = vadd.f32 0.001143296, %v5653_v40 }
 0x9fd   : > { %v5557_v58 = vmul.f32 %v5556_v56, %v5532_v21  ;;  %v5632_v57 = vand.u32 2147483647, %v11996_v35  ;;  %v5634_v34 = vand.u32 2147483648, %v11996_v35  ;;  %v12069_v59 = vmul.f32 0.70710677, %v12058_v47 }
 0x9fe   : > { %v5626_v29 = vmul.f32 %v7746_v5, %v5625_v37  ;;  %vm5629_vm5 = vweird.f32 %v7746_v5  ;;  %v5644_v45 = vmul.f32 %v5643_v53, %v12050_v48  ;;  %v5655_v41 = vmul.f32 %v5654_v4, %v12050_v48 }
 0x9ff   : > { %v12073_v46 = vadd.f32 %v4718_v11, %v4680_v50  ;;  %v4681_v1 = vadd.f32 %v11939_v38, %v4611_v25  ;;  %v4612_v28 = vadd.f32 %v13655_v52, %v4542_v14  ;;  %v4792_v63 = vrot.slane %v13652_v55, 1  ;;  %v13656_v25 = vld [vmem:[#allocation79_spill] sm:$0xff] }
 0xa00   : > { %v5627_v56 = vadd.f32 %v7746_v5, %v5626_v29  ;;  %vm5628_vm6 = vweird.f32 %v11996_v35  ;;  %v5645_v43 = vadd.f32 0.0036580483, %v5644_v45  ;;  %v5656_v0 = vadd.f32 0.014752088, %v5655_v41  ;;  %v13657_v35 = vld [vmem:[#allocation70_spill] sm:$0xff] }
 0xa01   : > { %v7075_v40 = vclamps-f32 %v5557_v58, 1.0  ;;  %v5612_v37 = vmul.f32 %v5611_v3, %v11886_v18  ;;  %vm5630_vm8 = vmor %vm5628_vm6, %vm5629_vm5  ;;  %v5635_v7 = vor.u32 1.1754944e-38, %v5634_v34  ;;  %v5720_v4 = vmul.f32 %v12069_v59, %v12069_v59  ;;  %v13658_v58 = vld [vmem:[#allocation56_spill] sm:$0xff] }
 0xa02   : > { %v5631_v50 = vsel %vm5630_vm8, %v7746_v5, %v5627_v56  ;;  %vm5633_vm10 = vcmp.eq.f32.partialorder %v5632_v57, 8.507059e+37  ;;  %v5646_v38 = vmul.f32 %v5645_v43, %v12050_v48  ;;  %v5657_v11 = vmul.f32 %v5656_v0, %v12050_v48  ;;  %v13659_v0 = vld [vmem:[#allocation73_spill] sm:$0xff] }
 0xa03   : > { %v4511_v29 = vmul.f32 %v10500_v39, %v13656_v25  ;;  %v4793_v14 = vrot.slane %v13657_v35, 1  ;;  %v5636_v33 = vsel %vm5633_vm10, %v5635_v7, %v5631_v50  ;;  %v12087_v21 = vmin.f32 %v5720_v4, 16.0 }
 0xa04   : > { %v5637_v18 = vmul.f32 %v5636_v33, %v5612_v37  ;;  %v5647_v3 = vadd.f32 0.05243302, %v5646_v38  ;;  %v5658_v53 = vadd.f32 0.112945676, %v5657_v11  ;;  %v4937_v34 = vmul.f32 %v13658_v58, %v13626_v16  ;;  %v13660_v37 = vld [vmem:[#allocation93_spill] sm:$0xff] }
 0xa05   : > { %v4682_v5 = vadd.f32 %v11980_v20, %v4612_v28  ;;  %v6449_v57 = vadd.f32 1.0, %v7075_v40  ;;  %v5722_v45 = vmul.f32 2.1237322e-06, %v12087_v21  ;;  %v5733_v41 = vmul.f32 3.8918573e-05, %v12087_v21 }
 0xa06   : > { %v7077_v52 = vclamps-f32 %v5637_v18, 1.0  ;;  %v5648_v56 = vmul.f32 %v5647_v3, %v12050_v48  ;;  %v5659_v43 = vmul.f32 %v5658_v53, %v12050_v48  ;;  %v4969_v7 = vadd.f32 %v4937_v34, %v13659_v0  ;;  %v13662_v53 = vld [vmem:[#allocation63_spill] sm:$0xff] }
 0xa07   : > { %v5105_v4 = vmul.f32 0.5, %v13660_v37  ;;  %v5107_v50 = vmul.f32 0.5, %v11869_v31  ;;  %v5723_v38 = vadd.f32 0.00028619796, %v5722_v45  ;;  %v5734_v16 = vadd.f32 0.001143296, %v5733_v41 }
 0xa08   : > { %v6451_v11 = vadd.f32 1.0, %v7077_v52  ;;  %v5649_v20 = vadd.f32 0.18741608, %v5648_v56  ;;  %v5660_v28 = vadd.f32 0.4994258, %v5659_v43  ;;  %v12101_v40 = vmul.f32 %v13592_v32, %v13639_v36  ;;  %v13663_v45 = vld [vmem:[#allocation36_spill] sm:$0xff] }
 0xa09   : > { %v4543_v33 = vadd.f32 %v4511_v29, %v4472_v15  ;;  %v5724_v18 = vmul.f32 %v5723_v38, %v12087_v21  ;;  %v5735_v3 = vmul.f32 %v5734_v16, %v12087_v21  ;;  %v5039_v34 = vadd.f32 %v13662_v53, %v4969_v7 }
 0xa0a   : > { %13661 = vst [vmem:[#allocation68_spill] sm:$0xff] %v12101_v40  ;;  %v6481_v0 = vmul.f32 %v6449_v57, %v5105_v4  ;;  %v6483_v37 = vmul.f32 %v6451_v11, %v5107_v50  ;;  %v5661_v31 = vmul.f32 %v5660_v28, %v12050_v48  ;;  %v5041_v41 = vadd.f32 %v12101_v40, %v13663_v45 }
 0xa0b   : > { %v5650_v52 = vmul.f32 %v5649_v20, %v12050_v48  ;;  %v5725_v56 = vadd.f32 0.0036580483, %v5724_v18  ;;  %v5736_v43 = vadd.f32 0.014752088, %v5735_v3  ;;  %v12111_v36 = vadd.f32 %v10943_v6, %v5039_v34 }
 0xa0c   : > { %v12115_v15 = vsel %vm4804_vm9, %v4792_v63, 0.0  ;;  %v6509_v29 = vpack.c.bf16 %v6483_v37, %v6481_v0  ;;  %v12117_v7 = vadd.f32 1.0, %v5661_v31  ;;  %v12120_v57 = vadd.f32 %v10943_v6, %v5041_v41  ;;  %v13665_v0 = vld [vmem:[#allocation64_spill] sm:$0xff] }
 0xa0d   : > { %v12124_v4 = vmul.f32 %v13571_v24, %v13657_v35  ;;  %v5726_v48 = vmul.f32 %v5725_v56, %v12087_v21  ;;  %v5737_v50 = vmul.f32 %v5736_v43, %v12087_v21  ;;  %v12129_v38 = vmul.f32 0.70710677, %v12111_v36 }
 0xa0e   : > { %v12132_v63 = vadd.f32 %v12030_v60, %v4681_v1  ;;  %v12135_v16 = vadd.f32 %v12055_v13, %v4682_v5  ;;  %v12139_v11 = vsel %vm4804_vm9, %v4793_v14, 0.0  ;;  %6719 = vmatmul.bf16.gmra.mxu0 %v6509_v29  ;;  %7747 = vrcp.f32 %v12117_v7 }
 0xa0f   : > { %v12143_v20 = vadd.f32 %v11923_v22, %v4543_v33  ;;  %v5651_v28 = vadd.f32 1.1283791, %v5650_v52  ;;  %v5727_v18 = vadd.f32 0.05243302, %v5726_v48  ;;  %v5738_v3 = vadd.f32 0.112945676, %v5737_v50 }
 0xa10   : > { %v12146_v53 = vmul.f32 0.5, %v12007_v12  ;;  %v12149_v60 = vmul.f32 0.5, %v12058_v47  ;;  %v12152_v13 = vmul.f32 0.70710677, %v12120_v57  ;;  %v5680_v1 = vmul.f32 %v12129_v38, %v12129_v38  ;;  %v13664_v33 = vld [vmem:[#allocation67_spill] sm:$0xff] }
 0xa11   : > { %v5672_v14 = vand.u32 2147483647, %v12117_v7  ;;  %v5728_v22 = vmul.f32 %v5727_v18, %v12087_v21  ;;  %v5739_v5 = vmul.f32 %v5738_v3, %v12087_v21  ;;  %v4942_v34 = vmul.f32 %v13562_v51, %v13664_v33 }
 0xa12   : > { %v12161_v12 = vmin.f32 %v5680_v1, 16.0  ;;  %v5760_v47 = vmul.f32 %v12152_v13, %v12152_v13  ;;  %v4902_v37 = vadd.f32 %v13665_v0, %v11856_v49  ;;  %v5010_v31 = vmul.f32 %v13640_v17, %v13664_v33  ;;  %v13668_v33 = vld [vmem:[#allocation92_spill] sm:$0xff] }
 0xa13   : > { %v5652_v45 = vmul.f32 %v5651_v28, %v12019_v54  ;;  %v5674_v41 = vand.u32 2147483648, %v12117_v7  ;;  %v5740_v52 = vadd.f32 0.4994258, %v5739_v5  ;;  %v12173_v56 = vmul.f32 %v13658_v58, %v11837_v42 }
 0xa14   : > { %v7748_v43 = vpop.eup %7747  ;;  %vm5668_vm11 = vweird.f32 %v12117_v7  ;;  %v5682_v29 = vmul.f32 2.1237322e-06, %v12161_v12  ;;  %v5693_v48 = vmul.f32 3.8918573e-05, %v12161_v12  ;;  %v12178_v49 = vmin.f32 %v5760_v47, 16.0 }
 0xa15   : > { %v5664_v50 = vmul.f32 %v7748_v43, %v12117_v7  ;;  %vm12181_vm12 = vcmp.eq.f32.partialorder %v5672_v14, 8.507059e+37  ;;  %v5729_v28 = vadd.f32 0.18741608, %v5728_v22  ;;  %v5741_v18 = vmul.f32 %v5740_v52, %v12087_v21  ;;  %v13669_v22 = vld [vmem:[#allocation91_spill] sm:$0xff] }
 0xa16   : > { %v5683_v3 = vadd.f32 0.00028619796, %v5682_v29  ;;  %v5694_v1 = vadd.f32 0.001143296, %v5693_v48  ;;  %v5762_v5 = vmul.f32 2.1237322e-06, %v12178_v49  ;;  %v4972_v0 = vadd.f32 %v13668_v33, %v4902_v37 }
 0xa17   : > { %v5665_v40 = vsub.f32 1.0, %v5664_v50  ;;  %v5675_v39 = vor.u32 1.1754944e-38, %v5674_v41  ;;  %v12188_v24 = vadd.f32 1.0, %v5741_v18  ;;  %v5773_v47 = vmul.f32 3.8918573e-05, %v12178_v49 }
 0xa18   : > { %v5684_v14 = vmul.f32 %v5683_v3, %v12161_v12  ;;  %v5695_v25 = vmul.f32 %v5694_v1, %v12161_v12  ;;  %v5763_v35 = vadd.f32 0.00028619796, %v5762_v5  ;;  %v4904_v52 = vadd.f32 %v13669_v22, %v11986_v30 }
 0xa19   : > { %v5666_v29 = vmul.f32 %v7748_v43, %v5665_v40  ;;  %vm5669_vm13 = vweird.f32 %v7748_v43  ;;  %7749 = vrcp.f32 %v12188_v24  ;;  %v5012_v37 = vmul.f32 %v13640_v17, %v11899_v8 }
 0xa1a   : > { %v5730_v41 = vmul.f32 %v5729_v28, %v12087_v21  ;;  %v5685_v48 = vadd.f32 0.0036580483, %v5684_v14  ;;  %v5764_v50 = vmul.f32 %v5763_v35, %v12178_v49  ;;  %v5042_v18 = vadd.f32 %v5010_v31, %v4972_v0  ;;  %vm5670_vm14 = vmor %vm5668_vm11, %vm5669_vm13 }
 0xa1b   : > { %v5667_v3 = vadd.f32 %v7748_v43, %v5666_v29  ;;  %v5696_v33 = vadd.f32 0.014752088, %v5695_v25  ;;  %v5774_v1 = vadd.f32 0.001143296, %v5773_v47  ;;  %v4974_v5 = vadd.f32 %v4942_v34, %v4904_v52 }
 0xa1c   : > { %v5686_v30 = vmul.f32 %v5685_v48, %v12161_v12  ;;  %v5765_v40 = vadd.f32 0.0036580483, %v5764_v50  ;;  %v12205_v22 = vmul.f32 %v13592_v32, %v11837_v42  ;;  %v12209_v21 = vmul.f32 %v13592_v32, %v11957_v44 }
 0xa1d   : > { %v5671_v35 = vsel %vm5670_vm14, %v7748_v43, %v5667_v3  ;;  %v5697_v31 = vmul.f32 %v5696_v33, %v12161_v12  ;;  %v5775_v25 = vmul.f32 %v5774_v1, %v12178_v49  ;;  %v5044_v34 = vadd.f32 %v5012_v37, %v4974_v5 }
 0xa1e   : > { %v5676_v7 = vsel %vm12181_vm12, %v5675_v39, %v5671_v35  ;;  %v5687_v28 = vadd.f32 0.05243302, %v5686_v30  ;;  %v5766_v0 = vmul.f32 %v5765_v40, %v12178_v49  ;;  %v12217_v47 = vadd.f32 %v13643_v61, %v5042_v18 }
 0xa1f   : > { %v7750_v42 = vpop.eup %7749  ;;  %v5677_v14 = vmul.f32 %v5676_v7, %v5652_v45  ;;  %v5731_v52 = vadd.f32 1.1283791, %v5730_v41  ;;  %v5698_v29 = vadd.f32 0.112945676, %v5697_v31  ;;  %v5776_v48 = vadd.f32 0.014752088, %v5775_v25 }
 0xa20   : > { %v5744_v43 = vmul.f32 %v7750_v42, %v12188_v24  ;;  %v5688_v50 = vmul.f32 %v5687_v28, %v12161_v12  ;;  %v5767_v3 = vadd.f32 0.05243302, %v5766_v0  ;;  %v12222_v37 = vadd.f32 %v13643_v61, %v5044_v34 }
 0xa21   : > { %v7078_v39 = vclamps-f32 %v5677_v14, 1.0  ;;  %v5752_v54 = vand.u32 2147483647, %v12188_v24  ;;  %v5699_v33 = vmul.f32 %v5698_v29, %v12161_v12  ;;  %v5777_v18 = vmul.f32 %v5776_v48, %v12178_v49 }
 0xa22   : > { %v5745_v1 = vsub.f32 1.0, %v5744_v43  ;;  %v5689_v45 = vadd.f32 0.18741608, %v5688_v50  ;;  %v5768_v41 = vmul.f32 %v5767_v3, %v12178_v49  ;;  %v12229_v5 = vmul.f32 0.70710677, %v12217_v47 }
 0xa23   : > { %vm5749_vm15 = vweird.f32 %v7750_v42  ;;  %v5754_v30 = vand.u32 2147483648, %v12188_v24  ;;  %v5700_v40 = vadd.f32 0.4994258, %v5699_v33  ;;  %v5778_v35 = vadd.f32 0.112945676, %v5777_v18 }
 0xa24   : > { %v5746_v31 = vmul.f32 %v7750_v42, %v5745_v1  ;;  %v5690_v25 = vmul.f32 %v5689_v45, %v12161_v12  ;;  %v5769_v34 = vadd.f32 0.18741608, %v5768_v41  ;;  %v12234_v7 = vmul.f32 0.70710677, %v12222_v37 }
 0xa25   : > { %v6452_v28 = vadd.f32 1.0, %v7078_v39  ;;  %v5701_v0 = vmul.f32 %v5700_v40, %v12161_v12  ;;  %v5779_v14 = vmul.f32 %v5778_v35, %v12178_v49  ;;  %v5800_v29 = vmul.f32 %v12229_v5, %v12229_v5  ;;  %v12255_v40 = vld [vmem:[%s13136_s13] ss:$0 sm:$0xff]  ;;  %v13670_v35 = vld [vmem:[#allocation66_spill] sm:$0xff] }
 0xa26   : > { %v5747_v48 = vadd.f32 %v7750_v42, %v5746_v31  ;;  %vm5748_vm1 = vweird.f32 %v12188_v24  ;;  %v5770_v43 = vmul.f32 %v5769_v34, %v12178_v49  ;;  %v5880_v50 = vmul.f32 %v12234_v7, %v12234_v7 }
 0xa27   : > { %vm5750_vm2 = vmor %vm5748_vm1, %vm5749_vm15  ;;  %v5755_v3 = vor.u32 1.1754944e-38, %v5754_v30  ;;  %v12245_v33 = vadd.f32 1.0, %v5701_v0  ;;  %v5780_v39 = vadd.f32 0.4994258, %v5779_v14  ;;  %v12247_v12 = vmin.f32 %v5800_v29, 16.0  ;;  %v6661_v30 = vpop.f32.mrf.mxu3 }
 0xa28   : > { %v5732_v18 = vmul.f32 %v5731_v52, %v12069_v59  ;;  %v5751_v1 = vsel %vm5750_vm2, %v7750_v42, %v5747_v48  ;;  %vm5753_vm3 = vcmp.eq.f32.partialorder %v5752_v54, 8.507059e+37  ;;  %v5691_v45 = vadd.f32 1.1283791, %v5690_v25  ;;  %v13671_v25 = vld [vmem:[#allocation94_spill] sm:$0xff] }
 0xa29   : > { %v5756_v41 = vsel %vm5753_vm3, %v5755_v3, %v5751_v1  ;;  %v6484_v24 = vmul.f32 %v6452_v28, %v12146_v53  ;;  %7751 = vrcp.f32 %v12245_v33  ;;  %v4903_v31 = vadd.f32 %v13670_v35, %v11952_v9 }
 0xa2a   : > { %v5757_v34 = vmul.f32 %v5756_v41, %v5732_v18  ;;  %v5771_v0 = vadd.f32 1.1283791, %v5770_v43  ;;  %v5781_v59 = vmul.f32 %v5780_v39, %v12178_v49  ;;  %v12260_v42 = vmin.f32 %v5880_v50, 16.0  ;;  %v6710_v49 = vpop.f32.mrf.mxu0 }
 0xa2b   : > { %v6662_v52 = vadd.f32 %v12255_v40, %v6661_v30  ;;  %v5802_v53 = vmul.f32 2.1237322e-06, %v12247_v12  ;;  %v5813_v54 = vmul.f32 3.8918573e-05, %v12247_v12  ;;  %v4905_v28 = vadd.f32 %v13671_v25, %v12026_v27 }
 0xa2c   : > { %v7080_v14 = vclamps-f32 %v5757_v34, 1.0  ;;  %v12268_v29 = vmul.f32 %v5691_v45, %v12129_v38  ;;  %v5712_v9 = vand.u32 2147483647, %v12245_v33  ;;  %v12271_v48 = vadd.f32 1.0, %v5781_v59  ;;  %v13672_v45 = vld [vmem:[#allocation32_spill] sm:$0xff] }
 0xa2d   : > { %v5714_v43 = vand.u32 2147483648, %v12245_v33  ;;  %v6711_v50 = vadd.f32 %v6710_v49, %v6662_v52  ;;  %v5803_v3 = vadd.f32 0.00028619796, %v5802_v53  ;;  %v5814_v39 = vadd.f32 0.001143296, %v5813_v54 }
 0xa2e   : > { %v6454_v18 = vadd.f32 1.0, %v7080_v14  ;;  %vm5708_vm4 = vweird.f32 %v12245_v33  ;;  %v12276_v27 = vmul.f32 %v5771_v0, %v12152_v13  ;;  %7753 = vrcp.f32 %v12271_v48  ;;  %v13675_v14 = vld [vmem:[#allocation95_spill] sm:$0xff] }
 0xa2f   : > { %v5882_v38 = vmul.f32 2.1237322e-06, %v12260_v42  ;;  %v7752_v1 = vpop.eup %7751  ;;  %v6750_v41 = vadd.f32 %v6711_v50, %v13672_v45  ;;  %v5804_v30 = vmul.f32 %v5803_v3, %v12247_v12  ;;  %v5815_v35 = vmul.f32 %v5814_v39, %v12247_v12  ;;  %v6663_v13 = vpop.f32.mrf.mxu3 }
 0xa30   : > { %v5893_v34 = vmul.f32 3.8918573e-05, %v12260_v42  ;;  %v6486_v59 = vmul.f32 %v6454_v18, %v12149_v60  ;;  %v5704_v52 = vmul.f32 %v7752_v1, %v12245_v33  ;;  %vm12286_vm5 = vcmp.eq.f32.partialorder %v5712_v9, 8.507059e+37 }
 0xa31   : > { %v5792_v0 = vand.u32 2147483647, %v12271_v48  ;;  %v5715_v53 = vor.u32 1.1754944e-38, %v5714_v43  ;;  %6766 = vst.msk [vmem:[%s12293_s29] sm:$0xff] %vm508_vm0, %v6750_v41  ;;  %v5805_v54 = vadd.f32 0.0036580483, %v5804_v30  ;;  %v4973_v49 = vadd.f32 %v13675_v14, %v4903_v31 }
 0xa32   : > { %v5816_v25 = vadd.f32 0.014752088, %v5815_v35  ;;  %v6510_v60 = vpack.c.bf16 %v6486_v59, %v6484_v24  ;;  %v5705_v50 = vsub.f32 1.0, %v5704_v52  ;;  %v5794_v9 = vand.u32 2147483648, %v12271_v48 }
 0xa33   : > { %v5883_v3 = vadd.f32 0.00028619796, %v5882_v38  ;;  %v5806_v39 = vmul.f32 %v5805_v54, %v12247_v12  ;;  %v5894_v43 = vadd.f32 0.001143296, %v5893_v34  ;;  %v4975_v45 = vadd.f32 %v12173_v56, %v4905_v28 }
 0xa34   : > { %v5817_v18 = vmul.f32 %v5816_v25, %v12247_v12  ;;  %v7754_v55 = vpop.eup %7753  ;;  %6675 = vmatmul.bf16.gmra.mxu3 %v6510_v60  ;;  %v5706_v26 = vmul.f32 %v7752_v1, %v5705_v50  ;;  %vm5709_vm6 = vweird.f32 %v7752_v1  ;;  %v5043_v31 = vadd.f32 %v12205_v22, %v4973_v49 }
 0xa35   : > { %v5884_v41 = vmul.f32 %v5883_v3, %v12260_v42  ;;  %v5784_v24 = vmul.f32 %v7754_v55, %v12271_v48  ;;  %vm5789_vm8 = vweird.f32 %v7754_v55  ;;  %v5807_v30 = vadd.f32 0.05243302, %v5806_v39  ;;  %vm5710_vm10 = vmor %vm5708_vm4, %vm5709_vm6 }
 0xa36   : > { %v5818_v38 = vadd.f32 0.112945676, %v5817_v18  ;;  %v5707_v35 = vadd.f32 %v7752_v1, %v5706_v26  ;;  %v5895_v52 = vmul.f32 %v5894_v43, %v12260_v42  ;;  %v5045_v34 = vadd.f32 %v12209_v21, %v4975_v45 }
 0xa37   : > { %v5885_v59 = vadd.f32 0.0036580483, %v5884_v41  ;;  %v5785_v56 = vsub.f32 1.0, %v5784_v24  ;;  %v5808_v28 = vmul.f32 %v5807_v30, %v12247_v12  ;;  %v12312_v22 = vadd.f32 %v10943_v6, %v5043_v31 }
 0xa38   : > { %v5819_v54 = vmul.f32 %v5818_v38, %v12247_v12  ;;  %v5711_v25 = vsel %vm5710_vm10, %v7752_v1, %v5707_v35  ;;  %v5896_v26 = vadd.f32 0.014752088, %v5895_v52  ;;  %v12316_v49 = vadd.f32 %v10943_v6, %v5045_v34 }
 0xa39   : > { %v5886_v14 = vmul.f32 %v5885_v59, %v12260_v42  ;;  %v5716_v21 = vsel %vm12286_vm5, %v5715_v53, %v5711_v25  ;;  %v5786_v33 = vmul.f32 %v7754_v55, %v5785_v56  ;;  %v5809_v60 = vadd.f32 0.18741608, %v5808_v28 }
 0xa3a   : > { %v5820_v50 = vadd.f32 0.4994258, %v5819_v54  ;;  %v5717_v3 = vmul.f32 %v5716_v21, %v12268_v29  ;;  %vm5788_vm11 = vweird.f32 %v12271_v48  ;;  %v5897_v18 = vmul.f32 %v5896_v26, %v12260_v42  ;;  %v13676_v21 = vld [vmem:[#allocation97_spill] sm:$0xff] }
 0xa3b   : > { %v5887_v39 = vadd.f32 0.05243302, %v5886_v14  ;;  %v5787_v1 = vadd.f32 %v7754_v55, %v5786_v33  ;;  %vm5793_vm12 = vcmp.eq.f32.partialorder %v5792_v0, 8.507059e+37  ;;  %v5795_v43 = vor.u32 1.1754944e-38, %v5794_v9  ;;  %vm5790_vm13 = vmor %vm5788_vm11, %vm5789_vm8 }
 0xa3c   : > { %v5821_v45 = vmul.f32 %v5820_v50, %v12247_v12  ;;  %v7079_v41 = vclamps-f32 %v5717_v3, 1.0  ;;  %v5810_v53 = vmul.f32 %v5809_v60, %v12247_v12  ;;  %v5898_v24 = vadd.f32 0.112945676, %v5897_v18 }
 0xa3d   : > { %v5888_v31 = vmul.f32 %v5887_v39, %v12260_v42  ;;  %v5791_v29 = vsel %vm5790_vm13, %v7754_v55, %v5787_v1  ;;  %v12330_v48 = vmul.f32 0.70710677, %v12312_v22  ;;  %v12333_v0 = vmul.f32 0.70710677, %v12316_v49 }
 0xa3e   : > { %v12327_v30 = vadd.f32 1.0, %v5821_v45  ;;  %v12337_v9 = vadd.f32 %v12014_v2, %v12143_v20  ;;  %v5796_v38 = vsel %vm5793_vm12, %v5795_v43, %v5791_v29  ;;  %v5899_v12 = vmul.f32 %v5898_v24, %v12260_v42 }
 0xa3f   : > { %v5889_v35 = vadd.f32 0.18741608, %v5888_v31  ;;  %v5109_v59 = vmul.f32 0.5, %v12111_v36  ;;  %v5797_v55 = vmul.f32 %v5796_v38, %v12276_v27  ;;  %v6664_v52 = vadd.f32 %v12255_v40, %v6663_v13  ;;  %v13677_v13 = vld [vmem:[#allocation28_spill] sm:$0xff] }
 0xa40   : > { %7755 = vrcp.f32 %v12327_v30  ;;  %v5111_v34 = vmul.f32 0.5, %v12120_v57  ;;  %v6453_v56 = vadd.f32 1.0, %v7079_v41  ;;  %v5811_v28 = vadd.f32 1.1283791, %v5810_v53  ;;  %v6712_v57 = vpop.f32.mrf.mxu0 }
 0xa41   : > { %v4944_v2 = vmul.f32 %v13562_v51, %v11899_v8  ;;  %v7081_v20 = vclamps-f32 %v5797_v55, 1.0  ;;  %v5900_v54 = vadd.f32 0.4994258, %v5899_v12  ;;  %v5840_v25 = vmul.f32 %v12330_v48, %v12330_v48 }
 0xa42   : > { %v5920_v36 = vmul.f32 %v12333_v0, %v12333_v0  ;;  %v5832_v27 = vand.u32 2147483647, %v12327_v30  ;;  %v5834_v14 = vand.u32 2147483648, %v12327_v30  ;;  %v5890_v26 = vmul.f32 %v5889_v35, %v12260_v42 }
 0xa43   : > { %v4906_v33 = vadd.f32 %v13676_v21, %v12073_v46  ;;  %v6455_v60 = vadd.f32 1.0, %v7081_v20  ;;  %v5901_v8 = vmul.f32 %v5900_v54, %v12260_v42  ;;  %v6713_v50 = vadd.f32 %v6712_v57, %v6664_v52 }
 0xa44   : > { %v12357_v3 = vmin.f32 %v5840_v25, 16.0  ;;  %v6485_v39 = vmul.f32 %v6453_v56, %v5109_v59  ;;  %v5812_v18 = vmul.f32 %v5811_v28, %v12229_v5  ;;  %vm5828_vm14 = vweird.f32 %v12327_v30 }
 0xa45   : > { %v12361_v1 = vmin.f32 %v5920_v36, 16.0  ;;  %v6487_v45 = vmul.f32 %v6455_v60, %v5111_v34  ;;  %v12363_v41 = vadd.f32 1.0, %v5901_v8  ;;  %v6751_v46 = vadd.f32 %v6713_v50, %v13677_v13 }
 0xa46   : > { %v7756_v43 = vpop.eup %7755  ;;  %v5842_v53 = vmul.f32 2.1237322e-06, %v12357_v3  ;;  %vm12368_vm15 = vcmp.eq.f32.partialorder %v5832_v27, 8.507059e+37  ;;  %v5853_v5 = vmul.f32 3.8918573e-05, %v12357_v3  ;;  %v5835_v38 = vor.u32 1.1754944e-38, %v5834_v14 }
 0xa47   : > { %v5824_v42 = vmul.f32 %v7756_v43, %v12327_v30  ;;  %v5922_v24 = vmul.f32 2.1237322e-06, %v12361_v1  ;;  %v6511_v29 = vpack.c.bf16 %v6487_v45, %v6485_v39  ;;  %v5891_v35 = vadd.f32 1.1283791, %v5890_v26  ;;  %6767 = vst.msk [vmem:[%s12293_s29 + $0x8] sm:$0xff] %vm508_vm0, %v6751_v46 }
 0xa48   : > { %7757 = vrcp.f32 %v12363_v41  ;;  %v5843_v59 = vadd.f32 0.00028619796, %v5842_v53  ;;  %v5854_v55 = vadd.f32 0.001143296, %v5853_v5  ;;  %v4908_v52 = vadd.f32 %v11911_v19, %v12135_v16 }
 0xa49   : > { %v5825_v12 = vsub.f32 1.0, %v5824_v42  ;;  %6724 = vmatmul.bf16.gmra.mxu0 %v6511_v29  ;;  %v5923_v34 = vadd.f32 0.00028619796, %v5922_v24  ;;  %v5933_v56 = vmul.f32 3.8918573e-05, %v12361_v1  ;;  %v4946_v28 = vmul.f32 %v13562_v51, %v11992_v62 }
 0xa4a   : > { %v4976_v20 = vadd.f32 %v4944_v2, %v4906_v33  ;;  %vm5829_vm1 = vweird.f32 %v7756_v43  ;;  %v5844_v25 = vmul.f32 %v5843_v59, %v12357_v3  ;;  %v5855_v36 = vmul.f32 %v5854_v55, %v12357_v3 }
 0xa4b   : > { %v5826_v54 = vmul.f32 %v7756_v43, %v5825_v12  ;;  %v5892_v27 = vmul.f32 %v5891_v35, %v12234_v7  ;;  %v5924_v14 = vmul.f32 %v5923_v34, %v12361_v1  ;;  %v5934_v26 = vadd.f32 0.001143296, %v5933_v56  ;;  %vm5830_vm2 = vmor %vm5828_vm14, %vm5829_vm1 }
 0xa4c   : > { %v5014_v19 = vmul.f32 %v13640_v17, %v11992_v62  ;;  %v5845_v57 = vadd.f32 0.0036580483, %v5844_v25  ;;  %v5856_v21 = vadd.f32 0.014752088, %v5855_v36  ;;  %v4978_v60 = vadd.f32 %v4946_v28, %v4908_v52 }
 0xa4d   : > { %v5827_v16 = vadd.f32 %v7756_v43, %v5826_v54  ;;  %v5914_v2 = vand.u32 2147483648, %v12363_v41  ;;  %v5925_v33 = vadd.f32 0.0036580483, %v5924_v14  ;;  %v5935_v50 = vmul.f32 %v5934_v26, %v12361_v1 }
 0xa4e   : > { %v7758_v8 = vpop.eup %7757  ;;  %v5046_v7 = vadd.f32 %v5014_v19, %v4976_v20  ;;  %v5846_v13 = vmul.f32 %v5845_v57, %v12357_v3  ;;  %v5016_v46 = vmul.f32 %v13640_v17, %v12115_v15  ;;  %v5857_v30 = vmul.f32 %v5856_v21, %v12357_v3 }
 0xa4f   : > { %v5831_v39 = vsel %vm5830_vm2, %v7756_v43, %v5827_v16  ;;  %v5904_v45 = vmul.f32 %v7758_v8, %v12363_v41  ;;  %v5926_v42 = vmul.f32 %v5925_v33, %v12361_v1  ;;  %v5936_v5 = vadd.f32 0.014752088, %v5935_v50 }
 0xa50   : > { %v5836_v53 = vsel %vm12368_vm15, %v5835_v38, %v5831_v39  ;;  %v5847_v29 = vadd.f32 0.05243302, %v5846_v13  ;;  %v5048_v35 = vadd.f32 %v5016_v46, %v4978_v60  ;;  %v12401_v43 = vadd.f32 %v13643_v61, %v5046_v7 }
 0xa51   : > { %v5905_v24 = vsub.f32 1.0, %v5904_v45  ;;  %v5837_v12 = vmul.f32 %v5836_v53, %v5812_v18  ;;  %v5858_v59 = vadd.f32 0.112945676, %v5857_v30  ;;  %v5927_v55 = vadd.f32 0.05243302, %v5926_v42  ;;  %v6666_v42 = vpop.f32.mrf.mxu3 }
 0xa52   : > { %v5937_v52 = vmul.f32 %v5936_v5, %v12361_v1  ;;  %vm5909_vm3 = vweird.f32 %v7758_v8  ;;  %v5912_v31 = vand.u32 2147483647, %v12363_v41  ;;  %v5848_v38 = vmul.f32 %v5847_v29, %v12357_v3  ;;  %v6715_v5 = vpop.f32.mrf.mxu0 }
 0xa53   : > { %v5906_v34 = vmul.f32 %v7758_v8, %v5905_v24  ;;  %vm5908_vm4 = vweird.f32 %v12363_v41  ;;  %v5859_v56 = vmul.f32 %v5858_v59, %v12357_v3  ;;  %v5928_v28 = vmul.f32 %v5927_v55, %v12361_v1 }
 0xa54   : > { %v5938_v20 = vadd.f32 0.112945676, %v5937_v52  ;;  %v5849_v25 = vadd.f32 0.18741608, %v5848_v38  ;;  %v12410_v18 = vadd.f32 %v13643_v61, %v5048_v35  ;;  %v12413_v36 = vmul.f32 0.70710677, %v12401_v43  ;;  %vm5910_vm5 = vmor %vm5908_vm4, %vm5909_vm3 }
 0xa55   : > { %v5907_v54 = vadd.f32 %v7758_v8, %v5906_v34  ;;  %v7082_v14 = vclamps-f32 %v5837_v12, 1.0  ;;  %v5915_v26 = vor.u32 1.1754944e-38, %v5914_v2  ;;  %v5860_v19 = vadd.f32 0.4994258, %v5859_v56 }
 0xa56   : > { %v5939_v16 = vmul.f32 %v5938_v20, %v12361_v1  ;;  %vm5913_vm6 = vcmp.eq.f32.partialorder %v5912_v31, 8.507059e+37  ;;  %v5929_v57 = vadd.f32 0.18741608, %v5928_v28  ;;  %v5960_v21 = vmul.f32 %v12413_v36, %v12413_v36 }
 0xa57   : > { %v5911_v41 = vsel %vm5910_vm5, %v7758_v8, %v5907_v54  ;;  %v5850_v33 = vmul.f32 %v5849_v25, %v12357_v3  ;;  %v5861_v50 = vmul.f32 %v5860_v19, %v12357_v3  ;;  %v4753_v39 = vadd.f32 %v12124_v4, %v12337_v9 }
 0xa58   : > { %v5916_v60 = vsel %vm5913_vm6, %v5915_v26, %v5911_v41  ;;  %v5940_v7 = vadd.f32 0.4994258, %v5939_v16  ;;  %v12423_v2 = vmul.f32 0.70710677, %v12410_v18  ;;  %v12425_v13 = vmin.f32 %v5960_v21, 16.0 }
 0xa59   : > { %v5917_v45 = vmul.f32 %v5916_v60, %v5892_v27  ;;  %v5112_v8 = vmul.f32 0.5, %v12217_v47  ;;  %v6456_v46 = vadd.f32 1.0, %v7082_v14  ;;  %v12428_v53 = vadd.f32 1.0, %v5861_v50 }
 0xa5a   : > { %v5941_v30 = vmul.f32 %v5940_v7, %v12361_v1  ;;  %v5930_v24 = vmul.f32 %v5929_v57, %v12361_v1  ;;  %v6667_v4 = vadd.f32 %v12255_v40, %v6666_v42  ;;  %v5962_v9 = vmul.f32 2.1237322e-06, %v12425_v13  ;;  %v6668_v57 = vpop.f32.mrf.mxu3 }
 0xa5b   : > { %v7084_v3 = vclamps-f32 %v5917_v45, 1.0  ;;  %v5114_v27 = vmul.f32 0.5, %v12222_v37  ;;  %v5851_v29 = vadd.f32 1.1283791, %v5850_v33  ;;  %7759 = vrcp.f32 %v12428_v53 }
 0xa5c   : > { %v4907_v47 = vadd.f32 %v11876_v10, %v12132_v63  ;;  %v12438_v12 = vadd.f32 1.0, %v5941_v30  ;;  %v6716_v59 = vadd.f32 %v6715_v5, %v6667_v4  ;;  %v6040_v55 = vmul.f32 %v12423_v2, %v12423_v2  ;;  %v13680_v10 = vld [vmem:[#allocation29_spill] sm:$0xff]  ;;  %v13683_v4 = vld [vmem:[#allocation78_spill] sm:$0xff] }
 0xa5d   : > { %v6458_v35 = vadd.f32 1.0, %v7084_v3  ;;  %v6488_v1 = vmul.f32 %v6456_v46, %v5112_v8  ;;  %v5874_v52 = vand.u32 2147483648, %v12428_v53  ;;  %v5963_v34 = vadd.f32 0.00028619796, %v5962_v9 }
 0xa5e   : > { %v5973_v31 = vmul.f32 3.8918573e-05, %v12425_v13  ;;  %v5872_v38 = vand.u32 2147483647, %v12428_v53  ;;  %v12445_v56 = vadd.f32 1.1283791, %v5930_v24  ;;  %7761 = vrcp.f32 %v12438_v12 }
 0xa5f   : > { %v6490_v37 = vmul.f32 %v6458_v35, %v5114_v27  ;;  %v6752_v63 = vadd.f32 %v6716_v59, %v13680_v10  ;;  %v5964_v28 = vmul.f32 %v5963_v34, %v12425_v13  ;;  %v4909_v54 = vadd.f32 %v11971_v23, %v4753_v39  ;;  %v6717_v39 = vpop.f32.mrf.mxu0  ;;  %v13684_v59 = vld [vmem:[#allocation27_spill] sm:$0xff] }
 0xa60   : > { %v5974_v20 = vadd.f32 0.001143296, %v5973_v31  ;;  %v5852_v14 = vmul.f32 %v5851_v29, %v12330_v48  ;;  %vm5868_vm8 = vweird.f32 %v12428_v53  ;;  %v12453_v26 = vmin.f32 %v6040_v55, 16.0 }
 0xa61   : > { %v6512_v25 = vpack.c.bf16 %v6490_v37, %v6488_v1  ;;  %v7760_v19 = vpop.eup %7759  ;;  %v5875_v16 = vor.u32 1.1754944e-38, %v5874_v52  ;;  %v5952_v41 = vand.u32 2147483647, %v12438_v12  ;;  %6768 = vst.msk [vmem:[%s12293_s29 + $0x10] sm:$0xff] %vm508_vm0, %v6752_v63  ;;  %v5965_v21 = vadd.f32 0.0036580483, %v5964_v28 }
 0xa62   : > { %v5975_v60 = vmul.f32 %v5974_v20, %v12425_v13  ;;  %v5864_v23 = vmul.f32 %v7760_v19, %v12428_v53  ;;  %vm12460_vm10 = vcmp.eq.f32.partialorder %v5872_v38, 8.507059e+37  ;;  %v5954_v48 = vand.u32 2147483648, %v12438_v12 }
 0xa63   : > { %6680 = vmatmul.bf16.gmra.mxu3 %v6512_v25  ;;  %v6669_v50 = vadd.f32 %v12255_v40, %v6668_v57  ;;  %v6042_v7 = vmul.f32 2.1237322e-06, %v12453_v26  ;;  %vm5948_vm11 = vweird.f32 %v12438_v12  ;;  %v5966_v45 = vmul.f32 %v5965_v21, %v12425_v13 }
 0xa64   : > { %v5976_v8 = vadd.f32 0.014752088, %v5975_v60  ;;  %v6053_v46 = vmul.f32 3.8918573e-05, %v12453_v26  ;;  %v4945_v30 = vmul.f32 %v13658_v58, %v11957_v44  ;;  %v7762_v42 = vpop.eup %7761  ;;  %v5865_v5 = vsub.f32 1.0, %v5864_v23 }
 0xa65   : > { %v6718_v3 = vadd.f32 %v6717_v39, %v6669_v50  ;;  %v6043_v24 = vadd.f32 0.00028619796, %v6042_v7  ;;  %v4947_v40 = vmul.f32 %v13658_v58, %v13683_v4  ;;  %vm5869_vm12 = vweird.f32 %v7760_v19 }
 0xa66   : > { %v5944_v9 = vmul.f32 %v7762_v42, %v12438_v12  ;;  %v5977_v27 = vmul.f32 %v5976_v8, %v12425_v13  ;;  %v4977_v29 = vadd.f32 %v4945_v30, %v4907_v47  ;;  %v5866_v35 = vmul.f32 %v7760_v19, %v5865_v5  ;;  %vm5870_vm13 = vmor %vm5868_vm8, %vm5869_vm12 }
 0xa67   : > { %v6753_v55 = vadd.f32 %v6718_v3, %v13684_v59  ;;  %v6044_v1 = vmul.f32 %v6043_v24, %v12453_v26  ;;  %v6054_v44 = vadd.f32 0.001143296, %v6053_v46  ;;  %v5967_v34 = vadd.f32 0.05243302, %v5966_v45 }
 0xa68   : > { %v5945_v52 = vsub.f32 1.0, %v5944_v9  ;;  %v5978_v31 = vadd.f32 0.112945676, %v5977_v27  ;;  %v4979_v37 = vadd.f32 %v4947_v40, %v4909_v54  ;;  %v5867_v38 = vadd.f32 %v7760_v19, %v5866_v35 }
 0xa69   : > { %6769 = vst.msk [vmem:[%s12293_s29 + $0x18] sm:$0xff] %vm508_vm0, %v6753_v55  ;;  %v6045_v10 = vadd.f32 0.0036580483, %v6044_v1  ;;  %v6055_v63 = vmul.f32 %v6054_v44, %v12453_v26  ;;  %v5015_v28 = vmul.f32 %v13592_v32, %v13683_v4  ;;  %vm5949_vm14 = vweird.f32 %v7762_v42 }
 0xa6a   : > { %v5946_v47 = vmul.f32 %v7762_v42, %v5945_v52  ;;  %v5979_v20 = vmul.f32 %v5978_v31, %v12425_v13  ;;  %v5017_v54 = vmul.f32 %v13592_v32, %v12139_v11  ;;  %v5871_v25 = vsel %vm5870_vm13, %v7760_v19, %v5867_v38  ;;  %vm5950_vm15 = vmor %vm5948_vm11, %vm5949_vm14 }
 0xa6b   : > { %v5955_v57 = vor.u32 1.1754944e-38, %v5954_v48  ;;  %v6056_v21 = vadd.f32 0.014752088, %v6055_v63  ;;  %v5047_v60 = vadd.f32 %v5015_v28, %v4977_v29  ;;  %v5876_v23 = vsel %vm12460_vm10, %v5875_v16, %v5871_v25 }
 0xa6c   : > { %v5947_v50 = vadd.f32 %v7762_v42, %v5946_v47  ;;  %v5980_v7 = vadd.f32 0.4994258, %v5979_v20  ;;  %v5049_v39 = vadd.f32 %v5017_v54, %v4979_v37  ;;  %v5877_v45 = vmul.f32 %v5876_v23, %v5852_v14  ;;  %v13685_v23 = vld [vmem:[#allocation82_spill] sm:$0xff] }
 0xa6d   : > { %v5968_v53 = vmul.f32 %v5967_v34, %v12425_v13  ;;  %v6046_v8 = vmul.f32 %v6045_v10, %v12453_v26  ;;  %v6057_v46 = vmul.f32 %v6056_v21, %v12453_v26  ;;  %v5932_v19 = vmul.f32 %v12445_v56, %v12333_v0 }
 0xa6e   : > { %v5951_v48 = vsel %vm5950_vm15, %v7762_v42, %v5947_v50  ;;  %vm5953_vm1 = vcmp.eq.f32.partialorder %v5952_v41, 8.507059e+37  ;;  %v5981_v16 = vmul.f32 %v5980_v7, %v12425_v13  ;;  %v7083_v33 = vclamps-f32 %v5877_v45, 1.0  ;;  %v13686_v50 = vld [vmem:[#allocation57_spill] sm:$0xff] }
 0xa6f   : > { %v5956_v30 = vsel %vm5953_vm1, %v5955_v57, %v5951_v48  ;;  %v6058_v5 = vadd.f32 0.112945676, %v6057_v46  ;;  %v12500_v12 = vadd.f32 %v10943_v6, %v5047_v60  ;;  %v12503_v24 = vadd.f32 %v10943_v6, %v5049_v39  ;;  %v13687_v48 = vld [vmem:[#allocation47_spill] sm:$0xff] }
 0xa70   : > { %v5957_v14 = vmul.f32 %v5956_v30, %v5932_v19  ;;  %v5982_v3 = vadd.f32 1.0, %v5981_v16  ;;  %v5969_v40 = vadd.f32 0.18741608, %v5968_v53  ;;  %v6047_v9 = vadd.f32 0.05243302, %v6046_v8 }
 0xa71   : > { %v6059_v27 = vmul.f32 %v6058_v5, %v12453_v26  ;;  %v6457_v56 = vadd.f32 1.0, %v7083_v33  ;;  %v5113_v41 = vmul.f32 0.5, %v12312_v22  ;;  %v5115_v29 = vmul.f32 0.5, %v12316_v49 }
 0xa72   : > { %v7085_v0 = vclamps-f32 %v5957_v14, 1.0  ;;  %7763 = vrcp.f32 %v5982_v3  ;;  %v12509_v59 = vmul.f32 0.70710677, %v12500_v12  ;;  %v12512_v55 = vmul.f32 0.70710677, %v12503_v24 }
 0xa73   : > { %v6060_v42 = vadd.f32 0.4994258, %v6059_v27  ;;  %v5970_v1 = vmul.f32 %v5969_v40, %v12425_v13  ;;  %v6048_v44 = vmul.f32 %v6047_v9, %v12453_v26  ;;  %v6489_v34 = vmul.f32 %v6457_v56, %v5113_v41 }
 0xa74   : > { %v6459_v35 = vadd.f32 1.0, %v7085_v0  ;;  %v6000_v22 = vmul.f32 %v12509_v59, %v12509_v59  ;;  %v6080_v49 = vmul.f32 %v12512_v55, %v12512_v55  ;;  %v5992_v20 = vand.u32 2147483647, %v5982_v3 }
 0xa75   : > { %v6061_v52 = vmul.f32 %v6060_v42, %v12453_v26  ;;  %v5971_v13 = vadd.f32 1.1283791, %v5970_v1  ;;  %v6049_v54 = vadd.f32 0.18741608, %v6048_v44  ;;  %v4722_v7 = vmul.f32 %v13686_v50, %v13685_v23 }
 0xa76   : > { %v6491_v31 = vmul.f32 %v6459_v35, %v5115_v29  ;;  %v12523_v63 = vmin.f32 %v6000_v22, 16.0  ;;  %v12525_v28 = vmin.f32 %v6080_v49, 16.0  ;;  %v5994_v39 = vand.u32 2147483648, %v5982_v3 }
 0xa77   : > { %v12521_v37 = vadd.f32 1.0, %v6061_v52  ;;  %v4754_v16 = vadd.f32 %v4722_v7, %v13687_v48  ;;  %v6050_v33 = vmul.f32 %v6049_v54, %v12453_v26  ;;  %vm5988_vm3 = vweird.f32 %v5982_v3 }
 0xa78   : > { %v7764_v38 = vpop.eup %7763  ;;  %v6513_v10 = vpack.c.bf16 %v6491_v31, %v6489_v34  ;;  %v6002_v25 = vmul.f32 2.1237322e-06, %v12523_v63  ;;  %v6013_v21 = vmul.f32 3.8918573e-05, %v12523_v63  ;;  %v6082_v60 = vmul.f32 2.1237322e-06, %v12525_v28 }
 0xa79   : > { %v5984_v47 = vmul.f32 %v7764_v38, %v5982_v3  ;;  %7765 = vrcp.f32 %v12521_v37  ;;  %v6093_v53 = vmul.f32 3.8918573e-05, %v12525_v28  ;;  %vm5989_vm2 = vweird.f32 %v7764_v38 }
 0xa7a   : > { %6729 = vmatmul.bf16.gmra.mxu0 %v6513_v10  ;;  %v6003_v45 = vadd.f32 0.00028619796, %v6002_v25  ;;  %v6014_v46 = vadd.f32 0.001143296, %v6013_v21  ;;  %v6083_v19 = vadd.f32 0.00028619796, %v6082_v60  ;;  %v5972_v0 = vmul.f32 %v5971_v13, %v12413_v36  ;;  %vm5990_vm4 = vmor %vm5988_vm3, %vm5989_vm2 }
 0xa7b   : > { %v5985_v57 = vsub.f32 1.0, %v5984_v47  ;;  %v6094_v5 = vadd.f32 0.001143296, %v6093_v53  ;;  %v5995_v56 = vor.u32 1.1754944e-38, %v5994_v39  ;;  %vm5993_vm5 = vcmp.eq.f32.partialorder %v5992_v20, 8.507059e+37 }
 0xa7c   : > { %v6004_v30 = vmul.f32 %v6003_v45, %v12523_v63  ;;  %v6015_v9 = vmul.f32 %v6014_v46, %v12523_v63  ;;  %v6084_v27 = vmul.f32 %v6083_v19, %v12525_v28  ;;  %v6051_v44 = vadd.f32 1.1283791, %v6050_v33 }
 0xa7d   : > { %v5986_v8 = vmul.f32 %v7764_v38, %v5985_v57  ;;  %v6095_v42 = vmul.f32 %v6094_v5, %v12525_v28  ;;  %v6072_v34 = vand.u32 2147483647, %v12521_v37  ;;  %v6074_v31 = vand.u32 2147483648, %v12521_v37 }
 0xa7e   : > { %v6005_v26 = vadd.f32 0.0036580483, %v6004_v30  ;;  %v6016_v35 = vadd.f32 0.014752088, %v6015_v9  ;;  %v6085_v22 = vadd.f32 0.0036580483, %v6084_v27  ;;  %v6052_v57 = vmul.f32 %v6051_v44, %v12423_v2  ;;  %v4144_v27 = vpop.f32.mrf.mxu1  ;;  %v4193_v44 = vpop.f32.mrf.mxu2 }
 0xa7f   : > { %v7766_v14 = vpop.eup %7765  ;;  %v5987_v40 = vadd.f32 %v7764_v38, %v5986_v8  ;;  %v6096_v3 = vadd.f32 0.014752088, %v6095_v42  ;;  %v4794_v20 = vrot.slane %v13685_v23, 1  ;;  %vm6068_vm8 = vweird.f32 %v12521_v37  ;;  %v13690_v42 = vld [vmem:[#allocation38_spill] sm:$0xff] }
 0xa80   : > { %v6064_v41 = vmul.f32 %v7766_v14, %v12521_v37  ;;  %v6017_v36 = vmul.f32 %v6016_v35, %v12523_v63  ;;  %vm6069_vm6 = vweird.f32 %v7766_v14  ;;  %v6006_v54 = vmul.f32 %v6005_v26, %v12523_v63 }
 0xa81   : > { %v5991_v29 = vsel %vm5990_vm4, %v7764_v38, %v5987_v40  ;;  %v6097_v13 = vmul.f32 %v6096_v3, %v12525_v28  ;;  %v13688_v38 = vld [vmem:[#allocation45_spill] sm:$0xff]  ;;  %vm6070_vm10 = vmor %vm6068_vm8, %vm6069_vm6  ;;  %v6075_v7 = vor.u32 1.1754944e-38, %v6074_v31  ;;  %v6086_v45 = vmul.f32 %v6085_v22, %v12525_v28  ;;  %v13691_v22 = vld [vmem:[#allocation87_spill] sm:$0xff] }
 0xa82   : > { %v5996_v1 = vsel %vm5993_vm5, %v5995_v56, %v5991_v29  ;;  %v6065_v52 = vsub.f32 1.0, %v6064_v41  ;;  %v4878_v47 = vmul.f32 %v13688_v38, %v11992_v62  ;;  %v6018_v25 = vadd.f32 0.112945676, %v6017_v36 }
 0xa83   : > { %v5997_v49 = vmul.f32 %v5996_v1, %v5972_v0  ;;  %v6098_v60 = vadd.f32 0.112945676, %v6097_v13  ;;  %vm6073_vm11 = vcmp.eq.f32.partialorder %v6072_v34, 8.507059e+37  ;;  %v6007_v48 = vadd.f32 0.05243302, %v6006_v54  ;;  %v13693_v54 = vld [vmem:[#allocation46_spill] sm:$0xff] }
 0xa84   : > { %v6066_v10 = vmul.f32 %v7766_v14, %v6065_v52  ;;  %v6019_v39 = vmul.f32 %v6018_v25, %v12523_v63  ;;  %v4910_v53 = vadd.f32 %v4878_v47, %v4754_v16  ;;  %v4948_v2 = vmul.f32 %v13562_v51, %v12115_v15 }
 0xa85   : > { %v7086_v8 = vclamps-f32 %v5997_v49, 1.0  ;;  %v6099_v46 = vmul.f32 %v6098_v60, %v12525_v28  ;;  %v12559_v30 = vsel %vm4804_vm9, %v4794_v20, 0.0  ;;  %v6087_v16 = vadd.f32 0.05243302, %v6086_v45  ;;  %v13692_v49 = vld [vmem:[#allocation44_spill] sm:$0xff] }
 0xa86   : > { %v6067_v21 = vadd.f32 %v7766_v14, %v6066_v10  ;;  %v6020_v33 = vadd.f32 0.4994258, %v6019_v39  ;;  %v12564_v29 = vadd.f32 %v4144_v27, %v13690_v42  ;;  %v5116_v26 = vmul.f32 0.5, %v12401_v43 }
 0xa87   : > { %v6100_v40 = vadd.f32 0.4994258, %v6099_v46  ;;  %v6460_v56 = vadd.f32 1.0, %v7086_v8  ;;  %v6008_v35 = vmul.f32 %v6007_v48, %v12523_v63  ;;  %v5018_v52 = vmul.f32 %v13640_v17, %v12559_v30  ;;  %v13699_v48 = vld [vmem:[#allocation39_spill] sm:$0xff] }
 0xa88   : > { %v6071_v62 = vsel %vm6070_vm10, %v7766_v14, %v6067_v21  ;;  %v6021_v9 = vmul.f32 %v6020_v33, %v12523_v63  ;;  %v4980_v14 = vadd.f32 %v4948_v2, %v4910_v53  ;;  %v5118_v3 = vmul.f32 0.5, %v12410_v18  ;;  %v13694_v18 = vld [vmem:[#allocation76_spill] sm:$0xff]  ;;  %v13700_v2 = vld [vmem:[#allocation89_spill] sm:$0xff] }
 0xa89   : > { %v6076_v19 = vsel %vm6073_vm11, %v6075_v7, %v6071_v62  ;;  %v6101_v41 = vmul.f32 %v6100_v40, %v12525_v28  ;;  %v4319_v36 = vrot.slane %v12564_v29, 7  ;;  %v4443_v10 = vmul.f32 %v13692_v49, %v13691_v22  ;;  %v13697_v62 = vld [vmem:[#allocation54_spill] sm:$0xff] }
 0xa8a   : > { %v6077_v5 = vmul.f32 %v6076_v19, %v6052_v57  ;;  %v12568_v1 = vadd.f32 1.0, %v6021_v9  ;;  %v6088_v43 = vmul.f32 %v6087_v16, %v12525_v28  ;;  %v5050_v13 = vadd.f32 %v5018_v52, %v4980_v14  ;;  %v13695_v57 = vld [vmem:[#allocation42_spill] sm:$0xff]  ;;  %v13698_v19 = vld [vmem:[#allocation69_spill] sm:$0xff] }
 0xa8b   : > { %v12573_v31 = vadd.f32 1.0, %v6101_v41  ;;  %v6492_v47 = vmul.f32 %v6460_v56, %v5116_v26  ;;  %v12582_v25 = vadd.f32 %v4193_v44, %v13693_v54  ;;  %v4404_v21 = vmul.f32 %v13695_v57, %v13694_v18  ;;  %v13702_v14 = vld [vmem:[#allocation53_spill] sm:$0xff]  ;;  %v13703_v56 = vld [vmem:[#allocation70_spill] sm:$0xff] }
 0xa8c   : > { %v7088_v0 = vclamps-f32 %v6077_v5, 1.0  ;;  %7767 = vrcp.f32 %v12568_v1  ;;  %v6009_v60 = vadd.f32 0.18741608, %v6008_v35  ;;  %v12588_v45 = vsel %vm4326_vm7, %v4319_v36, 0.0  ;;  %v13701_v5 = vld [vmem:[#allocation52_spill] sm:$0xff]  ;;  %v13704_v41 = vld [vmem:[#allocation49_spill] sm:$0xff] }
 0xa8d   : > { %7769 = vrcp.f32 %v12573_v31  ;;  %v4475_v53 = vadd.f32 %v4443_v10, %v4404_v21  ;;  %v6089_v8 = vadd.f32 0.18741608, %v6088_v43  ;;  %v4514_v46 = vmul.f32 %v13697_v62, %v12588_v45  ;;  %v13707_v10 = vld [vmem:[#allocation83_spill] sm:$0xff]  ;;  %v13708_v43 = vld [vmem:[#allocation61_spill] sm:$0xff] }
 0xa8e   : > { %v6462_v34 = vadd.f32 1.0, %v7088_v0  ;;  %v4584_v33 = vmul.f32 %v13699_v48, %v13698_v19  ;;  %v4444_v40 = vmul.f32 %v13701_v5, %v13700_v2  ;;  %v4320_v9 = vrot.slane %v12582_v25, 7 }
 0xa8f   : > { %v12598_v16 = vadd.f32 %v13643_v61, %v5050_v13  ;;  %v4879_v0 = vmul.f32 %v13702_v14, %v13683_v4  ;;  %v4585_v26 = vmul.f32 %v13704_v41, %v13703_v56  ;;  %v6010_v35 = vmul.f32 %v6009_v60, %v12523_v63 }
 0xa90   : > { %v6494_v20 = vmul.f32 %v6462_v34, %v5118_v3  ;;  %v4546_v44 = vadd.f32 %v4514_v46, %v4475_v53  ;;  %v13705_v3 = vld [vmem:[#allocation79_spill] sm:$0xff]  ;;  %v4795_v4 = vrot.slane %v13707_v10, 1  ;;  %v6090_v18 = vmul.f32 %v6089_v8, %v12525_v28  ;;  %v13710_v53 = vld [vmem:[#allocation62_spill] sm:$0xff] }
 0xa91   : > { %v13706_v34 = vld [vmem:[#allocation51_spill] sm:$0xff]  ;;  %v12620_v19 = vmul.f32 0.70710677, %v12598_v16  ;;  %v6011_v56 = vadd.f32 1.1283791, %v6010_v35  ;;  %v6114_v28 = vand.u32 2147483648, %v12573_v31  ;;  %vm6028_vm14 = vweird.f32 %v12568_v1 }
 0xa92   : > { %v6514_v7 = vpack.c.bf16 %v6494_v20, %v6492_v47  ;;  %v7768_v27 = vpop.eup %7767  ;;  %v4405_v36 = vmul.f32 %v13706_v34, %v13705_v3  ;;  %v4723_v47 = vmul.f32 %v13708_v43, %v13707_v10  ;;  %v12612_v20 = vsel %vm4326_vm7, %v4320_v9, 0.0 }
 0xa93   : > { %v7770_v52 = vpop.eup %7769  ;;  %v6024_v13 = vmul.f32 %v7768_v27, %v12568_v1  ;;  %13709 = vst [vmem:[#allocation16_spill] sm:$0xff] %v12612_v20  ;;  %v4616_v21 = vadd.f32 %v4584_v33, %v4546_v44  ;;  %v4515_v46 = vmul.f32 %v13710_v53, %v12612_v20  ;;  %v6032_v3 = vand.u32 2147483647, %v12568_v1 }
 0xa94   : > { %6685 = vmatmul.bf16.gmra.mxu3 %v6514_v7  ;;  %v6104_v63 = vmul.f32 %v7770_v52, %v12573_v31  ;;  %v4476_v60 = vadd.f32 %v4444_v40, %v4405_v36  ;;  %13711 = vst [vmem:[#allocation65_spill] sm:$0xff] %v12620_v19  ;;  %v6034_v9 = vand.u32 2147483648, %v12568_v1  ;;  %vm6029_vm12 = vweird.f32 %v7768_v27  ;;  %v13712_v36 = vld [vmem:[#allocation90_spill] sm:$0xff] }
 0xa95   : > { %v6025_v7 = vsub.f32 1.0, %v6024_v13  ;;  %v6091_v33 = vadd.f32 1.1283791, %v6090_v18  ;;  %vm6109_vm13 = vweird.f32 %v7770_v52  ;;  %v6112_v44 = vand.u32 2147483647, %v12573_v31  ;;  %vm6030_vm15 = vmor %vm6028_vm14, %vm6029_vm12 }
 0xa96   : > { %v6105_v62 = vsub.f32 1.0, %v6104_v63  ;;  %v4547_v8 = vadd.f32 %v4515_v46, %v4476_v60  ;;  %v4755_v13 = vadd.f32 %v4723_v47, %v13712_v36  ;;  %v6035_v20 = vor.u32 1.1754944e-38, %v6034_v9 }
 0xa97   : > { %v6026_v5 = vmul.f32 %v7768_v27, %v6025_v7  ;;  %vm6108_vm1 = vweird.f32 %v12573_v31  ;;  %v6120_v60 = vmul.f32 %v12620_v19, %v12620_v19  ;;  %vm6033_vm2 = vcmp.eq.f32.partialorder %v6032_v3, 8.507059e+37 }
 0xa98   : > { %v6106_v40 = vmul.f32 %v7770_v52, %v6105_v62  ;;  %v12628_v35 = vadd.f32 %v4585_v26, %v4547_v8  ;;  %v6012_v62 = vmul.f32 %v6011_v56, %v12509_v59  ;;  %vm6110_vm3 = vmor %vm6108_vm1, %vm6109_vm13  ;;  %v6115_v7 = vor.u32 1.1754944e-38, %v6114_v28  ;;  %v13713_v26 = vld [vmem:[#allocation40_spill] sm:$0xff] }
 0xa99   : > { %v6027_v53 = vadd.f32 %v7768_v27, %v6026_v5  ;;  %v6092_v5 = vmul.f32 %v6091_v33, %v12512_v55  ;;  %vm6113_vm4 = vcmp.eq.f32.partialorder %v6112_v44, 8.507059e+37  ;;  %v4654_v46 = vmul.f32 %v13713_v26, %v13685_v23  ;;  %v6671_v55 = vpop.f32.mrf.mxu3 }
 0xa9a   : > { %v6107_v63 = vadd.f32 %v7770_v52, %v6106_v40  ;;  %v4911_v31 = vadd.f32 %v4879_v0, %v4755_v13  ;;  %v4949_v59 = vmul.f32 %v13658_v58, %v12139_v11  ;;  %v4724_v56 = vmul.f32 %v13686_v50, %v12564_v29 }
 0xa9b   : > { %v6031_v18 = vsel %vm6030_vm15, %v7768_v27, %v6027_v53  ;;  %v4686_v19 = vadd.f32 %v4654_v46, %v4616_v21  ;;  %v12641_v27 = vsel %vm4804_vm9, %v4795_v4, 0.0  ;;  %v5117_v0 = vmul.f32 0.5, %v12500_v12  ;;  %v12653_v4 = vld [vmem:[%s13136_s13] ss:$0 sm:$0xff]  ;;  %v6720_v12 = vpop.f32.mrf.mxu0 }
 0xa9c   : > { %v6036_v47 = vsel %vm6033_vm2, %v6035_v20, %v6031_v18  ;;  %v6111_v1 = vsel %vm6110_vm3, %v7770_v52, %v6107_v63  ;;  %v12643_v52 = vmin.f32 %v6120_v60, 16.0  ;;  %v4981_v3 = vadd.f32 %v4949_v59, %v4911_v31 }
 0xa9d   : > { %v6037_v9 = vmul.f32 %v6036_v47, %v6012_v62  ;;  %v6116_v8 = vsel %vm6113_vm4, %v6115_v7, %v6111_v1  ;;  %v5119_v21 = vmul.f32 0.5, %v12503_v24  ;;  %v4796_v33 = vrot.slane %v12564_v29, 1  ;;  %v13714_v1 = vld [vmem:[#allocation26_spill] sm:$0xff] }
 0xa9e   : > { %v6117_v40 = vmul.f32 %v6116_v8, %v6092_v5  ;;  %v4756_v44 = vadd.f32 %v4724_v56, %v4686_v19  ;;  %v6672_v13 = vadd.f32 %v12653_v4, %v6671_v55  ;;  %v5019_v63 = vmul.f32 %v13592_v32, %v12641_v27  ;;  %v4146_v56 = vpop.f32.mrf.mxu1 }
 0xa9f   : > { %v7087_v36 = vclamps-f32 %v6037_v9, 1.0  ;;  %v6133_v24 = vmul.f32 3.8918573e-05, %v12643_v52  ;;  %v4880_v18 = vmul.f32 %v13688_v38, %v12115_v15  ;;  %v12663_v5 = vsel %vm4804_vm9, %v4796_v33, 0.0 }
 0xaa0   : > { %v7089_v20 = vclamps-f32 %v6117_v40, 1.0  ;;  %v6721_v19 = vadd.f32 %v6720_v12, %v6672_v13  ;;  %v5051_v7 = vadd.f32 %v5019_v63, %v4981_v3  ;;  %v4950_v8 = vmul.f32 %v13562_v51, %v12559_v30 }
 0xaa1   : > { %v6461_v53 = vadd.f32 1.0, %v7087_v36  ;;  %v4912_v9 = vadd.f32 %v4880_v18, %v4756_v44  ;;  %v6122_v31 = vmul.f32 2.1237322e-06, %v12643_v52  ;;  %v6134_v40 = vadd.f32 0.001143296, %v6133_v24 }
 0xaa2   : > { %v6463_v28 = vadd.f32 1.0, %v7089_v20  ;;  %v6754_v46 = vadd.f32 %v6721_v19, %v13714_v1  ;;  %v5020_v36 = vmul.f32 %v13640_v17, %v12663_v5  ;;  %v12674_v59 = vadd.f32 %v10943_v6, %v5051_v7 }
 0xaa3   : > { %v6493_v60 = vmul.f32 %v6461_v53, %v5117_v0  ;;  %v4982_v15 = vadd.f32 %v4950_v8, %v4912_v9  ;;  %v6135_v20 = vmul.f32 %v6134_v40, %v12643_v52  ;;  %v6123_v3 = vadd.f32 0.00028619796, %v6122_v31 }
 0xaa4   : > { %v6495_v62 = vmul.f32 %v6463_v28, %v5119_v21  ;;  %6770 = vst.msk [vmem:[%s12293_s29 + $0x20] sm:$0xff] %vm508_vm0, %v6754_v46  ;;  %v12678_v53 = vmul.f32 0.70710677, %v12674_v59  ;;  %v12687_v44 = vadd.f32 %v4146_v56, %v13690_v42  ;;  %v4406_v42 = vmul.f32 %v13695_v57, %v13691_v22 }
 0xaa5   : > { %13715 = vst [vmem:[#allocation35_spill] sm:$0xff] %v12674_v59  ;;  %v5052_v55 = vadd.f32 %v5020_v36, %v4982_v15  ;;  %v6136_v0 = vadd.f32 0.014752088, %v6135_v20  ;;  %v6124_v12 = vmul.f32 %v6123_v3, %v12643_v52  ;;  %v12707_v18 = vmul.f32 %v13704_v41, %v13707_v10  ;;  %v4195_v3 = vpop.f32.mrf.mxu2 }
 0xaa6   : > { %v6515_v47 = vpack.c.bf16 %v6495_v62, %v6493_v60  ;;  %13716 = vst [vmem:[#allocation85_spill] sm:$0xff] %v12678_v53  ;;  %v6160_v28 = vmul.f32 %v12678_v53, %v12678_v53  ;;  %v12696_v60 = vmul.f32 %v13702_v14, %v12139_v11  ;;  %v12700_v62 = vmul.f32 %v13699_v48, %v13685_v23  ;;  %v13718_v23 = vld [vmem:[#allocation50_spill] sm:$0xff] }
 0xaa7   : > { %v12681_v21 = vadd.f32 %v13643_v61, %v5052_v55  ;;  %v6137_v33 = vmul.f32 %v6136_v0, %v12643_v52  ;;  %v12714_v7 = vmul.f32 %v13706_v34, %v13700_v2  ;;  %v12720_v1 = vmul.f32 %v13688_v38, %v12559_v30 }
 0xaa8   : > { %6734 = vmatmul.bf16.gmra.mxu0 %v6515_v47  ;;  %v12692_v63 = vmin.f32 %v6160_v28, 16.0  ;;  %v4655_v47 = vmul.f32 %v13718_v23, %v13707_v10  ;;  %v4321_v46 = vrot.slane %v12687_v44, 7  ;;  %v12726_v9 = vmul.f32 %v13702_v14, %v12641_v27 }
 0xaa9   : > { %13717 = vst [vmem:[#allocation74_spill] sm:$0xff] %v12681_v21  ;;  %v12690_v13 = vmul.f32 0.70710677, %v12681_v21  ;;  %v6138_v24 = vadd.f32 0.112945676, %v6137_v33  ;;  %v12731_v2 = vmul.f32 0.5, %v12598_v16  ;;  %v12735_v30 = vmul.f32 %v13658_v58, %v12641_v27 }
 0xaaa   : > { %v6173_v11 = vmul.f32 3.8918573e-05, %v12692_v63  ;;  %13719 = vst [vmem:[#allocation48_spill] sm:$0xff] %v12726_v9  ;;  %v6125_v40 = vadd.f32 0.0036580483, %v6124_v12  ;;  %v12739_v15 = vmul.f32 %v13699_v48, %v12564_v29  ;;  %v4445_v16 = vmul.f32 %v13692_v49, %v12588_v45 }
 0xaab   : > { %v6200_v19 = vmul.f32 %v12690_v13, %v12690_v13  ;;  %v6139_v22 = vmul.f32 %v6138_v24, %v12643_v52  ;;  %13720 = vst [vmem:[#allocation72_spill] sm:$0xff] %v12731_v2  ;;  %v12748_v56 = vmul.f32 %v13713_v26, %v12564_v29  ;;  %v12752_v27 = vmul.f32 %v13704_v41, %v12582_v25 }
 0xaac   : > { %v6174_v31 = vadd.f32 0.001143296, %v6173_v11  ;;  %v12757_v0 = vmul.f32 %v13718_v23, %v12582_v25  ;;  %v4367_v28 = vsel %vm4326_vm7, %v4321_v46, 0.0  ;;  %v4725_v29 = vmul.f32 %v13708_v43, %v12582_v25  ;;  %v13721_v46 = vld [vmem:[#allocation16_spill] sm:$0xff] }
 0xaad   : > { %v12728_v8 = vmin.f32 %v6200_v19, 16.0  ;;  %v6140_v10 = vadd.f32 0.4994258, %v6139_v22  ;;  %v6126_v24 = vmul.f32 %v6125_v40, %v12643_v52  ;;  %v4797_v11 = vrot.slane %v12582_v25, 1 }
 0xaae   : > { %v6175_v55 = vmul.f32 %v6174_v31, %v12692_v63  ;;  %v12768_v22 = vadd.f32 %v4195_v3, %v13693_v54  ;;  %v4447_v59 = vmul.f32 %v13692_v49, %v4367_v28  ;;  %v4798_v40 = vrot.slane %v12687_v44, 1 }
 0xaaf   : > { %v6202_v36 = vmul.f32 2.1237322e-06, %v12728_v8  ;;  %v6213_v20 = vmul.f32 3.8918573e-05, %v12728_v8  ;;  %v6141_v48 = vmul.f32 %v6140_v10, %v12643_v52  ;;  %v4687_v3 = vadd.f32 %v4655_v47, %v12628_v35 }
 0xab0   : > { %v6176_v41 = vadd.f32 0.014752088, %v6175_v55  ;;  %v13723_v55 = vld [vmem:[#allocation54_spill] sm:$0xff]  ;;  %v6162_v61 = vmul.f32 2.1237322e-06, %v12692_v63  ;;  %v4477_v2 = vadd.f32 %v4445_v16, %v4406_v42  ;;  %v4322_v49 = vrot.slane %v12768_v22, 7 }
 0xab1   : > { %v6203_v33 = vadd.f32 0.00028619796, %v6202_v36  ;;  %v6214_v12 = vadd.f32 0.001143296, %v6213_v20  ;;  %v12764_v19 = vadd.f32 1.0, %v6141_v48  ;;  %v13722_v36 = vld [vmem:[#allocation52_spill] sm:$0xff]  ;;  %v4516_v48 = vmul.f32 %v13723_v55, %v4367_v28 }
 0xab2   : > { %v12774_v20 = vmul.f32 %v13722_v36, %v13721_v46  ;;  %v6177_v54 = vmul.f32 %v6176_v41, %v12692_v63  ;;  %v12789_v28 = vsel %vm4804_vm9, %v4797_v11, 0.0  ;;  %v4658_v35 = vmul.f32 %v13713_v26, %v12687_v44 }
 0xab3   : > { %v6204_v31 = vmul.f32 %v6203_v33, %v12728_v8  ;;  %v6215_v10 = vmul.f32 %v6214_v12, %v12728_v8  ;;  %7771 = vrcp.f32 %v12764_v19  ;;  %v4408_v33 = vmul.f32 %v13695_v57, %v12588_v45  ;;  %v6673_v45 = vpop.f32.mrf.mxu3 }
 0xab4   : > { %v6127_v12 = vadd.f32 0.05243302, %v6126_v24  ;;  %v6178_v21 = vadd.f32 0.112945676, %v6177_v54  ;;  %v4844_v57 = vsel %vm4804_vm9, %v4798_v40, 0.0  ;;  %v4548_v47 = vadd.f32 %v4516_v48, %v4477_v2 }
 0xab5   : > { %v6205_v25 = vadd.f32 0.0036580483, %v6204_v31  ;;  %v6216_v53 = vadd.f32 0.014752088, %v6215_v10  ;;  %v4479_v31 = vadd.f32 %v4447_v59, %v4408_v33  ;;  %v4757_v41 = vadd.f32 %v4725_v29, %v4687_v3  ;;  %v6722_v33 = vpop.f32.mrf.mxu0 }
 0xab6   : > { %v6179_v24 = vmul.f32 %v6178_v21, %v12692_v63  ;;  %v4726_v11 = vmul.f32 %v13686_v50, %v12687_v44  ;;  %v6128_v59 = vmul.f32 %v6127_v12, %v12643_v52  ;;  %v6163_v10 = vadd.f32 0.00028619796, %v6162_v61  ;;  %v13724_v21 = vld [vmem:[#allocation71_spill] sm:$0xff] }
 0xab7   : > { %v6217_v9 = vmul.f32 %v6216_v53, %v12728_v8  ;;  %v6206_v42 = vmul.f32 %v6205_v25, %v12728_v8  ;;  %v4368_v26 = vsel %vm4326_vm7, %v4322_v49, 0.0  ;;  %v6674_v40 = vadd.f32 %v12653_v4, %v6673_v45 }
 0xab8   : > { %v4550_v55 = vadd.f32 %v13724_v21, %v4479_v31  ;;  %v12811_v29 = vmul.f32 %v13688_v38, %v12663_v5  ;;  %v12814_v50 = vmul.f32 %v13562_v51, %v4844_v57  ;;  %v6180_v61 = vadd.f32 0.4994258, %v6179_v24 }
 0xab9   : > { %v6218_v16 = vadd.f32 0.112945676, %v6217_v9  ;;  %v12797_v53 = vpop.eup %7771  ;;  %v4618_v39 = vadd.f32 %v12700_v62, %v4548_v47  ;;  %v6207_v48 = vadd.f32 0.05243302, %v6206_v42  ;;  %v4448_v54 = vmul.f32 %v13722_v36, %v4368_v26  ;;  %v13725_v42 = vld [vmem:[#allocation62_spill] sm:$0xff] }
 0xaba   : > { %v6144_v2 = vmul.f32 %v12797_v53, %v12764_v19  ;;  %v6129_v3 = vadd.f32 0.18741608, %v6128_v59  ;;  %v4913_v12 = vadd.f32 %v12696_v60, %v4757_v41  ;;  %v6164_v49 = vmul.f32 %v6163_v10, %v12692_v63  ;;  %v13726_v10 = vld [vmem:[#allocation25_spill] sm:$0xff] }
 0xabb   : > { %v6219_v9 = vmul.f32 %v6218_v16, %v12728_v8  ;;  %v6723_v45 = vadd.f32 %v6722_v33, %v6674_v40  ;;  %v6181_v16 = vmul.f32 %v6180_v61, %v12692_v63  ;;  %v4620_v62 = vadd.f32 %v12739_v15, %v4550_v55 }
 0xabc   : > { %v6145_v44 = vsub.f32 1.0, %v6144_v2  ;;  %v4409_v47 = vmul.f32 %v13706_v34, %v13721_v46  ;;  %v4983_v36 = vadd.f32 %v12735_v30, %v4913_v12  ;;  %v5021_v60 = vmul.f32 %v13592_v32, %v12789_v28 }
 0xabd   : > { %v6220_v25 = vadd.f32 0.4994258, %v6219_v9  ;;  %v4517_v24 = vmul.f32 %v13725_v42, %v4368_v26  ;;  %v6208_v41 = vmul.f32 %v6207_v48, %v12728_v8  ;;  %v6755_v40 = vadd.f32 %v6723_v45, %v13726_v10  ;;  %v13730_v45 = vld [vmem:[#allocation75_spill] sm:$0xff] }
 0xabe   : > { %v6146_v38 = vmul.f32 %v12797_v53, %v6145_v44  ;;  %v4480_v2 = vadd.f32 %v4448_v54, %v4409_v47  ;;  %v6130_v9 = vmul.f32 %v6129_v3, %v12643_v52  ;;  %v5053_v15 = vadd.f32 %v5021_v60, %v4983_v36  ;;  %v13727_v3 = vld [vmem:[#allocation80_spill] sm:$0xff]  ;;  %v13731_v60 = vld [vmem:[#allocation65_spill] sm:$0xff] }
 0xabf   : > { %v6221_v31 = vmul.f32 %v6220_v25, %v12728_v8  ;;  %v6165_v21 = vadd.f32 0.0036580483, %v6164_v49  ;;  %vm6149_vm7 = vweird.f32 %v12797_v53  ;;  %6771 = vst.msk [vmem:[%s12293_s29 + $0x28] sm:$0xff] %vm508_vm0, %v6755_v40  ;;  %v12840_v30 = vadd.f32 1.0, %v6181_v16 }
 0xac0   : > { %v6147_v34 = vadd.f32 %v12797_v53, %v6146_v38  ;;  %v4688_v46 = vadd.f32 %v12748_v56, %v4618_v39  ;;  %v4478_v26 = vadd.f32 %v12774_v20, %v12714_v7  ;;  %v6154_v55 = vand.u32 2147483648, %v12764_v19 }
 0xac1   : > { %v12831_v59 = vadd.f32 1.0, %v6221_v31  ;;  %v12847_v52 = vadd.f32 %v10943_v6, %v5053_v15  ;;  %v12850_v61 = vmul.f32 %v13640_v17, %v4844_v57  ;;  %vm6148_vm5 = vweird.f32 %v12764_v19 }
 0xac2   : > { %v6152_v44 = vand.u32 2147483647, %v12764_v19  ;;  %v6209_v48 = vadd.f32 0.18741608, %v6208_v41  ;;  %v4690_v25 = vadd.f32 %v4658_v35, %v4620_v62  ;;  %v4549_v54 = vadd.f32 %v4517_v24, %v4478_v26  ;;  %vm12857_vm6 = vmor %vm6148_vm5, %vm6149_vm7 }
 0xac3   : > { %7773 = vrcp.f32 %v12831_v59  ;;  %v4551_v56 = vadd.f32 %v13727_v3, %v4480_v2  ;;  %v12862_v20 = vmul.f32 0.70710677, %v12847_v52  ;;  %v6131_v17 = vadd.f32 1.1283791, %v6130_v9 }
 0xac4   : > { %v6151_v57 = vsel %vm12857_vm6, %v12797_v53, %v6147_v34  ;;  %v6166_v19 = vmul.f32 %v6165_v21, %v12692_v63  ;;  %7775 = vrcp.f32 %v12840_v30  ;;  %v4758_v35 = vadd.f32 %v4726_v11, %v4688_v46 }
 0xac5   : > { %v4659_v39 = vmul.f32 %v13718_v23, %v12768_v22  ;;  %v6155_v33 = vor.u32 1.1754944e-38, %v6154_v55  ;;  %v6240_v12 = vmul.f32 %v12862_v20, %v12862_v20  ;;  %v4727_v38 = vmul.f32 %v13708_v43, %v12768_v22 }
 0xac6   : > { %v4799_v31 = vrot.slane %v12768_v22, 1  ;;  %vm6153_vm8 = vcmp.eq.f32.partialorder %v6152_v44, 8.507059e+37  ;;  %v6210_v53 = vmul.f32 %v6209_v48, %v12728_v8  ;;  %v4760_v16 = vadd.f32 %v13730_v45, %v4690_v25 }
 0xac7   : > { %v6156_v62 = vsel %vm6153_vm8, %v6155_v33, %v6151_v57  ;;  %v12879_v47 = vmin.f32 %v6240_v12, 16.0  ;;  %v4619_v23 = vadd.f32 %v12707_v18, %v4549_v54  ;;  %v4621_v36 = vadd.f32 %v12752_v27, %v4551_v56 }
 0xac8   : > { %v6132_v42 = vmul.f32 %v6131_v17, %v13731_v60  ;;  %v6167_v24 = vadd.f32 0.05243302, %v6166_v19  ;;  %v4914_v43 = vadd.f32 %v12720_v1, %v4758_v35  ;;  %v6211_v2 = vadd.f32 1.1283791, %v6210_v53 }
 0xac9   : > { %v7774_v49 = vpop.eup %7773  ;;  %v6242_v41 = vmul.f32 2.1237322e-06, %v12879_v47  ;;  %v6253_v8 = vmul.f32 3.8918573e-05, %v12879_v47  ;;  %v6232_v9 = vand.u32 2147483647, %v12831_v59  ;;  %v4916_v34 = vadd.f32 %v12811_v29, %v4760_v16 }
 0xaca   : > { %v6224_v11 = vmul.f32 %v7774_v49, %v12831_v59  ;;  %v12887_v10 = vpop.eup %7775  ;;  %v6157_v40 = vmul.f32 %v6156_v62, %v6132_v42  ;;  %v6234_v18 = vand.u32 2147483648, %v12831_v59  ;;  %vm6229_vm10 = vweird.f32 %v7774_v49 }
 0xacb   : > { %v6243_v27 = vadd.f32 0.00028619796, %v6242_v41  ;;  %v6254_v21 = vadd.f32 0.001143296, %v6253_v8  ;;  %v4689_v1 = vadd.f32 %v12757_v0, %v4619_v23  ;;  %v4691_v46 = vadd.f32 %v4659_v39, %v4621_v36  ;;  %v13733_v23 = vld [vmem:[#allocation74_spill] sm:$0xff] }
 0xacc   : > { %v6225_v22 = vsub.f32 1.0, %v6224_v11  ;;  %vm6228_vm11 = vweird.f32 %v12831_v59  ;;  %v6184_v55 = vmul.f32 %v12887_v10, %v12840_v30  ;;  %v7090_v25 = vclamps-f32 %v6157_v40, 1.0 }
 0xacd   : > { %v6244_v44 = vmul.f32 %v6243_v27, %v12879_v47  ;;  %v6255_v48 = vmul.f32 %v6254_v21, %v12879_v47  ;;  %v6212_v54 = vmul.f32 %v6211_v2, %v12690_v13  ;;  %vm6230_vm12 = vmor %vm6228_vm11, %vm6229_vm10  ;;  %v6235_v3 = vor.u32 1.1754944e-38, %v6234_v18  ;;  %v13736_v18 = vld [vmem:[#allocation86_spill] sm:$0xff]  ;;  %v6676_v27 = vpop.f32.mrf.mxu3  ;;  %v13737_v21 = vld [vmem:[#allocation24_spill] sm:$0xff] }
 0xace   : > { %v6226_v15 = vmul.f32 %v7774_v49, %v6225_v22  ;;  %v6168_v29 = vmul.f32 %v6167_v24, %v12692_v63  ;;  %vm6233_vm13 = vcmp.eq.f32.partialorder %v6232_v9, 8.507059e+37  ;;  %v4986_v59 = vadd.f32 %v12814_v50, %v4916_v34  ;;  %v13734_v22 = vld [vmem:[#allocation48_spill] sm:$0xff] }
 0xacf   : > { %v6245_v0 = vadd.f32 0.0036580483, %v6244_v44  ;;  %v6256_v7 = vadd.f32 0.014752088, %v6255_v48  ;;  %v4845_v17 = vsel %vm4804_vm9, %v4799_v31, 0.0  ;;  %v4952_v19 = vmul.f32 %v13562_v51, %v12663_v5  ;;  %v6725_v44 = vpop.f32.mrf.mxu0 }
 0xad0   : > { %v6227_v26 = vadd.f32 %v7774_v49, %v6226_v15  ;;  %v6185_v39 = vsub.f32 1.0, %v6184_v55  ;;  %v4759_v12 = vadd.f32 %v4727_v38, %v4689_v1  ;;  %v6464_v45 = vadd.f32 1.0, %v7090_v25 }
 0xad1   : > { %v6246_v13 = vmul.f32 %v6245_v0, %v12879_v47  ;;  %v6257_v33 = vmul.f32 %v6256_v7, %v12879_v47  ;;  %v6169_v16 = vadd.f32 0.18741608, %v6168_v29  ;;  %v4984_v37 = vadd.f32 %v4952_v19, %v4914_v43  ;;  %v13735_v43 = vld [vmem:[#allocation72_spill] sm:$0xff] }
 0xad2   : > { %v6231_v56 = vsel %vm6230_vm12, %v7774_v49, %v6227_v26  ;;  %v13732_v49 = vld [vmem:[#allocation84_spill] sm:$0xff]  ;;  %v4885_v31 = vmul.f32 %v13702_v14, %v12789_v28  ;;  %v4955_v51 = vmul.f32 %v13658_v58, %v4845_v17  ;;  %v5023_v5 = vmul.f32 %v13592_v32, %v4845_v17 }
 0xad3   : > { %v6236_v57 = vsel %vm6233_vm13, %v6235_v3, %v6231_v56  ;;  %v4761_v53 = vadd.f32 %v13732_v49, %v4691_v46  ;;  %v6247_v50 = vadd.f32 0.05243302, %v6246_v13  ;;  %v6258_v11 = vadd.f32 0.112945676, %v6257_v33 }
 0xad4   : > { %v6237_v35 = vmul.f32 %v6236_v57, %v6212_v54  ;;  %v5122_v36 = vmul.f32 0.5, %v13733_v23  ;;  %v6186_v38 = vmul.f32 %v12887_v10, %v6185_v39  ;;  %v5054_v24 = vadd.f32 %v12850_v61, %v4984_v37 }
 0xad5   : > { %v6259_v42 = vmul.f32 %v6258_v11, %v12879_v47  ;;  %v4915_v41 = vadd.f32 %v13734_v22, %v4759_v12  ;;  %v4917_v8 = vadd.f32 %v4885_v31, %v4761_v53  ;;  %v6496_v40 = vmul.f32 %v6464_v45, %v13735_v43  ;;  %v13742_v11 = vld [vmem:[#allocation68_spill] sm:$0xff] }
 0xad6   : > { %v7092_v62 = vclamps-f32 %v6237_v35, 1.0  ;;  %v6170_v14 = vmul.f32 %v6169_v16, %v12692_v63  ;;  %v6248_v9 = vmul.f32 %v6247_v50, %v12879_v47  ;;  %v5056_v15 = vadd.f32 %v13736_v18, %v4986_v59  ;;  %v13740_v35 = vld [vmem:[#allocation20_spill] sm:$0xff]  ;;  %v13741_v16 = vld [vmem:[#allocation85_spill] sm:$0xff] }
 0xad7   : > { %v6260_v32 = vadd.f32 0.4994258, %v6259_v42  ;;  %vm6188_vm9 = vweird.f32 %v12840_v30  ;;  %vm6189_vm14 = vweird.f32 %v12887_v10  ;;  %v12924_v61 = vadd.f32 %v13737_v21, %v5054_v24 }
 0xad8   : > { %v6466_v60 = vadd.f32 1.0, %v7092_v62  ;;  %v4953_v34 = vmul.f32 %v13658_v58, %v12789_v28  ;;  %v6187_v63 = vadd.f32 %v12887_v10, %v6186_v38  ;;  %v6677_v26 = vadd.f32 %v12653_v4, %v6676_v27  ;;  %vm12943_vm15 = vmor %vm6188_vm9, %vm6189_vm14 }
 0xad9   : > { %v6261_v46 = vmul.f32 %v6260_v32, %v12879_v47  ;;  %v6194_v55 = vand.u32 2147483648, %v12840_v30  ;;  %v12933_v48 = vadd.f32 %v13737_v21, %v5056_v15  ;;  %v12936_v25 = vmul.f32 0.70710677, %v12924_v61 }
 0xada   : > { %v6498_v2 = vmul.f32 %v6466_v60, %v5122_v36  ;;  %v4985_v54 = vadd.f32 %v4953_v34, %v4915_v41  ;;  %v6192_v58 = vand.u32 2147483647, %v12840_v30  ;;  %v6249_v28 = vadd.f32 0.18741608, %v6248_v9 }
 0xadb   : > { %v6262_v3 = vadd.f32 1.0, %v6261_v46  ;;  %v6726_v29 = vadd.f32 %v6725_v44, %v6677_v26  ;;  %v12948_v0 = vmul.f32 0.70710677, %v12933_v48  ;;  %v6280_v7 = vmul.f32 %v12936_v25, %v12936_v25 }
 0xadc   : > { %v6516_v1 = vpack.c.bf16 %v6498_v2, %v6496_v40  ;;  %v5055_v59 = vadd.f32 %v5023_v5, %v4985_v54  ;;  %v4987_v17 = vadd.f32 %v4955_v51, %v4917_v8  ;;  %v6171_v57 = vadd.f32 1.1283791, %v6170_v14 }
 0xadd   : > { %v6191_v19 = vsel %vm12943_vm15, %v12887_v10, %v6187_v63  ;;  %7777 = vrcp.f32 %v6262_v3  ;;  %v6195_v30 = vor.u32 1.1754944e-38, %v6194_v55  ;;  %v6756_v39 = vadd.f32 %v6726_v29, %v13740_v35 }
 0xade   : > { %6690 = vmatmul.bf16.gmra.mxu3 %v6516_v1  ;;  %v12956_v13 = vmin.f32 %v6280_v7, 16.0  ;;  %v6360_v33 = vmul.f32 %v12948_v0, %v12948_v0  ;;  %vm6193_vm1 = vcmp.eq.f32.partialorder %v6192_v58, 8.507059e+37  ;;  %v6250_v12 = vmul.f32 %v6249_v28, %v12879_v47 }
 0xadf   : > { %v12962_v49 = vadd.f32 %v10943_v6, %v5055_v59  ;;  %v6196_v53 = vsel %vm6193_vm1, %v6195_v30, %v6191_v19  ;;  %6772 = vst.msk [vmem:[%s12293_s29 + $0x30] sm:$0xff] %vm508_vm0, %v6756_v39  ;;  %v6172_v62 = vmul.f32 %v6171_v57, %v13741_v16  ;;  %v5057_v37 = vadd.f32 %v13742_v11, %v4987_v17 }
 0xae0   : > { %v6282_v10 = vmul.f32 2.1237322e-06, %v12956_v13  ;;  %v6293_v45 = vmul.f32 3.8918573e-05, %v12956_v13  ;;  %v12969_v50 = vmin.f32 %v6360_v33, 16.0  ;;  %v6274_v18 = vand.u32 2147483648, %v6262_v3 }
 0xae1   : > { %v12973_v47 = vmul.f32 0.70710677, %v12962_v49  ;;  %v6197_v23 = vmul.f32 %v6196_v53, %v6172_v62  ;;  %v6251_v36 = vadd.f32 1.1283791, %v6250_v12  ;;  %v6272_v24 = vand.u32 2147483647, %v6262_v3 }
 0xae2   : > { %v6283_v31 = vadd.f32 0.00028619796, %v6282_v10  ;;  %v6294_v51 = vadd.f32 0.001143296, %v6293_v45  ;;  %v6362_v60 = vmul.f32 2.1237322e-06, %v12969_v50  ;;  %v12980_v40 = vadd.f32 %v10943_v6, %v5057_v37 }
 0xae3   : > { %v7778_v5 = vpop.eup %7777  ;;  %v6373_v38 = vmul.f32 3.8918573e-05, %v12969_v50  ;;  %v6320_v14 = vmul.f32 %v12973_v47, %v12973_v47  ;;  %v7091_v34 = vclamps-f32 %v6197_v23, 1.0  ;;  %vm6268_vm3 = vweird.f32 %v6262_v3  ;;  %v13743_v10 = vld [vmem:[#allocation35_spill] sm:$0xff] }
 0xae4   : > { %v6264_v42 = vmul.f32 %v7778_v5, %v6262_v3  ;;  %v6284_v22 = vmul.f32 %v6283_v31, %v12956_v13  ;;  %v6295_v41 = vmul.f32 %v6294_v51, %v12956_v13  ;;  %v6363_v8 = vadd.f32 0.00028619796, %v6362_v60  ;;  %v6678_v3 = vpop.f32.mrf.mxu3 }
 0xae5   : > { %v6374_v43 = vadd.f32 0.001143296, %v6373_v38  ;;  %v12986_v21 = vmin.f32 %v6320_v14, 16.0  ;;  %vm6269_vm2 = vweird.f32 %v7778_v5  ;;  %v12990_v26 = vmul.f32 0.70710677, %v12980_v40 }
 0xae6   : > { %v6265_v2 = vsub.f32 1.0, %v6264_v42  ;;  %v6285_v9 = vadd.f32 0.0036580483, %v6284_v22  ;;  %v6296_v32 = vadd.f32 0.014752088, %v6295_v41  ;;  %v6364_v15 = vmul.f32 %v6363_v8, %v12969_v50  ;;  %vm6270_vm4 = vmor %vm6268_vm3, %vm6269_vm2  ;;  %v6727_v41 = vpop.f32.mrf.mxu0 }
 0xae7   : > { %v6375_v27 = vmul.f32 %v6374_v43, %v12969_v50  ;;  %v6333_v58 = vmul.f32 3.8918573e-05, %v12986_v21  ;;  %v6252_v28 = vmul.f32 %v6251_v36, %v12862_v20  ;;  %vm6273_vm7 = vcmp.eq.f32.partialorder %v6272_v24, 8.507059e+37 }
 0xae8   : > { %v6266_v1 = vmul.f32 %v7778_v5, %v6265_v2  ;;  %v6297_v63 = vmul.f32 %v6296_v32, %v12956_v13  ;;  %v6365_v6 = vadd.f32 0.0036580483, %v6364_v15  ;;  %v6286_v44 = vmul.f32 %v6285_v9, %v12956_v13 }
 0xae9   : > { %v6376_v46 = vadd.f32 0.014752088, %v6375_v27  ;;  %v6275_v29 = vor.u32 1.1754944e-38, %v6274_v18  ;;  %v6334_v57 = vadd.f32 0.001143296, %v6333_v58  ;;  %v6400_v39 = vmul.f32 %v12990_v26, %v12990_v26 }
 0xaea   : > { %v6267_v55 = vadd.f32 %v7778_v5, %v6266_v1  ;;  %v6298_v54 = vadd.f32 0.112945676, %v6297_v63  ;;  %v6366_v17 = vmul.f32 %v6365_v6, %v12969_v50  ;;  %v6322_v35 = vmul.f32 2.1237322e-06, %v12986_v21  ;;  %v13744_v1 = vld [vmem:[#allocation23_spill] sm:$0xff] }
 0xaeb   : > { %v6377_v56 = vmul.f32 %v6376_v46, %v12969_v50  ;;  %v6287_v33 = vadd.f32 0.05243302, %v6286_v44  ;;  %v6335_v53 = vmul.f32 %v6334_v57, %v12986_v21  ;;  %v5121_v45 = vmul.f32 0.5, %v13743_v10 }
 0xaec   : > { %v6271_v7 = vsel %vm6270_vm4, %v7778_v5, %v6267_v55  ;;  %v6299_v59 = vmul.f32 %v6298_v54, %v12956_v13  ;;  %v6465_v16 = vadd.f32 1.0, %v7091_v34  ;;  %v6679_v62 = vadd.f32 %v12653_v4, %v6678_v3 }
 0xaed   : > { %v6276_v19 = vsel %vm6273_vm7, %v6275_v29, %v6271_v7  ;;  %v6378_v30 = vadd.f32 0.112945676, %v6377_v56  ;;  %v6367_v51 = vadd.f32 0.05243302, %v6366_v17  ;;  %v6336_v5 = vadd.f32 0.014752088, %v6335_v53 }
 0xaee   : > { %v6277_v20 = vmul.f32 %v6276_v19, %v6252_v28  ;;  %v6300_v12 = vadd.f32 0.4994258, %v6299_v59  ;;  %v5123_v23 = vmul.f32 0.5, %v12847_v52  ;;  %v6323_v60 = vadd.f32 0.00028619796, %v6322_v35 }
 0xaef   : > { %v6379_v11 = vmul.f32 %v6378_v30, %v12969_v50  ;;  %v13007_v38 = vmin.f32 %v6400_v39, 16.0  ;;  %v6288_v24 = vmul.f32 %v6287_v33, %v12956_v13  ;;  %v6337_v8 = vmul.f32 %v6336_v5, %v12986_v21 }
 0xaf0   : > { %v7093_v37 = vclamps-f32 %v6277_v20, 1.0  ;;  %v6301_v31 = vmul.f32 %v6300_v12, %v12956_v13  ;;  %v6728_v14 = vadd.f32 %v6727_v41, %v6679_v62  ;;  %v6497_v2 = vmul.f32 %v6465_v16, %v5121_v45 }
 0xaf1   : > { %v6380_v36 = vadd.f32 0.4994258, %v6379_v11  ;;  %v6368_v52 = vmul.f32 %v6367_v51, %v12969_v50  ;;  %v6324_v18 = vmul.f32 %v6323_v60, %v12986_v21  ;;  %v6402_v15 = vmul.f32 2.1237322e-06, %v13007_v38 }
 0xaf2   : > { %v6467_v42 = vadd.f32 1.0, %v7093_v37  ;;  %v6302_v22 = vadd.f32 1.0, %v6301_v31  ;;  %v6289_v34 = vadd.f32 0.18741608, %v6288_v24  ;;  %v6757_v63 = vadd.f32 %v6728_v14, %v13744_v1 }
 0xaf3   : > { %v6381_v43 = vmul.f32 %v6380_v36, %v12969_v50  ;;  %v6338_v6 = vadd.f32 0.112945676, %v6337_v8  ;;  %v6369_v46 = vadd.f32 0.18741608, %v6368_v52  ;;  %v6325_v55 = vadd.f32 0.0036580483, %v6324_v18 }
 0xaf4   : > { %v6499_v9 = vmul.f32 %v6467_v42, %v5123_v23  ;;  %7779 = vrcp.f32 %v6302_v22  ;;  %6773 = vst.msk [vmem:[%s12293_s29 + $0x38] sm:$0xff] %vm508_vm0, %v6757_v63  ;;  %v6403_v54 = vadd.f32 0.00028619796, %v6402_v15  ;;  %v6413_v58 = vmul.f32 3.8918573e-05, %v13007_v38 }
 0xaf5   : > { %v13013_v32 = vadd.f32 1.0, %v6381_v43  ;;  %v6339_v44 = vmul.f32 %v6338_v6, %v12986_v21  ;;  %v6290_v29 = vmul.f32 %v6289_v34, %v12956_v13  ;;  %v6314_v3 = vand.u32 2147483648, %v6302_v22 }
 0xaf6   : > { %v6517_v27 = vpack.c.bf16 %v6499_v9, %v6497_v2  ;;  %v6370_v59 = vmul.f32 %v6369_v46, %v12969_v50  ;;  %v6414_v17 = vadd.f32 0.001143296, %v6413_v58  ;;  %v6326_v30 = vmul.f32 %v6325_v55, %v12986_v21 }
 0xaf7   : > { %7781 = vrcp.f32 %v13013_v32  ;;  %v6340_v7 = vadd.f32 0.4994258, %v6339_v44  ;;  %v6404_v39 = vmul.f32 %v6403_v54, %v13007_v38  ;;  %v6291_v20 = vadd.f32 1.1283791, %v6290_v29  ;;  %v6681_v44 = vpop.f32.mrf.mxu3  ;;  %v6730_v54 = vpop.f32.mrf.mxu0 }
 0xaf8   : > { %6739 = vmatmul.bf16.gmra.mxu0 %v6517_v27  ;;  %vm6308_vm5 = vweird.f32 %v6302_v22  ;;  %v6415_v13 = vmul.f32 %v6414_v17, %v13007_v38  ;;  %v6312_v53 = vand.u32 2147483647, %v6302_v22  ;;  %v6315_v50 = vor.u32 1.1754944e-38, %v6314_v3 }
 0xaf9   : > { %v6341_v35 = vmul.f32 %v6340_v7, %v12986_v21  ;;  %v6371_v45 = vadd.f32 1.1283791, %v6370_v59  ;;  %v6394_v37 = vand.u32 2147483648, %v13013_v32  ;;  %v6405_v31 = vadd.f32 0.0036580483, %v6404_v39 }
 0xafa   : > { %v7780_v28 = vpop.eup %7779  ;;  %v6416_v62 = vadd.f32 0.014752088, %v6415_v13  ;;  %v6392_v5 = vand.u32 2147483647, %v13013_v32  ;;  %v6292_v36 = vmul.f32 %v6291_v20, %v12936_v25  ;;  %vm6313_vm11 = vcmp.eq.f32.partialorder %v6312_v53, 8.507059e+37 }
 0xafb   : > { %v6304_v56 = vmul.f32 %v7780_v28, %v6302_v22  ;;  %vm6309_vm6 = vweird.f32 %v7780_v28  ;;  %v13030_v10 = vadd.f32 1.0, %v6341_v35  ;;  %v6327_v42 = vadd.f32 0.05243302, %v6326_v30 }
 0xafc   : > { %vm6310_vm8 = vmor %vm6308_vm5, %vm6309_vm6  ;;  %v6417_v23 = vmul.f32 %v6416_v62, %v13007_v38  ;;  %vm6388_vm12 = vweird.f32 %v13013_v32  ;;  %v6395_v43 = vor.u32 1.1754944e-38, %v6394_v37  ;;  %v6406_v22 = vmul.f32 %v6405_v31, %v13007_v38 }
 0xafd   : > { %v7782_v57 = vpop.eup %7781  ;;  %v6305_v19 = vsub.f32 1.0, %v6304_v56  ;;  %7783 = vrcp.f32 %v13030_v10  ;;  %v6372_v2 = vmul.f32 %v6371_v45, %v12948_v0  ;;  %vm6393_vm9 = vcmp.eq.f32.partialorder %v6392_v5, 8.507059e+37 }
 0xafe   : > { %v6384_v33 = vmul.f32 %v7782_v57, %v13013_v32  ;;  %vm6389_vm10 = vweird.f32 %v7782_v57  ;;  %v6418_v14 = vadd.f32 0.112945676, %v6417_v23  ;;  %v6328_v15 = vmul.f32 %v6327_v42, %v12986_v21  ;;  %v13746_v23 = vld [vmem:[#allocation30_spill] sm:$0xff] }
 0xaff   : > { %v6306_v12 = vmul.f32 %v7780_v28, %v6305_v19  ;;  %vm6390_vm13 = vmor %vm6388_vm12, %vm6389_vm10  ;;  %v6407_v1 = vadd.f32 0.05243302, %v6406_v22  ;;  %v5124_v29 = vmul.f32 0.5, %v12924_v61  ;;  %v5126_v56 = vmul.f32 0.5, %v12933_v48  ;;  %v6683_v53 = vpop.f32.mrf.mxu3 }
 0xb00   : > { %v6385_v16 = vsub.f32 1.0, %v6384_v33  ;;  %v6419_v27 = vmul.f32 %v6418_v14, %v13007_v38  ;;  %v6329_v0 = vadd.f32 0.18741608, %v6328_v15  ;;  %v13745_v33 = vld [vmem:[#allocation34_spill] sm:$0xff]  ;;  %v6354_v61 = vand.u32 2147483648, %v13030_v10 }
 0xb01   : > { %v6307_v11 = vadd.f32 %v7780_v28, %v6306_v12  ;;  %v6408_v59 = vmul.f32 %v6407_v1, %v13007_v38  ;;  %vm6348_vm15 = vweird.f32 %v13030_v10  ;;  %v6352_v12 = vand.u32 2147483647, %v13030_v10 }
 0xb02   : > { %v6386_v51 = vmul.f32 %v7782_v57, %v6385_v16  ;;  %v6420_v63 = vadd.f32 0.4994258, %v6419_v27  ;;  %v6330_v35 = vmul.f32 %v6329_v0, %v12986_v21  ;;  %v6684_v21 = vadd.f32 %v12653_v4, %v6683_v53  ;;  %v6732_v16 = vpop.f32.mrf.mxu0  ;;  %v13747_v27 = vld [vmem:[#allocation19_spill] sm:$0xff] }
 0xb03   : > { %v6311_v60 = vsel %vm6310_vm8, %v7780_v28, %v6307_v11  ;;  %v7784_v52 = vpop.eup %7783  ;;  %v6682_v28 = vadd.f32 %v12653_v4, %v6681_v44  ;;  %v6409_v48 = vadd.f32 0.18741608, %v6408_v59  ;;  %v6355_v11 = vor.u32 1.1754944e-38, %v6354_v61 }
 0xb04   : > { %v6316_v24 = vsel %vm6313_vm11, %v6315_v50, %v6311_v60  ;;  %v6387_v41 = vadd.f32 %v7782_v57, %v6386_v51  ;;  %v6344_v32 = vmul.f32 %v7784_v52, %v13030_v10  ;;  %v6421_v58 = vmul.f32 %v6420_v63, %v13007_v38 }
 0xb05   : > { %v6317_v8 = vmul.f32 %v6316_v24, %v6292_v36  ;;  %vm6349_vm14 = vweird.f32 %v7784_v52  ;;  %v6331_v50 = vadd.f32 1.1283791, %v6330_v35  ;;  %v6410_v37 = vmul.f32 %v6409_v48, %v13007_v38 }
 0xb06   : > { %v6391_v9 = vsel %vm6390_vm13, %v7782_v57, %v6387_v41  ;;  %v6345_v55 = vsub.f32 1.0, %v6344_v32  ;;  %v6422_v17 = vadd.f32 1.0, %v6421_v58  ;;  %v6731_v57 = vadd.f32 %v6730_v54, %v6682_v28  ;;  %vm6350_vm1 = vmor %vm6348_vm15, %vm6349_vm14 }
 0xb07   : > { %v7094_v18 = vclamps-f32 %v6317_v8, 1.0  ;;  %v6396_v25 = vsel %vm6393_vm9, %v6395_v43, %v6391_v9  ;;  %v6733_v31 = vadd.f32 %v6732_v16, %v6684_v21  ;;  %vm6353_vm2 = vcmp.eq.f32.partialorder %v6352_v12, 8.507059e+37  ;;  %v13752_v21 = vld [vmem:[#allocation21_spill] sm:$0xff] }
 0xb08   : > { %v6397_v34 = vmul.f32 %v6396_v25, %v6372_v2  ;;  %v6346_v3 = vmul.f32 %v7784_v52, %v6345_v55  ;;  %7785 = vrcp.f32 %v6422_v17  ;;  %v6758_v13 = vadd.f32 %v6731_v57, %v13745_v33  ;;  %v13750_v57 = vld [vmem:[#allocation22_spill] sm:$0xff]  ;;  %v13751_v33 = vld [vmem:[#allocation33_spill] sm:$0xff] }
 0xb09   : > { %v6468_v46 = vadd.f32 1.0, %v7094_v18  ;;  %v6759_v10 = vadd.f32 %v6733_v31, %v13746_v23  ;;  %v6332_v36 = vmul.f32 %v6331_v50, %v12973_v47  ;;  %v6411_v42 = vadd.f32 1.1283791, %v6410_v37 }
 0xb0a   : > { %v7096_v6 = vclamps-f32 %v6397_v34, 1.0  ;;  %v6347_v20 = vadd.f32 %v7784_v52, %v6346_v3  ;;  %6774 = vst.msk [vmem:[%s12293_s29 + $0x40] sm:$0xff] %vm508_vm0, %v6758_v13  ;;  %v6434_v24 = vand.u32 2147483648, %v6422_v17  ;;  %v6432_v43 = vand.u32 2147483647, %v6422_v17 }
 0xb0b   : > { %v6500_v19 = vmul.f32 %v6468_v46, %v5124_v29  ;;  %6775 = vst.msk [vmem:[%s12293_s29 + $0x48] sm:$0xff] %vm508_vm0, %v6759_v10  ;;  %vm6428_vm4 = vweird.f32 %v6422_v17  ;;  %v6412_v18 = vmul.f32 %v6411_v42, %v12990_v26  ;;  %v5125_v55 = vmul.f32 0.5, %v12962_v49  ;;  %v13748_v29 = vld [vmem:[#allocation18_spill] sm:$0xff] }
 0xb0c   : > { %v6470_v7 = vadd.f32 1.0, %v7096_v6  ;;  %v6351_v45 = vsel %vm6350_vm1, %v7784_v52, %v6347_v20  ;;  %v6435_v9 = vor.u32 1.1754944e-38, %v6434_v24  ;;  %vm6433_vm5 = vcmp.eq.f32.partialorder %v6432_v43, 8.507059e+37 }
 0xb0d   : > { %v6356_v5 = vsel %vm6353_vm2, %v6355_v11, %v6351_v45  ;;  %v5127_v44 = vmul.f32 0.5, %v12980_v40  ;;  %v13755_v11 = vld [vmem:[#allocation17_spill] sm:$0xff] }
 0xb0e   : > { %v6502_v30 = vmul.f32 %v6470_v7, %v5126_v56  ;;  %v7786_v62 = vpop.eup %7785  ;;  %v6357_v41 = vmul.f32 %v6356_v5, %v6332_v36 }
 0xb0f   : > { %v6424_v51 = vmul.f32 %v7786_v62, %v6422_v17  ;;  %vm6429_vm3 = vweird.f32 %v7786_v62 }
 0xb10   : > { %v6518_v39 = vpack.c.bf16 %v6502_v30, %v6500_v19  ;;  %vm6430_vm7 = vmor %vm6428_vm4, %vm6429_vm3  ;;  %v7095_v47 = vclamps-f32 %v6357_v41, 1.0  ;;  %v7806_v30 = vld [vmem:[%s13136_s13] ss:$0 sm:$0xff] }
 0xb11   : > { %v6425_v60 = vsub.f32 1.0, %v6424_v51 }
 0xb12   : > { %6695 = vmatmul.bf16.gmra.mxu3 %v6518_v39  ;;  %v6469_v63 = vadd.f32 1.0, %v7095_v47 }
 0xb13   : > { %v6426_v8 = vmul.f32 %v7786_v62, %v6425_v60 }
 0xb14   : > { %v6501_v58 = vmul.f32 %v6469_v63, %v5125_v55 }
 0xb15   : > { %v6427_v14 = vadd.f32 %v7786_v62, %v6426_v8 }
 0xb17   : > { %v6686_v22 = vpop.f32.mrf.mxu3  ;;  %v6431_v25 = vsel %vm6430_vm7, %v7786_v62, %v6427_v14 }
 0xb18   : > { %v6687_v38 = vadd.f32 %v12653_v4, %v6686_v22  ;;  %v6436_v15 = vsel %vm6433_vm5, %v6435_v9, %v6431_v25 }
 0xb19   : > { %v6437_v32 = vmul.f32 %v6436_v15, %v6412_v18 }
 0xb1b   : > { %v7097_v1 = vclamps-f32 %v6437_v32, 1.0 }
 0xb1d   : > { %v6471_v26 = vadd.f32 1.0, %v7097_v1 }
 0xb1f   : > { %v6688_v6 = vpop.f32.mrf.mxu3  ;;  %v6503_v28 = vmul.f32 %v6471_v26, %v5127_v44 }
 0xb20   : > { %v6689_v46 = vadd.f32 %v12653_v4, %v6688_v6 }
 0xb21   : > { %v6519_v7 = vpack.c.bf16 %v6503_v28, %v6501_v58 }
 0xb23   : > { %6744 = vmatmul.bf16.gmra.mxu0 %v6519_v7 }
 0xb25   : > { %v6735_v2 = vpop.f32.mrf.mxu0 }
 0xb26   : > { %v6736_v52 = vadd.f32 %v6735_v2, %v6687_v38 }
 0xb28   : > { %v6760_v34 = vadd.f32 %v6736_v52, %v13747_v27 }
 0xb2a   : > { %6776 = vst.msk [vmem:[%s12293_s29 + $0x50] sm:$0xff] %vm508_vm0, %v6760_v34 }
 0xb2d   : > { %v6737_v54 = vpop.f32.mrf.mxu0 }
 0xb2e   : > { %v6738_v0 = vadd.f32 %v6737_v54, %v6689_v46 }
 0xb30   : > { %v6761_v56 = vadd.f32 %v6738_v0, %v13748_v29 }
 0xb32   : > { %6777 = vst.msk [vmem:[%s12293_s29 + $0x58] sm:$0xff] %vm508_vm0, %v6761_v56 }
 0xb61   : > { %v6691_v3 = vpop.f32.mrf.mxu3 }
 0xb62   : > { %v6692_v59 = vadd.f32 %v12653_v4, %v6691_v3 }
 0xb69   : > { %v6693_v40 = vpop.f32.mrf.mxu3 }
 0xb6a   : > { %v6694_v35 = vadd.f32 %v7806_v30, %v6693_v40 }
 0xb75   : > { %v6740_v49 = vpop.f32.mrf.mxu0 }
 0xb76   : > { %v6741_v17 = vadd.f32 %v6740_v49, %v6692_v59 }
 0xb78   : > { %v6762_v19 = vadd.f32 %v6741_v17, %v13750_v57 }
 0xb7a   : > { %6778 = vst.msk [vmem:[%s12293_s29 + $0x60] sm:$0xff] %vm508_vm0, %v6762_v19 }
 0xb7d   : > { %v6742_v39 = vpop.f32.mrf.mxu0 }
 0xb7e   : > { %v6743_v20 = vadd.f32 %v6742_v39, %v6694_v35 }
 0xb80   : > { %v6763_v13 = vadd.f32 %v6743_v20, %v13751_v33 }
 0xb82   : > { %6779 = vst.msk [vmem:[%s12293_s29 + $0x68] sm:$0xff] %vm508_vm0, %v6763_v13 }
 0xb95   : > { %v6696_v4 = vpop.f32.mrf.mxu3 }
 0xb96   : > { %v6697_v61 = vadd.f32 %v7806_v30, %v6696_v4 }
 0xb9d   : > { %v6698_v53 = vpop.f32.mrf.mxu3 }
 0xb9e   : > { %v6699_v45 = vadd.f32 %v7806_v30, %v6698_v53 }
 0xba0   : > { %v6745_v48 = vpop.f32.mrf.mxu0 }
 0xba1   : > { %v6746_v12 = vadd.f32 %v6745_v48, %v6697_v61 }
 0xba3   : > { %v6764_v50 = vadd.f32 %v6746_v12, %v13752_v21 }
 0xba5   : > { %6780 = vst.msk [vmem:[%s12293_s29 + $0x70] sm:$0xff] %vm508_vm0, %v6764_v50 }
 0xba8   : > { %v6747_v16 = vpop.f32.mrf.mxu0 }
 0xba9   : > { %v6748_v62 = vadd.f32 %v6747_v16, %v6699_v45 }
 0xbab   : > { %v6765_v37 = vadd.f32 %v6748_v62, %v13755_v11 }
 0xbad   : > { %6781 = vst.msk [vmem:[%s12293_s29 + $0x78] sm:$0xff] %vm508_vm0, %v6765_v37 }
 0xbae   : > { %7864 = shalt.err (!%p7861_p4)
}
 0xbaf   : > { %s7916_s18 = smov 128   ;;  %s7917_s29 = smov 8  }
 0xbb0   : > { %7218 = dma.vmem_to_hbm [thread:$0]  (%p8043_p11), %s6797_s26, 2048, %s6799_s14, %s6783_s25, %s7916_s18, %s7916_s18, %s7917_s29  }
 0xbb1 PF: > { %s13756_s27 = sld [smem:[#allocation9_spill]]  ;;  %p13758_p7 = scmp.ge.s32.totalorder %s7903_s16, 2 }
 0xbb3   : > { %p7225_p5 = pnand %p13758_p7, %p8047_p12 }
 0xbb5   : > { %p7226_p8 = pneg %p7225_p5 }
 0xbb7   : > { %s6813_s1 = sand.u32 1, %s13756_s27  }
 0xbb8   : > { %s6814_s17 = scalar_lea.sflag [#allocation5], %s6813_s1 }
 0xbb9   : > { %7886 = dma.done.wait (%p7226_p8), %s6814_s17, 2048  }
 0xbba   : > { %7888 = vsyncadd (%p7226_p8), %s6814_s17, 4294965248  ;;  %s13759_s16 = sld [smem:[#allocation12_spill]]  ;;  %s13762_s29 = smov %s7895_s30 }
 0xbbb   : > { %s13760_s15 = sld [smem:[#allocation10_spill]] }
 0xbbc   : > { %s13761_s19 = sld [smem:[#allocation13_spill]] }
 0xbc0   : > { %p27_p10 = scmp.ge.s32.totalorder %s13759_s16, 4  }
 0xbc1   : > { %s13763_s30 = smov %s13760_s15 }
 0xbc2   : > { %s13764_s15 = smov %s13761_s19  ;;  %29 = sbr.rel (!%p27_p10) target bundleno = 9 (0x9), region = 123 }
 0xbc7   :  { %6820 = vsyncpa [#allocation4], 1 }
 0xbc8   :  { %6822 = vsyncpa [#allocation4 + $0x1], 1 }
 0xbc9   :  { %6823 = vsyncpa [#allocation5], 1 }
 0xbca   :  { %6825 = vsyncpa [#allocation5 + $0x1], 1 }

</bundles_post_ra>
